<compile_context>
chip_gen: v5e
topology: v5e:2x2
jax: 0.10.0
libtpu: 0.0.40
codegen_flags: <defaults>
</compile_context>

<pallas_src>
import functools
import math

import jax
import jax.numpy as jnp
from jax import lax
from jax.experimental import pallas as pl
from jax.experimental.pallas import tpu as pltpu

LANE = 128      # TPU vreg lane width
SUBLANE = 8     # TPU vreg sublane count (f32)


# ----------------------------------------------------------------------------
# small padding helpers (run once at init / setup time, not per-call)
# ----------------------------------------------------------------------------
def _round_up(x, m):
    return ((x + m - 1) // m) * m


def _pad2d(a, rows, cols):
    r, c = a.shape
    return jnp.pad(a, ((0, rows - r), (0, cols - c)))


def _pad_row(v, cols):
    return jnp.pad(v.reshape(1, -1), ((0, 0), (0, cols - v.shape[0])))


# ----------------------------------------------------------------------------
# in-kernel LayerNorm over a zero-padded feature axis.
#   Padded input lanes, gamma and beta are all zero, so:
#     * sums over the padded axis equal sums over the true lanes,
#     * var = E[x^2] - mean^2 is exact for the true feature count d_true,
#     * padded output lanes stay exactly zero (gamma=beta=0 there).
#   No iota/where mask needed (pure VPU-filler removed per perf review).
# ----------------------------------------------------------------------------
def _ln(x, gamma, beta, d_true):
    inv_d = 1.0 / d_true
    mean = jnp.sum(x, axis=-1, keepdims=True) * inv_d
    ex2 = jnp.sum(x * x, axis=-1, keepdims=True) * inv_d
    var = ex2 - mean * mean
    return (x - mean) * lax.rsqrt(var + 1e-5) * gamma + beta


def _mlp2_relu(z, g0, b0, w1, c1, g1, b1, w2, c2, d_in, d_hid):
    """AllSet 2-layer MLP (InputNorm=True) followed by HalfNLHconv's ReLU:
       LN -> Linear -> ReLU -> LN -> (dropout=id) -> Linear -> ReLU."""
    z = _ln(z, g0, b0, d_in)
    z = jnp.maximum(jnp.dot(z, w1, preferred_element_type=jnp.float32) + c1, 0.0)
    z = _ln(z, g1, b1, d_hid)
    z = jnp.dot(z, w2, preferred_element_type=jnp.float32) + c2
    return jnp.maximum(z, 0.0)


# ----------------------------------------------------------------------------
# Fully fused SetGNN forward kernel.
#   Conv params are stacked along a leading layer axis (layer order:
#   V2E[0], E2V[0], V2E[1], E2V[1], ...).  Even layers propagate with H
#   (nodes->hyperedges), odd layers with H^T via a transposed-lhs dot_general,
#   so H^T never exists in HBM.
# ----------------------------------------------------------------------------
def _setgnn_fused_kernel(
        x_ref, h_ref,
        eg0, eb0, ew1, ec1, eg1, eb1, ew2, ec2,      # stacked f_enc params (L, ...)
        dg0, db0, dw1, dc1, dg1, db1, dw2, dc2,      # stacked f_dec params (L, ...)
        cw1, cc1, cg1, cb1, cw2, cc2,                # classifier params
        o_ref, *, d_ins, d_hid, d_cls_hid):
    h = h_ref[...]                                   # (E_pad, N_pad) f32
    x = x_ref[...]                                   # (N_pad, 128)   f32
    for li, d_in in enumerate(d_ins):                # statically unrolled
        # ---- f_enc (+ HalfNLHconv ReLU) ---------------------------------
        z = _mlp2_relu(x, eg0[li], eb0[li], ew1[li], ec1[li],
                       eg1[li], eb1[li], ew2[li], ec2[li], d_in, d_hid)
        # ---- propagate(aggr='add'): weighted incidence matmul, no bias ---
        if li % 2 == 0:                              # V2E:  H  @ z -> (E_pad, d)
            z = jnp.dot(h, z, preferred_element_type=jnp.float32)
        else:                                        # E2V:  H^T @ z -> (N_pad, d)
            z = lax.dot_general(h, z, (((0,), (0,)), ((), ())),
                                preferred_element_type=jnp.float32)
        # ---- f_dec (+ HalfNLHconv ReLU) ----------------------------------
        x = _mlp2_relu(z, dg0[li], db0[li], dw1[li], dc1[li],
                       dg1[li], db1[li], dw2[li], dc2[li], d_hid, d_hid)
    # ---- classifier MLP (InputNorm=False, 2 layers): Lin->ReLU->LN->Lin ---
    z = jnp.maximum(
        jnp.dot(x, cw1[...], preferred_element_type=jnp.float32) + cc1[...], 0.0)
    z = _ln(z, cg1[...], cb1[...], d_cls_hid)
    o_ref[...] = jnp.dot(z, cw2[...], preferred_element_type=jnp.float32) + cc2[...]


# ----------------------------------------------------------------------------
# Parameter construction (PyTorch-like uniform init), padded to 128 lanes once.
# ----------------------------------------------------------------------------
def init_linear_padded(key, in_dim, out_dim, in_pad, out_pad):
    k1, k2 = jax.random.split(key)
    bound = 1.0 / math.sqrt(in_dim)
    w = jax.random.uniform(k1, (in_dim, out_dim), jnp.float32, -bound, bound)
    b = jax.random.uniform(k2, (out_dim,), jnp.float32, -bound, bound)
    return _pad2d(w, in_pad, out_pad), _pad_row(b, out_pad)


def init_ln_padded(dim, dim_pad):
    return (_pad_row(jnp.ones((dim,), jnp.float32), dim_pad),
            _pad_row(jnp.zeros((dim,), jnp.float32), dim_pad))


def init_halfnlhconv(key, in_dim, hid_dim, out_dim, in_pad, hid_pad, out_pad):
    ks = jax.random.split(key, 4)
    eg0, eb0 = init_ln_padded(in_dim, in_pad)
    ew1, ec1 = init_linear_padded(ks[0], in_dim, hid_dim, in_pad, hid_pad)
    eg1, eb1 = init_ln_padded(hid_dim, hid_pad)
    ew2, ec2 = init_linear_padded(ks[1], hid_dim, hid_dim, hid_pad, hid_pad)
    dg0, db0 = init_ln_padded(hid_dim, hid_pad)
    dw1, dc1 = init_linear_padded(ks[2], hid_dim, hid_dim, hid_pad, hid_pad)
    dg1, db1 = init_ln_padded(hid_dim, hid_pad)
    dw2, dc2 = init_linear_padded(ks[3], hid_dim, out_dim, hid_pad, out_pad)
    return (eg0, eb0, ew1, ec1, eg1, eb1, ew2, ec2,
            dg0, db0, dw1, dc1, dg1, db1, dw2, dc2)


def init_classifier(key, in_dim, hid_dim, out_dim, in_pad, hid_pad, out_pad):
    ks = jax.random.split(key, 2)
    w1, c1 = init_linear_padded(ks[0], in_dim, hid_dim, in_pad, hid_pad)
    g1, b1 = init_ln_padded(hid_dim, hid_pad)
    w2, c2 = init_linear_padded(ks[1], hid_dim, out_dim, hid_pad, out_pad)
    return (w1, c1, g1, b1, w2, c2)


class SetGNNConfig:
    All_num_layers = 2
    num_features = 16
    MLP_hidden = 32
    MLP_num_layers = 2            # fused kernel assumes 2-layer MLPs
    Classifier_hidden = 32
    Classifier_num_layers = 2     # fused classifier assumes 2 layers
    num_classes = 4
    aggregate = "add"
    normalization = "ln"
    deepset_input_norm = True
    dropout = 0.0
    GPR = False
    LearnMask = False
    PMA = False


def init_setgnn(key, cfg):
    assert cfg.MLP_num_layers == 2 and cfg.Classifier_num_layers == 2
    in_pad = _round_up(cfg.num_features, LANE)
    hid_pad = _round_up(cfg.MLP_hidden, LANE)
    assert in_pad == hid_pad, "stacking assumes a common padded width"
    cls_hid_pad = _round_up(cfg.Classifier_hidden, LANE)
    cls_out_pad = _round_up(cfg.num_classes, LANE)

    n_conv = 2 * cfg.All_num_layers
    keys = jax.random.split(key, n_conv + 1)

    # Forward order: V2E[0], E2V[0], V2E[1], E2V[1], ...
    layers = [init_halfnlhconv(keys[0], cfg.num_features, cfg.MLP_hidden,
                               cfg.MLP_hidden, in_pad, hid_pad, hid_pad),
              init_halfnlhconv(keys[1], cfg.MLP_hidden, cfg.MLP_hidden,
                               cfg.MLP_hidden, hid_pad, hid_pad, hid_pad)]
    for li in range(cfg.All_num_layers - 1):
        layers.append(init_halfnlhconv(keys[2 + 2 * li], cfg.MLP_hidden,
                                       cfg.MLP_hidden, cfg.MLP_hidden,
                                       hid_pad, hid_pad, hid_pad))
        layers.append(init_halfnlhconv(keys[3 + 2 * li], cfg.MLP_hidden,
                                       cfg.MLP_hidden, cfg.MLP_hidden,
                                       hid_pad, hid_pad, hid_pad))
    # Stack each of the 16 param slots along a leading layer axis.
    conv_stacked = tuple(jnp.stack([lp[i] for lp in layers], axis=0)
                         for i in range(16))
    classifier = init_classifier(keys[-1], cfg.MLP_hidden, cfg.Classifier_hidden,
                                 cfg.num_classes, hid_pad, cls_hid_pad, cls_out_pad)
    # NOTE: bnV2Es / bnE2Vs exist in __init__ but are never used in forward(); omitted.
    return {"conv": conv_stacked, "classifier": classifier}


# ----------------------------------------------------------------------------
# Forward (eval mode: all F.dropout calls are identity).  One pallas_call.
# ----------------------------------------------------------------------------
def setgnn_forward(params, x, edge_index, norm, *, num_nodes, num_hyperedges, cfg):
    # edge_index[1] -= edge_index[1].min()
    edges = edge_index[1] - jnp.min(edge_index[1])
    nodes = edge_index[0]

    n_pad = _round_up(num_nodes, SUBLANE)
    e_pad = _round_up(num_hyperedges, SUBLANE)
    # Dense weighted incidence (scatter-add of `norm`); exact for aggr='add'.
    # Only H is built; H^T is realized inside the kernel as a transposed matmul.
    H = jnp.zeros((e_pad, n_pad), jnp.float32).at[edges, nodes].add(norm)

    f_pad = _round_up(cfg.num_features, LANE)
    x_pad = _pad2d(x.astype(jnp.float32), n_pad, f_pad)

    d_ins = (cfg.num_features,) + (cfg.MLP_hidden,) * (2 * cfg.All_num_layers - 1)
    cls_out_pad = params["classifier"][4].shape[1]   # padded classifier out width

    ins = (x_pad, H) + params["conv"] + params["classifier"]
    vmem = pl.BlockSpec(memory_space=pltpu.MemorySpace.VMEM)
    out = pl.pallas_call(
        functools.partial(_setgnn_fused_kernel, d_ins=d_ins,
                          d_hid=cfg.MLP_hidden, d_cls_hid=cfg.Classifier_hidden),
        out_shape=jax.ShapeDtypeStruct((n_pad, cls_out_pad), jnp.float32),
        in_specs=[vmem] * len(ins),
        out_specs=vmem,
    )(*ins)
    # Padded rows carry garbage (nullified by zero H columns between layers);
    # padded lanes are exactly zero.  Slice both off.
    return out[:num_nodes, :cfg.num_classes]


# ----------------------------------------------------------------------------
# Pure-JAX reference (unpadded) for correctness validation
# ----------------------------------------------------------------------------
def _ref_ln(x, g, b):
    mean = x.mean(-1, keepdims=True)
    var = ((x - mean) ** 2).mean(-1, keepdims=True)
    return (x - mean) * lax.rsqrt(var + 1e-5) * g + b


def _ref_dot(a, b):
    return jnp.dot(a, b, precision=lax.Precision.HIGHEST)


def reference_forward(params, x, edge_index, norm, num_nodes, num_hyperedges, cfg):
    edges = edge_index[1] - jnp.min(edge_index[1])
    H = jnp.zeros((num_hyperedges, num_nodes),
                  jnp.float32).at[edges, edge_index[0]].add(norm)
    (eg0, eb0, ew1, ec1, eg1, eb1, ew2, ec2,
     dg0, db0, dw1, dc1, dg1, db1, dw2, dc2) = params["conv"]
    h = cfg.MLP_hidden
    d_in = cfg.num_features
    for li in range(2 * cfg.All_num_layers):
        Hl = H if li % 2 == 0 else H.T
        z = _ref_ln(x, eg0[li, 0, :d_in], eb0[li, 0, :d_in])
        z = jnp.maximum(_ref_dot(z, ew1[li, :d_in, :h]) + ec1[li, 0, :h], 0.0)
        z = _ref_ln(z, eg1[li, 0, :h], eb1[li, 0, :h])
        z = jnp.maximum(_ref_dot(z, ew2[li, :h, :h]) + ec2[li, 0, :h], 0.0)
        z = _ref_dot(Hl, z)
        z = _ref_ln(z, dg0[li, 0, :h], db0[li, 0, :h])
        z = jnp.maximum(_ref_dot(z, dw1[li, :h, :h]) + dc1[li, 0, :h], 0.0)
        z = _ref_ln(z, dg1[li, 0, :h], db1[li, 0, :h])
        z = jnp.maximum(_ref_dot(z, dw2[li, :h, :h]) + dc2[li, 0, :h], 0.0)
        x = z
        d_in = h
    w1, c1, g1, b1, w2, c2 = params["classifier"]
    ch, nc = cfg.Classifier_hidden, cfg.num_classes
    z = jnp.maximum(_ref_dot(x, w1[:h, :ch]) + c1[0, :ch], 0.0)
    z = _ref_ln(z, g1[0, :ch], b1[0, :ch])
    return _ref_dot(z, w2[:ch, :nc]) + c2[0, :nc]


# ----------------------------------------------------------------------------
if __name__ == "__main__":
    cfg = SetGNNConfig()
    N_NODES = 64
    N_HYPEREDGES = 32
    N_INCIDENCE = 128

    root = jax.random.PRNGKey(0)
    k_param, k_x, k_src, k_dst, k_norm = jax.random.split(root, 5)

    params = init_setgnn(k_param, cfg)

    x = jax.random.normal(k_x, (N_NODES, cfg.num_features), jnp.float32)
    src_nodes = jax.random.randint(k_src, (N_INCIDENCE,), 0, N_NODES)
    dst_edges = jax.random.randint(k_dst, (N_INCIDENCE,), 0, N_HYPEREDGES)
    edge_index = jnp.stack([src_nodes, dst_edges], axis=0)          # (2, |E|)
    norm = jax.random.uniform(k_norm, (N_INCIDENCE,), jnp.float32, 0.5, 1.5)

    fwd = jax.jit(functools.partial(setgnn_forward, num_nodes=N_NODES,
                                    num_hyperedges=N_HYPEREDGES, cfg=cfg))
    out = jax.block_until_ready(fwd(params, x, edge_index, norm))
    assert out.shape == (N_NODES, cfg.num_classes), out.shape

    ref = reference_forward(params, x, edge_index, norm, N_NODES, N_HYPEREDGES, cfg)
    err = float(jnp.max(jnp.abs(out - ref)))
    scale = 1.0 + float(jnp.max(jnp.abs(ref)))
    assert err < 5e-2 * scale, (err, scale)

    print("KERNEL_OK")
</pallas_src>

<mosaic_0001>
module attributes {stable_mosaic.version = 11 : i64} {
  func.func @_setgnn_fused_kernel(%arg0: memref<64x128xf32, #tpu.memory_space<vmem>>, %arg1: memref<32x64xf32, #tpu.memory_space<vmem>>, %arg2: memref<4x1x128xf32, #tpu.memory_space<vmem>>, %arg3: memref<4x1x128xf32, #tpu.memory_space<vmem>>, %arg4: memref<4x128x128xf32, #tpu.memory_space<vmem>>, %arg5: memref<4x1x128xf32, #tpu.memory_space<vmem>>, %arg6: memref<4x1x128xf32, #tpu.memory_space<vmem>>, %arg7: memref<4x1x128xf32, #tpu.memory_space<vmem>>, %arg8: memref<4x128x128xf32, #tpu.memory_space<vmem>>, %arg9: memref<4x1x128xf32, #tpu.memory_space<vmem>>, %arg10: memref<4x1x128xf32, #tpu.memory_space<vmem>>, %arg11: memref<4x1x128xf32, #tpu.memory_space<vmem>>, %arg12: memref<4x128x128xf32, #tpu.memory_space<vmem>>, %arg13: memref<4x1x128xf32, #tpu.memory_space<vmem>>, %arg14: memref<4x1x128xf32, #tpu.memory_space<vmem>>, %arg15: memref<4x1x128xf32, #tpu.memory_space<vmem>>, %arg16: memref<4x128x128xf32, #tpu.memory_space<vmem>>, %arg17: memref<4x1x128xf32, #tpu.memory_space<vmem>>, %arg18: memref<128x128xf32, #tpu.memory_space<vmem>>, %arg19: memref<1x128xf32, #tpu.memory_space<vmem>>, %arg20: memref<1x128xf32, #tpu.memory_space<vmem>>, %arg21: memref<1x128xf32, #tpu.memory_space<vmem>>, %arg22: memref<128x128xf32, #tpu.memory_space<vmem>>, %arg23: memref<1x128xf32, #tpu.memory_space<vmem>>, %arg24: memref<64x128xf32, #tpu.memory_space<vmem>>) attributes {dimension_semantics = [], scalar_prefetch = 0 : i64, scratch_operands = 0 : i64, tpu.core_type = #tpu.core_type<tc>} {
    %c0 = arith.constant 0 : index
    %c0_0 = arith.constant 0 : index
    %0 = vector.load %arg1[%c0, %c0_0] : memref<32x64xf32, #tpu.memory_space<vmem>>, vector<32x64xf32>
    %c0_1 = arith.constant 0 : index
    %c0_2 = arith.constant 0 : index
    %1 = vector.load %arg0[%c0_1, %c0_2] : memref<64x128xf32, #tpu.memory_space<vmem>>, vector<64x128xf32>
    %c0_3 = arith.constant 0 : index
    %c0_4 = arith.constant 0 : index
    %c0_5 = arith.constant 0 : index
    %2 = vector.load %arg2[%c0_3, %c0_4, %c0_5] : memref<4x1x128xf32, #tpu.memory_space<vmem>>, vector<1x1x128xf32>
    %3 = vector.shape_cast %2 : vector<1x1x128xf32> to vector<1x128xf32>
    %c0_6 = arith.constant 0 : index
    %c0_7 = arith.constant 0 : index
    %c0_8 = arith.constant 0 : index
    %4 = vector.load %arg3[%c0_6, %c0_7, %c0_8] : memref<4x1x128xf32, #tpu.memory_space<vmem>>, vector<1x1x128xf32>
    %5 = vector.shape_cast %4 : vector<1x1x128xf32> to vector<1x128xf32>
    %c0_9 = arith.constant 0 : index
    %c0_10 = arith.constant 0 : index
    %c0_11 = arith.constant 0 : index
    %6 = vector.load %arg4[%c0_9, %c0_10, %c0_11] : memref<4x128x128xf32, #tpu.memory_space<vmem>>, vector<1x128x128xf32>
    %7 = vector.shape_cast %6 : vector<1x128x128xf32> to vector<128x128xf32>
    %c0_12 = arith.constant 0 : index
    %c0_13 = arith.constant 0 : index
    %c0_14 = arith.constant 0 : index
    %8 = vector.load %arg5[%c0_12, %c0_13, %c0_14] : memref<4x1x128xf32, #tpu.memory_space<vmem>>, vector<1x1x128xf32>
    %9 = vector.shape_cast %8 : vector<1x1x128xf32> to vector<1x128xf32>
    %c0_15 = arith.constant 0 : index
    %c0_16 = arith.constant 0 : index
    %c0_17 = arith.constant 0 : index
    %10 = vector.load %arg6[%c0_15, %c0_16, %c0_17] : memref<4x1x128xf32, #tpu.memory_space<vmem>>, vector<1x1x128xf32>
    %11 = vector.shape_cast %10 : vector<1x1x128xf32> to vector<1x128xf32>
    %c0_18 = arith.constant 0 : index
    %c0_19 = arith.constant 0 : index
    %c0_20 = arith.constant 0 : index
    %12 = vector.load %arg7[%c0_18, %c0_19, %c0_20] : memref<4x1x128xf32, #tpu.memory_space<vmem>>, vector<1x1x128xf32>
    %13 = vector.shape_cast %12 : vector<1x1x128xf32> to vector<1x128xf32>
    %c0_21 = arith.constant 0 : index
    %c0_22 = arith.constant 0 : index
    %c0_23 = arith.constant 0 : index
    %14 = vector.load %arg8[%c0_21, %c0_22, %c0_23] : memref<4x128x128xf32, #tpu.memory_space<vmem>>, vector<1x128x128xf32>
    %15 = vector.shape_cast %14 : vector<1x128x128xf32> to vector<128x128xf32>
    %c0_24 = arith.constant 0 : index
    %c0_25 = arith.constant 0 : index
    %c0_26 = arith.constant 0 : index
    %16 = vector.load %arg9[%c0_24, %c0_25, %c0_26] : memref<4x1x128xf32, #tpu.memory_space<vmem>>, vector<1x1x128xf32>
    %17 = vector.shape_cast %16 : vector<1x1x128xf32> to vector<1x128xf32>
    %cst = arith.constant dense<0.000000e+00> : vector<64xf32>
    %18 = vector.multi_reduction <add>, %1, %cst [1] : vector<64x128xf32> to vector<64xf32>
    %19 = vector.shape_cast %18 : vector<64xf32> to vector<64x1xf32>
    %cst_27 = arith.constant 6.250000e-02 : f32
    %20 = vector.broadcast %cst_27 : f32 to vector<64x1xf32>
    %21 = arith.mulf %19, %20 : vector<64x1xf32>
    %22 = arith.mulf %1, %1 : vector<64x128xf32>
    %cst_28 = arith.constant dense<0.000000e+00> : vector<64xf32>
    %23 = vector.multi_reduction <add>, %22, %cst_28 [1] : vector<64x128xf32> to vector<64xf32>
    %24 = vector.shape_cast %23 : vector<64xf32> to vector<64x1xf32>
    %cst_29 = arith.constant 6.250000e-02 : f32
    %25 = vector.broadcast %cst_29 : f32 to vector<64x1xf32>
    %26 = arith.mulf %24, %25 : vector<64x1xf32>
    %27 = arith.mulf %21, %21 : vector<64x1xf32>
    %28 = arith.subf %26, %27 : vector<64x1xf32>
    %29 = vector.broadcast %21 : vector<64x1xf32> to vector<64x128xf32>
    %30 = arith.subf %1, %29 : vector<64x128xf32>
    %cst_30 = arith.constant 9.99999974E-6 : f32
    %31 = vector.broadcast %cst_30 : f32 to vector<64x1xf32>
    %32 = arith.addf %28, %31 : vector<64x1xf32>
    %33 = math.rsqrt %32 : vector<64x1xf32>
    %34 = vector.broadcast %33 : vector<64x1xf32> to vector<64x128xf32>
    %35 = arith.mulf %30, %34 : vector<64x128xf32>
    %36 = vector.broadcast %3 : vector<1x128xf32> to vector<64x128xf32>
    %37 = arith.mulf %35, %36 : vector<64x128xf32>
    %38 = vector.broadcast %5 : vector<1x128xf32> to vector<64x128xf32>
    %39 = arith.addf %37, %38 : vector<64x128xf32>
    %cst_31 = arith.constant dense<0.000000e+00> : vector<64x128xf32>
    %40 = tpu.matmul %39, %7, %cst_31 {dimension_numbers = #tpu.dot_dimension_numbers<[1], [0], [0], [1], [0, 0, 1, 1], [], []>} : vector<64x128xf32>, vector<128x128xf32>, vector<64x128xf32> -> vector<64x128xf32>
    %41 = vector.broadcast %9 : vector<1x128xf32> to vector<64x128xf32>
    %42 = arith.addf %40, %41 : vector<64x128xf32>
    %cst_32 = arith.constant 0.000000e+00 : f32
    %43 = vector.broadcast %cst_32 : f32 to vector<64x128xf32>
    %44 = arith.maximumf %42, %43 : vector<64x128xf32>
    %cst_33 = arith.constant dense<0.000000e+00> : vector<64xf32>
    %45 = vector.multi_reduction <add>, %44, %cst_33 [1] : vector<64x128xf32> to vector<64xf32>
    %46 = vector.shape_cast %45 : vector<64xf32> to vector<64x1xf32>
    %cst_34 = arith.constant 3.125000e-02 : f32
    %47 = vector.broadcast %cst_34 : f32 to vector<64x1xf32>
    %48 = arith.mulf %46, %47 : vector<64x1xf32>
    %49 = arith.mulf %44, %44 : vector<64x128xf32>
    %cst_35 = arith.constant dense<0.000000e+00> : vector<64xf32>
    %50 = vector.multi_reduction <add>, %49, %cst_35 [1] : vector<64x128xf32> to vector<64xf32>
    %51 = vector.shape_cast %50 : vector<64xf32> to vector<64x1xf32>
    %cst_36 = arith.constant 3.125000e-02 : f32
    %52 = vector.broadcast %cst_36 : f32 to vector<64x1xf32>
    %53 = arith.mulf %51, %52 : vector<64x1xf32>
    %54 = arith.mulf %48, %48 : vector<64x1xf32>
    %55 = arith.subf %53, %54 : vector<64x1xf32>
    %56 = vector.broadcast %48 : vector<64x1xf32> to vector<64x128xf32>
    %57 = arith.subf %44, %56 : vector<64x128xf32>
    %cst_37 = arith.constant 9.99999974E-6 : f32
    %58 = vector.broadcast %cst_37 : f32 to vector<64x1xf32>
    %59 = arith.addf %55, %58 : vector<64x1xf32>
    %60 = math.rsqrt %59 : vector<64x1xf32>
    %61 = vector.broadcast %60 : vector<64x1xf32> to vector<64x128xf32>
    %62 = arith.mulf %57, %61 : vector<64x128xf32>
    %63 = vector.broadcast %11 : vector<1x128xf32> to vector<64x128xf32>
    %64 = arith.mulf %62, %63 : vector<64x128xf32>
    %65 = vector.broadcast %13 : vector<1x128xf32> to vector<64x128xf32>
    %66 = arith.addf %64, %65 : vector<64x128xf32>
    %cst_38 = arith.constant dense<0.000000e+00> : vector<64x128xf32>
    %67 = tpu.matmul %66, %15, %cst_38 {dimension_numbers = #tpu.dot_dimension_numbers<[1], [0], [0], [1], [0, 0, 1, 1], [], []>} : vector<64x128xf32>, vector<128x128xf32>, vector<64x128xf32> -> vector<64x128xf32>
    %68 = vector.broadcast %17 : vector<1x128xf32> to vector<64x128xf32>
    %69 = arith.addf %67, %68 : vector<64x128xf32>
    %cst_39 = arith.constant 0.000000e+00 : f32
    %70 = vector.broadcast %cst_39 : f32 to vector<64x128xf32>
    %71 = arith.maximumf %69, %70 : vector<64x128xf32>
    %cst_40 = arith.constant dense<0.000000e+00> : vector<32x128xf32>
    %72 = tpu.matmul %0, %71, %cst_40 {dimension_numbers = #tpu.dot_dimension_numbers<[1], [0], [0], [1], [0, 0, 1, 1], [], []>} : vector<32x64xf32>, vector<64x128xf32>, vector<32x128xf32> -> vector<32x128xf32>
    %c0_41 = arith.constant 0 : index
    %c0_42 = arith.constant 0 : index
    %c0_43 = arith.constant 0 : index
    %73 = vector.load %arg10[%c0_41, %c0_42, %c0_43] : memref<4x1x128xf32, #tpu.memory_space<vmem>>, vector<1x1x128xf32>
    %74 = vector.shape_cast %73 : vector<1x1x128xf32> to vector<1x128xf32>
    %c0_44 = arith.constant 0 : index
    %c0_45 = arith.constant 0 : index
    %c0_46 = arith.constant 0 : index
    %75 = vector.load %arg11[%c0_44, %c0_45, %c0_46] : memref<4x1x128xf32, #tpu.memory_space<vmem>>, vector<1x1x128xf32>
    %76 = vector.shape_cast %75 : vector<1x1x128xf32> to vector<1x128xf32>
    %c0_47 = arith.constant 0 : index
    %c0_48 = arith.constant 0 : index
    %c0_49 = arith.constant 0 : index
    %77 = vector.load %arg12[%c0_47, %c0_48, %c0_49] : memref<4x128x128xf32, #tpu.memory_space<vmem>>, vector<1x128x128xf32>
    %78 = vector.shape_cast %77 : vector<1x128x128xf32> to vector<128x128xf32>
    %c0_50 = arith.constant 0 : index
    %c0_51 = arith.constant 0 : index
    %c0_52 = arith.constant 0 : index
    %79 = vector.load %arg13[%c0_50, %c0_51, %c0_52] : memref<4x1x128xf32, #tpu.memory_space<vmem>>, vector<1x1x128xf32>
    %80 = vector.shape_cast %79 : vector<1x1x128xf32> to vector<1x128xf32>
    %c0_53 = arith.constant 0 : index
    %c0_54 = arith.constant 0 : index
    %c0_55 = arith.constant 0 : index
    %81 = vector.load %arg14[%c0_53, %c0_54, %c0_55] : memref<4x1x128xf32, #tpu.memory_space<vmem>>, vector<1x1x128xf32>
    %82 = vector.shape_cast %81 : vector<1x1x128xf32> to vector<1x128xf32>
    %c0_56 = arith.constant 0 : index
    %c0_57 = arith.constant 0 : index
    %c0_58 = arith.constant 0 : index
    %83 = vector.load %arg15[%c0_56, %c0_57, %c0_58] : memref<4x1x128xf32, #tpu.memory_space<vmem>>, vector<1x1x128xf32>
    %84 = vector.shape_cast %83 : vector<1x1x128xf32> to vector<1x128xf32>
    %c0_59 = arith.constant 0 : index
    %c0_60 = arith.constant 0 : index
    %c0_61 = arith.constant 0 : index
    %85 = vector.load %arg16[%c0_59, %c0_60, %c0_61] : memref<4x128x128xf32, #tpu.memory_space<vmem>>, vector<1x128x128xf32>
    %86 = vector.shape_cast %85 : vector<1x128x128xf32> to vector<128x128xf32>
    %c0_62 = arith.constant 0 : index
    %c0_63 = arith.constant 0 : index
    %c0_64 = arith.constant 0 : index
    %87 = vector.load %arg17[%c0_62, %c0_63, %c0_64] : memref<4x1x128xf32, #tpu.memory_space<vmem>>, vector<1x1x128xf32>
    %88 = vector.shape_cast %87 : vector<1x1x128xf32> to vector<1x128xf32>
    %cst_65 = arith.constant dense<0.000000e+00> : vector<32xf32>
    %89 = vector.multi_reduction <add>, %72, %cst_65 [1] : vector<32x128xf32> to vector<32xf32>
    %90 = vector.shape_cast %89 : vector<32xf32> to vector<32x1xf32>
    %cst_66 = arith.constant 3.125000e-02 : f32
    %91 = vector.broadcast %cst_66 : f32 to vector<32x1xf32>
    %92 = arith.mulf %90, %91 : vector<32x1xf32>
    %93 = arith.mulf %72, %72 : vector<32x128xf32>
    %cst_67 = arith.constant dense<0.000000e+00> : vector<32xf32>
    %94 = vector.multi_reduction <add>, %93, %cst_67 [1] : vector<32x128xf32> to vector<32xf32>
    %95 = vector.shape_cast %94 : vector<32xf32> to vector<32x1xf32>
    %cst_68 = arith.constant 3.125000e-02 : f32
    %96 = vector.broadcast %cst_68 : f32 to vector<32x1xf32>
    %97 = arith.mulf %95, %96 : vector<32x1xf32>
    %98 = arith.mulf %92, %92 : vector<32x1xf32>
    %99 = arith.subf %97, %98 : vector<32x1xf32>
    %100 = vector.broadcast %92 : vector<32x1xf32> to vector<32x128xf32>
    %101 = arith.subf %72, %100 : vector<32x128xf32>
    %cst_69 = arith.constant 9.99999974E-6 : f32
    %102 = vector.broadcast %cst_69 : f32 to vector<32x1xf32>
    %103 = arith.addf %99, %102 : vector<32x1xf32>
    %104 = math.rsqrt %103 : vector<32x1xf32>
    %105 = vector.broadcast %104 : vector<32x1xf32> to vector<32x128xf32>
    %106 = arith.mulf %101, %105 : vector<32x128xf32>
    %107 = vector.broadcast %74 : vector<1x128xf32> to vector<32x128xf32>
    %108 = arith.mulf %106, %107 : vector<32x128xf32>
    %109 = vector.broadcast %76 : vector<1x128xf32> to vector<32x128xf32>
    %110 = arith.addf %108, %109 : vector<32x128xf32>
    %cst_70 = arith.constant dense<0.000000e+00> : vector<32x128xf32>
    %111 = tpu.matmul %110, %78, %cst_70 {dimension_numbers = #tpu.dot_dimension_numbers<[1], [0], [0], [1], [0, 0, 1, 1], [], []>} : vector<32x128xf32>, vector<128x128xf32>, vector<32x128xf32> -> vector<32x128xf32>
    %112 = vector.broadcast %80 : vector<1x128xf32> to vector<32x128xf32>
    %113 = arith.addf %111, %112 : vector<32x128xf32>
    %cst_71 = arith.constant 0.000000e+00 : f32
    %114 = vector.broadcast %cst_71 : f32 to vector<32x128xf32>
    %115 = arith.maximumf %113, %114 : vector<32x128xf32>
    %cst_72 = arith.constant dense<0.000000e+00> : vector<32xf32>
    %116 = vector.multi_reduction <add>, %115, %cst_72 [1] : vector<32x128xf32> to vector<32xf32>
    %117 = vector.shape_cast %116 : vector<32xf32> to vector<32x1xf32>
    %cst_73 = arith.constant 3.125000e-02 : f32
    %118 = vector.broadcast %cst_73 : f32 to vector<32x1xf32>
    %119 = arith.mulf %117, %118 : vector<32x1xf32>
    %120 = arith.mulf %115, %115 : vector<32x128xf32>
    %cst_74 = arith.constant dense<0.000000e+00> : vector<32xf32>
    %121 = vector.multi_reduction <add>, %120, %cst_74 [1] : vector<32x128xf32> to vector<32xf32>
    %122 = vector.shape_cast %121 : vector<32xf32> to vector<32x1xf32>
    %cst_75 = arith.constant 3.125000e-02 : f32
    %123 = vector.broadcast %cst_75 : f32 to vector<32x1xf32>
    %124 = arith.mulf %122, %123 : vector<32x1xf32>
    %125 = arith.mulf %119, %119 : vector<32x1xf32>
    %126 = arith.subf %124, %125 : vector<32x1xf32>
    %127 = vector.broadcast %119 : vector<32x1xf32> to vector<32x128xf32>
    %128 = arith.subf %115, %127 : vector<32x128xf32>
    %cst_76 = arith.constant 9.99999974E-6 : f32
    %129 = vector.broadcast %cst_76 : f32 to vector<32x1xf32>
    %130 = arith.addf %126, %129 : vector<32x1xf32>
    %131 = math.rsqrt %130 : vector<32x1xf32>
    %132 = vector.broadcast %131 : vector<32x1xf32> to vector<32x128xf32>
    %133 = arith.mulf %128, %132 : vector<32x128xf32>
    %134 = vector.broadcast %82 : vector<1x128xf32> to vector<32x128xf32>
    %135 = arith.mulf %133, %134 : vector<32x128xf32>
    %136 = vector.broadcast %84 : vector<1x128xf32> to vector<32x128xf32>
    %137 = arith.addf %135, %136 : vector<32x128xf32>
    %cst_77 = arith.constant dense<0.000000e+00> : vector<32x128xf32>
    %138 = tpu.matmul %137, %86, %cst_77 {dimension_numbers = #tpu.dot_dimension_numbers<[1], [0], [0], [1], [0, 0, 1, 1], [], []>} : vector<32x128xf32>, vector<128x128xf32>, vector<32x128xf32> -> vector<32x128xf32>
    %139 = vector.broadcast %88 : vector<1x128xf32> to vector<32x128xf32>
    %140 = arith.addf %138, %139 : vector<32x128xf32>
    %cst_78 = arith.constant 0.000000e+00 : f32
    %141 = vector.broadcast %cst_78 : f32 to vector<32x128xf32>
    %142 = arith.maximumf %140, %141 : vector<32x128xf32>
    %c1 = arith.constant 1 : index
    %c0_79 = arith.constant 0 : index
    %c0_80 = arith.constant 0 : index
    %143 = vector.load %arg2[%c1, %c0_79, %c0_80] : memref<4x1x128xf32, #tpu.memory_space<vmem>>, vector<1x1x128xf32>
    %144 = vector.shape_cast %143 : vector<1x1x128xf32> to vector<1x128xf32>
    %c1_81 = arith.constant 1 : index
    %c0_82 = arith.constant 0 : index
    %c0_83 = arith.constant 0 : index
    %145 = vector.load %arg3[%c1_81, %c0_82, %c0_83] : memref<4x1x128xf32, #tpu.memory_space<vmem>>, vector<1x1x128xf32>
    %146 = vector.shape_cast %145 : vector<1x1x128xf32> to vector<1x128xf32>
    %c1_84 = arith.constant 1 : index
    %c0_85 = arith.constant 0 : index
    %c0_86 = arith.constant 0 : index
    %147 = vector.load %arg4[%c1_84, %c0_85, %c0_86] : memref<4x128x128xf32, #tpu.memory_space<vmem>>, vector<1x128x128xf32>
    %148 = vector.shape_cast %147 : vector<1x128x128xf32> to vector<128x128xf32>
    %c1_87 = arith.constant 1 : index
    %c0_88 = arith.constant 0 : index
    %c0_89 = arith.constant 0 : index
    %149 = vector.load %arg5[%c1_87, %c0_88, %c0_89] : memref<4x1x128xf32, #tpu.memory_space<vmem>>, vector<1x1x128xf32>
    %150 = vector.shape_cast %149 : vector<1x1x128xf32> to vector<1x128xf32>
    %c1_90 = arith.constant 1 : index
    %c0_91 = arith.constant 0 : index
    %c0_92 = arith.constant 0 : index
    %151 = vector.load %arg6[%c1_90, %c0_91, %c0_92] : memref<4x1x128xf32, #tpu.memory_space<vmem>>, vector<1x1x128xf32>
    %152 = vector.shape_cast %151 : vector<1x1x128xf32> to vector<1x128xf32>
    %c1_93 = arith.constant 1 : index
    %c0_94 = arith.constant 0 : index
    %c0_95 = arith.constant 0 : index
    %153 = vector.load %arg7[%c1_93, %c0_94, %c0_95] : memref<4x1x128xf32, #tpu.memory_space<vmem>>, vector<1x1x128xf32>
    %154 = vector.shape_cast %153 : vector<1x1x128xf32> to vector<1x128xf32>
    %c1_96 = arith.constant 1 : index
    %c0_97 = arith.constant 0 : index
    %c0_98 = arith.constant 0 : index
    %155 = vector.load %arg8[%c1_96, %c0_97, %c0_98] : memref<4x128x128xf32, #tpu.memory_space<vmem>>, vector<1x128x128xf32>
    %156 = vector.shape_cast %155 : vector<1x128x128xf32> to vector<128x128xf32>
    %c1_99 = arith.constant 1 : index
    %c0_100 = arith.constant 0 : index
    %c0_101 = arith.constant 0 : index
    %157 = vector.load %arg9[%c1_99, %c0_100, %c0_101] : memref<4x1x128xf32, #tpu.memory_space<vmem>>, vector<1x1x128xf32>
    %158 = vector.shape_cast %157 : vector<1x1x128xf32> to vector<1x128xf32>
    %cst_102 = arith.constant dense<0.000000e+00> : vector<32xf32>
    %159 = vector.multi_reduction <add>, %142, %cst_102 [1] : vector<32x128xf32> to vector<32xf32>
    %160 = vector.shape_cast %159 : vector<32xf32> to vector<32x1xf32>
    %cst_103 = arith.constant 3.125000e-02 : f32
    %161 = vector.broadcast %cst_103 : f32 to vector<32x1xf32>
    %162 = arith.mulf %160, %161 : vector<32x1xf32>
    %163 = arith.mulf %142, %142 : vector<32x128xf32>
    %cst_104 = arith.constant dense<0.000000e+00> : vector<32xf32>
    %164 = vector.multi_reduction <add>, %163, %cst_104 [1] : vector<32x128xf32> to vector<32xf32>
    %165 = vector.shape_cast %164 : vector<32xf32> to vector<32x1xf32>
    %cst_105 = arith.constant 3.125000e-02 : f32
    %166 = vector.broadcast %cst_105 : f32 to vector<32x1xf32>
    %167 = arith.mulf %165, %166 : vector<32x1xf32>
    %168 = arith.mulf %162, %162 : vector<32x1xf32>
    %169 = arith.subf %167, %168 : vector<32x1xf32>
    %170 = vector.broadcast %162 : vector<32x1xf32> to vector<32x128xf32>
    %171 = arith.subf %142, %170 : vector<32x128xf32>
    %cst_106 = arith.constant 9.99999974E-6 : f32
    %172 = vector.broadcast %cst_106 : f32 to vector<32x1xf32>
    %173 = arith.addf %169, %172 : vector<32x1xf32>
    %174 = math.rsqrt %173 : vector<32x1xf32>
    %175 = vector.broadcast %174 : vector<32x1xf32> to vector<32x128xf32>
    %176 = arith.mulf %171, %175 : vector<32x128xf32>
    %177 = vector.broadcast %144 : vector<1x128xf32> to vector<32x128xf32>
    %178 = arith.mulf %176, %177 : vector<32x128xf32>
    %179 = vector.broadcast %146 : vector<1x128xf32> to vector<32x128xf32>
    %180 = arith.addf %178, %179 : vector<32x128xf32>
    %cst_107 = arith.constant dense<0.000000e+00> : vector<32x128xf32>
    %181 = tpu.matmul %180, %148, %cst_107 {dimension_numbers = #tpu.dot_dimension_numbers<[1], [0], [0], [1], [0, 0, 1, 1], [], []>} : vector<32x128xf32>, vector<128x128xf32>, vector<32x128xf32> -> vector<32x128xf32>
    %182 = vector.broadcast %150 : vector<1x128xf32> to vector<32x128xf32>
    %183 = arith.addf %181, %182 : vector<32x128xf32>
    %cst_108 = arith.constant 0.000000e+00 : f32
    %184 = vector.broadcast %cst_108 : f32 to vector<32x128xf32>
    %185 = arith.maximumf %183, %184 : vector<32x128xf32>
    %cst_109 = arith.constant dense<0.000000e+00> : vector<32xf32>
    %186 = vector.multi_reduction <add>, %185, %cst_109 [1] : vector<32x128xf32> to vector<32xf32>
    %187 = vector.shape_cast %186 : vector<32xf32> to vector<32x1xf32>
    %cst_110 = arith.constant 3.125000e-02 : f32
    %188 = vector.broadcast %cst_110 : f32 to vector<32x1xf32>
    %189 = arith.mulf %187, %188 : vector<32x1xf32>
    %190 = arith.mulf %185, %185 : vector<32x128xf32>
    %cst_111 = arith.constant dense<0.000000e+00> : vector<32xf32>
    %191 = vector.multi_reduction <add>, %190, %cst_111 [1] : vector<32x128xf32> to vector<32xf32>
    %192 = vector.shape_cast %191 : vector<32xf32> to vector<32x1xf32>
    %cst_112 = arith.constant 3.125000e-02 : f32
    %193 = vector.broadcast %cst_112 : f32 to vector<32x1xf32>
    %194 = arith.mulf %192, %193 : vector<32x1xf32>
    %195 = arith.mulf %189, %189 : vector<32x1xf32>
    %196 = arith.subf %194, %195 : vector<32x1xf32>
    %197 = vector.broadcast %189 : vector<32x1xf32> to vector<32x128xf32>
    %198 = arith.subf %185, %197 : vector<32x128xf32>
    %cst_113 = arith.constant 9.99999974E-6 : f32
    %199 = vector.broadcast %cst_113 : f32 to vector<32x1xf32>
    %200 = arith.addf %196, %199 : vector<32x1xf32>
    %201 = math.rsqrt %200 : vector<32x1xf32>
    %202 = vector.broadcast %201 : vector<32x1xf32> to vector<32x128xf32>
    %203 = arith.mulf %198, %202 : vector<32x128xf32>
    %204 = vector.broadcast %152 : vector<1x128xf32> to vector<32x128xf32>
    %205 = arith.mulf %203, %204 : vector<32x128xf32>
    %206 = vector.broadcast %154 : vector<1x128xf32> to vector<32x128xf32>
    %207 = arith.addf %205, %206 : vector<32x128xf32>
    %cst_114 = arith.constant dense<0.000000e+00> : vector<32x128xf32>
    %208 = tpu.matmul %207, %156, %cst_114 {dimension_numbers = #tpu.dot_dimension_numbers<[1], [0], [0], [1], [0, 0, 1, 1], [], []>} : vector<32x128xf32>, vector<128x128xf32>, vector<32x128xf32> -> vector<32x128xf32>
    %209 = vector.broadcast %158 : vector<1x128xf32> to vector<32x128xf32>
    %210 = arith.addf %208, %209 : vector<32x128xf32>
    %cst_115 = arith.constant 0.000000e+00 : f32
    %211 = vector.broadcast %cst_115 : f32 to vector<32x128xf32>
    %212 = arith.maximumf %210, %211 : vector<32x128xf32>
    %cst_116 = arith.constant dense<0.000000e+00> : vector<64x128xf32>
    %213 = tpu.matmul %0, %212, %cst_116 {dimension_numbers = #tpu.dot_dimension_numbers<[0], [0], [1], [1], [0, 1, 1, 1], [], []>} : vector<32x64xf32>, vector<32x128xf32>, vector<64x128xf32> -> vector<64x128xf32>
    %c1_117 = arith.constant 1 : index
    %c0_118 = arith.constant 0 : index
    %c0_119 = arith.constant 0 : index
    %214 = vector.load %arg10[%c1_117, %c0_118, %c0_119] : memref<4x1x128xf32, #tpu.memory_space<vmem>>, vector<1x1x128xf32>
    %215 = vector.shape_cast %214 : vector<1x1x128xf32> to vector<1x128xf32>
    %c1_120 = arith.constant 1 : index
    %c0_121 = arith.constant 0 : index
    %c0_122 = arith.constant 0 : index
    %216 = vector.load %arg11[%c1_120, %c0_121, %c0_122] : memref<4x1x128xf32, #tpu.memory_space<vmem>>, vector<1x1x128xf32>
    %217 = vector.shape_cast %216 : vector<1x1x128xf32> to vector<1x128xf32>
    %c1_123 = arith.constant 1 : index
    %c0_124 = arith.constant 0 : index
    %c0_125 = arith.constant 0 : index
    %218 = vector.load %arg12[%c1_123, %c0_124, %c0_125] : memref<4x128x128xf32, #tpu.memory_space<vmem>>, vector<1x128x128xf32>
    %219 = vector.shape_cast %218 : vector<1x128x128xf32> to vector<128x128xf32>
    %c1_126 = arith.constant 1 : index
    %c0_127 = arith.constant 0 : index
    %c0_128 = arith.constant 0 : index
    %220 = vector.load %arg13[%c1_126, %c0_127, %c0_128] : memref<4x1x128xf32, #tpu.memory_space<vmem>>, vector<1x1x128xf32>
    %221 = vector.shape_cast %220 : vector<1x1x128xf32> to vector<1x128xf32>
    %c1_129 = arith.constant 1 : index
    %c0_130 = arith.constant 0 : index
    %c0_131 = arith.constant 0 : index
    %222 = vector.load %arg14[%c1_129, %c0_130, %c0_131] : memref<4x1x128xf32, #tpu.memory_space<vmem>>, vector<1x1x128xf32>
    %223 = vector.shape_cast %222 : vector<1x1x128xf32> to vector<1x128xf32>
    %c1_132 = arith.constant 1 : index
    %c0_133 = arith.constant 0 : index
    %c0_134 = arith.constant 0 : index
    %224 = vector.load %arg15[%c1_132, %c0_133, %c0_134] : memref<4x1x128xf32, #tpu.memory_space<vmem>>, vector<1x1x128xf32>
    %225 = vector.shape_cast %224 : vector<1x1x128xf32> to vector<1x128xf32>
    %c1_135 = arith.constant 1 : index
    %c0_136 = arith.constant 0 : index
    %c0_137 = arith.constant 0 : index
    %226 = vector.load %arg16[%c1_135, %c0_136, %c0_137] : memref<4x128x128xf32, #tpu.memory_space<vmem>>, vector<1x128x128xf32>
    %227 = vector.shape_cast %226 : vector<1x128x128xf32> to vector<128x128xf32>
    %c1_138 = arith.constant 1 : index
    %c0_139 = arith.constant 0 : index
    %c0_140 = arith.constant 0 : index
    %228 = vector.load %arg17[%c1_138, %c0_139, %c0_140] : memref<4x1x128xf32, #tpu.memory_space<vmem>>, vector<1x1x128xf32>
    %229 = vector.shape_cast %228 : vector<1x1x128xf32> to vector<1x128xf32>
    %cst_141 = arith.constant dense<0.000000e+00> : vector<64xf32>
    %230 = vector.multi_reduction <add>, %213, %cst_141 [1] : vector<64x128xf32> to vector<64xf32>
    %231 = vector.shape_cast %230 : vector<64xf32> to vector<64x1xf32>
    %cst_142 = arith.constant 3.125000e-02 : f32
    %232 = vector.broadcast %cst_142 : f32 to vector<64x1xf32>
    %233 = arith.mulf %231, %232 : vector<64x1xf32>
    %234 = arith.mulf %213, %213 : vector<64x128xf32>
    %cst_143 = arith.constant dense<0.000000e+00> : vector<64xf32>
    %235 = vector.multi_reduction <add>, %234, %cst_143 [1] : vector<64x128xf32> to vector<64xf32>
    %236 = vector.shape_cast %235 : vector<64xf32> to vector<64x1xf32>
    %cst_144 = arith.constant 3.125000e-02 : f32
    %237 = vector.broadcast %cst_144 : f32 to vector<64x1xf32>
    %238 = arith.mulf %236, %237 : vector<64x1xf32>
    %239 = arith.mulf %233, %233 : vector<64x1xf32>
    %240 = arith.subf %238, %239 : vector<64x1xf32>
    %241 = vector.broadcast %233 : vector<64x1xf32> to vector<64x128xf32>
    %242 = arith.subf %213, %241 : vector<64x128xf32>
    %cst_145 = arith.constant 9.99999974E-6 : f32
    %243 = vector.broadcast %cst_145 : f32 to vector<64x1xf32>
    %244 = arith.addf %240, %243 : vector<64x1xf32>
    %245 = math.rsqrt %244 : vector<64x1xf32>
    %246 = vector.broadcast %245 : vector<64x1xf32> to vector<64x128xf32>
    %247 = arith.mulf %242, %246 : vector<64x128xf32>
    %248 = vector.broadcast %215 : vector<1x128xf32> to vector<64x128xf32>
    %249 = arith.mulf %247, %248 : vector<64x128xf32>
    %250 = vector.broadcast %217 : vector<1x128xf32> to vector<64x128xf32>
    %251 = arith.addf %249, %250 : vector<64x128xf32>
    %cst_146 = arith.constant dense<0.000000e+00> : vector<64x128xf32>
    %252 = tpu.matmul %251, %219, %cst_146 {dimension_numbers = #tpu.dot_dimension_numbers<[1], [0], [0], [1], [0, 0, 1, 1], [], []>} : vector<64x128xf32>, vector<128x128xf32>, vector<64x128xf32> -> vector<64x128xf32>
    %253 = vector.broadcast %221 : vector<1x128xf32> to vector<64x128xf32>
    %254 = arith.addf %252, %253 : vector<64x128xf32>
    %cst_147 = arith.constant 0.000000e+00 : f32
    %255 = vector.broadcast %cst_147 : f32 to vector<64x128xf32>
    %256 = arith.maximumf %254, %255 : vector<64x128xf32>
    %cst_148 = arith.constant dense<0.000000e+00> : vector<64xf32>
    %257 = vector.multi_reduction <add>, %256, %cst_148 [1] : vector<64x128xf32> to vector<64xf32>
    %258 = vector.shape_cast %257 : vector<64xf32> to vector<64x1xf32>
    %cst_149 = arith.constant 3.125000e-02 : f32
    %259 = vector.broadcast %cst_149 : f32 to vector<64x1xf32>
    %260 = arith.mulf %258, %259 : vector<64x1xf32>
    %261 = arith.mulf %256, %256 : vector<64x128xf32>
    %cst_150 = arith.constant dense<0.000000e+00> : vector<64xf32>
    %262 = vector.multi_reduction <add>, %261, %cst_150 [1] : vector<64x128xf32> to vector<64xf32>
    %263 = vector.shape_cast %262 : vector<64xf32> to vector<64x1xf32>
    %cst_151 = arith.constant 3.125000e-02 : f32
    %264 = vector.broadcast %cst_151 : f32 to vector<64x1xf32>
    %265 = arith.mulf %263, %264 : vector<64x1xf32>
    %266 = arith.mulf %260, %260 : vector<64x1xf32>
    %267 = arith.subf %265, %266 : vector<64x1xf32>
    %268 = vector.broadcast %260 : vector<64x1xf32> to vector<64x128xf32>
    %269 = arith.subf %256, %268 : vector<64x128xf32>
    %cst_152 = arith.constant 9.99999974E-6 : f32
    %270 = vector.broadcast %cst_152 : f32 to vector<64x1xf32>
    %271 = arith.addf %267, %270 : vector<64x1xf32>
    %272 = math.rsqrt %271 : vector<64x1xf32>
    %273 = vector.broadcast %272 : vector<64x1xf32> to vector<64x128xf32>
    %274 = arith.mulf %269, %273 : vector<64x128xf32>
    %275 = vector.broadcast %223 : vector<1x128xf32> to vector<64x128xf32>
    %276 = arith.mulf %274, %275 : vector<64x128xf32>
    %277 = vector.broadcast %225 : vector<1x128xf32> to vector<64x128xf32>
    %278 = arith.addf %276, %277 : vector<64x128xf32>
    %cst_153 = arith.constant dense<0.000000e+00> : vector<64x128xf32>
    %279 = tpu.matmul %278, %227, %cst_153 {dimension_numbers = #tpu.dot_dimension_numbers<[1], [0], [0], [1], [0, 0, 1, 1], [], []>} : vector<64x128xf32>, vector<128x128xf32>, vector<64x128xf32> -> vector<64x128xf32>
    %280 = vector.broadcast %229 : vector<1x128xf32> to vector<64x128xf32>
    %281 = arith.addf %279, %280 : vector<64x128xf32>
    %cst_154 = arith.constant 0.000000e+00 : f32
    %282 = vector.broadcast %cst_154 : f32 to vector<64x128xf32>
    %283 = arith.maximumf %281, %282 : vector<64x128xf32>
    %c2 = arith.constant 2 : index
    %c0_155 = arith.constant 0 : index
    %c0_156 = arith.constant 0 : index
    %284 = vector.load %arg2[%c2, %c0_155, %c0_156] : memref<4x1x128xf32, #tpu.memory_space<vmem>>, vector<1x1x128xf32>
    %285 = vector.shape_cast %284 : vector<1x1x128xf32> to vector<1x128xf32>
    %c2_157 = arith.constant 2 : index
    %c0_158 = arith.constant 0 : index
    %c0_159 = arith.constant 0 : index
    %286 = vector.load %arg3[%c2_157, %c0_158, %c0_159] : memref<4x1x128xf32, #tpu.memory_space<vmem>>, vector<1x1x128xf32>
    %287 = vector.shape_cast %286 : vector<1x1x128xf32> to vector<1x128xf32>
    %c2_160 = arith.constant 2 : index
    %c0_161 = arith.constant 0 : index
    %c0_162 = arith.constant 0 : index
    %288 = vector.load %arg4[%c2_160, %c0_161, %c0_162] : memref<4x128x128xf32, #tpu.memory_space<vmem>>, vector<1x128x128xf32>
    %289 = vector.shape_cast %288 : vector<1x128x128xf32> to vector<128x128xf32>
    %c2_163 = arith.constant 2 : index
    %c0_164 = arith.constant 0 : index
    %c0_165 = arith.constant 0 : index
    %290 = vector.load %arg5[%c2_163, %c0_164, %c0_165] : memref<4x1x128xf32, #tpu.memory_space<vmem>>, vector<1x1x128xf32>
    %291 = vector.shape_cast %290 : vector<1x1x128xf32> to vector<1x128xf32>
    %c2_166 = arith.constant 2 : index
    %c0_167 = arith.constant 0 : index
    %c0_168 = arith.constant 0 : index
    %292 = vector.load %arg6[%c2_166, %c0_167, %c0_168] : memref<4x1x128xf32, #tpu.memory_space<vmem>>, vector<1x1x128xf32>
    %293 = vector.shape_cast %292 : vector<1x1x128xf32> to vector<1x128xf32>
    %c2_169 = arith.constant 2 : index
    %c0_170 = arith.constant 0 : index
    %c0_171 = arith.constant 0 : index
    %294 = vector.load %arg7[%c2_169, %c0_170, %c0_171] : memref<4x1x128xf32, #tpu.memory_space<vmem>>, vector<1x1x128xf32>
    %295 = vector.shape_cast %294 : vector<1x1x128xf32> to vector<1x128xf32>
    %c2_172 = arith.constant 2 : index
    %c0_173 = arith.constant 0 : index
    %c0_174 = arith.constant 0 : index
    %296 = vector.load %arg8[%c2_172, %c0_173, %c0_174] : memref<4x128x128xf32, #tpu.memory_space<vmem>>, vector<1x128x128xf32>
    %297 = vector.shape_cast %296 : vector<1x128x128xf32> to vector<128x128xf32>
    %c2_175 = arith.constant 2 : index
    %c0_176 = arith.constant 0 : index
    %c0_177 = arith.constant 0 : index
    %298 = vector.load %arg9[%c2_175, %c0_176, %c0_177] : memref<4x1x128xf32, #tpu.memory_space<vmem>>, vector<1x1x128xf32>
    %299 = vector.shape_cast %298 : vector<1x1x128xf32> to vector<1x128xf32>
    %cst_178 = arith.constant dense<0.000000e+00> : vector<64xf32>
    %300 = vector.multi_reduction <add>, %283, %cst_178 [1] : vector<64x128xf32> to vector<64xf32>
    %301 = vector.shape_cast %300 : vector<64xf32> to vector<64x1xf32>
    %cst_179 = arith.constant 3.125000e-02 : f32
    %302 = vector.broadcast %cst_179 : f32 to vector<64x1xf32>
    %303 = arith.mulf %301, %302 : vector<64x1xf32>
    %304 = arith.mulf %283, %283 : vector<64x128xf32>
    %cst_180 = arith.constant dense<0.000000e+00> : vector<64xf32>
    %305 = vector.multi_reduction <add>, %304, %cst_180 [1] : vector<64x128xf32> to vector<64xf32>
    %306 = vector.shape_cast %305 : vector<64xf32> to vector<64x1xf32>
    %cst_181 = arith.constant 3.125000e-02 : f32
    %307 = vector.broadcast %cst_181 : f32 to vector<64x1xf32>
    %308 = arith.mulf %306, %307 : vector<64x1xf32>
    %309 = arith.mulf %303, %303 : vector<64x1xf32>
    %310 = arith.subf %308, %309 : vector<64x1xf32>
    %311 = vector.broadcast %303 : vector<64x1xf32> to vector<64x128xf32>
    %312 = arith.subf %283, %311 : vector<64x128xf32>
    %cst_182 = arith.constant 9.99999974E-6 : f32
    %313 = vector.broadcast %cst_182 : f32 to vector<64x1xf32>
    %314 = arith.addf %310, %313 : vector<64x1xf32>
    %315 = math.rsqrt %314 : vector<64x1xf32>
    %316 = vector.broadcast %315 : vector<64x1xf32> to vector<64x128xf32>
    %317 = arith.mulf %312, %316 : vector<64x128xf32>
    %318 = vector.broadcast %285 : vector<1x128xf32> to vector<64x128xf32>
    %319 = arith.mulf %317, %318 : vector<64x128xf32>
    %320 = vector.broadcast %287 : vector<1x128xf32> to vector<64x128xf32>
    %321 = arith.addf %319, %320 : vector<64x128xf32>
    %cst_183 = arith.constant dense<0.000000e+00> : vector<64x128xf32>
    %322 = tpu.matmul %321, %289, %cst_183 {dimension_numbers = #tpu.dot_dimension_numbers<[1], [0], [0], [1], [0, 0, 1, 1], [], []>} : vector<64x128xf32>, vector<128x128xf32>, vector<64x128xf32> -> vector<64x128xf32>
    %323 = vector.broadcast %291 : vector<1x128xf32> to vector<64x128xf32>
    %324 = arith.addf %322, %323 : vector<64x128xf32>
    %cst_184 = arith.constant 0.000000e+00 : f32
    %325 = vector.broadcast %cst_184 : f32 to vector<64x128xf32>
    %326 = arith.maximumf %324, %325 : vector<64x128xf32>
    %cst_185 = arith.constant dense<0.000000e+00> : vector<64xf32>
    %327 = vector.multi_reduction <add>, %326, %cst_185 [1] : vector<64x128xf32> to vector<64xf32>
    %328 = vector.shape_cast %327 : vector<64xf32> to vector<64x1xf32>
    %cst_186 = arith.constant 3.125000e-02 : f32
    %329 = vector.broadcast %cst_186 : f32 to vector<64x1xf32>
    %330 = arith.mulf %328, %329 : vector<64x1xf32>
    %331 = arith.mulf %326, %326 : vector<64x128xf32>
    %cst_187 = arith.constant dense<0.000000e+00> : vector<64xf32>
    %332 = vector.multi_reduction <add>, %331, %cst_187 [1] : vector<64x128xf32> to vector<64xf32>
    %333 = vector.shape_cast %332 : vector<64xf32> to vector<64x1xf32>
    %cst_188 = arith.constant 3.125000e-02 : f32
    %334 = vector.broadcast %cst_188 : f32 to vector<64x1xf32>
    %335 = arith.mulf %333, %334 : vector<64x1xf32>
    %336 = arith.mulf %330, %330 : vector<64x1xf32>
    %337 = arith.subf %335, %336 : vector<64x1xf32>
    %338 = vector.broadcast %330 : vector<64x1xf32> to vector<64x128xf32>
    %339 = arith.subf %326, %338 : vector<64x128xf32>
    %cst_189 = arith.constant 9.99999974E-6 : f32
    %340 = vector.broadcast %cst_189 : f32 to vector<64x1xf32>
    %341 = arith.addf %337, %340 : vector<64x1xf32>
    %342 = math.rsqrt %341 : vector<64x1xf32>
    %343 = vector.broadcast %342 : vector<64x1xf32> to vector<64x128xf32>
    %344 = arith.mulf %339, %343 : vector<64x128xf32>
    %345 = vector.broadcast %293 : vector<1x128xf32> to vector<64x128xf32>
    %346 = arith.mulf %344, %345 : vector<64x128xf32>
    %347 = vector.broadcast %295 : vector<1x128xf32> to vector<64x128xf32>
    %348 = arith.addf %346, %347 : vector<64x128xf32>
    %cst_190 = arith.constant dense<0.000000e+00> : vector<64x128xf32>
    %349 = tpu.matmul %348, %297, %cst_190 {dimension_numbers = #tpu.dot_dimension_numbers<[1], [0], [0], [1], [0, 0, 1, 1], [], []>} : vector<64x128xf32>, vector<128x128xf32>, vector<64x128xf32> -> vector<64x128xf32>
    %350 = vector.broadcast %299 : vector<1x128xf32> to vector<64x128xf32>
    %351 = arith.addf %349, %350 : vector<64x128xf32>
    %cst_191 = arith.constant 0.000000e+00 : f32
    %352 = vector.broadcast %cst_191 : f32 to vector<64x128xf32>
    %353 = arith.maximumf %351, %352 : vector<64x128xf32>
    %cst_192 = arith.constant dense<0.000000e+00> : vector<32x128xf32>
    %354 = tpu.matmul %0, %353, %cst_192 {dimension_numbers = #tpu.dot_dimension_numbers<[1], [0], [0], [1], [0, 0, 1, 1], [], []>} : vector<32x64xf32>, vector<64x128xf32>, vector<32x128xf32> -> vector<32x128xf32>
    %c2_193 = arith.constant 2 : index
    %c0_194 = arith.constant 0 : index
    %c0_195 = arith.constant 0 : index
    %355 = vector.load %arg10[%c2_193, %c0_194, %c0_195] : memref<4x1x128xf32, #tpu.memory_space<vmem>>, vector<1x1x128xf32>
    %356 = vector.shape_cast %355 : vector<1x1x128xf32> to vector<1x128xf32>
    %c2_196 = arith.constant 2 : index
    %c0_197 = arith.constant 0 : index
    %c0_198 = arith.constant 0 : index
    %357 = vector.load %arg11[%c2_196, %c0_197, %c0_198] : memref<4x1x128xf32, #tpu.memory_space<vmem>>, vector<1x1x128xf32>
    %358 = vector.shape_cast %357 : vector<1x1x128xf32> to vector<1x128xf32>
    %c2_199 = arith.constant 2 : index
    %c0_200 = arith.constant 0 : index
    %c0_201 = arith.constant 0 : index
    %359 = vector.load %arg12[%c2_199, %c0_200, %c0_201] : memref<4x128x128xf32, #tpu.memory_space<vmem>>, vector<1x128x128xf32>
    %360 = vector.shape_cast %359 : vector<1x128x128xf32> to vector<128x128xf32>
    %c2_202 = arith.constant 2 : index
    %c0_203 = arith.constant 0 : index
    %c0_204 = arith.constant 0 : index
    %361 = vector.load %arg13[%c2_202, %c0_203, %c0_204] : memref<4x1x128xf32, #tpu.memory_space<vmem>>, vector<1x1x128xf32>
    %362 = vector.shape_cast %361 : vector<1x1x128xf32> to vector<1x128xf32>
    %c2_205 = arith.constant 2 : index
    %c0_206 = arith.constant 0 : index
    %c0_207 = arith.constant 0 : index
    %363 = vector.load %arg14[%c2_205, %c0_206, %c0_207] : memref<4x1x128xf32, #tpu.memory_space<vmem>>, vector<1x1x128xf32>
    %364 = vector.shape_cast %363 : vector<1x1x128xf32> to vector<1x128xf32>
    %c2_208 = arith.constant 2 : index
    %c0_209 = arith.constant 0 : index
    %c0_210 = arith.constant 0 : index
    %365 = vector.load %arg15[%c2_208, %c0_209, %c0_210] : memref<4x1x128xf32, #tpu.memory_space<vmem>>, vector<1x1x128xf32>
    %366 = vector.shape_cast %365 : vector<1x1x128xf32> to vector<1x128xf32>
    %c2_211 = arith.constant 2 : index
    %c0_212 = arith.constant 0 : index
    %c0_213 = arith.constant 0 : index
    %367 = vector.load %arg16[%c2_211, %c0_212, %c0_213] : memref<4x128x128xf32, #tpu.memory_space<vmem>>, vector<1x128x128xf32>
    %368 = vector.shape_cast %367 : vector<1x128x128xf32> to vector<128x128xf32>
    %c2_214 = arith.constant 2 : index
    %c0_215 = arith.constant 0 : index
    %c0_216 = arith.constant 0 : index
    %369 = vector.load %arg17[%c2_214, %c0_215, %c0_216] : memref<4x1x128xf32, #tpu.memory_space<vmem>>, vector<1x1x128xf32>
    %370 = vector.shape_cast %369 : vector<1x1x128xf32> to vector<1x128xf32>
    %cst_217 = arith.constant dense<0.000000e+00> : vector<32xf32>
    %371 = vector.multi_reduction <add>, %354, %cst_217 [1] : vector<32x128xf32> to vector<32xf32>
    %372 = vector.shape_cast %371 : vector<32xf32> to vector<32x1xf32>
    %cst_218 = arith.constant 3.125000e-02 : f32
    %373 = vector.broadcast %cst_218 : f32 to vector<32x1xf32>
    %374 = arith.mulf %372, %373 : vector<32x1xf32>
    %375 = arith.mulf %354, %354 : vector<32x128xf32>
    %cst_219 = arith.constant dense<0.000000e+00> : vector<32xf32>
    %376 = vector.multi_reduction <add>, %375, %cst_219 [1] : vector<32x128xf32> to vector<32xf32>
    %377 = vector.shape_cast %376 : vector<32xf32> to vector<32x1xf32>
    %cst_220 = arith.constant 3.125000e-02 : f32
    %378 = vector.broadcast %cst_220 : f32 to vector<32x1xf32>
    %379 = arith.mulf %377, %378 : vector<32x1xf32>
    %380 = arith.mulf %374, %374 : vector<32x1xf32>
    %381 = arith.subf %379, %380 : vector<32x1xf32>
    %382 = vector.broadcast %374 : vector<32x1xf32> to vector<32x128xf32>
    %383 = arith.subf %354, %382 : vector<32x128xf32>
    %cst_221 = arith.constant 9.99999974E-6 : f32
    %384 = vector.broadcast %cst_221 : f32 to vector<32x1xf32>
    %385 = arith.addf %381, %384 : vector<32x1xf32>
    %386 = math.rsqrt %385 : vector<32x1xf32>
    %387 = vector.broadcast %386 : vector<32x1xf32> to vector<32x128xf32>
    %388 = arith.mulf %383, %387 : vector<32x128xf32>
    %389 = vector.broadcast %356 : vector<1x128xf32> to vector<32x128xf32>
    %390 = arith.mulf %388, %389 : vector<32x128xf32>
    %391 = vector.broadcast %358 : vector<1x128xf32> to vector<32x128xf32>
    %392 = arith.addf %390, %391 : vector<32x128xf32>
    %cst_222 = arith.constant dense<0.000000e+00> : vector<32x128xf32>
    %393 = tpu.matmul %392, %360, %cst_222 {dimension_numbers = #tpu.dot_dimension_numbers<[1], [0], [0], [1], [0, 0, 1, 1], [], []>} : vector<32x128xf32>, vector<128x128xf32>, vector<32x128xf32> -> vector<32x128xf32>
    %394 = vector.broadcast %362 : vector<1x128xf32> to vector<32x128xf32>
    %395 = arith.addf %393, %394 : vector<32x128xf32>
    %cst_223 = arith.constant 0.000000e+00 : f32
    %396 = vector.broadcast %cst_223 : f32 to vector<32x128xf32>
    %397 = arith.maximumf %395, %396 : vector<32x128xf32>
    %cst_224 = arith.constant dense<0.000000e+00> : vector<32xf32>
    %398 = vector.multi_reduction <add>, %397, %cst_224 [1] : vector<32x128xf32> to vector<32xf32>
    %399 = vector.shape_cast %398 : vector<32xf32> to vector<32x1xf32>
    %cst_225 = arith.constant 3.125000e-02 : f32
    %400 = vector.broadcast %cst_225 : f32 to vector<32x1xf32>
    %401 = arith.mulf %399, %400 : vector<32x1xf32>
    %402 = arith.mulf %397, %397 : vector<32x128xf32>
    %cst_226 = arith.constant dense<0.000000e+00> : vector<32xf32>
    %403 = vector.multi_reduction <add>, %402, %cst_226 [1] : vector<32x128xf32> to vector<32xf32>
    %404 = vector.shape_cast %403 : vector<32xf32> to vector<32x1xf32>
    %cst_227 = arith.constant 3.125000e-02 : f32
    %405 = vector.broadcast %cst_227 : f32 to vector<32x1xf32>
    %406 = arith.mulf %404, %405 : vector<32x1xf32>
    %407 = arith.mulf %401, %401 : vector<32x1xf32>
    %408 = arith.subf %406, %407 : vector<32x1xf32>
    %409 = vector.broadcast %401 : vector<32x1xf32> to vector<32x128xf32>
    %410 = arith.subf %397, %409 : vector<32x128xf32>
    %cst_228 = arith.constant 9.99999974E-6 : f32
    %411 = vector.broadcast %cst_228 : f32 to vector<32x1xf32>
    %412 = arith.addf %408, %411 : vector<32x1xf32>
    %413 = math.rsqrt %412 : vector<32x1xf32>
    %414 = vector.broadcast %413 : vector<32x1xf32> to vector<32x128xf32>
    %415 = arith.mulf %410, %414 : vector<32x128xf32>
    %416 = vector.broadcast %364 : vector<1x128xf32> to vector<32x128xf32>
    %417 = arith.mulf %415, %416 : vector<32x128xf32>
    %418 = vector.broadcast %366 : vector<1x128xf32> to vector<32x128xf32>
    %419 = arith.addf %417, %418 : vector<32x128xf32>
    %cst_229 = arith.constant dense<0.000000e+00> : vector<32x128xf32>
    %420 = tpu.matmul %419, %368, %cst_229 {dimension_numbers = #tpu.dot_dimension_numbers<[1], [0], [0], [1], [0, 0, 1, 1], [], []>} : vector<32x128xf32>, vector<128x128xf32>, vector<32x128xf32> -> vector<32x128xf32>
    %421 = vector.broadcast %370 : vector<1x128xf32> to vector<32x128xf32>
    %422 = arith.addf %420, %421 : vector<32x128xf32>
    %cst_230 = arith.constant 0.000000e+00 : f32
    %423 = vector.broadcast %cst_230 : f32 to vector<32x128xf32>
    %424 = arith.maximumf %422, %423 : vector<32x128xf32>
    %c3 = arith.constant 3 : index
    %c0_231 = arith.constant 0 : index
    %c0_232 = arith.constant 0 : index
    %425 = vector.load %arg2[%c3, %c0_231, %c0_232] : memref<4x1x128xf32, #tpu.memory_space<vmem>>, vector<1x1x128xf32>
    %426 = vector.shape_cast %425 : vector<1x1x128xf32> to vector<1x128xf32>
    %c3_233 = arith.constant 3 : index
    %c0_234 = arith.constant 0 : index
    %c0_235 = arith.constant 0 : index
    %427 = vector.load %arg3[%c3_233, %c0_234, %c0_235] : memref<4x1x128xf32, #tpu.memory_space<vmem>>, vector<1x1x128xf32>
    %428 = vector.shape_cast %427 : vector<1x1x128xf32> to vector<1x128xf32>
    %c3_236 = arith.constant 3 : index
    %c0_237 = arith.constant 0 : index
    %c0_238 = arith.constant 0 : index
    %429 = vector.load %arg4[%c3_236, %c0_237, %c0_238] : memref<4x128x128xf32, #tpu.memory_space<vmem>>, vector<1x128x128xf32>
    %430 = vector.shape_cast %429 : vector<1x128x128xf32> to vector<128x128xf32>
    %c3_239 = arith.constant 3 : index
    %c0_240 = arith.constant 0 : index
    %c0_241 = arith.constant 0 : index
    %431 = vector.load %arg5[%c3_239, %c0_240, %c0_241] : memref<4x1x128xf32, #tpu.memory_space<vmem>>, vector<1x1x128xf32>
    %432 = vector.shape_cast %431 : vector<1x1x128xf32> to vector<1x128xf32>
    %c3_242 = arith.constant 3 : index
    %c0_243 = arith.constant 0 : index
    %c0_244 = arith.constant 0 : index
    %433 = vector.load %arg6[%c3_242, %c0_243, %c0_244] : memref<4x1x128xf32, #tpu.memory_space<vmem>>, vector<1x1x128xf32>
    %434 = vector.shape_cast %433 : vector<1x1x128xf32> to vector<1x128xf32>
    %c3_245 = arith.constant 3 : index
    %c0_246 = arith.constant 0 : index
    %c0_247 = arith.constant 0 : index
    %435 = vector.load %arg7[%c3_245, %c0_246, %c0_247] : memref<4x1x128xf32, #tpu.memory_space<vmem>>, vector<1x1x128xf32>
    %436 = vector.shape_cast %435 : vector<1x1x128xf32> to vector<1x128xf32>
    %c3_248 = arith.constant 3 : index
    %c0_249 = arith.constant 0 : index
    %c0_250 = arith.constant 0 : index
    %437 = vector.load %arg8[%c3_248, %c0_249, %c0_250] : memref<4x128x128xf32, #tpu.memory_space<vmem>>, vector<1x128x128xf32>
    %438 = vector.shape_cast %437 : vector<1x128x128xf32> to vector<128x128xf32>
    %c3_251 = arith.constant 3 : index
    %c0_252 = arith.constant 0 : index
    %c0_253 = arith.constant 0 : index
    %439 = vector.load %arg9[%c3_251, %c0_252, %c0_253] : memref<4x1x128xf32, #tpu.memory_space<vmem>>, vector<1x1x128xf32>
    %440 = vector.shape_cast %439 : vector<1x1x128xf32> to vector<1x128xf32>
    %cst_254 = arith.constant dense<0.000000e+00> : vector<32xf32>
    %441 = vector.multi_reduction <add>, %424, %cst_254 [1] : vector<32x128xf32> to vector<32xf32>
    %442 = vector.shape_cast %441 : vector<32xf32> to vector<32x1xf32>
    %cst_255 = arith.constant 3.125000e-02 : f32
    %443 = vector.broadcast %cst_255 : f32 to vector<32x1xf32>
    %444 = arith.mulf %442, %443 : vector<32x1xf32>
    %445 = arith.mulf %424, %424 : vector<32x128xf32>
    %cst_256 = arith.constant dense<0.000000e+00> : vector<32xf32>
    %446 = vector.multi_reduction <add>, %445, %cst_256 [1] : vector<32x128xf32> to vector<32xf32>
    %447 = vector.shape_cast %446 : vector<32xf32> to vector<32x1xf32>
    %cst_257 = arith.constant 3.125000e-02 : f32
    %448 = vector.broadcast %cst_257 : f32 to vector<32x1xf32>
    %449 = arith.mulf %447, %448 : vector<32x1xf32>
    %450 = arith.mulf %444, %444 : vector<32x1xf32>
    %451 = arith.subf %449, %450 : vector<32x1xf32>
    %452 = vector.broadcast %444 : vector<32x1xf32> to vector<32x128xf32>
    %453 = arith.subf %424, %452 : vector<32x128xf32>
    %cst_258 = arith.constant 9.99999974E-6 : f32
    %454 = vector.broadcast %cst_258 : f32 to vector<32x1xf32>
    %455 = arith.addf %451, %454 : vector<32x1xf32>
    %456 = math.rsqrt %455 : vector<32x1xf32>
    %457 = vector.broadcast %456 : vector<32x1xf32> to vector<32x128xf32>
    %458 = arith.mulf %453, %457 : vector<32x128xf32>
    %459 = vector.broadcast %426 : vector<1x128xf32> to vector<32x128xf32>
    %460 = arith.mulf %458, %459 : vector<32x128xf32>
    %461 = vector.broadcast %428 : vector<1x128xf32> to vector<32x128xf32>
    %462 = arith.addf %460, %461 : vector<32x128xf32>
    %cst_259 = arith.constant dense<0.000000e+00> : vector<32x128xf32>
    %463 = tpu.matmul %462, %430, %cst_259 {dimension_numbers = #tpu.dot_dimension_numbers<[1], [0], [0], [1], [0, 0, 1, 1], [], []>} : vector<32x128xf32>, vector<128x128xf32>, vector<32x128xf32> -> vector<32x128xf32>
    %464 = vector.broadcast %432 : vector<1x128xf32> to vector<32x128xf32>
    %465 = arith.addf %463, %464 : vector<32x128xf32>
    %cst_260 = arith.constant 0.000000e+00 : f32
    %466 = vector.broadcast %cst_260 : f32 to vector<32x128xf32>
    %467 = arith.maximumf %465, %466 : vector<32x128xf32>
    %cst_261 = arith.constant dense<0.000000e+00> : vector<32xf32>
    %468 = vector.multi_reduction <add>, %467, %cst_261 [1] : vector<32x128xf32> to vector<32xf32>
    %469 = vector.shape_cast %468 : vector<32xf32> to vector<32x1xf32>
    %cst_262 = arith.constant 3.125000e-02 : f32
    %470 = vector.broadcast %cst_262 : f32 to vector<32x1xf32>
    %471 = arith.mulf %469, %470 : vector<32x1xf32>
    %472 = arith.mulf %467, %467 : vector<32x128xf32>
    %cst_263 = arith.constant dense<0.000000e+00> : vector<32xf32>
    %473 = vector.multi_reduction <add>, %472, %cst_263 [1] : vector<32x128xf32> to vector<32xf32>
    %474 = vector.shape_cast %473 : vector<32xf32> to vector<32x1xf32>
    %cst_264 = arith.constant 3.125000e-02 : f32
    %475 = vector.broadcast %cst_264 : f32 to vector<32x1xf32>
    %476 = arith.mulf %474, %475 : vector<32x1xf32>
    %477 = arith.mulf %471, %471 : vector<32x1xf32>
    %478 = arith.subf %476, %477 : vector<32x1xf32>
    %479 = vector.broadcast %471 : vector<32x1xf32> to vector<32x128xf32>
    %480 = arith.subf %467, %479 : vector<32x128xf32>
    %cst_265 = arith.constant 9.99999974E-6 : f32
    %481 = vector.broadcast %cst_265 : f32 to vector<32x1xf32>
    %482 = arith.addf %478, %481 : vector<32x1xf32>
    %483 = math.rsqrt %482 : vector<32x1xf32>
    %484 = vector.broadcast %483 : vector<32x1xf32> to vector<32x128xf32>
    %485 = arith.mulf %480, %484 : vector<32x128xf32>
    %486 = vector.broadcast %434 : vector<1x128xf32> to vector<32x128xf32>
    %487 = arith.mulf %485, %486 : vector<32x128xf32>
    %488 = vector.broadcast %436 : vector<1x128xf32> to vector<32x128xf32>
    %489 = arith.addf %487, %488 : vector<32x128xf32>
    %cst_266 = arith.constant dense<0.000000e+00> : vector<32x128xf32>
    %490 = tpu.matmul %489, %438, %cst_266 {dimension_numbers = #tpu.dot_dimension_numbers<[1], [0], [0], [1], [0, 0, 1, 1], [], []>} : vector<32x128xf32>, vector<128x128xf32>, vector<32x128xf32> -> vector<32x128xf32>
    %491 = vector.broadcast %440 : vector<1x128xf32> to vector<32x128xf32>
    %492 = arith.addf %490, %491 : vector<32x128xf32>
    %cst_267 = arith.constant 0.000000e+00 : f32
    %493 = vector.broadcast %cst_267 : f32 to vector<32x128xf32>
    %494 = arith.maximumf %492, %493 : vector<32x128xf32>
    %cst_268 = arith.constant dense<0.000000e+00> : vector<64x128xf32>
    %495 = tpu.matmul %0, %494, %cst_268 {dimension_numbers = #tpu.dot_dimension_numbers<[0], [0], [1], [1], [0, 1, 1, 1], [], []>} : vector<32x64xf32>, vector<32x128xf32>, vector<64x128xf32> -> vector<64x128xf32>
    %c3_269 = arith.constant 3 : index
    %c0_270 = arith.constant 0 : index
    %c0_271 = arith.constant 0 : index
    %496 = vector.load %arg10[%c3_269, %c0_270, %c0_271] : memref<4x1x128xf32, #tpu.memory_space<vmem>>, vector<1x1x128xf32>
    %497 = vector.shape_cast %496 : vector<1x1x128xf32> to vector<1x128xf32>
    %c3_272 = arith.constant 3 : index
    %c0_273 = arith.constant 0 : index
    %c0_274 = arith.constant 0 : index
    %498 = vector.load %arg11[%c3_272, %c0_273, %c0_274] : memref<4x1x128xf32, #tpu.memory_space<vmem>>, vector<1x1x128xf32>
    %499 = vector.shape_cast %498 : vector<1x1x128xf32> to vector<1x128xf32>
    %c3_275 = arith.constant 3 : index
    %c0_276 = arith.constant 0 : index
    %c0_277 = arith.constant 0 : index
    %500 = vector.load %arg12[%c3_275, %c0_276, %c0_277] : memref<4x128x128xf32, #tpu.memory_space<vmem>>, vector<1x128x128xf32>
    %501 = vector.shape_cast %500 : vector<1x128x128xf32> to vector<128x128xf32>
    %c3_278 = arith.constant 3 : index
    %c0_279 = arith.constant 0 : index
    %c0_280 = arith.constant 0 : index
    %502 = vector.load %arg13[%c3_278, %c0_279, %c0_280] : memref<4x1x128xf32, #tpu.memory_space<vmem>>, vector<1x1x128xf32>
    %503 = vector.shape_cast %502 : vector<1x1x128xf32> to vector<1x128xf32>
    %c3_281 = arith.constant 3 : index
    %c0_282 = arith.constant 0 : index
    %c0_283 = arith.constant 0 : index
    %504 = vector.load %arg14[%c3_281, %c0_282, %c0_283] : memref<4x1x128xf32, #tpu.memory_space<vmem>>, vector<1x1x128xf32>
    %505 = vector.shape_cast %504 : vector<1x1x128xf32> to vector<1x128xf32>
    %c3_284 = arith.constant 3 : index
    %c0_285 = arith.constant 0 : index
    %c0_286 = arith.constant 0 : index
    %506 = vector.load %arg15[%c3_284, %c0_285, %c0_286] : memref<4x1x128xf32, #tpu.memory_space<vmem>>, vector<1x1x128xf32>
    %507 = vector.shape_cast %506 : vector<1x1x128xf32> to vector<1x128xf32>
    %c3_287 = arith.constant 3 : index
    %c0_288 = arith.constant 0 : index
    %c0_289 = arith.constant 0 : index
    %508 = vector.load %arg16[%c3_287, %c0_288, %c0_289] : memref<4x128x128xf32, #tpu.memory_space<vmem>>, vector<1x128x128xf32>
    %509 = vector.shape_cast %508 : vector<1x128x128xf32> to vector<128x128xf32>
    %c3_290 = arith.constant 3 : index
    %c0_291 = arith.constant 0 : index
    %c0_292 = arith.constant 0 : index
    %510 = vector.load %arg17[%c3_290, %c0_291, %c0_292] : memref<4x1x128xf32, #tpu.memory_space<vmem>>, vector<1x1x128xf32>
    %511 = vector.shape_cast %510 : vector<1x1x128xf32> to vector<1x128xf32>
    %cst_293 = arith.constant dense<0.000000e+00> : vector<64xf32>
    %512 = vector.multi_reduction <add>, %495, %cst_293 [1] : vector<64x128xf32> to vector<64xf32>
    %513 = vector.shape_cast %512 : vector<64xf32> to vector<64x1xf32>
    %cst_294 = arith.constant 3.125000e-02 : f32
    %514 = vector.broadcast %cst_294 : f32 to vector<64x1xf32>
    %515 = arith.mulf %513, %514 : vector<64x1xf32>
    %516 = arith.mulf %495, %495 : vector<64x128xf32>
    %cst_295 = arith.constant dense<0.000000e+00> : vector<64xf32>
    %517 = vector.multi_reduction <add>, %516, %cst_295 [1] : vector<64x128xf32> to vector<64xf32>
    %518 = vector.shape_cast %517 : vector<64xf32> to vector<64x1xf32>
    %cst_296 = arith.constant 3.125000e-02 : f32
    %519 = vector.broadcast %cst_296 : f32 to vector<64x1xf32>
    %520 = arith.mulf %518, %519 : vector<64x1xf32>
    %521 = arith.mulf %515, %515 : vector<64x1xf32>
    %522 = arith.subf %520, %521 : vector<64x1xf32>
    %523 = vector.broadcast %515 : vector<64x1xf32> to vector<64x128xf32>
    %524 = arith.subf %495, %523 : vector<64x128xf32>
    %cst_297 = arith.constant 9.99999974E-6 : f32
    %525 = vector.broadcast %cst_297 : f32 to vector<64x1xf32>
    %526 = arith.addf %522, %525 : vector<64x1xf32>
    %527 = math.rsqrt %526 : vector<64x1xf32>
    %528 = vector.broadcast %527 : vector<64x1xf32> to vector<64x128xf32>
    %529 = arith.mulf %524, %528 : vector<64x128xf32>
    %530 = vector.broadcast %497 : vector<1x128xf32> to vector<64x128xf32>
    %531 = arith.mulf %529, %530 : vector<64x128xf32>
    %532 = vector.broadcast %499 : vector<1x128xf32> to vector<64x128xf32>
    %533 = arith.addf %531, %532 : vector<64x128xf32>
    %cst_298 = arith.constant dense<0.000000e+00> : vector<64x128xf32>
    %534 = tpu.matmul %533, %501, %cst_298 {dimension_numbers = #tpu.dot_dimension_numbers<[1], [0], [0], [1], [0, 0, 1, 1], [], []>} : vector<64x128xf32>, vector<128x128xf32>, vector<64x128xf32> -> vector<64x128xf32>
    %535 = vector.broadcast %503 : vector<1x128xf32> to vector<64x128xf32>
    %536 = arith.addf %534, %535 : vector<64x128xf32>
    %cst_299 = arith.constant 0.000000e+00 : f32
    %537 = vector.broadcast %cst_299 : f32 to vector<64x128xf32>
    %538 = arith.maximumf %536, %537 : vector<64x128xf32>
    %cst_300 = arith.constant dense<0.000000e+00> : vector<64xf32>
    %539 = vector.multi_reduction <add>, %538, %cst_300 [1] : vector<64x128xf32> to vector<64xf32>
    %540 = vector.shape_cast %539 : vector<64xf32> to vector<64x1xf32>
    %cst_301 = arith.constant 3.125000e-02 : f32
    %541 = vector.broadcast %cst_301 : f32 to vector<64x1xf32>
    %542 = arith.mulf %540, %541 : vector<64x1xf32>
    %543 = arith.mulf %538, %538 : vector<64x128xf32>
    %cst_302 = arith.constant dense<0.000000e+00> : vector<64xf32>
    %544 = vector.multi_reduction <add>, %543, %cst_302 [1] : vector<64x128xf32> to vector<64xf32>
    %545 = vector.shape_cast %544 : vector<64xf32> to vector<64x1xf32>
    %cst_303 = arith.constant 3.125000e-02 : f32
    %546 = vector.broadcast %cst_303 : f32 to vector<64x1xf32>
    %547 = arith.mulf %545, %546 : vector<64x1xf32>
    %548 = arith.mulf %542, %542 : vector<64x1xf32>
    %549 = arith.subf %547, %548 : vector<64x1xf32>
    %550 = vector.broadcast %542 : vector<64x1xf32> to vector<64x128xf32>
    %551 = arith.subf %538, %550 : vector<64x128xf32>
    %cst_304 = arith.constant 9.99999974E-6 : f32
    %552 = vector.broadcast %cst_304 : f32 to vector<64x1xf32>
    %553 = arith.addf %549, %552 : vector<64x1xf32>
    %554 = math.rsqrt %553 : vector<64x1xf32>
    %555 = vector.broadcast %554 : vector<64x1xf32> to vector<64x128xf32>
    %556 = arith.mulf %551, %555 : vector<64x128xf32>
    %557 = vector.broadcast %505 : vector<1x128xf32> to vector<64x128xf32>
    %558 = arith.mulf %556, %557 : vector<64x128xf32>
    %559 = vector.broadcast %507 : vector<1x128xf32> to vector<64x128xf32>
    %560 = arith.addf %558, %559 : vector<64x128xf32>
    %cst_305 = arith.constant dense<0.000000e+00> : vector<64x128xf32>
    %561 = tpu.matmul %560, %509, %cst_305 {dimension_numbers = #tpu.dot_dimension_numbers<[1], [0], [0], [1], [0, 0, 1, 1], [], []>} : vector<64x128xf32>, vector<128x128xf32>, vector<64x128xf32> -> vector<64x128xf32>
    %562 = vector.broadcast %511 : vector<1x128xf32> to vector<64x128xf32>
    %563 = arith.addf %561, %562 : vector<64x128xf32>
    %cst_306 = arith.constant 0.000000e+00 : f32
    %564 = vector.broadcast %cst_306 : f32 to vector<64x128xf32>
    %565 = arith.maximumf %563, %564 : vector<64x128xf32>
    %c0_307 = arith.constant 0 : index
    %c0_308 = arith.constant 0 : index
    %566 = vector.load %arg18[%c0_307, %c0_308] : memref<128x128xf32, #tpu.memory_space<vmem>>, vector<128x128xf32>
    %cst_309 = arith.constant dense<0.000000e+00> : vector<64x128xf32>
    %567 = tpu.matmul %565, %566, %cst_309 {dimension_numbers = #tpu.dot_dimension_numbers<[1], [0], [0], [1], [0, 0, 1, 1], [], []>} : vector<64x128xf32>, vector<128x128xf32>, vector<64x128xf32> -> vector<64x128xf32>
    %c0_310 = arith.constant 0 : index
    %c0_311 = arith.constant 0 : index
    %568 = vector.load %arg19[%c0_310, %c0_311] : memref<1x128xf32, #tpu.memory_space<vmem>>, vector<1x128xf32>
    %569 = vector.broadcast %568 : vector<1x128xf32> to vector<64x128xf32>
    %570 = arith.addf %567, %569 : vector<64x128xf32>
    %cst_312 = arith.constant 0.000000e+00 : f32
    %571 = vector.broadcast %cst_312 : f32 to vector<64x128xf32>
    %572 = arith.maximumf %570, %571 : vector<64x128xf32>
    %c0_313 = arith.constant 0 : index
    %c0_314 = arith.constant 0 : index
    %573 = vector.load %arg20[%c0_313, %c0_314] : memref<1x128xf32, #tpu.memory_space<vmem>>, vector<1x128xf32>
    %c0_315 = arith.constant 0 : index
    %c0_316 = arith.constant 0 : index
    %574 = vector.load %arg21[%c0_315, %c0_316] : memref<1x128xf32, #tpu.memory_space<vmem>>, vector<1x128xf32>
    %cst_317 = arith.constant dense<0.000000e+00> : vector<64xf32>
    %575 = vector.multi_reduction <add>, %572, %cst_317 [1] : vector<64x128xf32> to vector<64xf32>
    %576 = vector.shape_cast %575 : vector<64xf32> to vector<64x1xf32>
    %cst_318 = arith.constant 3.125000e-02 : f32
    %577 = vector.broadcast %cst_318 : f32 to vector<64x1xf32>
    %578 = arith.mulf %576, %577 : vector<64x1xf32>
    %579 = arith.mulf %572, %572 : vector<64x128xf32>
    %cst_319 = arith.constant dense<0.000000e+00> : vector<64xf32>
    %580 = vector.multi_reduction <add>, %579, %cst_319 [1] : vector<64x128xf32> to vector<64xf32>
    %581 = vector.shape_cast %580 : vector<64xf32> to vector<64x1xf32>
    %cst_320 = arith.constant 3.125000e-02 : f32
    %582 = vector.broadcast %cst_320 : f32 to vector<64x1xf32>
    %583 = arith.mulf %581, %582 : vector<64x1xf32>
    %584 = arith.mulf %578, %578 : vector<64x1xf32>
    %585 = arith.subf %583, %584 : vector<64x1xf32>
    %586 = vector.broadcast %578 : vector<64x1xf32> to vector<64x128xf32>
    %587 = arith.subf %572, %586 : vector<64x128xf32>
    %cst_321 = arith.constant 9.99999974E-6 : f32
    %588 = vector.broadcast %cst_321 : f32 to vector<64x1xf32>
    %589 = arith.addf %585, %588 : vector<64x1xf32>
    %590 = math.rsqrt %589 : vector<64x1xf32>
    %591 = vector.broadcast %590 : vector<64x1xf32> to vector<64x128xf32>
    %592 = arith.mulf %587, %591 : vector<64x128xf32>
    %593 = vector.broadcast %573 : vector<1x128xf32> to vector<64x128xf32>
    %594 = arith.mulf %592, %593 : vector<64x128xf32>
    %595 = vector.broadcast %574 : vector<1x128xf32> to vector<64x128xf32>
    %596 = arith.addf %594, %595 : vector<64x128xf32>
    %c0_322 = arith.constant 0 : index
    %c0_323 = arith.constant 0 : index
    %597 = vector.load %arg22[%c0_322, %c0_323] : memref<128x128xf32, #tpu.memory_space<vmem>>, vector<128x128xf32>
    %cst_324 = arith.constant dense<0.000000e+00> : vector<64x128xf32>
    %598 = tpu.matmul %596, %597, %cst_324 {dimension_numbers = #tpu.dot_dimension_numbers<[1], [0], [0], [1], [0, 0, 1, 1], [], []>} : vector<64x128xf32>, vector<128x128xf32>, vector<64x128xf32> -> vector<64x128xf32>
    %c0_325 = arith.constant 0 : index
    %c0_326 = arith.constant 0 : index
    %599 = vector.load %arg23[%c0_325, %c0_326] : memref<1x128xf32, #tpu.memory_space<vmem>>, vector<1x128xf32>
    %600 = vector.broadcast %599 : vector<1x128xf32> to vector<64x128xf32>
    %601 = arith.addf %598, %600 : vector<64x128xf32>
    %c0_327 = arith.constant 0 : index
    %c0_328 = arith.constant 0 : index
    %602 = vector.load %arg24[%c0_327, %c0_328] : memref<64x128xf32, #tpu.memory_space<vmem>>, vector<64x128xf32>
    tpu.vector_store %arg24[%c0_327, %c0_328], %601 {strides = array<i32>} : memref<64x128xf32, #tpu.memory_space<vmem>>, vector<64x128xf32>,
    return
  }
}

</mosaic_0001>

<bundles_post_ra>
// kernel: setgnn_forward.1
= control target key start
LH: loop header
LB: loop body
LE: loop exit
PB: predicated region body
PF: predicated region fallthrough
CT: control target
= control target key end

     0   :  { %s7001_s0 = inlined_call_operand.vmem [shape: f32[64,128], index: 0, kind: input, shape index: {}]   ;;  %s7002_s2 = inlined_call_operand.vmem [shape: f32[4,1,128], index: 2, kind: input, shape index: {}]   ;;  %s7003_s3 = inlined_call_operand.vmem [shape: f32[4,1,128], index: 3, kind: input, shape index: {}]   ;;  %s7004_s4 = inlined_call_operand.vmem [shape: f32[4,128,128], index: 4, kind: input, shape index: {}]   ;;  %s7005_s5 = inlined_call_operand.vmem [shape: f32[4,1,128], index: 5, kind: input, shape index: {}]   ;;  %s7006_s6 = inlined_call_operand.vmem [shape: f32[4,1,128], index: 6, kind: input, shape index: {}]   ;;  %s7007_s7 = inlined_call_operand.vmem [shape: f32[4,1,128], index: 7, kind: input, shape index: {}]   ;;  %s7008_s9 = inlined_call_operand.vmem [shape: f32[4,1,128], index: 9, kind: input, shape index: {}]   ;;  %s7009_s8 = inlined_call_operand.vmem [shape: f32[4,128,128], index: 8, kind: input, shape index: {}]   ;;  %s7010_s1 = inlined_call_operand.vmem [shape: f32[32,64], index: 1, kind: input, shape index: {}]   ;;  %s7011_s10 = inlined_call_operand.vmem [shape: f32[4,1,128], index: 10, kind: input, shape index: {}]   ;;  %s7012_s11 = inlined_call_operand.vmem [shape: f32[4,1,128], index: 11, kind: input, shape index: {}]   ;;  %s7013_s13 = inlined_call_operand.vmem [shape: f32[4,1,128], index: 13, kind: input, shape index: {}]   ;;  %s7014_s12 = inlined_call_operand.vmem [shape: f32[4,128,128], index: 12, kind: input, shape index: {}]   ;;  %s7015_s14 = inlined_call_operand.vmem [shape: f32[4,1,128], index: 14, kind: input, shape index: {}]   ;;  %s7016_s15 = inlined_call_operand.vmem [shape: f32[4,1,128], index: 15, kind: input, shape index: {}]   ;;  %s7017_s17 = inlined_call_operand.vmem [shape: f32[4,1,128], index: 17, kind: input, shape index: {}]   ;;  %s7018_s16 = inlined_call_operand.vmem [shape: f32[4,128,128], index: 16, kind: input, shape index: {}]   ;;  %s7019_s18 = inlined_call_operand.vmem [shape: f32[128,128], index: 18, kind: input, shape index: {}]   ;;  %s7020_s19 = inlined_call_operand.vmem [shape: f32[1,128], index: 19, kind: input, shape index: {}]   ;;  %s7021_s20 = inlined_call_operand.vmem [shape: f32[1,128], index: 20, kind: input, shape index: {}]   ;;  %s7022_s21 = inlined_call_operand.vmem [shape: f32[1,128], index: 21, kind: input, shape index: {}]   ;;  %s7023_s22 = inlined_call_operand.vmem [shape: f32[128,128], index: 22, kind: input, shape index: {}]   ;;  %s7024_s23 = inlined_call_operand.vmem [shape: f32[1,128], index: 23, kind: input, shape index: {}]   ;;  %s7025_s24 = inlined_call_operand.vmem [shape: f32[64,128], index: 24, kind: output, shape index: {}]  }
   0x1   :  { %7036 = sst [smem:[#allocation2_spill]] %s7001_s0 }
   0x2   :  { %7037 = sst [smem:[#allocation3_spill]] %s7002_s2 }
   0x3   :  { %7038 = sst [smem:[#allocation4_spill]] %s7003_s3 }
   0x4   :  { %7039 = sst [smem:[#allocation5_spill]] %s7004_s4 }
   0x5   :  { %7040 = sst [smem:[#allocation6_spill]] %s7005_s5 }
   0x6   :  { %7041 = sst [smem:[#allocation7_spill]] %s7006_s6 }
   0x7   :  { %7042 = sst [smem:[#allocation8_spill]] %s7007_s7 }
   0x8   :  { %7043 = sst [smem:[#allocation9_spill]] %s7008_s9 }
   0x9   :  { %7044 = sst [smem:[#allocation10_spill]] %s7009_s8 }
   0xa   :  { %7045 = sst [smem:[#allocation11_spill]] %s7022_s21 }
   0xb   :  { %7046 = sst [smem:[#allocation12_spill]] %s7024_s23 }
   0xc   :  { %7047 = sst [smem:[#allocation13_spill]] %s7025_s24 }
   0xd   :  { %s7048_s27 = sld [smem:[#allocation2_spill]] }
   0xe   :  { %s7049_s3 = sld [smem:[#allocation5_spill]] }
   0xf   :  { %s7050_s30 = sld [smem:[#allocation3_spill]] }
  0x10   :  { %s7051_s8 = sld [smem:[#allocation4_spill]] }
  0x11   :  { %s7052_s6 = sld [smem:[#allocation6_spill]] }
  0x12   :  { %s7053_s7 = sld [smem:[#allocation10_spill]] }
  0x13   :  { %v4776_v0 = vld [vmem:[%s7048_s27 + $0x10] sm:$0xff]  ;;  %v4781_v1 = vld [vmem:[%s7048_s27 + $0x8] sm:$0xff]  ;;  %v4786_v2 = vld [vmem:[%s7048_s27] sm:$0xff]  ;;  %s7055_s25 = sld [smem:[#allocation8_spill]] }
  0x14   :  { %131 = vadd.xlane.f32.xlu2 %v4776_v0  ;;  %129 = vadd.xlane.f32.xlu1 %v4781_v1  ;;  %v153_v3 = vmul.f32 %v4776_v0, %v4776_v0  ;;  %v152_v4 = vmul.f32 %v4781_v1, %v4781_v1  ;;  %v151_v5 = vmul.f32 %v4786_v2, %v4786_v2  ;;  %v4800_v6 = vld [vmem:[%s7048_s27 + $0x18] sm:$0xff]  ;;  %v4807_v8 = vld [vmem:[%s7048_s27 + $0x20] sm:$0xff]  ;;  %v4814_v9 = vld [vmem:[%s7048_s27 + $0x28] sm:$0xff]  ;;  %s7056_s26 = sld [smem:[#allocation9_spill]] }
  0x15   :  { %127 = vadd.xlane.f32.xlu0 %v4786_v2  ;;  %v154_v7 = vmul.f32 %v4800_v6, %v4800_v6  ;;  %v156_v10 = vmul.f32 %v4814_v9, %v4814_v9  ;;  %v155_v11 = vmul.f32 %v4807_v8, %v4807_v8  ;;  %v4824_v12 = vld [vmem:[%s7048_s27 + $0x30] sm:$0xff]  ;;  %v4831_v14 = vld [vmem:[%s7048_s27 + $0x38] sm:$0xff]  ;;  %v104_v18 = vld [vmem:[%s7049_s3 + $0x68] sm:$0xff]  ;;  %s7054_s27 = sld [smem:[#allocation7_spill]] }
  0x16   :  { %v157_v13 = vmul.f32 %v4824_v12, %v4824_v12  ;;  %v158_v15 = vmul.f32 %v4831_v14, %v4831_v14  ;;  %v106_v16 = vld [vmem:[%s7049_s3 + $0x78] sm:$0xff]  ;;  %v105_v17 = vld [vmem:[%s7049_s3 + $0x70] sm:$0xff]  ;;  %v103_v19 = vld [vmem:[%s7049_s3 + $0x60] sm:$0xff]  ;;  %s7059_s29 = sld [smem:[#allocation13_spill]] }
  0x17   :  { %328 = vmatpush.msra.mxu0 %v106_v16  ;;  %v102_v20 = vld [vmem:[%s7049_s3 + $0x58] sm:$0xff]  ;;  %v101_v21 = vld [vmem:[%s7049_s3 + $0x50] sm:$0xff]  ;;  %v100_v22 = vld [vmem:[%s7049_s3 + $0x48] sm:$0xff] }
  0x18   :  { %v99_v23 = vld [vmem:[%s7049_s3 + $0x40] sm:$0xff]  ;;  %v98_v24 = vld [vmem:[%s7049_s3 + $0x38] sm:$0xff]  ;;  %v97_v25 = vld [vmem:[%s7049_s3 + $0x30] sm:$0xff] }
  0x19   :  { %329 = vmatpush.msra.mxu0 %v105_v17  ;;  %v96_v26 = vld [vmem:[%s7049_s3 + $0x28] sm:$0xff]  ;;  %v95_v27 = vld [vmem:[%s7049_s3 + $0x20] sm:$0xff]  ;;  %v94_v31 = vld [vmem:[%s7049_s3 + $0x18] sm:$0xff] }
  0x1a   :  { %v93_v34 = vld [vmem:[%s7049_s3 + $0x10] sm:$0xff]  ;;  %v92_v35 = vld [vmem:[%s7049_s3 + $0x8] sm:$0xff]  ;;  %v91_v39 = vld [vmem:[%s7049_s3] sm:$0xff] }
  0x1b   :  { %330 = vmatpush.msra.mxu0 %v104_v18 }
  0x1c   :  { %163 = vadd.xlane.f32.xlu2 %v153_v3  ;;  %161 = vadd.xlane.f32.xlu1 %v152_v4 }
  0x1d   :  { %159 = vadd.xlane.f32.xlu0 %v151_v5  ;;  %331 = vmatpush.msra.mxu0 %v103_v19 }
  0x1f   :  { %332 = vmatpush.msra.mxu0 %v102_v20 }
  0x21   :  { %333 = vmatpush.msra.mxu0 %v101_v21 }
  0x23   :  { %334 = vmatpush.msra.mxu0 %v100_v22 }
  0x24   :  { %165 = vadd.xlane.f32.xlu1 %v154_v7  ;;  %135 = vadd.xlane.f32.xlu2 %v4807_v8 }
  0x25   :  { %133 = vadd.xlane.f32.xlu0 %v4800_v6  ;;  %335 = vmatpush.msra.mxu0 %v99_v23 }
  0x27   :  { %336 = vmatpush.msra.mxu0 %v98_v24 }
  0x29   :  { %337 = vmatpush.msra.mxu0 %v97_v25 }
  0x2b   :  { %338 = vmatpush.msra.mxu0 %v96_v26 }
  0x2c   :  { %137 = vadd.xlane.f32.xlu1 %v4814_v9  ;;  %169 = vadd.xlane.f32.xlu2 %v156_v10 }
  0x2d   :  { %167 = vadd.xlane.f32.xlu0 %v155_v11  ;;  %339 = vmatpush.msra.mxu0 %v95_v27 }
  0x2f   :  { %340 = vmatpush.msra.mxu0 %v94_v31 }
  0x31   :  { %341 = vmatpush.msra.mxu0 %v93_v34 }
  0x33   :  { %342 = vmatpush.msra.mxu0 %v92_v35 }
  0x34   :  { %171 = vadd.xlane.f32.xlu1 %v157_v13  ;;  %141 = vadd.xlane.f32.xlu2 %v4831_v14 }
  0x35   :  { %139 = vadd.xlane.f32.xlu0 %v4824_v12  ;;  %343 = vmatpush.msra.mxu0 %v91_v39 }
  0x3d   :  { %173 = vadd.xlane.f32.xlu0 %v158_v15 }
  0x87   :  { %v132_v28 = vpop.xlane.xlu2 %131  ;;  %v130_v29 = vpop.xlane.xlu1 %129 }
  0x88   :  { %v128_v30 = vpop.xlane.xlu0 %127  ;;  %v4876_v32 = vmul.f32 0.0625, %v132_v28  ;;  %v4878_v33 = vmul.f32 0.0625, %v130_v29 }
  0x89   :  { %v4886_v36 = vmul.f32 0.0625, %v128_v30 }
  0x8a   :  { %v185_v37 = vmul.f32 %v4876_v32, %v4876_v32  ;;  %v184_v38 = vmul.f32 %v4878_v33, %v4878_v33 }
  0x8b   :  { %v183_v45 = vmul.f32 %v4886_v36, %v4886_v36 }
  0x8f   :  { %v164_v40 = vpop.xlane.xlu2 %163  ;;  %v162_v41 = vpop.xlane.xlu1 %161 }
  0x90   :  { %v177_v42 = vmul.f32 0.0625, %v164_v40  ;;  %v176_v43 = vmul.f32 0.0625, %v162_v41  ;;  %v160_v44 = vpop.xlane.xlu0 %159  ;;  %v4932_v41 = vld [vmem:[%s7050_s30] ss:$0 sm:$0xff] }
  0x91   :  { %v175_v46 = vmul.f32 0.0625, %v160_v44 }
  0x92   :  { %v193_v47 = vsub.f32 %v177_v42, %v185_v37  ;;  %v192_v48 = vsub.f32 %v176_v43, %v184_v38  ;;  %v199_v38 = vsub.f32 %v4786_v2, %v4886_v36  ;;  %v4941_v2 = vld [vmem:[%s7051_s8] ss:$0 sm:$0xff] }
  0x93   :  { %v191_v49 = vsub.f32 %v175_v46, %v183_v45 }
  0x94   :  { %v4897_v50 = vadd.f32 1e-05, %v193_v47  ;;  %v208_v51 = vadd.f32 1e-05, %v192_v48 }
  0x95   :  { %v207_v52 = vadd.f32 1e-05, %v191_v49 }
  0x96   :  { %4434 = vrsqrt.f32 %v4897_v50  ;;  %vm231_vm4 = vweird.f32 %v208_v51  ;;  %vm241_vm6 = vweird.f32 %v4897_v50 }
  0x97   :  { %4436 = vrsqrt.f32 %v208_v51  ;;  %v166_v53 = vpop.xlane.xlu1 %165  ;;  %v136_v54 = vpop.xlane.xlu2 %135  ;;  %vm221_vm1 = vweird.f32 %v207_v52 }
  0x98   :  { %4438 = vrsqrt.f32 %v207_v52  ;;  %v134_v55 = vpop.xlane.xlu0 %133  ;;  %v178_v56 = vmul.f32 0.0625, %v166_v53  ;;  %v4904_v59 = vmul.f32 0.0625, %v136_v54 }
  0x99   :  { %v4900_v57 = vmul.f32 0.0625, %v134_v55 }
  0x9a   :  { %v187_v10 = vmul.f32 %v4904_v59, %v4904_v59 }
  0x9b   :  { %v186_v58 = vmul.f32 %v4900_v57, %v4900_v57 }
  0x9c   :  { %v4906_v60 = vpop.eup %4434 }
  0x9d   :  { %v4437_v61 = vpop.eup %4436  ;;  %v194_v62 = vsub.f32 %v178_v56, %v186_v58  ;;  %v236_v4 = vmul.f32 %v4906_v60, %v4897_v50  ;;  %vm242_vm7 = vweird.f32 %v4906_v60 }
  0x9e   :  { %v4439_v63 = vpop.eup %4438  ;;  %v226_v3 = vmul.f32 %v4437_v61, %v208_v51  ;;  %vm232_vm2 = vweird.f32 %v4437_v61  ;;  %vm243_vm8 = vmor %vm241_vm6, %vm242_vm7 }
  0x9f   :  { %v216_v5 = vmul.f32 %v4439_v63, %v207_v52  ;;  %v4910_v7 = vadd.f32 1e-05, %v194_v62  ;;  %v138_v11 = vpop.xlane.xlu1 %137  ;;  %v170_v13 = vpop.xlane.xlu2 %169  ;;  %v237_v23 = vmul.f32 %v4906_v60, %v236_v4  ;;  %vm222_vm0 = vweird.f32 %v4439_v63  ;;  %vm233_vm5 = vmor %vm231_vm4, %vm232_vm2 }
  0xa0   :  { %v227_v15 = vmul.f32 %v4437_v61, %v226_v3  ;;  %v4914_v16 = vmul.f32 0.0625, %v138_v11  ;;  %v168_v17 = vpop.xlane.xlu0 %167  ;;  %v180_v20 = vmul.f32 0.0625, %v170_v13  ;;  %vm223_vm3 = vmor %vm221_vm1, %vm222_vm0  ;;  %v200_v52 = vsub.f32 %v4781_v1, %v4878_v33 }
  0xa1   :  { %v217_v18 = vmul.f32 %v4439_v63, %v216_v5  ;;  %4440 = vrsqrt.f32 %v4910_v7  ;;  %v179_v19 = vmul.f32 0.0625, %v168_v17  ;;  %v238_v31 = vmul.f32 0.5, %v237_v23 }
  0xa2   :  { %v228_v21 = vmul.f32 0.5, %v227_v15  ;;  %v188_v22 = vmul.f32 %v4914_v16, %v4914_v16  ;;  %vm251_vm9 = vweird.f32 %v4910_v7 }
  0xa3   :  { %v218_v24 = vmul.f32 0.5, %v217_v18  ;;  %v195_v25 = vsub.f32 %v179_v19, %v187_v10  ;;  %v239_v36 = vsub.f32 1.5, %v238_v31  ;;  %v201_v18 = vsub.f32 %v4776_v0, %v4876_v32 }
  0xa4   :  { %v229_v26 = vsub.f32 1.5, %v228_v21  ;;  %v196_v29 = vsub.f32 %v180_v20, %v188_v22 }
  0xa5   :  { %v219_v27 = vsub.f32 1.5, %v218_v24  ;;  %v4920_v28 = vadd.f32 1e-05, %v195_v25 }
  0xa6   :  { %v230_v37 = vmul.f32 %v4437_v61, %v229_v26  ;;  %v4934_v42 = vadd.f32 1e-05, %v196_v29  ;;  %v202_v26 = vsub.f32 %v4800_v6, %v4900_v57  ;;  %v203_v6 = vsub.f32 %v4807_v8, %v4904_v59 }
  0xa7   :  { %v4922_v30 = vpop.eup %4440  ;;  %4442 = vrsqrt.f32 %v4920_v28  ;;  %v172_v34 = vpop.xlane.xlu1 %171  ;;  %v220_v35 = vmul.f32 %v4439_v63, %v219_v27  ;;  %vm261_vm12 = vweird.f32 %v4920_v28 }
  0xa8   :  { %v246_v39 = vmul.f32 %v4922_v30, %v4910_v7  ;;  %v140_v40 = vpop.xlane.xlu0 %139  ;;  %v181_v45 = vmul.f32 0.0625, %v172_v34  ;;  %v142_v49 = vpop.xlane.xlu2 %141  ;;  %v234_v51 = vsel %vm233_vm5, %v4437_v61, %v230_v37  ;;  %4444 = vrsqrt.f32 %v4934_v42 }
  0xa9   :  { %v4936_v43 = vmul.f32 0.0625, %v140_v40  ;;  %v224_v44 = vsel %vm223_vm3, %v4439_v63, %v220_v35  ;;  %v4953_v58 = vmul.f32 0.0625, %v142_v49  ;;  %v296_v62 = vmul.f32 %v234_v51, %v200_v52 }
  0xaa   :  { %v295_v46 = vmul.f32 %v224_v44, %v199_v38  ;;  %v247_v47 = vmul.f32 %v4922_v30, %v246_v39  ;;  %v240_v61 = vmul.f32 %v4906_v60, %v239_v36  ;;  %vm252_vm10 = vweird.f32 %v4922_v30 }
  0xab   :  { %v189_v48 = vmul.f32 %v4936_v43, %v4936_v43  ;;  %v190_v4 = vmul.f32 %v4953_v58, %v4953_v58  ;;  %v307_v10 = vmul.f32 %v4932_v41, %v296_v62  ;;  %vm253_vm11 = vmor %vm251_vm9, %vm252_vm10  ;;  %vm271_vm15 = vweird.f32 %v4934_v42 }
  0xac   :  { %v306_v53 = vmul.f32 %v4932_v41, %v295_v46  ;;  %v248_v63 = vmul.f32 0.5, %v247_v47  ;;  %v244_v15 = vsel %vm243_vm8, %v4906_v60, %v240_v61  ;;  %v204_v36 = vsub.f32 %v4814_v9, %v4914_v16 }
  0xad   :  { %v4443_v54 = vpop.eup %4442  ;;  %v197_v55 = vsub.f32 %v181_v45, %v189_v48  ;;  %v318_v20 = vadd.f32 %v4941_v2, %v307_v10  ;;  %v297_v21 = vmul.f32 %v244_v15, %v201_v18 }
  0xae   :  { %v317_v56 = vadd.f32 %v4941_v2, %v306_v53  ;;  %v256_v3 = vmul.f32 %v4443_v54, %v4920_v28  ;;  %v4445_v11 = vpop.eup %4444  ;;  %v249_v17 = vsub.f32 1.5, %v248_v63  ;;  %vm262_vm13 = vweird.f32 %v4443_v54 }
  0xaf   :  { %v4958_v33 = vadd.f32 1e-05, %v197_v55  ;;  %v266_v22 = vmul.f32 %v4445_v11, %v4934_v42  ;;  %v308_v0 = vmul.f32 %v4932_v41, %v297_v21  ;;  %vm263_vm14 = vmor %vm261_vm12, %vm262_vm13  ;;  %vm272_vm0 = vweird.f32 %v4445_v11 }
  0xb0   :  { %344 = vmatmul.f32.vlgmr.msra.gmra.mxu0 %v317_v56  ;;  %v174_v1 = vpop.xlane.xlu0 %173  ;;  %v257_v13 = vmul.f32 %v4443_v54, %v256_v3  ;;  %v250_v23 = vmul.f32 %v4922_v30, %v249_v17  ;;  %vm273_vm1 = vmor %vm271_vm15, %vm272_vm0  ;;  %v205_v53 = vsub.f32 %v4824_v12, %v4936_v43  ;;  %v206_v63 = vsub.f32 %v4831_v14, %v4953_v58 }
  0xb1   :  { %v182_v5 = vmul.f32 0.0625, %v174_v1  ;;  %4446 = vrsqrt.f32 %v4958_v33  ;;  %v267_v7 = vmul.f32 %v4445_v11, %v266_v22  ;;  %v319_v27 = vadd.f32 %v4941_v2, %v308_v0 }
  0xb2   :  { %v258_v50 = vmul.f32 0.5, %v257_v13  ;;  %v254_v24 = vsel %vm253_vm11, %v4922_v30, %v250_v23  ;;  %vm281_vm2 = vweird.f32 %v4958_v33 }
  0xb3   :  { %v198_v19 = vsub.f32 %v182_v5, %v190_v4  ;;  %v298_v29 = vmul.f32 %v254_v24, %v202_v26  ;;  %v268_v31 = vmul.f32 0.5, %v267_v7  ;;  %v4384_v4 = vld [vmem:[%s7052_s6] ss:$0 sm:$0xff] }
  0xb4   :  { %v259_v32 = vsub.f32 1.5, %v258_v50 }
  0xb5   :  { %v214_v60 = vadd.f32 1e-05, %v198_v19  ;;  %v309_v37 = vmul.f32 %v4932_v41, %v298_v29  ;;  %v269_v30 = vsub.f32 1.5, %v268_v31 }
  0xb6   :  { %v260_v35 = vmul.f32 %v4443_v54, %v259_v32 }
  0xb7   :  { %v4447_v25 = vpop.eup %4446  ;;  %4448 = vrsqrt.f32 %v214_v60  ;;  %v320_v57 = vadd.f32 %v4941_v2, %v309_v37  ;;  %v270_v46 = vmul.f32 %v4445_v11, %v269_v30  ;;  %vm291_vm5 = vweird.f32 %v214_v60 }
  0xb8   :  { %347 = vmatmul.f32.gmra.mxu0 %v318_v20  ;;  %v276_v34 = vmul.f32 %v4447_v25, %v4958_v33  ;;  %v264_v39 = vsel %vm263_vm14, %v4443_v54, %v260_v35  ;;  %vm282_vm3 = vweird.f32 %v4447_v25 }
  0xb9   :  { %v299_v28 = vmul.f32 %v264_v39, %v203_v6  ;;  %v274_v51 = vsel %vm273_vm1, %v4445_v11, %v270_v46  ;;  %vm283_vm4 = vmor %vm281_vm2, %vm282_vm3  ;;  %v125_v39 = vld [vmem:[%s7053_s7 + $0x78] sm:$0xff]  ;;  %v123_v6 = vld [vmem:[%s7053_s7 + $0x68] sm:$0xff] }
  0xba   :  { %v277_v38 = vmul.f32 %v4447_v25, %v276_v34  ;;  %v300_v59 = vmul.f32 %v274_v51, %v204_v36  ;;  %578 = vmatpush.msra.mxu1 %v125_v39  ;;  %v118_v46 = vld [vmem:[%s7053_s7 + $0x40] sm:$0xff]  ;;  %v117_v36 = vld [vmem:[%s7053_s7 + $0x38] sm:$0xff] }
  0xbb   :  { %v310_v47 = vmul.f32 %v4932_v41, %v299_v28  ;;  %v121_v28 = vld [vmem:[%s7053_s7 + $0x58] sm:$0xff] }
  0xbc   :  { %v278_v44 = vmul.f32 0.5, %v277_v38  ;;  %v311_v9 = vmul.f32 %v4932_v41, %v300_v59  ;;  %v113_v51 = vld [vmem:[%s7053_s7 + $0x18] sm:$0xff]  ;;  %v111_v59 = vld [vmem:[%s7053_s7 + $0x8] sm:$0xff] }
  0xbd   :  { %v4449_v40 = vpop.eup %4448  ;;  %v321_v8 = vadd.f32 %v4941_v2, %v310_v47  ;;  %v116_v47 = vld [vmem:[%s7053_s7 + $0x30] sm:$0xff] }
  0xbe   :  { %v286_v45 = vmul.f32 %v4449_v40, %v214_v60  ;;  %v279_v48 = vsub.f32 1.5, %v278_v44  ;;  %vm292_vm6 = vweird.f32 %v4449_v40  ;;  %v322_v55 = vadd.f32 %v4941_v2, %v311_v9  ;;  %v120_v44 = vld [vmem:[%s7053_s7 + $0x50] sm:$0xff] }
  0xbf   :  { %vm293_vm7 = vmor %vm291_vm5, %vm292_vm6 }
  0xc0   :  { %350 = vmatmul.f32.gmra.mxu0 %v319_v27  ;;  %v287_v49 = vmul.f32 %v4449_v40, %v286_v45  ;;  %v280_v52 = vmul.f32 %v4447_v25, %v279_v48  ;;  %v119_v45 = vld [vmem:[%s7053_s7 + $0x48] sm:$0xff] }
  0xc1   :  { %v115_v48 = vld [vmem:[%s7053_s7 + $0x28] sm:$0xff] }
  0xc2   :  { %v288_v42 = vmul.f32 0.5, %v287_v49  ;;  %v284_v54 = vsel %vm283_vm4, %v4447_v25, %v280_v52  ;;  %v114_v49 = vld [vmem:[%s7053_s7 + $0x20] sm:$0xff] }
  0xc3   :  { %v301_v56 = vmul.f32 %v284_v54, %v205_v53  ;;  %v110_v52 = vld [vmem:[%s7053_s7] sm:$0xff] }
  0xc4   :  { %v289_v16 = vsub.f32 1.5, %v288_v42 }
  0xc5   :  { %v312_v3 = vmul.f32 %v4932_v41, %v301_v56 }
  0xc6   :  { %v290_v62 = vmul.f32 %v4449_v40, %v289_v16 }
  0xc7   :  { %v323_v12 = vadd.f32 %v4941_v2, %v312_v3 }
  0xc8   :  { %353 = vmatmul.f32.gmra.mxu0 %v320_v57  ;;  %v294_v61 = vsel %vm293_vm7, %v4449_v40, %v290_v62  ;;  %v124_v40 = vld [vmem:[%s7053_s7 + $0x70] sm:$0xff]  ;;  %v122_v57 = vld [vmem:[%s7053_s7 + $0x60] sm:$0xff] }
  0xc9   :  { %v302_v43 = vmul.f32 %v294_v61, %v206_v63  ;;  %579 = vmatpush.msra.mxu1 %v124_v40 }
  0xcb   :  { %v313_v1 = vmul.f32 %v4932_v41, %v302_v43  ;;  %580 = vmatpush.msra.mxu1 %v123_v6 }
  0xcd   :  { %v324_v33 = vadd.f32 %v4941_v2, %v313_v1  ;;  %581 = vmatpush.msra.mxu1 %v122_v57 }
  0xcf   :  { %582 = vmatpush.msra.mxu1 %v121_v28 }
  0xd0   :  { %356 = vmatmul.f32.gmra.mxu0 %v321_v8  ;;  %v112_v8 = vld [vmem:[%s7053_s7 + $0x10] sm:$0xff] }
  0xd1   :  { %583 = vmatpush.msra.mxu1 %v120_v44 }
  0xd3   :  { %584 = vmatpush.msra.mxu1 %v119_v45 }
  0xd5   :  { %585 = vmatpush.msra.mxu1 %v118_v46 }
  0xd7   :  { %586 = vmatpush.msra.mxu1 %v117_v36 }
  0xd8   :  { %359 = vmatmul.f32.gmra.mxu0 %v322_v55 }
  0xd9   :  { %587 = vmatpush.msra.mxu1 %v116_v47 }
  0xdb   :  { %588 = vmatpush.msra.mxu1 %v115_v48 }
  0xdd   :  { %589 = vmatpush.msra.mxu1 %v114_v49 }
  0xdf   :  { %590 = vmatpush.msra.mxu1 %v113_v51 }
  0xe0   :  { %362 = vmatmul.f32.gmra.mxu0 %v323_v12 }
  0xe1   :  { %591 = vmatpush.msra.mxu1 %v112_v8 }
  0xe3   :  { %592 = vmatpush.msra.mxu1 %v111_v59 }
  0xe5   :  { %593 = vmatpush.msra.mxu1 %v110_v52 }
  0xe8   :  { %365 = vmatmul.f32.gmra.mxu0 %v324_v33 }
 0x12d   :  { %v345_v5 = vpop.f32.mrf.mxu0 }
 0x12e   :  { %v346_v10 = vadd.f32 %v4384_v4, %v345_v5 }
 0x130   :  { %v5004_v11 = vmax.f32 %v346_v10, 0.0 }
 0x132   :  { %377 = vadd.xlane.f32.xlu1 %v5004_v11  ;;  %v401_v14 = vmul.f32 %v5004_v11, %v5004_v11 }
 0x134   :  { %409 = vadd.xlane.f32.xlu2 %v401_v14 }
 0x135   :  { %v348_v58 = vpop.f32.mrf.mxu0 }
 0x136   :  { %v349_v13 = vadd.f32 %v4384_v4, %v348_v58 }
 0x138   :  { %v5009_v41 = vmax.f32 %v349_v13, 0.0 }
 0x13a   :  { %379 = vadd.xlane.f32.xlu0 %v5009_v41  ;;  %v402_v2 = vmul.f32 %v5009_v41, %v5009_v41 }
 0x13c   :  { %411 = vadd.xlane.f32.xlu1 %v402_v2 }
 0x13d   :  { %v351_v15 = vpop.f32.mrf.mxu0 }
 0x13e   :  { %v352_v17 = vadd.f32 %v4384_v4, %v351_v15 }
 0x140   :  { %v5014_v18 = vmax.f32 %v352_v17, 0.0 }
 0x142   :  { %381 = vadd.xlane.f32.xlu2 %v5014_v18  ;;  %v403_v19 = vmul.f32 %v5014_v18, %v5014_v18 }
 0x144   :  { %413 = vadd.xlane.f32.xlu0 %v403_v19 }
 0x145   :  { %v354_v20 = vpop.f32.mrf.mxu0 }
 0x146   :  { %v355_v21 = vadd.f32 %v4384_v4, %v354_v20 }
 0x148   :  { %v5019_v50 = vmax.f32 %v355_v21, 0.0 }
 0x14a   :  { %383 = vadd.xlane.f32.xlu1 %v5019_v50  ;;  %v404_v22 = vmul.f32 %v5019_v50, %v5019_v50 }
 0x14c   :  { %415 = vadd.xlane.f32.xlu2 %v404_v22 }
 0x14d   :  { %v357_v23 = vpop.f32.mrf.mxu0 }
 0x14e   :  { %v358_v60 = vadd.f32 %v4384_v4, %v357_v23 }
 0x150   :  { %v5024_v0 = vmax.f32 %v358_v60, 0.0 }
 0x152   :  { %385 = vadd.xlane.f32.xlu0 %v5024_v0  ;;  %v405_v32 = vmul.f32 %v5024_v0, %v5024_v0 }
 0x154   :  { %417 = vadd.xlane.f32.xlu1 %v405_v32 }
 0x155   :  { %v360_v7 = vpop.f32.mrf.mxu0 }
 0x156   :  { %v361_v24 = vadd.f32 %v4384_v4, %v360_v7 }
 0x158   :  { %v5029_v25 = vmax.f32 %v361_v24, 0.0  ;;  %v5102_v24 = vld [vmem:[%s7054_s27] ss:$0 sm:$0xff] }
 0x15a   :  { %387 = vadd.xlane.f32.xlu2 %v5029_v25  ;;  %v406_v26 = vmul.f32 %v5029_v25, %v5029_v25 }
 0x15c   :  { %419 = vadd.xlane.f32.xlu0 %v406_v26 }
 0x15d   :  { %v363_v27 = vpop.f32.mrf.mxu0 }
 0x15e   :  { %v364_v29 = vadd.f32 %v4384_v4, %v363_v27 }
 0x160   :  { %v5034_v31 = vmax.f32 %v364_v29, 0.0 }
 0x162   :  { %389 = vadd.xlane.f32.xlu1 %v5034_v31  ;;  %v407_v34 = vmul.f32 %v5034_v31, %v5034_v31 }
 0x164   :  { %421 = vadd.xlane.f32.xlu2 %v407_v34 }
 0x165   :  { %v366_v35 = vpop.f32.mrf.mxu0 }
 0x166   :  { %v367_v37 = vadd.f32 %v4384_v4, %v366_v35 }
 0x168   :  { %v5039_v30 = vmax.f32 %v367_v37, 0.0 }
 0x16a   :  { %391 = vadd.xlane.f32.xlu0 %v5039_v30  ;;  %v408_v38 = vmul.f32 %v5039_v30, %v5039_v30 }
 0x16c   :  { %423 = vadd.xlane.f32.xlu1 %v408_v38 }
 0x1a5   :  { %v378_v42 = vpop.xlane.xlu1 %377 }
 0x1a6   :  { %v393_v53 = vmul.f32 0.03125, %v378_v42 }
 0x1a7   :  { %v410_v9 = vpop.xlane.xlu2 %409 }
 0x1a8   :  { %v433_v16 = vmul.f32 %v393_v53, %v393_v53  ;;  %v425_v54 = vmul.f32 0.03125, %v410_v9  ;;  %v449_v32 = vsub.f32 %v5004_v11, %v393_v53  ;;  %v5109_v11 = vld [vmem:[%s7055_s25] ss:$0 sm:$0xff] }
 0x1aa   :  { %v441_v55 = vsub.f32 %v425_v54, %v433_v16 }
 0x1ac   :  { %v457_v56 = vadd.f32 1e-05, %v441_v55 }
 0x1ad   :  { %v380_v62 = vpop.xlane.xlu0 %379 }
 0x1ae   :  { %4450 = vrsqrt.f32 %v457_v56  ;;  %v394_v63 = vmul.f32 0.03125, %v380_v62  ;;  %vm471_vm9 = vweird.f32 %v457_v56 }
 0x1af   :  { %v412_v3 = vpop.xlane.xlu1 %411 }
 0x1b0   :  { %v434_v61 = vmul.f32 %v394_v63, %v394_v63  ;;  %v426_v12 = vmul.f32 0.03125, %v412_v3  ;;  %v450_v47 = vsub.f32 %v5009_v41, %v394_v63 }
 0x1b2   :  { %v442_v43 = vsub.f32 %v426_v12, %v434_v61 }
 0x1b4   :  { %v4451_v1 = vpop.eup %4450  ;;  %v458_v33 = vadd.f32 1e-05, %v442_v43 }
 0x1b5   :  { %v466_v4 = vmul.f32 %v4451_v1, %v457_v56  ;;  %v382_v5 = vpop.xlane.xlu2 %381  ;;  %vm472_vm8 = vweird.f32 %v4451_v1 }
 0x1b6   :  { %4452 = vrsqrt.f32 %v458_v33  ;;  %v5092_v10 = vmul.f32 0.03125, %v382_v5  ;;  %vm473_vm10 = vmor %vm471_vm9, %vm472_vm8  ;;  %vm481_vm12 = vweird.f32 %v458_v33 }
 0x1b7   :  { %v467_v14 = vmul.f32 %v4451_v1, %v466_v4  ;;  %v414_v58 = vpop.xlane.xlu0 %413 }
 0x1b8   :  { %v435_v13 = vmul.f32 %v5092_v10, %v5092_v10  ;;  %v427_v2 = vmul.f32 0.03125, %v414_v58  ;;  %v451_v61 = vsub.f32 %v5014_v18, %v5092_v10 }
 0x1b9   :  { %v468_v15 = vmul.f32 0.5, %v467_v14 }
 0x1ba   :  { %v443_v17 = vsub.f32 %v427_v2, %v435_v13 }
 0x1bb   :  { %v469_v19 = vsub.f32 1.5, %v468_v15 }
 0x1bc   :  { %v4453_v20 = vpop.eup %4452  ;;  %v459_v21 = vadd.f32 1e-05, %v443_v17 }
 0x1bd   :  { %v476_v22 = vmul.f32 %v4453_v20, %v458_v33  ;;  %v384_v23 = vpop.xlane.xlu1 %383  ;;  %v470_v60 = vmul.f32 %v4451_v1, %v469_v19  ;;  %vm482_vm11 = vweird.f32 %v4453_v20 }
 0x1be   :  { %4454 = vrsqrt.f32 %v459_v21  ;;  %v5097_v7 = vmul.f32 0.03125, %v384_v23  ;;  %vm483_vm13 = vmor %vm481_vm12, %vm482_vm11  ;;  %vm491_vm15 = vweird.f32 %v459_v21 }
 0x1bf   :  { %v477_v26 = vmul.f32 %v4453_v20, %v476_v22  ;;  %v416_v27 = vpop.xlane.xlu2 %415  ;;  %v474_v29 = vsel %vm473_vm10, %v4451_v1, %v470_v60 }
 0x1c0   :  { %v436_v34 = vmul.f32 %v5097_v7, %v5097_v7  ;;  %v428_v35 = vmul.f32 0.03125, %v416_v27  ;;  %v545_v37 = vmul.f32 %v474_v29, %v449_v32  ;;  %v452_v22 = vsub.f32 %v5019_v50, %v5097_v7 }
 0x1c1   :  { %v478_v38 = vmul.f32 0.5, %v477_v26 }
 0x1c2   :  { %v444_v39 = vsub.f32 %v428_v35, %v436_v34  ;;  %v556_v40 = vmul.f32 %v5102_v24, %v545_v37 }
 0x1c3   :  { %v479_v6 = vsub.f32 1.5, %v478_v38 }
 0x1c4   :  { %v4455_v57 = vpop.eup %4454  ;;  %v460_v28 = vadd.f32 1e-05, %v444_v39  ;;  %v567_v44 = vadd.f32 %v5109_v11, %v556_v40 }
 0x1c5   :  { %v486_v45 = vmul.f32 %v4455_v57, %v459_v21  ;;  %v386_v46 = vpop.xlane.xlu0 %385  ;;  %v480_v36 = vmul.f32 %v4453_v20, %v479_v6  ;;  %vm492_vm14 = vweird.f32 %v4455_v57 }
 0x1c6   :  { %4456 = vrsqrt.f32 %v460_v28  ;;  %v5114_v48 = vmul.f32 0.03125, %v386_v46  ;;  %594 = vmatmul.f32.vlgmr.msra.gmra.mxu1 %v567_v44  ;;  %vm493_vm0 = vmor %vm491_vm15, %vm492_vm14  ;;  %vm501_vm2 = vweird.f32 %v460_v28 }
 0x1c7   :  { %v487_v49 = vmul.f32 %v4455_v57, %v486_v45  ;;  %v418_v51 = vpop.xlane.xlu1 %417  ;;  %v484_v8 = vsel %vm483_vm13, %v4453_v20, %v480_v36 }
 0x1c8   :  { %v437_v59 = vmul.f32 %v5114_v48, %v5114_v48  ;;  %v429_v42 = vmul.f32 0.03125, %v418_v51  ;;  %v546_v52 = vmul.f32 %v484_v8, %v450_v47  ;;  %v453_v44 = vsub.f32 %v5024_v0, %v5114_v48 }
 0x1c9   :  { %v488_v53 = vmul.f32 0.5, %v487_v49 }
 0x1ca   :  { %v445_v9 = vsub.f32 %v429_v42, %v437_v59  ;;  %v557_v16 = vmul.f32 %v5102_v24, %v546_v52 }
 0x1cb   :  { %v489_v54 = vsub.f32 1.5, %v488_v53 }
 0x1cc   :  { %v4457_v41 = vpop.eup %4456  ;;  %v461_v55 = vadd.f32 1e-05, %v445_v9  ;;  %v568_v56 = vadd.f32 %v5109_v11, %v557_v16 }
 0x1cd   :  { %v496_v62 = vmul.f32 %v4457_v41, %v460_v28  ;;  %v388_v63 = vpop.xlane.xlu2 %387  ;;  %v490_v3 = vmul.f32 %v4455_v57, %v489_v54  ;;  %vm502_vm1 = vweird.f32 %v4457_v41 }
 0x1ce   :  { %4458 = vrsqrt.f32 %v461_v55  ;;  %v5122_v12 = vmul.f32 0.03125, %v388_v63  ;;  %597 = vmatmul.f32.gmra.mxu1 %v568_v56  ;;  %vm503_vm3 = vmor %vm501_vm2, %vm502_vm1  ;;  %vm511_vm5 = vweird.f32 %v461_v55 }
 0x1cf   :  { %v497_v43 = vmul.f32 %v4457_v41, %v496_v62  ;;  %v420_v1 = vpop.xlane.xlu0 %419  ;;  %v494_v33 = vsel %vm493_vm0, %v4455_v57, %v490_v3  ;;  %vm627_vm0 = vcmask 523264  }
 0x1d0   :  { %v438_v4 = vmul.f32 %v5122_v12, %v5122_v12  ;;  %v430_v5 = vmul.f32 0.03125, %v420_v1  ;;  %v547_v14 = vmul.f32 %v494_v33, %v451_v61 }
 0x1d1   :  { %v498_v58 = vmul.f32 0.5, %v497_v43 }
 0x1d2   :  { %v446_v13 = vsub.f32 %v430_v5, %v438_v4  ;;  %v558_v2 = vmul.f32 %v5102_v24, %v547_v14 }
 0x1d3   :  { %v499_v15 = vsub.f32 1.5, %v498_v58 }
 0x1d4   :  { %v4459_v18 = vpop.eup %4458  ;;  %v462_v10 = vadd.f32 1e-05, %v446_v13  ;;  %v569_v17 = vadd.f32 %v5109_v11, %v558_v2 }
 0x1d5   :  { %v506_v19 = vmul.f32 %v4459_v18, %v461_v55  ;;  %v390_v20 = vpop.xlane.xlu1 %389  ;;  %v500_v21 = vmul.f32 %v4457_v41, %v499_v15  ;;  %vm512_vm4 = vweird.f32 %v4459_v18 }
 0x1d6   :  { %4460 = vrsqrt.f32 %v462_v10  ;;  %v5130_v23 = vmul.f32 0.03125, %v390_v20  ;;  %600 = vmatmul.f32.gmra.mxu1 %v569_v17  ;;  %vm513_vm6 = vmor %vm511_vm5, %vm512_vm4  ;;  %vm521_vm8 = vweird.f32 %v462_v10 }
 0x1d7   :  { %v507_v60 = vmul.f32 %v4459_v18, %v506_v19  ;;  %v422_v32 = vpop.xlane.xlu2 %421  ;;  %v504_v26 = vsel %vm503_vm3, %v4457_v41, %v500_v21  ;;  %v454_v41 = vsub.f32 %v5029_v25, %v5122_v12 }
 0x1d8   :  { %v439_v27 = vmul.f32 %v5130_v23, %v5130_v23  ;;  %v431_v29 = vmul.f32 0.03125, %v422_v32  ;;  %v548_v34 = vmul.f32 %v504_v26, %v452_v22  ;;  %v455_v25 = vsub.f32 %v5034_v31, %v5130_v23 }
 0x1d9   :  { %v508_v35 = vmul.f32 0.5, %v507_v60 }
 0x1da   :  { %v447_v37 = vsub.f32 %v431_v29, %v439_v27  ;;  %v559_v38 = vmul.f32 %v5102_v24, %v548_v34 }
 0x1db   :  { %v509_v39 = vsub.f32 1.5, %v508_v35 }
 0x1dc   :  { %v4461_v50 = vpop.eup %4460  ;;  %v463_v7 = vadd.f32 1e-05, %v447_v37  ;;  %v570_v40 = vadd.f32 %v5109_v11, %v559_v38 }
 0x1dd   :  { %v516_v6 = vmul.f32 %v4461_v50, %v462_v10  ;;  %v392_v57 = vpop.xlane.xlu0 %391  ;;  %v510_v28 = vmul.f32 %v4459_v18, %v509_v39  ;;  %vm522_vm7 = vweird.f32 %v4461_v50 }
 0x1de   :  { %4462 = vrsqrt.f32 %v463_v7  ;;  %v400_v45 = vmul.f32 0.03125, %v392_v57  ;;  %603 = vmatmul.f32.gmra.mxu1 %v570_v40  ;;  %vm523_vm9 = vmor %vm521_vm8, %vm522_vm7  ;;  %vm531_vm11 = vweird.f32 %v463_v7 }
 0x1df   :  { %v517_v46 = vmul.f32 %v4461_v50, %v516_v6  ;;  %v424_v36 = vpop.xlane.xlu1 %423  ;;  %v514_v47 = vsel %vm513_vm6, %v4459_v18, %v510_v28 }
 0x1e0   :  { %v440_v49 = vmul.f32 %v400_v45, %v400_v45  ;;  %v432_v51 = vmul.f32 0.03125, %v424_v36  ;;  %v549_v8 = vmul.f32 %v514_v47, %v453_v44  ;;  %v456_v10 = vsub.f32 %v5039_v30, %v400_v45  ;;  %v4387_v30 = vld [vmem:[%s7056_s26] ss:$0 sm:$0xff]  ;;  %v5164_v47 = vld [vmem:[%s7010_s1 + $0x8] sm:$0xff] }
 0x1e1   :  { %v518_v59 = vmul.f32 0.5, %v517_v46  ;;  %v5157_v36 = vld [vmem:[%s7010_s1] sm:$0xff] }
 0x1e2   :  { %v448_v42 = vsub.f32 %v432_v51, %v440_v49  ;;  %v560_v52 = vmul.f32 %v5102_v24, %v549_v8  ;;  %v79_v49 = vld [vmem:[%s7010_s1 + $0x10] sm:$0xff]  ;;  %v80_v51 = vld [vmem:[%s7010_s1 + $0x18] sm:$0xff] }
 0x1e3   :  { %v519_v53 = vsub.f32 1.5, %v518_v59 }
 0x1e4   :  { %v4463_v9 = vpop.eup %4462  ;;  %v464_v16 = vadd.f32 1e-05, %v448_v42  ;;  %v571_v0 = vadd.f32 %v5109_v11, %v560_v52 }
 0x1e5   :  { %v526_v48 = vmul.f32 %v4463_v9, %v463_v7  ;;  %v520_v54 = vmul.f32 %v4461_v50, %v519_v53  ;;  %vm532_vm10 = vweird.f32 %v4463_v9 }
 0x1e6   :  { %4464 = vrsqrt.f32 %v464_v16  ;;  %606 = vmatmul.f32.gmra.mxu1 %v571_v0  ;;  %vm533_vm12 = vmor %vm531_vm11, %vm532_vm10  ;;  %vm541_vm14 = vweird.f32 %v464_v16 }
 0x1e7   :  { %v527_v55 = vmul.f32 %v4463_v9, %v526_v48  ;;  %v524_v56 = vsel %vm523_vm9, %v4461_v50, %v520_v54  ;;  %v686_v48 = vld [vmem:[%s7014_s12 + $0x78] sm:$0xff]  ;;  %v685_v54 = vld [vmem:[%s7014_s12 + $0x70] sm:$0xff] }
 0x1e8   :  { %v550_v62 = vmul.f32 %v524_v56, %v454_v41  ;;  %812 = vmatpush.msra.mxu3 %v686_v48  ;;  %v684_v41 = vld [vmem:[%s7014_s12 + $0x68] sm:$0xff]  ;;  %v682_v56 = vld [vmem:[%s7014_s12 + $0x58] sm:$0xff] }
 0x1e9   :  { %v528_v63 = vmul.f32 0.5, %v527_v55  ;;  %v683_v55 = vld [vmem:[%s7014_s12 + $0x60] sm:$0xff] }
 0x1ea   :  { %v561_v3 = vmul.f32 %v5102_v24, %v550_v62  ;;  %813 = vmatpush.msra.mxu3 %v685_v54  ;;  %v681_v62 = vld [vmem:[%s7014_s12 + $0x50] sm:$0xff] }
 0x1eb   :  { %v529_v61 = vsub.f32 1.5, %v528_v63  ;;  %v680_v63 = vld [vmem:[%s7014_s12 + $0x48] sm:$0xff] }
 0x1ec   :  { %v4465_v43 = vpop.eup %4464  ;;  %v572_v1 = vadd.f32 %v5109_v11, %v561_v3  ;;  %814 = vmatpush.msra.mxu3 %v684_v41  ;;  %v679_v3 = vld [vmem:[%s7014_s12 + $0x40] sm:$0xff] }
 0x1ed   :  { %v536_v33 = vmul.f32 %v4465_v43, %v464_v16  ;;  %v530_v4 = vmul.f32 %v4463_v9, %v529_v61  ;;  %vm542_vm13 = vweird.f32 %v4465_v43  ;;  %v678_v61 = vld [vmem:[%s7014_s12 + $0x38] sm:$0xff] }
 0x1ee   :  { %609 = vmatmul.f32.gmra.mxu1 %v572_v1  ;;  %vm543_vm15 = vmor %vm541_vm14, %vm542_vm13  ;;  %815 = vmatpush.msra.mxu3 %v683_v55  ;;  %v676_v1 = vld [vmem:[%s7014_s12 + $0x28] sm:$0xff] }
 0x1ef   :  { %v537_v12 = vmul.f32 %v4465_v43, %v536_v33  ;;  %v534_v5 = vsel %vm533_vm12, %v4463_v9, %v530_v4  ;;  %v675_v33 = vld [vmem:[%s7014_s12 + $0x20] sm:$0xff]  ;;  %v674_v4 = vld [vmem:[%s7014_s12 + $0x18] sm:$0xff] }
 0x1f0   :  { %v551_v14 = vmul.f32 %v534_v5, %v455_v25  ;;  %816 = vmatpush.msra.mxu3 %v682_v56  ;;  %v673_v25 = vld [vmem:[%s7014_s12 + $0x10] sm:$0xff] }
 0x1f1   :  { %v538_v58 = vmul.f32 0.5, %v537_v12  ;;  %v672_v12 = vld [vmem:[%s7014_s12 + $0x8] sm:$0xff] }
 0x1f2   :  { %v562_v13 = vmul.f32 %v5102_v24, %v551_v14  ;;  %817 = vmatpush.msra.mxu3 %v681_v62  ;;  %v671_v14 = vld [vmem:[%s7014_s12] sm:$0xff] }
 0x1f3   :  { %v539_v2 = vsub.f32 1.5, %v538_v58 }
 0x1f4   :  { %v573_v15 = vadd.f32 %v5109_v11, %v562_v13  ;;  %818 = vmatpush.msra.mxu3 %v680_v63 }
 0x1f5   :  { %v540_v18 = vmul.f32 %v4465_v43, %v539_v2 }
 0x1f6   :  { %612 = vmatmul.f32.gmra.mxu1 %v573_v15  ;;  %819 = vmatpush.msra.mxu3 %v679_v3 }
 0x1f7   :  { %v544_v17 = vsel %vm543_vm15, %v4465_v43, %v540_v18  ;;  %v677_v43 = vld [vmem:[%s7014_s12 + $0x30] sm:$0xff] }
 0x1f8   :  { %v552_v31 = vmul.f32 %v544_v17, %v456_v10  ;;  %820 = vmatpush.msra.mxu3 %v678_v61 }
 0x1fa   :  { %v563_v19 = vmul.f32 %v5102_v24, %v552_v31  ;;  %821 = vmatpush.msra.mxu3 %v677_v43 }
 0x1fc   :  { %v574_v20 = vadd.f32 %v5109_v11, %v563_v19  ;;  %822 = vmatpush.msra.mxu3 %v676_v1 }
 0x1fe   :  { %615 = vmatmul.f32.gmra.mxu1 %v574_v20  ;;  %823 = vmatpush.msra.mxu3 %v675_v33 }
 0x200   :  { %824 = vmatpush.msra.mxu3 %v674_v4 }
 0x202   :  { %825 = vmatpush.msra.mxu3 %v673_v25 }
 0x204   :  { %826 = vmatpush.msra.mxu3 %v672_v12 }
 0x206   :  { %827 = vmatpush.msra.mxu3 %v671_v14 }
 0x243   :  { %v595_v21 = vpop.f32.mrf.mxu1 }
 0x244   :  { %v596_v28 = vadd.f32 %v4387_v30, %v595_v21 }
 0x246   :  { %v619_v46 = vmax.f32 %v596_v28, 0.0  ;;  %v4388_v28 = vld [vmem:[%s7011_s10] ss:$0 sm:$0xff] }
 0x24b   :  { %v598_v22 = vpop.f32.mrf.mxu1 }
 0x24c   :  { %v599_v6 = vadd.f32 %v4387_v30, %v598_v22 }
 0x24e   :  { %v620_v45 = vmax.f32 %v599_v6, 0.0 }
 0x253   :  { %v601_v23 = vpop.f32.mrf.mxu1 }
 0x254   :  { %v602_v7 = vadd.f32 %v4387_v30, %v601_v23 }
 0x256   :  { %v621_v44 = vmax.f32 %v602_v7, 0.0 }
 0x25b   :  { %v604_v60 = vpop.f32.mrf.mxu1 }
 0x25c   :  { %v605_v39 = vadd.f32 %v4387_v30, %v604_v60 }
 0x25e   :  { %v622_v57 = vmax.f32 %v605_v39, 0.0 }
 0x263   :  { %v607_v32 = vpop.f32.mrf.mxu1 }
 0x264   :  { %v608_v24 = vadd.f32 %v4387_v30, %v607_v32 }
 0x266   :  { %v623_v40 = vmax.f32 %v608_v24, 0.0 }
 0x26b   :  { %v610_v26 = vpop.f32.mrf.mxu1 }
 0x26c   :  { %v611_v37 = vadd.f32 %v4387_v30, %v610_v26 }
 0x26e   :  { %v624_v50 = vmax.f32 %v611_v37, 0.0 }
 0x273   :  { %v613_v27 = vpop.f32.mrf.mxu1 }
 0x274   :  { %v614_v34 = vadd.f32 %v4387_v30, %v613_v27 }
 0x276   :  { %v625_v11 = vmax.f32 %v614_v34, 0.0 }
 0x27b   :  { %v616_v29 = vpop.f32.mrf.mxu1 }
 0x27c   :  { %v617_v35 = vadd.f32 %v4387_v30, %v616_v29 }
 0x27e   :  { %v626_v38 = vmax.f32 %v617_v35, 0.0 }
 0x280   :  { %648 = vmatpush.msrb.mxu0 %v626_v38 }
 0x282   :  { %649 = vmatpush.msrb.mxu0 %v625_v11 }
 0x284   :  { %650 = vmatpush.msrb.mxu0 %v624_v50 }
 0x286   :  { %651 = vmatpush.msrb.mxu0 %v623_v40 }
 0x288   :  { %652 = vmatpush.msrb.mxu0 %v622_v57 }
 0x28a   :  { %653 = vmatpush.msrb.mxu0 %v621_v44 }
 0x28c   :  { %654 = vmatpush.msrb.mxu0 %v620_v45 }
 0x28e   :  { %655 = vmatpush.msrb.mxu0 %v619_v46 }
 0x28f   :  { %4097 = vmatmul.msk.f32.vlgmr.msrb.gmra.mxu0 %vm627_vm0, %v5157_v36 }
 0x297   :  { %4098 = vmatmul.msk.f32.gmra.mxu0 %vm627_vm0, %v5164_v47 }
 0x29f   :  { %4099 = vmatmul.msk.f32.gmra.mxu0 %vm627_vm0, %v79_v49 }
 0x2a7   :  { %4100 = vmatmul.msk.f32.gmra.mxu0 %vm627_vm0, %v80_v51 }
 0x30c   :  { %v5176_v8 = vpop.f32.mrf.mxu0 }
 0x30d   :  { %707 = vadd.xlane.f32.xlu2 %v5176_v8  ;;  %v719_v59 = vmul.f32 %v5176_v8, %v5176_v8 }
 0x30f   :  { %723 = vadd.xlane.f32.xlu0 %v719_v59 }
 0x314   :  { %v5181_v42 = vpop.f32.mrf.mxu0 }
 0x315   :  { %709 = vadd.xlane.f32.xlu1 %v5181_v42  ;;  %v720_v52 = vmul.f32 %v5181_v42, %v5181_v42 }
 0x317   :  { %725 = vadd.xlane.f32.xlu2 %v720_v52  ;;  %v4389_v52 = vld [vmem:[%s7012_s11] ss:$0 sm:$0xff] }
 0x31c   :  { %v5186_v53 = vpop.f32.mrf.mxu0 }
 0x31d   :  { %711 = vadd.xlane.f32.xlu0 %v5186_v53  ;;  %v721_v9 = vmul.f32 %v5186_v53, %v5186_v53 }
 0x31f   :  { %727 = vadd.xlane.f32.xlu1 %v721_v9 }
 0x324   :  { %v5191_v16 = vpop.f32.mrf.mxu0 }
 0x325   :  { %713 = vadd.xlane.f32.xlu2 %v5191_v16  ;;  %v722_v0 = vmul.f32 %v5191_v16, %v5191_v16 }
 0x327   :  { %729 = vadd.xlane.f32.xlu0 %v722_v0 }
 0x380   :  { %v708_v5 = vpop.xlane.xlu2 %707 }
 0x381   :  { %v715_v58 = vmul.f32 0.03125, %v708_v5 }
 0x382   :  { %v724_v13 = vpop.xlane.xlu0 %723 }
 0x383   :  { %v735_v2 = vmul.f32 %v715_v58, %v715_v58  ;;  %v731_v15 = vmul.f32 0.03125, %v724_v13  ;;  %v743_v6 = vsub.f32 %v5176_v8, %v715_v58 }
 0x385   :  { %v739_v18 = vsub.f32 %v731_v15, %v735_v2 }
 0x387   :  { %v747_v10 = vadd.f32 1e-05, %v739_v18 }
 0x388   :  { %v710_v17 = vpop.xlane.xlu1 %709 }
 0x389   :  { %4466 = vrsqrt.f32 %v747_v10  ;;  %v716_v31 = vmul.f32 0.03125, %v710_v17  ;;  %vm757_vm2 = vweird.f32 %v747_v10 }
 0x38a   :  { %v726_v19 = vpop.xlane.xlu2 %725 }
 0x38b   :  { %v736_v20 = vmul.f32 %v716_v31, %v716_v31  ;;  %v732_v21 = vmul.f32 0.03125, %v726_v19  ;;  %v744_v63 = vsub.f32 %v5181_v42, %v716_v31 }
 0x38d   :  { %v740_v22 = vsub.f32 %v732_v21, %v736_v20 }
 0x38f   :  { %v4467_v23 = vpop.eup %4466  ;;  %v748_v60 = vadd.f32 1e-05, %v740_v22 }
 0x390   :  { %v752_v32 = vmul.f32 %v4467_v23, %v747_v10  ;;  %v712_v26 = vpop.xlane.xlu0 %711  ;;  %vm758_vm1 = vweird.f32 %v4467_v23 }
 0x391   :  { %4468 = vrsqrt.f32 %v748_v60  ;;  %v717_v27 = vmul.f32 0.03125, %v712_v26  ;;  %vm759_vm3 = vmor %vm757_vm2, %vm758_vm1  ;;  %vm767_vm5 = vweird.f32 %v748_v60 }
 0x392   :  { %v753_v30 = vmul.f32 %v4467_v23, %v752_v32  ;;  %v728_v29 = vpop.xlane.xlu1 %727 }
 0x393   :  { %v737_v34 = vmul.f32 %v717_v27, %v717_v27  ;;  %v733_v35 = vmul.f32 0.03125, %v728_v29  ;;  %v745_v58 = vsub.f32 %v5186_v53, %v717_v27 }
 0x394   :  { %v754_v37 = vmul.f32 0.5, %v753_v30 }
 0x395   :  { %v741_v38 = vsub.f32 %v733_v35, %v737_v34 }
 0x396   :  { %v755_v24 = vsub.f32 1.5, %v754_v37 }
 0x397   :  { %v4469_v11 = vpop.eup %4468  ;;  %v749_v39 = vadd.f32 1e-05, %v741_v38 }
 0x398   :  { %v762_v50 = vmul.f32 %v4469_v11, %v748_v60  ;;  %v714_v7 = vpop.xlane.xlu2 %713  ;;  %v756_v40 = vmul.f32 %v4467_v23, %v755_v24  ;;  %vm768_vm4 = vweird.f32 %v4469_v11 }
 0x399   :  { %4470 = vrsqrt.f32 %v749_v39  ;;  %v718_v57 = vmul.f32 0.03125, %v714_v7  ;;  %vm769_vm6 = vmor %vm767_vm5, %vm768_vm4  ;;  %vm777_vm8 = vweird.f32 %v749_v39 }
 0x39a   :  { %v763_v44 = vmul.f32 %v4469_v11, %v762_v50  ;;  %v730_v45 = vpop.xlane.xlu0 %729  ;;  %v760_v46 = vsel %vm759_vm3, %v4467_v23, %v756_v40  ;;  %v4394_v23 = vld [vmem:[%s7013_s13] ss:$0 sm:$0xff]  ;;  %v705_v40 = vld [vmem:[%s7018_s16 + $0x78] sm:$0xff] }
 0x39b   :  { %v738_v49 = vmul.f32 %v718_v57, %v718_v57  ;;  %v734_v51 = vmul.f32 0.03125, %v730_v45  ;;  %v791_v59 = vmul.f32 %v760_v46, %v743_v6  ;;  %v746_v19 = vsub.f32 %v5191_v16, %v718_v57  ;;  %950 = vmatpush.msra.mxu2 %v705_v40  ;;  %v704_v6 = vld [vmem:[%s7018_s16 + $0x70] sm:$0xff]  ;;  %v703_v57 = vld [vmem:[%s7018_s16 + $0x68] sm:$0xff] }
 0x39c   :  { %v764_v9 = vmul.f32 0.5, %v763_v44  ;;  %v701_v44 = vld [vmem:[%s7018_s16 + $0x58] sm:$0xff]  ;;  %v700_v45 = vld [vmem:[%s7018_s16 + $0x50] sm:$0xff]  ;;  %v699_v46 = vld [vmem:[%s7018_s16 + $0x48] sm:$0xff] }
 0x39d   :  { %v742_v0 = vsub.f32 %v734_v51, %v738_v49  ;;  %v798_v8 = vmul.f32 %v4388_v28, %v791_v59  ;;  %951 = vmatpush.msra.mxu2 %v704_v6  ;;  %v698_v49 = vld [vmem:[%s7018_s16 + $0x40] sm:$0xff]  ;;  %v697_v51 = vld [vmem:[%s7018_s16 + $0x38] sm:$0xff]  ;;  %v696_v59 = vld [vmem:[%s7018_s16 + $0x30] sm:$0xff] }
 0x39e   :  { %v765_v48 = vsub.f32 1.5, %v764_v9  ;;  %v694_v9 = vld [vmem:[%s7018_s16 + $0x20] sm:$0xff] }
 0x39f   :  { %v4471_v54 = vpop.eup %4470  ;;  %v750_v41 = vadd.f32 1e-05, %v742_v0  ;;  %v805_v55 = vadd.f32 %v4389_v52, %v798_v8  ;;  %952 = vmatpush.msra.mxu2 %v703_v57  ;;  %v693_v0 = vld [vmem:[%s7018_s16 + $0x18] sm:$0xff]  ;;  %v692_v8 = vld [vmem:[%s7018_s16 + $0x10] sm:$0xff] }
 0x3a0   :  { %v772_v56 = vmul.f32 %v4471_v54, %v749_v39  ;;  %v766_v62 = vmul.f32 %v4469_v11, %v765_v48  ;;  %vm778_vm7 = vweird.f32 %v4471_v54  ;;  %v691_v48 = vld [vmem:[%s7018_s16 + $0x8] sm:$0xff] }
 0x3a1   :  { %4472 = vrsqrt.f32 %v750_v41  ;;  %828 = vmatmul.f32.vlgmr.msra.gmra.mxu3 %v805_v55  ;;  %vm779_vm9 = vmor %vm777_vm8, %vm778_vm7  ;;  %vm787_vm11 = vweird.f32 %v750_v41 }
 0x3a2   :  { %v773_v3 = vmul.f32 %v4471_v54, %v772_v56  ;;  %v770_v61 = vsel %vm769_vm6, %v4469_v11, %v766_v62 }
 0x3a3   :  { %v792_v43 = vmul.f32 %v770_v61, %v744_v63 }
 0x3a4   :  { %v774_v1 = vmul.f32 0.5, %v773_v3 }
 0x3a5   :  { %v799_v33 = vmul.f32 %v4388_v28, %v792_v43 }
 0x3a6   :  { %v775_v4 = vsub.f32 1.5, %v774_v1 }
 0x3a7   :  { %v4473_v25 = vpop.eup %4472  ;;  %v806_v12 = vadd.f32 %v4389_v52, %v799_v33 }
 0x3a8   :  { %v782_v5 = vmul.f32 %v4473_v25, %v750_v41  ;;  %v776_v14 = vmul.f32 %v4471_v54, %v775_v4  ;;  %vm788_vm10 = vweird.f32 %v4473_v25  ;;  %v690_v41 = vld [vmem:[%s7018_s16] sm:$0xff] }
 0x3a9   :  { %831 = vmatmul.f32.gmra.mxu3 %v806_v12  ;;  %vm789_vm12 = vmor %vm787_vm11, %vm788_vm10 }
 0x3aa   :  { %v783_v42 = vmul.f32 %v4473_v25, %v782_v5  ;;  %v780_v13 = vsel %vm779_vm9, %v4471_v54, %v776_v14 }
 0x3ab   :  { %v793_v2 = vmul.f32 %v780_v13, %v745_v58 }
 0x3ac   :  { %v784_v15 = vmul.f32 0.5, %v783_v42 }
 0x3ad   :  { %v800_v18 = vmul.f32 %v4388_v28, %v793_v2 }
 0x3ae   :  { %v785_v10 = vsub.f32 1.5, %v784_v15 }
 0x3af   :  { %v807_v17 = vadd.f32 %v4389_v52, %v800_v18 }
 0x3b0   :  { %v786_v31 = vmul.f32 %v4473_v25, %v785_v10 }
 0x3b1   :  { %834 = vmatmul.f32.gmra.mxu3 %v807_v17 }
 0x3b2   :  { %v790_v20 = vsel %vm789_vm12, %v4473_v25, %v786_v31 }
 0x3b3   :  { %v794_v21 = vmul.f32 %v790_v20, %v746_v19 }
 0x3b5   :  { %v801_v22 = vmul.f32 %v4388_v28, %v794_v21  ;;  %v702_v28 = vld [vmem:[%s7018_s16 + $0x60] sm:$0xff] }
 0x3b6   :  { %953 = vmatpush.msra.mxu2 %v702_v28 }
 0x3b7   :  { %v808_v53 = vadd.f32 %v4389_v52, %v801_v22  ;;  %v695_v52 = vld [vmem:[%s7018_s16 + $0x28] sm:$0xff] }
 0x3b8   :  { %954 = vmatpush.msra.mxu2 %v701_v44 }
 0x3b9   :  { %837 = vmatmul.f32.gmra.mxu3 %v808_v53 }
 0x3ba   :  { %955 = vmatpush.msra.mxu2 %v700_v45 }
 0x3bc   :  { %956 = vmatpush.msra.mxu2 %v699_v46 }
 0x3be   :  { %957 = vmatpush.msra.mxu2 %v698_v49 }
 0x3c0   :  { %958 = vmatpush.msra.mxu2 %v697_v51 }
 0x3c2   :  { %959 = vmatpush.msra.mxu2 %v696_v59 }
 0x3c4   :  { %960 = vmatpush.msra.mxu2 %v695_v52 }
 0x3c6   :  { %961 = vmatpush.msra.mxu2 %v694_v9 }
 0x3c8   :  { %962 = vmatpush.msra.mxu2 %v693_v0 }
 0x3ca   :  { %963 = vmatpush.msra.mxu2 %v692_v8 }
 0x3cc   :  { %964 = vmatpush.msra.mxu2 %v691_v48 }
 0x3ce   :  { %965 = vmatpush.msra.mxu2 %v690_v41 }
 0x424   :  { %v829_v60 = vpop.f32.mrf.mxu3 }
 0x425   :  { %v830_v32 = vadd.f32 %v4394_v23, %v829_v60 }
 0x427   :  { %v5257_v26 = vmax.f32 %v830_v32, 0.0 }
 0x429   :  { %845 = vadd.xlane.f32.xlu1 %v5257_v26  ;;  %v857_v16 = vmul.f32 %v5257_v26, %v5257_v26 }
 0x42b   :  { %861 = vadd.xlane.f32.xlu2 %v857_v16  ;;  %v4397_v16 = vld [vmem:[%s7015_s14] ss:$0 sm:$0xff] }
 0x42c   :  { %v832_v27 = vpop.f32.mrf.mxu3 }
 0x42d   :  { %v833_v30 = vadd.f32 %v4394_v23, %v832_v27 }
 0x42f   :  { %v5262_v29 = vmax.f32 %v833_v30, 0.0 }
 0x431   :  { %847 = vadd.xlane.f32.xlu0 %v5262_v29  ;;  %v858_v34 = vmul.f32 %v5262_v29, %v5262_v29 }
 0x433   :  { %863 = vadd.xlane.f32.xlu1 %v858_v34 }
 0x434   :  { %v835_v35 = vpop.f32.mrf.mxu3 }
 0x435   :  { %v836_v37 = vadd.f32 %v4394_v23, %v835_v35 }
 0x437   :  { %v5267_v38 = vmax.f32 %v836_v37, 0.0 }
 0x439   :  { %849 = vadd.xlane.f32.xlu2 %v5267_v38  ;;  %v859_v24 = vmul.f32 %v5267_v38, %v5267_v38 }
 0x43b   :  { %865 = vadd.xlane.f32.xlu0 %v859_v24 }
 0x43c   :  { %v838_v11 = vpop.f32.mrf.mxu3 }
 0x43d   :  { %v839_v39 = vadd.f32 %v4394_v23, %v838_v11  ;;  %v4398_v11 = vld [vmem:[%s7016_s15] ss:$0 sm:$0xff] }
 0x43f   :  { %v5272_v50 = vmax.f32 %v839_v39, 0.0 }
 0x441   :  { %851 = vadd.xlane.f32.xlu1 %v5272_v50  ;;  %v860_v7 = vmul.f32 %v5272_v50, %v5272_v50 }
 0x443   :  { %867 = vadd.xlane.f32.xlu2 %v860_v7 }
 0x49c   :  { %v846_v54 = vpop.xlane.xlu1 %845 }
 0x49d   :  { %v853_v55 = vmul.f32 0.03125, %v846_v54 }
 0x49e   :  { %v862_v56 = vpop.xlane.xlu2 %861 }
 0x49f   :  { %v873_v62 = vmul.f32 %v853_v55, %v853_v55  ;;  %v869_v63 = vmul.f32 0.03125, %v862_v56  ;;  %v881_v60 = vsub.f32 %v5257_v26, %v853_v55 }
 0x4a1   :  { %v877_v3 = vsub.f32 %v869_v63, %v873_v62 }
 0x4a3   :  { %v885_v61 = vadd.f32 1e-05, %v877_v3 }
 0x4a4   :  { %v848_v43 = vpop.xlane.xlu0 %847 }
 0x4a5   :  { %4474 = vrsqrt.f32 %v885_v61  ;;  %v854_v1 = vmul.f32 0.03125, %v848_v43  ;;  %vm895_vm14 = vweird.f32 %v885_v61 }
 0x4a6   :  { %v864_v33 = vpop.xlane.xlu1 %863 }
 0x4a7   :  { %v874_v4 = vmul.f32 %v854_v1, %v854_v1  ;;  %v870_v25 = vmul.f32 0.03125, %v864_v33  ;;  %v882_v46 = vsub.f32 %v5262_v29, %v854_v1 }
 0x4a9   :  { %v878_v12 = vsub.f32 %v870_v25, %v874_v4 }
 0x4ab   :  { %v4475_v5 = vpop.eup %4474  ;;  %v886_v14 = vadd.f32 1e-05, %v878_v12 }
 0x4ac   :  { %v890_v58 = vmul.f32 %v4475_v5, %v885_v61  ;;  %v850_v42 = vpop.xlane.xlu2 %849  ;;  %vm896_vm13 = vweird.f32 %v4475_v5 }
 0x4ad   :  { %4476 = vrsqrt.f32 %v886_v14  ;;  %v855_v13 = vmul.f32 0.03125, %v850_v42  ;;  %vm897_vm15 = vmor %vm895_vm14, %vm896_vm13  ;;  %vm905_vm2 = vweird.f32 %v886_v14 }
 0x4ae   :  { %v891_v2 = vmul.f32 %v4475_v5, %v890_v58  ;;  %v866_v15 = vpop.xlane.xlu0 %865 }
 0x4af   :  { %v875_v18 = vmul.f32 %v855_v13, %v855_v13  ;;  %v871_v10 = vmul.f32 0.03125, %v866_v15  ;;  %v883_v55 = vsub.f32 %v5267_v38, %v855_v13 }
 0x4b0   :  { %v892_v17 = vmul.f32 0.5, %v891_v2 }
 0x4b1   :  { %v879_v31 = vsub.f32 %v871_v10, %v875_v18 }
 0x4b2   :  { %v893_v19 = vsub.f32 1.5, %v892_v17 }
 0x4b3   :  { %v4477_v20 = vpop.eup %4476  ;;  %v887_v21 = vadd.f32 1e-05, %v879_v31 }
 0x4b4   :  { %v900_v22 = vmul.f32 %v4477_v20, %v886_v14  ;;  %v852_v53 = vpop.xlane.xlu1 %851  ;;  %v894_v23 = vmul.f32 %v4475_v5, %v893_v19  ;;  %vm906_vm1 = vweird.f32 %v4477_v20 }
 0x4b5   :  { %4478 = vrsqrt.f32 %v887_v21  ;;  %v856_v32 = vmul.f32 0.03125, %v852_v53  ;;  %vm907_vm3 = vmor %vm905_vm2, %vm906_vm1  ;;  %vm915_vm5 = vweird.f32 %v887_v21 }
 0x4b6   :  { %v901_v27 = vmul.f32 %v4477_v20, %v900_v22  ;;  %v868_v30 = vpop.xlane.xlu2 %867  ;;  %v898_v34 = vsel %vm897_vm15, %v4475_v5, %v894_v23  ;;  %v4403_v5 = vld [vmem:[%s7017_s17] ss:$0 sm:$0xff]  ;;  %v4118_v23 = vld [vmem:[%s7049_s3 + $0xf8] sm:$0xff] }
 0x4b7   :  { %v876_v35 = vmul.f32 %v856_v32, %v856_v32  ;;  %v872_v37 = vmul.f32 0.03125, %v868_v30  ;;  %v929_v24 = vmul.f32 %v898_v34, %v881_v60  ;;  %v884_v33 = vsub.f32 %v5272_v50, %v856_v32  ;;  %1134 = vmatpush.msrb.mxu3 %v4118_v23  ;;  %v4117_v60 = vld [vmem:[%s7049_s3 + $0xf0] sm:$0xff]  ;;  %v4116_v32 = vld [vmem:[%s7049_s3 + $0xe8] sm:$0xff] }
 0x4b8   :  { %v902_v39 = vmul.f32 0.5, %v901_v27  ;;  %v4114_v27 = vld [vmem:[%s7049_s3 + $0xd8] sm:$0xff]  ;;  %v4113_v30 = vld [vmem:[%s7049_s3 + $0xd0] sm:$0xff]  ;;  %v4112_v34 = vld [vmem:[%s7049_s3 + $0xc8] sm:$0xff] }
 0x4b9   :  { %v880_v7 = vsub.f32 %v872_v37, %v876_v35  ;;  %v936_v26 = vmul.f32 %v4397_v16, %v929_v24  ;;  %1135 = vmatpush.msrb.mxu3 %v4117_v60  ;;  %v4111_v35 = vld [vmem:[%s7049_s3 + $0xc0] sm:$0xff]  ;;  %v4110_v37 = vld [vmem:[%s7049_s3 + $0xb8] sm:$0xff]  ;;  %v4109_v24 = vld [vmem:[%s7049_s3 + $0xb0] sm:$0xff] }
 0x4ba   :  { %v903_v40 = vsub.f32 1.5, %v902_v39  ;;  %v4107_v39 = vld [vmem:[%s7049_s3 + $0xa0] sm:$0xff] }
 0x4bb   :  { %v4479_v6 = vpop.eup %4478  ;;  %v888_v57 = vadd.f32 1e-05, %v880_v7  ;;  %v943_v28 = vadd.f32 %v4398_v11, %v936_v26  ;;  %1136 = vmatpush.msrb.mxu3 %v4116_v32  ;;  %v4106_v7 = vld [vmem:[%s7049_s3 + $0x98] sm:$0xff]  ;;  %v4105_v26 = vld [vmem:[%s7049_s3 + $0x90] sm:$0xff] }
 0x4bc   :  { %v910_v44 = vmul.f32 %v4479_v6, %v887_v21  ;;  %v904_v45 = vmul.f32 %v4477_v20, %v903_v40  ;;  %vm916_vm4 = vweird.f32 %v4479_v6  ;;  %v4104_v40 = vld [vmem:[%s7049_s3 + $0x88] sm:$0xff] }
 0x4bd   :  { %4480 = vrsqrt.f32 %v888_v57  ;;  %966 = vmatmul.f32.vlgmr.msra.gmra.mxu2 %v943_v28  ;;  %vm917_vm6 = vmor %vm915_vm5, %vm916_vm4  ;;  %vm925_vm8 = vweird.f32 %v888_v57 }
 0x4be   :  { %v911_v49 = vmul.f32 %v4479_v6, %v910_v44  ;;  %v908_v51 = vsel %vm907_vm3, %v4477_v20, %v904_v45 }
 0x4bf   :  { %v930_v59 = vmul.f32 %v908_v51, %v882_v46 }
 0x4c0   :  { %v912_v52 = vmul.f32 0.5, %v911_v49 }
 0x4c1   :  { %v937_v9 = vmul.f32 %v4397_v16, %v930_v59 }
 0x4c2   :  { %v913_v0 = vsub.f32 1.5, %v912_v52 }
 0x4c3   :  { %v4481_v8 = vpop.eup %4480  ;;  %v944_v48 = vadd.f32 %v4398_v11, %v937_v9 }
 0x4c4   :  { %v920_v54 = vmul.f32 %v4481_v8, %v888_v57  ;;  %v914_v41 = vmul.f32 %v4479_v6, %v913_v0  ;;  %vm926_vm7 = vweird.f32 %v4481_v8  ;;  %v4103_v57 = vld [vmem:[%s7049_s3 + $0x80] sm:$0xff] }
 0x4c5   :  { %969 = vmatmul.f32.gmra.mxu2 %v944_v48  ;;  %vm927_vm9 = vmor %vm925_vm8, %vm926_vm7 }
 0x4c6   :  { %v921_v29 = vmul.f32 %v4481_v8, %v920_v54  ;;  %v918_v56 = vsel %vm917_vm6, %v4479_v6, %v914_v41 }
 0x4c7   :  { %v931_v62 = vmul.f32 %v918_v56, %v883_v55 }
 0x4c8   :  { %v922_v63 = vmul.f32 0.5, %v921_v29 }
 0x4c9   :  { %v938_v3 = vmul.f32 %v4397_v16, %v931_v62 }
 0x4ca   :  { %v923_v61 = vsub.f32 1.5, %v922_v63 }
 0x4cb   :  { %v945_v43 = vadd.f32 %v4398_v11, %v938_v3 }
 0x4cc   :  { %v924_v1 = vmul.f32 %v4481_v8, %v923_v61 }
 0x4cd   :  { %972 = vmatmul.f32.gmra.mxu2 %v945_v43 }
 0x4ce   :  { %v928_v4 = vsel %vm927_vm9, %v4481_v8, %v924_v1 }
 0x4cf   :  { %v932_v25 = vmul.f32 %v928_v4, %v884_v33 }
 0x4d1   :  { %v939_v12 = vmul.f32 %v4397_v16, %v932_v25  ;;  %v4115_v16 = vld [vmem:[%s7049_s3 + $0xe0] sm:$0xff] }
 0x4d2   :  { %1137 = vmatpush.msrb.mxu3 %v4115_v16 }
 0x4d3   :  { %v946_v38 = vadd.f32 %v4398_v11, %v939_v12  ;;  %v4108_v11 = vld [vmem:[%s7049_s3 + $0xa8] sm:$0xff] }
 0x4d4   :  { %1138 = vmatpush.msrb.mxu3 %v4114_v27 }
 0x4d5   :  { %975 = vmatmul.f32.gmra.mxu2 %v946_v38 }
 0x4d6   :  { %1139 = vmatpush.msrb.mxu3 %v4113_v30 }
 0x4d8   :  { %1140 = vmatpush.msrb.mxu3 %v4112_v34 }
 0x4da   :  { %1141 = vmatpush.msrb.mxu3 %v4111_v35 }
 0x4dc   :  { %1142 = vmatpush.msrb.mxu3 %v4110_v37 }
 0x4de   :  { %1143 = vmatpush.msrb.mxu3 %v4109_v24 }
 0x4e0   :  { %1144 = vmatpush.msrb.mxu3 %v4108_v11 }
 0x4e2   :  { %1145 = vmatpush.msrb.mxu3 %v4107_v39 }
 0x4e4   :  { %1146 = vmatpush.msrb.mxu3 %v4106_v7 }
 0x4e6   :  { %1147 = vmatpush.msrb.mxu3 %v4105_v26 }
 0x4e8   :  { %1148 = vmatpush.msrb.mxu3 %v4104_v40 }
 0x4ea   :  { %1149 = vmatpush.msrb.mxu3 %v4103_v57 }
 0x540   :  { %v967_v14 = vpop.f32.mrf.mxu2 }
 0x541   :  { %v968_v58 = vadd.f32 %v4403_v5, %v967_v14 }
 0x543   :  { %v5338_v42 = vmax.f32 %v968_v58, 0.0 }
 0x545   :  { %1029 = vadd.xlane.f32.xlu0 %v5338_v42  ;;  %v1041_v50 = vmul.f32 %v5338_v42, %v5338_v42 }
 0x547   :  { %1045 = vadd.xlane.f32.xlu1 %v1041_v50  ;;  %v4406_v50 = vld [vmem:[%s7050_s30 + $0x1] ss:$0 sm:$0xff] }
 0x548   :  { %v970_v13 = vpop.f32.mrf.mxu2 }
 0x549   :  { %v971_v2 = vadd.f32 %v4403_v5, %v970_v13 }
 0x54b   :  { %v5343_v15 = vmax.f32 %v971_v2, 0.0 }
 0x54d   :  { %1031 = vadd.xlane.f32.xlu2 %v5343_v15  ;;  %v1042_v18 = vmul.f32 %v5343_v15, %v5343_v15 }
 0x54f   :  { %1047 = vadd.xlane.f32.xlu0 %v1042_v18 }
 0x550   :  { %v973_v10 = vpop.f32.mrf.mxu2 }
 0x551   :  { %v974_v17 = vadd.f32 %v4403_v5, %v973_v10 }
 0x553   :  { %v5348_v31 = vmax.f32 %v974_v17, 0.0 }
 0x555   :  { %1033 = vadd.xlane.f32.xlu1 %v5348_v31  ;;  %v1043_v19 = vmul.f32 %v5348_v31, %v5348_v31 }
 0x557   :  { %1049 = vadd.xlane.f32.xlu2 %v1043_v19 }
 0x558   :  { %v976_v20 = vpop.f32.mrf.mxu2 }
 0x559   :  { %v977_v21 = vadd.f32 %v4403_v5, %v976_v20  ;;  %v4407_v20 = vld [vmem:[%s7051_s8 + $0x1] ss:$0 sm:$0xff] }
 0x55b   :  { %v5353_v22 = vmax.f32 %v977_v21, 0.0 }
 0x55d   :  { %1035 = vadd.xlane.f32.xlu0 %v5353_v22  ;;  %v1044_v53 = vmul.f32 %v5353_v22, %v5353_v22 }
 0x55f   :  { %1051 = vadd.xlane.f32.xlu1 %v1044_v53 }
 0x5b8   :  { %v1030_v6 = vpop.xlane.xlu0 %1029 }
 0x5b9   :  { %v1037_v28 = vmul.f32 0.03125, %v1030_v6 }
 0x5ba   :  { %v1046_v44 = vpop.xlane.xlu1 %1045 }
 0x5bb   :  { %v1057_v45 = vmul.f32 %v1037_v28, %v1037_v28  ;;  %v1053_v46 = vmul.f32 0.03125, %v1046_v44  ;;  %v1065_v14 = vsub.f32 %v5338_v42, %v1037_v28 }
 0x5bd   :  { %v1061_v49 = vsub.f32 %v1053_v46, %v1057_v45 }
 0x5bf   :  { %v1069_v51 = vadd.f32 1e-05, %v1061_v49 }
 0x5c0   :  { %v1032_v59 = vpop.xlane.xlu2 %1031 }
 0x5c1   :  { %4482 = vrsqrt.f32 %v1069_v51  ;;  %v1038_v52 = vmul.f32 0.03125, %v1032_v59  ;;  %vm1079_vm11 = vweird.f32 %v1069_v51 }
 0x5c2   :  { %v1048_v9 = vpop.xlane.xlu0 %1047 }
 0x5c3   :  { %v1058_v0 = vmul.f32 %v1038_v52, %v1038_v52  ;;  %v1054_v8 = vmul.f32 0.03125, %v1048_v9  ;;  %v1066_v34 = vsub.f32 %v5343_v15, %v1038_v52 }
 0x5c5   :  { %v1062_v48 = vsub.f32 %v1054_v8, %v1058_v0 }
 0x5c7   :  { %v4483_v54 = vpop.eup %4482  ;;  %v1070_v41 = vadd.f32 1e-05, %v1062_v48 }
 0x5c8   :  { %v1074_v55 = vmul.f32 %v4483_v54, %v1069_v51  ;;  %v1034_v29 = vpop.xlane.xlu1 %1033  ;;  %vm1080_vm10 = vweird.f32 %v4483_v54 }
 0x5c9   :  { %4484 = vrsqrt.f32 %v1070_v41  ;;  %v1039_v56 = vmul.f32 0.03125, %v1034_v29  ;;  %vm1081_vm12 = vmor %vm1079_vm11, %vm1080_vm10  ;;  %vm1089_vm14 = vweird.f32 %v1070_v41 }
 0x5ca   :  { %v1075_v62 = vmul.f32 %v4483_v54, %v1074_v55  ;;  %v1050_v63 = vpop.xlane.xlu2 %1049 }
 0x5cb   :  { %v1059_v3 = vmul.f32 %v1039_v56, %v1039_v56  ;;  %v1055_v61 = vmul.f32 0.03125, %v1050_v63  ;;  %v1067_v28 = vsub.f32 %v5348_v31, %v1039_v56 }
 0x5cc   :  { %v1076_v43 = vmul.f32 0.5, %v1075_v62 }
 0x5cd   :  { %v1063_v1 = vsub.f32 %v1055_v61, %v1059_v3 }
 0x5ce   :  { %v1077_v33 = vsub.f32 1.5, %v1076_v43 }
 0x5cf   :  { %v4485_v4 = vpop.eup %4484  ;;  %v1071_v25 = vadd.f32 1e-05, %v1063_v1 }
 0x5d0   :  { %v1078_v12 = vmul.f32 %v4483_v54, %v1077_v33  ;;  %v1084_v38 = vmul.f32 %v4485_v4, %v1070_v41  ;;  %v1036_v5 = vpop.xlane.xlu0 %1035  ;;  %vm1090_vm13 = vweird.f32 %v4485_v4 }
 0x5d1   :  { %4486 = vrsqrt.f32 %v1071_v25  ;;  %v1040_v58 = vmul.f32 0.03125, %v1036_v5  ;;  %vm1091_vm15 = vmor %vm1089_vm14, %vm1090_vm13  ;;  %vm1099_vm2 = vweird.f32 %v1071_v25  ;;  %v4137_v5 = vld [vmem:[%s7053_s7 + $0xf8] sm:$0xff] }
 0x5d2   :  { %v1085_v13 = vmul.f32 %v4485_v4, %v1084_v38  ;;  %v1052_v2 = vpop.xlane.xlu1 %1051  ;;  %v1082_v18 = vsel %vm1081_vm12, %v4483_v54, %v1078_v12  ;;  %v4408_v54 = vld [vmem:[%s7052_s6 + $0x1] ss:$0 sm:$0xff]  ;;  %1272 = vmatpush.msrb.mxu2 %v4137_v5 }
 0x5d3   :  { %v1060_v10 = vmul.f32 %v1040_v58, %v1040_v58  ;;  %v1056_v17 = vmul.f32 0.03125, %v1052_v2  ;;  %v1113_v19 = vmul.f32 %v1082_v18, %v1065_v14  ;;  %v1068_v9 = vsub.f32 %v5353_v22, %v1040_v58  ;;  %v4136_v14 = vld [vmem:[%s7053_s7 + $0xf0] sm:$0xff]  ;;  %v4135_v58 = vld [vmem:[%s7053_s7 + $0xe8] sm:$0xff]  ;;  %v4130_v18 = vld [vmem:[%s7053_s7 + $0xc0] sm:$0xff] }
 0x5d4   :  { %v1086_v21 = vmul.f32 0.5, %v1085_v13  ;;  %1273 = vmatpush.msrb.mxu2 %v4136_v14  ;;  %v4132_v13 = vld [vmem:[%s7053_s7 + $0xd0] sm:$0xff]  ;;  %v4131_v2 = vld [vmem:[%s7053_s7 + $0xc8] sm:$0xff] }
 0x5d5   :  { %v1064_v53 = vsub.f32 %v1056_v17, %v1060_v10  ;;  %v1120_v42 = vmul.f32 %v4406_v50, %v1113_v19  ;;  %v4643_v10 = vld [vmem:[%s7010_s1 + $0x18] sm:$0xff]  ;;  %v4128_v19 = vld [vmem:[%s7053_s7 + $0xb0] sm:$0xff] }
 0x5d6   :  { %v1087_v23 = vsub.f32 1.5, %v1086_v21  ;;  %1274 = vmatpush.msrb.mxu2 %v4135_v58  ;;  %v4129_v17 = vld [vmem:[%s7053_s7 + $0xb8] sm:$0xff]  ;;  %v4126_v21 = vld [vmem:[%s7053_s7 + $0xa0] sm:$0xff] }
 0x5d7   :  { %v4487_v60 = vpop.eup %4486  ;;  %v1072_v32 = vadd.f32 1e-05, %v1064_v53  ;;  %v1127_v16 = vadd.f32 %v4407_v20, %v1120_v42  ;;  %v4125_v53 = vld [vmem:[%s7053_s7 + $0x98] sm:$0xff]  ;;  %v4124_v42 = vld [vmem:[%s7053_s7 + $0x90] sm:$0xff] }
 0x5d8   :  { %v1094_v27 = vmul.f32 %v4487_v60, %v1071_v25  ;;  %v1088_v30 = vmul.f32 %v4485_v4, %v1087_v23  ;;  %vm1100_vm1 = vweird.f32 %v4487_v60  ;;  %v4123_v23 = vld [vmem:[%s7053_s7 + $0x88] sm:$0xff] }
 0x5d9   :  { %4488 = vrsqrt.f32 %v1072_v32  ;;  %1150 = vmatmul.f32.vlgmr.msrb.gmra.mxu3 %v1127_v16  ;;  %vm1101_vm3 = vmor %vm1099_vm2, %vm1100_vm1  ;;  %vm1109_vm5 = vweird.f32 %v1072_v32 }
 0x5da   :  { %v1095_v35 = vmul.f32 %v4487_v60, %v1094_v27  ;;  %v1092_v37 = vsel %vm1091_vm15, %v4485_v4, %v1088_v30 }
 0x5db   :  { %v1114_v24 = vmul.f32 %v1092_v37, %v1066_v34 }
 0x5dc   :  { %v1096_v11 = vmul.f32 0.5, %v1095_v35 }
 0x5dd   :  { %v1121_v39 = vmul.f32 %v4406_v50, %v1114_v24 }
 0x5de   :  { %v1097_v7 = vsub.f32 1.5, %v1096_v11 }
 0x5df   :  { %v4489_v26 = vpop.eup %4488  ;;  %v1128_v40 = vadd.f32 %v4407_v20, %v1121_v39 }
 0x5e0   :  { %v1104_v6 = vmul.f32 %v4489_v26, %v1072_v32  ;;  %v1098_v57 = vmul.f32 %v4487_v60, %v1097_v7  ;;  %vm1110_vm4 = vweird.f32 %v4489_v26  ;;  %v4122_v32 = vld [vmem:[%s7053_s7 + $0x80] sm:$0xff] }
 0x5e1   :  { %1153 = vmatmul.f32.gmra.mxu3 %v1128_v40  ;;  %vm1111_vm6 = vmor %vm1109_vm5, %vm1110_vm4  ;;  %vm1337_vm4 = vcmask 261120  }
 0x5e2   :  { %v1105_v15 = vmul.f32 %v4489_v26, %v1104_v6  ;;  %v1102_v44 = vsel %vm1101_vm3, %v4487_v60, %v1098_v57 }
 0x5e3   :  { %v1115_v45 = vmul.f32 %v1102_v44, %v1067_v28 }
 0x5e4   :  { %v1106_v46 = vmul.f32 0.5, %v1105_v15 }
 0x5e5   :  { %v1122_v49 = vmul.f32 %v4406_v50, %v1115_v45 }
 0x5e6   :  { %v1107_v51 = vsub.f32 1.5, %v1106_v46 }
 0x5e7   :  { %v1129_v59 = vadd.f32 %v4407_v20, %v1122_v49 }
 0x5e8   :  { %v1108_v52 = vmul.f32 %v4489_v26, %v1107_v51 }
 0x5e9   :  { %1156 = vmatmul.f32.gmra.mxu3 %v1129_v59 }
 0x5ea   :  { %v1112_v0 = vsel %vm1111_vm6, %v4489_v26, %v1108_v52 }
 0x5eb   :  { %v1116_v8 = vmul.f32 %v1112_v0, %v1068_v9 }
 0x5ed   :  { %v1123_v48 = vmul.f32 %v4406_v50, %v1116_v8  ;;  %v4133_v50 = vld [vmem:[%s7053_s7 + $0xd8] sm:$0xff] }
 0x5ef   :  { %v1130_v31 = vadd.f32 %v4407_v20, %v1123_v48  ;;  %v4127_v20 = vld [vmem:[%s7053_s7 + $0xa8] sm:$0xff] }
 0x5f1   :  { %1159 = vmatmul.f32.gmra.mxu3 %v1130_v31 }
 0x65c   :  { %v1151_v41 = vpop.f32.mrf.mxu3 }
 0x65d   :  { %v1152_v55 = vadd.f32 %v4408_v54, %v1151_v41 }
 0x65f   :  { %v5419_v29 = vmax.f32 %v1152_v55, 0.0 }
 0x661   :  { %1167 = vadd.xlane.f32.xlu2 %v5419_v29  ;;  %v1179_v22 = vmul.f32 %v5419_v29, %v5419_v29 }
 0x663   :  { %1183 = vadd.xlane.f32.xlu0 %v1179_v22  ;;  %v4409_v22 = vld [vmem:[%s7054_s27 + $0x1] ss:$0 sm:$0xff] }
 0x664   :  { %v1154_v56 = vpop.f32.mrf.mxu3 }
 0x665   :  { %v1155_v62 = vadd.f32 %v4408_v54, %v1154_v56 }
 0x667   :  { %v5424_v63 = vmax.f32 %v1155_v62, 0.0 }
 0x669   :  { %1169 = vadd.xlane.f32.xlu1 %v5424_v63  ;;  %v1180_v3 = vmul.f32 %v5424_v63, %v5424_v63 }
 0x66b   :  { %1185 = vadd.xlane.f32.xlu2 %v1180_v3 }
 0x66c   :  { %v1157_v61 = vpop.f32.mrf.mxu3 }
 0x66d   :  { %v1158_v43 = vadd.f32 %v4408_v54, %v1157_v61 }
 0x66f   :  { %v5429_v1 = vmax.f32 %v1158_v43, 0.0 }
 0x671   :  { %1171 = vadd.xlane.f32.xlu0 %v5429_v1  ;;  %v1181_v33 = vmul.f32 %v5429_v1, %v5429_v1 }
 0x673   :  { %1187 = vadd.xlane.f32.xlu1 %v1181_v33 }
 0x674   :  { %v1160_v4 = vpop.f32.mrf.mxu3 }
 0x675   :  { %v1161_v25 = vadd.f32 %v4408_v54, %v1160_v4  ;;  %v4410_v4 = vld [vmem:[%s7055_s25 + $0x1] ss:$0 sm:$0xff] }
 0x677   :  { %v5434_v12 = vmax.f32 %v1161_v25, 0.0 }
 0x679   :  { %1173 = vadd.xlane.f32.xlu2 %v5434_v12  ;;  %v1182_v38 = vmul.f32 %v5434_v12, %v5434_v12 }
 0x67b   :  { %1189 = vadd.xlane.f32.xlu0 %v1182_v38 }
 0x6ad   :  { %1305 = vxpose.xlu1.b32.start [1/4] (short) (narrow) %v5157_v36, 64  ;;  %v4134_v36 = vld [vmem:[%s7053_s7 + $0xe0] sm:$0xff] }
 0x6ae   :  { %1275 = vmatpush.msrb.mxu2 %v4134_v36 }
 0x6b0   :  { %1276 = vmatpush.msrb.mxu2 %v4133_v50 }
 0x6b2   :  { %1277 = vmatpush.msrb.mxu2 %v4132_v13 }
 0x6b4   :  { %1278 = vmatpush.msrb.mxu2 %v4131_v2 }
 0x6b5   :  { %1306 = vxpose.xlu1.b32.cont [2/4] (short) (narrow) %v5164_v47, 64  ;;  %v4642_v47 = vld [vmem:[%s7010_s1 + $0x10] sm:$0xff] }
 0x6b6   :  { %1279 = vmatpush.msrb.mxu2 %v4130_v18 }
 0x6b8   :  { %1280 = vmatpush.msrb.mxu2 %v4129_v17 }
 0x6ba   :  { %1281 = vmatpush.msrb.mxu2 %v4128_v19 }
 0x6bc   :  { %1282 = vmatpush.msrb.mxu2 %v4127_v20 }
 0x6bd   :  { %1307 = vxpose.xlu1.b32.cont [3/4] (short) (narrow) %v4642_v47, 64 }
 0x6be   :  { %1283 = vmatpush.msrb.mxu2 %v4126_v21 }
 0x6c0   :  { %1284 = vmatpush.msrb.mxu2 %v4125_v53 }
 0x6c2   :  { %1285 = vmatpush.msrb.mxu2 %v4124_v42 }
 0x6c4   :  { %1286 = vmatpush.msrb.mxu2 %v4123_v23 }
 0x6c5   :  { %1308 = vxpose.xlu1.b32.end [4/4] (short) (narrow) %v4643_v10, 64 }
 0x6c6   :  { %1287 = vmatpush.msrb.mxu2 %v4122_v32 }
 0x6d4   :  { %v1168_v60 = vpop.xlane.xlu2 %1167 }
 0x6d5   :  { %v1175_v16 = vmul.f32 0.03125, %v1168_v60 }
 0x6d6   :  { %v1184_v27 = vpop.xlane.xlu0 %1183 }
 0x6d7   :  { %v1195_v30 = vmul.f32 %v1175_v16, %v1175_v16  ;;  %v1191_v34 = vmul.f32 0.03125, %v1184_v27  ;;  %v1203_v41 = vsub.f32 %v5419_v29, %v1175_v16 }
 0x6d9   :  { %v1199_v35 = vsub.f32 %v1191_v34, %v1195_v30 }
 0x6db   :  { %v1207_v37 = vadd.f32 1e-05, %v1199_v35 }
 0x6dc   :  { %v1170_v24 = vpop.xlane.xlu1 %1169 }
 0x6dd   :  { %4490 = vrsqrt.f32 %v1207_v37  ;;  %v1176_v11 = vmul.f32 0.03125, %v1170_v24  ;;  %vm1217_vm8 = vweird.f32 %v1207_v37 }
 0x6de   :  { %v1186_v39 = vpop.xlane.xlu2 %1185 }
 0x6df   :  { %v1196_v7 = vmul.f32 %v1176_v11, %v1176_v11  ;;  %v1192_v26 = vmul.f32 0.03125, %v1186_v39  ;;  %v1204_v13 = vsub.f32 %v5424_v63, %v1176_v11 }
 0x6e1   :  { %v1200_v40 = vsub.f32 %v1192_v26, %v1196_v7 }
 0x6e3   :  { %v4491_v6 = vpop.eup %4490  ;;  %v1208_v57 = vadd.f32 1e-05, %v1200_v40 }
 0x6e4   :  { %v1212_v28 = vmul.f32 %v4491_v6, %v1207_v37  ;;  %v1172_v15 = vpop.xlane.xlu0 %1171  ;;  %vm1218_vm7 = vweird.f32 %v4491_v6 }
 0x6e5   :  { %4492 = vrsqrt.f32 %v1208_v57  ;;  %v1177_v44 = vmul.f32 0.03125, %v1172_v15  ;;  %vm1219_vm9 = vmor %vm1217_vm8, %vm1218_vm7  ;;  %vm1227_vm11 = vweird.f32 %v1208_v57 }
 0x6e6   :  { %v1213_v45 = vmul.f32 %v4491_v6, %v1212_v28  ;;  %v1188_v46 = vpop.xlane.xlu1 %1187  ;;  %v4411_v28 = vld [vmem:[%s7056_s26 + $0x1] ss:$0 sm:$0xff] }
 0x6e7   :  { %v1197_v49 = vmul.f32 %v1177_v44, %v1177_v44  ;;  %v1193_v51 = vmul.f32 0.03125, %v1188_v46  ;;  %v1205_v60 = vsub.f32 %v5429_v1, %v1177_v44 }
 0x6e8   :  { %v1214_v59 = vmul.f32 0.5, %v1213_v45 }
 0x6e9   :  { %v1201_v52 = vsub.f32 %v1193_v51, %v1197_v49 }
 0x6ea   :  { %v1215_v9 = vsub.f32 1.5, %v1214_v59 }
 0x6eb   :  { %v4493_v0 = vpop.eup %4492  ;;  %v1209_v8 = vadd.f32 1e-05, %v1201_v52 }
 0x6ec   :  { %v1222_v48 = vmul.f32 %v4493_v0, %v1208_v57  ;;  %v1174_v31 = vpop.xlane.xlu2 %1173  ;;  %v1216_v54 = vmul.f32 %v4491_v6, %v1215_v9  ;;  %vm1228_vm10 = vweird.f32 %v4493_v0 }
 0x6ed   :  { %4494 = vrsqrt.f32 %v1209_v8  ;;  %v1178_v55 = vmul.f32 0.03125, %v1174_v31  ;;  %vm1229_vm12 = vmor %vm1227_vm11, %vm1228_vm10  ;;  %vm1237_vm14 = vweird.f32 %v1209_v8 }
 0x6ee   :  { %v1223_v56 = vmul.f32 %v4493_v0, %v1222_v48  ;;  %v1190_v62 = vpop.xlane.xlu0 %1189  ;;  %v1220_v3 = vsel %vm1219_vm9, %v4491_v6, %v1216_v54 }
 0x6ef   :  { %v1198_v61 = vmul.f32 %v1178_v55, %v1178_v55  ;;  %v1194_v43 = vmul.f32 0.03125, %v1190_v62  ;;  %v1251_v33 = vmul.f32 %v1220_v3, %v1203_v41  ;;  %v1206_v24 = vsub.f32 %v5434_v12, %v1178_v55 }
 0x6f0   :  { %v1224_v25 = vmul.f32 0.5, %v1223_v56 }
 0x6f1   :  { %v1202_v38 = vsub.f32 %v1194_v43, %v1198_v61  ;;  %v1258_v29 = vmul.f32 %v4409_v22, %v1251_v33 }
 0x6f2   :  { %v1225_v5 = vsub.f32 1.5, %v1224_v25 }
 0x6f3   :  { %v4495_v14 = vpop.eup %4494  ;;  %v1210_v58 = vadd.f32 1e-05, %v1202_v38  ;;  %v1265_v36 = vadd.f32 %v4410_v4, %v1258_v29 }
 0x6f4   :  { %v1232_v47 = vmul.f32 %v4495_v14, %v1209_v8  ;;  %v1226_v50 = vmul.f32 %v4493_v0, %v1225_v5  ;;  %vm1238_vm13 = vweird.f32 %v4495_v14 }
 0x6f5   :  { %4496 = vrsqrt.f32 %v1210_v58  ;;  %1288 = vmatmul.f32.vlgmr.msrb.gmra.mxu2 %v1265_v36  ;;  %vm1239_vm15 = vmor %vm1237_vm14, %vm1238_vm13  ;;  %vm1247_vm2 = vweird.f32 %v1210_v58 }
 0x6f6   :  { %v1233_v2 = vmul.f32 %v4495_v14, %v1232_v47  ;;  %v1230_v18 = vsel %vm1229_vm12, %v4493_v0, %v1226_v50  ;;  %v4164_v47 = vld [vmem:[%s7014_s12 + $0xf8] sm:$0xff]  ;;  %v4163_v50 = vld [vmem:[%s7014_s12 + $0xf0] sm:$0xff] }
 0x6f7   :  { %v1252_v10 = vmul.f32 %v1230_v18, %v1204_v13  ;;  %1650 = vmatpush.msrb.mxu1 %v4164_v47  ;;  %v4162_v13 = vld [vmem:[%s7014_s12 + $0xe8] sm:$0xff]  ;;  %v4160_v18 = vld [vmem:[%s7014_s12 + $0xd8] sm:$0xff] }
 0x6f8   :  { %v1234_v17 = vmul.f32 0.5, %v1233_v2  ;;  %v4161_v2 = vld [vmem:[%s7014_s12 + $0xe0] sm:$0xff] }
 0x6f9   :  { %v1259_v19 = vmul.f32 %v4409_v22, %v1252_v10  ;;  %1651 = vmatpush.msrb.mxu1 %v4163_v50  ;;  %v4159_v10 = vld [vmem:[%s7014_s12 + $0xd0] sm:$0xff] }
 0x6fa   :  { %v1235_v20 = vsub.f32 1.5, %v1234_v17  ;;  %v4158_v17 = vld [vmem:[%s7014_s12 + $0xc8] sm:$0xff] }
 0x6fb   :  { %v4497_v21 = vpop.eup %4496  ;;  %v1266_v53 = vadd.f32 %v4410_v4, %v1259_v19  ;;  %1652 = vmatpush.msrb.mxu1 %v4162_v13  ;;  %v4157_v19 = vld [vmem:[%s7014_s12 + $0xc0] sm:$0xff] }
 0x6fc   :  { %v1242_v42 = vmul.f32 %v4497_v21, %v1210_v58  ;;  %v1236_v23 = vmul.f32 %v4495_v14, %v1235_v20  ;;  %vm1248_vm1 = vweird.f32 %v4497_v21  ;;  %v4156_v20 = vld [vmem:[%s7014_s12 + $0xb8] sm:$0xff] }
 0x6fd   :  { %1291 = vmatmul.f32.gmra.mxu2 %v1266_v53  ;;  %vm1249_vm3 = vmor %vm1247_vm2, %vm1248_vm1  ;;  %1653 = vmatpush.msrb.mxu1 %v4161_v2  ;;  %v4154_v53 = vld [vmem:[%s7014_s12 + $0xa8] sm:$0xff] }
 0x6fe   :  { %v1243_v63 = vmul.f32 %v4497_v21, %v1242_v42  ;;  %v1240_v32 = vsel %vm1239_vm15, %v4495_v14, %v1236_v23  ;;  %v4153_v42 = vld [vmem:[%s7014_s12 + $0xa0] sm:$0xff]  ;;  %v4152_v23 = vld [vmem:[%s7014_s12 + $0x98] sm:$0xff] }
 0x6ff   :  { %v1253_v16 = vmul.f32 %v1240_v32, %v1205_v60  ;;  %1654 = vmatpush.msrb.mxu1 %v4160_v18  ;;  %v4151_v60 = vld [vmem:[%s7014_s12 + $0x90] sm:$0xff]  ;;  %v5643_v18 = vld [vmem:[%s7012_s11 + $0x1] ss:$0 sm:$0xff] }
 0x700   :  { %v1244_v27 = vmul.f32 0.5, %v1243_v63  ;;  %v4150_v63 = vld [vmem:[%s7014_s12 + $0x88] sm:$0xff] }
 0x701   :  { %v1260_v30 = vmul.f32 %v4409_v22, %v1253_v16  ;;  %1655 = vmatpush.msrb.mxu1 %v4159_v10  ;;  %v4149_v16 = vld [vmem:[%s7014_s12 + $0x80] sm:$0xff] }
 0x702   :  { %v1245_v34 = vsub.f32 1.5, %v1244_v27 }
 0x703   :  { %v1267_v35 = vadd.f32 %v4410_v4, %v1260_v30  ;;  %1656 = vmatpush.msrb.mxu1 %v4158_v17 }
 0x704   :  { %v1246_v37 = vmul.f32 %v4497_v21, %v1245_v34 }
 0x705   :  { %1294 = vmatmul.f32.gmra.mxu2 %v1267_v35  ;;  %1657 = vmatpush.msrb.mxu1 %v4157_v19 }
 0x706   :  { %v1250_v11 = vsel %vm1249_vm3, %v4497_v21, %v1246_v37  ;;  %v4155_v21 = vld [vmem:[%s7014_s12 + $0xb0] sm:$0xff] }
 0x707   :  { %v1254_v39 = vmul.f32 %v1250_v11, %v1206_v24  ;;  %1658 = vmatpush.msrb.mxu1 %v4156_v20 }
 0x709   :  { %v1261_v7 = vmul.f32 %v4409_v22, %v1254_v39  ;;  %1659 = vmatpush.msrb.mxu1 %v4155_v21 }
 0x70b   :  { %v1268_v1 = vadd.f32 %v4410_v4, %v1261_v7  ;;  %1660 = vmatpush.msrb.mxu1 %v4154_v53 }
 0x70d   :  { %1297 = vmatmul.f32.gmra.mxu2 %v1268_v1  ;;  %1661 = vmatpush.msrb.mxu1 %v4153_v42 }
 0x70f   :  { %1662 = vmatpush.msrb.mxu1 %v4152_v23 }
 0x711   :  { %1663 = vmatpush.msrb.mxu1 %v4151_v60 }
 0x713   :  { %1664 = vmatpush.msrb.mxu1 %v4150_v63 }
 0x715   :  { %1665 = vmatpush.msrb.mxu1 %v4149_v16 }
 0x751   :  { %v5505_v57 = vpop.trf.xlu1 }
 0x759   :  { %v5510_v59 = vpop.trf.xlu1 }
 0x761   :  { %v5514_v0 = vpop.trf.xlu1 }
 0x769   :  { %v5518_v8 = vpop.trf.xlu1 }
 0x771   :  { %v5522_v48 = vpop.trf.xlu1 }
 0x778   :  { %v1289_v26 = vpop.f32.mrf.mxu2 }
 0x779   :  { %v1290_v49 = vadd.f32 %v4411_v28, %v1289_v26  ;;  %v5528_v31 = vpop.trf.xlu1 }
 0x77b   :  { %v1301_v9 = vmax.f32 %v1290_v49, 0.0 }
 0x780   :  { %v1292_v40 = vpop.f32.mrf.mxu2 }
 0x781   :  { %v1293_v12 = vadd.f32 %v4411_v28, %v1292_v40  ;;  %v5532_v54 = vpop.trf.xlu1 }
 0x783   :  { %v1302_v52 = vmax.f32 %v1293_v12, 0.0 }
 0x788   :  { %v1295_v6 = vpop.f32.mrf.mxu2 }
 0x789   :  { %v1296_v44 = vadd.f32 %v4411_v28, %v1295_v6  ;;  %v5536_v41 = vpop.trf.xlu1 }
 0x78b   :  { %v1303_v51 = vmax.f32 %v1296_v44, 0.0 }
 0x790   :  { %v1298_v15 = vpop.f32.mrf.mxu2 }
 0x791   :  { %v1299_v45 = vadd.f32 %v4411_v28, %v1298_v15 }
 0x793   :  { %v1304_v46 = vmax.f32 %v1299_v45, 0.0 }
 0x795   :  { %1374 = vmatpush.msra.mxu0 %v1304_v46 }
 0x797   :  { %1375 = vmatpush.msra.mxu0 %v1303_v51 }
 0x799   :  { %1376 = vmatpush.msra.mxu0 %v1302_v52 }
 0x79b   :  { %1377 = vmatpush.msra.mxu0 %v1301_v9 }
 0x79c   :  { %4139 = vmatmul.msk.f32.vlgmr.msra.gmra.mxu0 %vm1337_vm4, %v5505_v57 }
 0x7a4   :  { %4140 = vmatmul.msk.f32.gmra.mxu0 %vm1337_vm4, %v5510_v59 }
 0x7ac   :  { %4141 = vmatmul.msk.f32.gmra.mxu0 %vm1337_vm4, %v5514_v0 }
 0x7b4   :  { %4142 = vmatmul.msk.f32.gmra.mxu0 %vm1337_vm4, %v5518_v8 }
 0x7bc   :  { %4143 = vmatmul.msk.f32.gmra.mxu0 %vm1337_vm4, %v5522_v48 }
 0x7c4   :  { %4144 = vmatmul.msk.f32.gmra.mxu0 %vm1337_vm4, %v5528_v31 }
 0x7cc   :  { %4145 = vmatmul.msk.f32.gmra.mxu0 %vm1337_vm4, %v5532_v54 }
 0x7d4   :  { %4146 = vmatmul.msk.f32.gmra.mxu0 %vm1337_vm4, %v5536_v41 }
 0x819   :  { %v5540_v55 = vpop.f32.mrf.mxu0 }
 0x81a   :  { %1449 = vadd.xlane.f32.xlu2 %v5540_v55  ;;  %v1473_v22 = vmul.f32 %v5540_v55, %v5540_v55 }
 0x81c   :  { %1481 = vadd.xlane.f32.xlu0 %v1473_v22 }
 0x821   :  { %v5545_v56 = vpop.f32.mrf.mxu0 }
 0x822   :  { %1451 = vadd.xlane.f32.xlu2 %v5545_v56  ;;  %v1474_v62 = vmul.f32 %v5545_v56, %v5545_v56 }
 0x824   :  { %1483 = vadd.xlane.f32.xlu0 %v1474_v62 }
 0x829   :  { %v5550_v3 = vpop.f32.mrf.mxu0 }
 0x82a   :  { %1453 = vadd.xlane.f32.xlu2 %v5550_v3  ;;  %v1475_v61 = vmul.f32 %v5550_v3, %v5550_v3 }
 0x82c   :  { %1485 = vadd.xlane.f32.xlu0 %v1475_v61 }
 0x831   :  { %v5555_v43 = vpop.f32.mrf.mxu0 }
 0x832   :  { %1455 = vadd.xlane.f32.xlu2 %v5555_v43  ;;  %v1476_v33 = vmul.f32 %v5555_v43, %v5555_v43 }
 0x834   :  { %1487 = vadd.xlane.f32.xlu0 %v1476_v33 }
 0x839   :  { %v5560_v4 = vpop.f32.mrf.mxu0 }
 0x83a   :  { %1457 = vadd.xlane.f32.xlu2 %v5560_v4  ;;  %v1477_v25 = vmul.f32 %v5560_v4, %v5560_v4 }
 0x83c   :  { %1489 = vadd.xlane.f32.xlu0 %v1477_v25 }
 0x841   :  { %v5565_v38 = vpop.f32.mrf.mxu0 }
 0x842   :  { %1459 = vadd.xlane.f32.xlu2 %v5565_v38  ;;  %v1478_v29 = vmul.f32 %v5565_v38, %v5565_v38 }
 0x844   :  { %1491 = vadd.xlane.f32.xlu0 %v1478_v29 }
 0x849   :  { %v5570_v5 = vpop.f32.mrf.mxu0 }
 0x84a   :  { %1461 = vadd.xlane.f32.xlu2 %v5570_v5  ;;  %v1479_v14 = vmul.f32 %v5570_v5, %v5570_v5 }
 0x84c   :  { %1493 = vadd.xlane.f32.xlu0 %v1479_v14  ;;  %v5635_v14 = vld [vmem:[%s7011_s10 + $0x1] ss:$0 sm:$0xff] }
 0x851   :  { %v5575_v58 = vpop.f32.mrf.mxu0 }
 0x852   :  { %1463 = vadd.xlane.f32.xlu2 %v5575_v58  ;;  %v1480_v36 = vmul.f32 %v5575_v58, %v5575_v58 }
 0x854   :  { %1495 = vadd.xlane.f32.xlu0 %v1480_v36 }
 0x88d   :  { %v1450_v32 = vpop.xlane.xlu2 %1449 }
 0x88e   :  { %v1465_v27 = vmul.f32 0.03125, %v1450_v32 }
 0x88f   :  { %v1482_v30 = vpop.xlane.xlu0 %1481 }
 0x890   :  { %v1505_v34 = vmul.f32 %v1465_v27, %v1465_v27  ;;  %v1497_v35 = vmul.f32 0.03125, %v1482_v30  ;;  %v1521_v36 = vsub.f32 %v5540_v55, %v1465_v27 }
 0x892   :  { %v1513_v37 = vsub.f32 %v1497_v35, %v1505_v34 }
 0x894   :  { %v1529_v24 = vadd.f32 1e-05, %v1513_v37 }
 0x895   :  { %v1452_v11 = vpop.xlane.xlu2 %1451 }
 0x896   :  { %4498 = vrsqrt.f32 %v1529_v24  ;;  %v1466_v39 = vmul.f32 0.03125, %v1452_v11  ;;  %vm1543_vm6 = vweird.f32 %v1529_v24 }
 0x897   :  { %v1484_v7 = vpop.xlane.xlu0 %1483 }
 0x898   :  { %v1506_v1 = vmul.f32 %v1466_v39, %v1466_v39  ;;  %v1498_v26 = vmul.f32 0.03125, %v1484_v7  ;;  %v1522_v27 = vsub.f32 %v5545_v56, %v1466_v39 }
 0x89a   :  { %v1514_v40 = vsub.f32 %v1498_v26, %v1506_v1 }
 0x89c   :  { %v4499_v6 = vpop.eup %4498  ;;  %v1530_v28 = vadd.f32 1e-05, %v1514_v40 }
 0x89d   :  { %v1538_v15 = vmul.f32 %v4499_v6, %v1529_v24  ;;  %v1454_v44 = vpop.xlane.xlu2 %1453  ;;  %vm1544_vm5 = vweird.f32 %v4499_v6 }
 0x89e   :  { %4500 = vrsqrt.f32 %v1530_v28  ;;  %v5628_v45 = vmul.f32 0.03125, %v1454_v44  ;;  %vm1545_vm7 = vmor %vm1543_vm6, %vm1544_vm5  ;;  %vm1553_vm9 = vweird.f32 %v1530_v28 }
 0x89f   :  { %v1539_v12 = vmul.f32 %v4499_v6, %v1538_v15  ;;  %v1486_v46 = vpop.xlane.xlu0 %1485 }
 0x8a0   :  { %v1507_v49 = vmul.f32 %v5628_v45, %v5628_v45  ;;  %v1499_v51 = vmul.f32 0.03125, %v1486_v46  ;;  %v1523_v46 = vsub.f32 %v5550_v3, %v5628_v45 }
 0x8a1   :  { %v1540_v52 = vmul.f32 0.5, %v1539_v12 }
 0x8a2   :  { %v1515_v9 = vsub.f32 %v1499_v51, %v1507_v49 }
 0x8a3   :  { %v1541_v22 = vsub.f32 1.5, %v1540_v52 }
 0x8a4   :  { %v4501_v62 = vpop.eup %4500  ;;  %v1531_v61 = vadd.f32 1e-05, %v1515_v9 }
 0x8a5   :  { %v1548_v33 = vmul.f32 %v4501_v62, %v1530_v28  ;;  %v1456_v25 = vpop.xlane.xlu2 %1455  ;;  %v1542_v29 = vmul.f32 %v4499_v6, %v1541_v22  ;;  %vm1554_vm8 = vweird.f32 %v4501_v62 }
 0x8a6   :  { %4502 = vrsqrt.f32 %v1531_v61  ;;  %v5638_v47 = vmul.f32 0.03125, %v1456_v25  ;;  %vm1555_vm10 = vmor %vm1553_vm9, %vm1554_vm8  ;;  %vm1563_vm12 = vweird.f32 %v1531_v61 }
 0x8a7   :  { %v1549_v50 = vmul.f32 %v4501_v62, %v1548_v33  ;;  %v1488_v13 = vpop.xlane.xlu0 %1487  ;;  %v1546_v2 = vsel %vm1545_vm7, %v4499_v6, %v1542_v29 }
 0x8a8   :  { %v1508_v10 = vmul.f32 %v5638_v47, %v5638_v47  ;;  %v1500_v17 = vmul.f32 0.03125, %v1488_v13  ;;  %v1617_v19 = vmul.f32 %v1546_v2, %v1521_v36 }
 0x8a9   :  { %v1550_v20 = vmul.f32 0.5, %v1549_v50 }
 0x8aa   :  { %v1516_v21 = vsub.f32 %v1500_v17, %v1508_v10  ;;  %v1628_v55 = vmul.f32 %v5635_v14, %v1617_v19  ;;  %v1524_v17 = vsub.f32 %v5555_v43, %v5638_v47 }
 0x8ab   :  { %v1551_v53 = vsub.f32 1.5, %v1550_v20 }
 0x8ac   :  { %v4503_v42 = vpop.eup %4502  ;;  %v1532_v23 = vadd.f32 1e-05, %v1516_v21  ;;  %v1639_v60 = vadd.f32 %v5643_v18, %v1628_v55 }
 0x8ad   :  { %v1558_v63 = vmul.f32 %v4503_v42, %v1531_v61  ;;  %v1458_v32 = vpop.xlane.xlu2 %1457  ;;  %v1552_v16 = vmul.f32 %v4501_v62, %v1551_v53  ;;  %vm1564_vm11 = vweird.f32 %v4503_v42 }
 0x8ae   :  { %4504 = vrsqrt.f32 %v1532_v23  ;;  %v5650_v30 = vmul.f32 0.03125, %v1458_v32  ;;  %1666 = vmatmul.f32.vlgmr.msrb.gmra.mxu1 %v1639_v60  ;;  %vm1565_vm13 = vmor %vm1563_vm12, %vm1564_vm11  ;;  %vm1573_vm15 = vweird.f32 %v1532_v23 }
 0x8af   :  { %v1559_v34 = vmul.f32 %v4503_v42, %v1558_v63  ;;  %v1490_v35 = vpop.xlane.xlu0 %1489  ;;  %v1556_v37 = vsel %vm1555_vm10, %v4501_v62, %v1552_v16 }
 0x8b0   :  { %v1509_v24 = vmul.f32 %v5650_v30, %v5650_v30  ;;  %v1501_v11 = vmul.f32 0.03125, %v1490_v35  ;;  %v1618_v7 = vmul.f32 %v1556_v37, %v1522_v27 }
 0x8b1   :  { %v1560_v1 = vmul.f32 0.5, %v1559_v34 }
 0x8b2   :  { %v1517_v26 = vsub.f32 %v1501_v11, %v1509_v24  ;;  %v1629_v40 = vmul.f32 %v5635_v14, %v1618_v7  ;;  %v1525_v24 = vsub.f32 %v5560_v4, %v5650_v30 }
 0x8b3   :  { %v1561_v6 = vsub.f32 1.5, %v1560_v1 }
 0x8b4   :  { %v4505_v56 = vpop.eup %4504  ;;  %v1533_v39 = vadd.f32 1e-05, %v1517_v26  ;;  %v1640_v28 = vadd.f32 %v5643_v18, %v1629_v40 }
 0x8b5   :  { %v1568_v15 = vmul.f32 %v4505_v56, %v1532_v23  ;;  %v1460_v44 = vpop.xlane.xlu2 %1459  ;;  %v1562_v12 = vmul.f32 %v4503_v42, %v1561_v6  ;;  %vm1574_vm14 = vweird.f32 %v4505_v56 }
 0x8b6   :  { %4506 = vrsqrt.f32 %v1533_v39  ;;  %v5658_v49 = vmul.f32 0.03125, %v1460_v44  ;;  %1669 = vmatmul.f32.gmra.mxu1 %v1640_v28  ;;  %vm1575_vm1 = vmor %vm1573_vm15, %vm1574_vm14  ;;  %vm1583_vm3 = vweird.f32 %v1533_v39 }
 0x8b7   :  { %v1569_v51 = vmul.f32 %v4505_v56, %v1568_v15  ;;  %v1492_v52 = vpop.xlane.xlu0 %1491  ;;  %v1566_v9 = vsel %vm1565_vm13, %v4503_v42, %v1562_v12 }
 0x8b8   :  { %v1510_v22 = vmul.f32 %v5658_v49, %v5658_v49  ;;  %v1502_v62 = vmul.f32 0.03125, %v1492_v52  ;;  %v1619_v33 = vmul.f32 %v1566_v9, %v1523_v46  ;;  %v1526_v52 = vsub.f32 %v5565_v38, %v5658_v49 }
 0x8b9   :  { %v1570_v61 = vmul.f32 0.5, %v1569_v51 }
 0x8ba   :  { %v1518_v25 = vsub.f32 %v1502_v62, %v1510_v22  ;;  %v1630_v29 = vmul.f32 %v5635_v14, %v1619_v33 }
 0x8bb   :  { %v1571_v36 = vsub.f32 1.5, %v1570_v61 }
 0x8bc   :  { %v4507_v3 = vpop.eup %4506  ;;  %v1534_v45 = vadd.f32 1e-05, %v1518_v25  ;;  %v1641_v50 = vadd.f32 %v5643_v18, %v1630_v29 }
 0x8bd   :  { %v1578_v13 = vmul.f32 %v4507_v3, %v1533_v39  ;;  %v1462_v2 = vpop.xlane.xlu2 %1461  ;;  %v1572_v10 = vmul.f32 %v4505_v56, %v1571_v36  ;;  %vm1584_vm2 = vweird.f32 %v4507_v3 }
 0x8be   :  { %4508 = vrsqrt.f32 %v1534_v45  ;;  %v5666_v19 = vmul.f32 0.03125, %v1462_v2  ;;  %1672 = vmatmul.f32.gmra.mxu1 %v1641_v50  ;;  %vm1585_vm5 = vmor %vm1583_vm3, %vm1584_vm2  ;;  %vm1593_vm7 = vweird.f32 %v1534_v45 }
 0x8bf   :  { %v1579_v20 = vmul.f32 %v4507_v3, %v1578_v13  ;;  %v1494_v21 = vpop.xlane.xlu0 %1493  ;;  %v1576_v55 = vsel %vm1575_vm1, %v4505_v56, %v1572_v10 }
 0x8c0   :  { %v1511_v53 = vmul.f32 %v5666_v19, %v5666_v19  ;;  %v1503_v42 = vmul.f32 0.03125, %v1494_v21  ;;  %v1620_v60 = vmul.f32 %v1576_v55, %v1524_v17  ;;  %v1527_v38 = vsub.f32 %v5570_v5, %v5666_v19 }
 0x8c1   :  { %v1580_v23 = vmul.f32 0.5, %v1579_v20 }
 0x8c2   :  { %v1519_v63 = vsub.f32 %v1503_v42, %v1511_v53  ;;  %v1631_v32 = vmul.f32 %v5635_v14, %v1620_v60  ;;  %v4395_v60 = vld [vmem:[%s7013_s13 + $0x1] ss:$0 sm:$0xff] }
 0x8c3   :  { %v1581_v16 = vsub.f32 1.5, %v1580_v23 }
 0x8c4   :  { %v4509_v43 = vpop.eup %4508  ;;  %v1535_v47 = vadd.f32 1e-05, %v1519_v63  ;;  %v1642_v27 = vadd.f32 %v5643_v18, %v1631_v32 }
 0x8c5   :  { %v1588_v34 = vmul.f32 %v4509_v43, %v1534_v45  ;;  %v1464_v35 = vpop.xlane.xlu2 %1463  ;;  %v1582_v37 = vmul.f32 %v4507_v3, %v1581_v16  ;;  %vm1594_vm6 = vweird.f32 %v4509_v43 }
 0x8c6   :  { %4510 = vrsqrt.f32 %v1535_v47  ;;  %v1472_v11 = vmul.f32 0.03125, %v1464_v35  ;;  %1675 = vmatmul.f32.gmra.mxu1 %v1642_v27  ;;  %vm1595_vm8 = vmor %vm1593_vm7, %vm1594_vm6  ;;  %vm1603_vm10 = vweird.f32 %v1535_v47 }
 0x8c7   :  { %v1589_v7 = vmul.f32 %v4509_v43, %v1588_v34  ;;  %v1496_v1 = vpop.xlane.xlu0 %1495  ;;  %v1586_v26 = vsel %vm1585_vm5, %v4507_v3, %v1582_v37 }
 0x8c8   :  { %v1512_v40 = vmul.f32 %v1472_v11, %v1472_v11  ;;  %v1504_v6 = vmul.f32 0.03125, %v1496_v1  ;;  %v1621_v56 = vmul.f32 %v1586_v26, %v1525_v24  ;;  %v1528_v55 = vsub.f32 %v5575_v58, %v1472_v11 }
 0x8c9   :  { %v1590_v28 = vmul.f32 0.5, %v1589_v7 }
 0x8ca   :  { %v1520_v15 = vsub.f32 %v1504_v6, %v1512_v40  ;;  %v1632_v39 = vmul.f32 %v5635_v14, %v1621_v56 }
 0x8cb   :  { %v1591_v44 = vsub.f32 1.5, %v1590_v28 }
 0x8cc   :  { %v4511_v12 = vpop.eup %4510  ;;  %v1536_v46 = vadd.f32 1e-05, %v1520_v15  ;;  %v1643_v4 = vadd.f32 %v5643_v18, %v1632_v39 }
 0x8cd   :  { %v1598_v30 = vmul.f32 %v4511_v12, %v1535_v47  ;;  %v1592_v51 = vmul.f32 %v4509_v43, %v1591_v44  ;;  %vm1604_vm9 = vweird.f32 %v4511_v12 }
 0x8ce   :  { %4512 = vrsqrt.f32 %v1536_v46  ;;  %1678 = vmatmul.f32.gmra.mxu1 %v1643_v4  ;;  %vm1605_vm11 = vmor %vm1603_vm10, %vm1604_vm9  ;;  %vm1613_vm13 = vweird.f32 %v1536_v46 }
 0x8cf   :  { %v1599_v9 = vmul.f32 %v4511_v12, %v1598_v30  ;;  %v1596_v22 = vsel %vm1595_vm8, %v4509_v43, %v1592_v51 }
 0x8d0   :  { %v1622_v62 = vmul.f32 %v1596_v22, %v1526_v52  ;;  %v4183_v22 = vld [vmem:[%s7018_s16 + $0xf8] sm:$0xff] }
 0x8d1   :  { %v1600_v33 = vmul.f32 0.5, %v1599_v9  ;;  %1900 = vmatpush.msra.mxu3 %v4183_v22 }
 0x8d2   :  { %v1633_v61 = vmul.f32 %v5635_v14, %v1622_v62  ;;  %v4182_v62 = vld [vmem:[%s7018_s16 + $0xf0] sm:$0xff] }
 0x8d3   :  { %v1601_v25 = vsub.f32 1.5, %v1600_v33  ;;  %1901 = vmatpush.msra.mxu3 %v4182_v62  ;;  %v4181_v33 = vld [vmem:[%s7018_s16 + $0xe8] sm:$0xff] }
 0x8d4   :  { %v4513_v29 = vpop.eup %4512  ;;  %v1644_v36 = vadd.f32 %v5643_v18, %v1633_v61  ;;  %v4180_v61 = vld [vmem:[%s7018_s16 + $0xe0] sm:$0xff] }
 0x8d5   :  { %v1608_v3 = vmul.f32 %v4513_v29, %v1536_v46  ;;  %v1602_v45 = vmul.f32 %v4511_v12, %v1601_v25  ;;  %vm1614_vm12 = vweird.f32 %v4513_v29  ;;  %1902 = vmatpush.msra.mxu3 %v4181_v33  ;;  %v4179_v25 = vld [vmem:[%s7018_s16 + $0xd8] sm:$0xff] }
 0x8d6   :  { %1681 = vmatmul.f32.gmra.mxu1 %v1644_v36  ;;  %vm1615_vm14 = vmor %vm1613_vm13, %vm1614_vm12  ;;  %v4177_v36 = vld [vmem:[%s7018_s16 + $0xc8] sm:$0xff] }
 0x8d7   :  { %v1609_v49 = vmul.f32 %v4513_v29, %v1608_v3  ;;  %v1606_v50 = vsel %vm1605_vm11, %v4511_v12, %v1602_v45  ;;  %1903 = vmatpush.msra.mxu3 %v4180_v61  ;;  %v4176_v3 = vld [vmem:[%s7018_s16 + $0xc0] sm:$0xff]  ;;  %v4175_v45 = vld [vmem:[%s7018_s16 + $0xb8] sm:$0xff] }
 0x8d8   :  { %v1623_v13 = vmul.f32 %v1606_v50, %v1527_v38  ;;  %v4174_v38 = vld [vmem:[%s7018_s16 + $0xb0] sm:$0xff]  ;;  %v4172_v50 = vld [vmem:[%s7018_s16 + $0xa0] sm:$0xff] }
 0x8d9   :  { %v1610_v2 = vmul.f32 0.5, %v1609_v49  ;;  %1904 = vmatpush.msra.mxu3 %v4179_v25  ;;  %v4173_v49 = vld [vmem:[%s7018_s16 + $0xa8] sm:$0xff]  ;;  %v5793_v25 = vld [vmem:[%s7016_s15 + $0x1] ss:$0 sm:$0xff] }
 0x8da   :  { %v1634_v10 = vmul.f32 %v5635_v14, %v1623_v13  ;;  %v4171_v13 = vld [vmem:[%s7018_s16 + $0x98] sm:$0xff] }
 0x8db   :  { %v1611_v17 = vsub.f32 1.5, %v1610_v2  ;;  %v4170_v2 = vld [vmem:[%s7018_s16 + $0x90] sm:$0xff] }
 0x8dc   :  { %v1645_v20 = vadd.f32 %v5643_v18, %v1634_v10  ;;  %v4169_v10 = vld [vmem:[%s7018_s16 + $0x88] sm:$0xff] }
 0x8dd   :  { %v1612_v21 = vmul.f32 %v4513_v29, %v1611_v17 }
 0x8de   :  { %1684 = vmatmul.f32.gmra.mxu1 %v1645_v20  ;;  %v4168_v20 = vld [vmem:[%s7018_s16 + $0x80] sm:$0xff] }
 0x8df   :  { %v1616_v53 = vsel %vm1615_vm14, %v4513_v29, %v1612_v21  ;;  %v4178_v29 = vld [vmem:[%s7018_s16 + $0xd0] sm:$0xff] }
 0x8e0   :  { %v1624_v5 = vmul.f32 %v1616_v53, %v1528_v55  ;;  %1905 = vmatpush.msra.mxu3 %v4178_v29 }
 0x8e2   :  { %v1635_v19 = vmul.f32 %v5635_v14, %v1624_v5  ;;  %1906 = vmatpush.msra.mxu3 %v4177_v36 }
 0x8e4   :  { %v1646_v42 = vadd.f32 %v5643_v18, %v1635_v19  ;;  %1907 = vmatpush.msra.mxu3 %v4176_v3 }
 0x8e6   :  { %1687 = vmatmul.f32.gmra.mxu1 %v1646_v42  ;;  %1908 = vmatpush.msra.mxu3 %v4175_v45 }
 0x8e8   :  { %1909 = vmatpush.msra.mxu3 %v4174_v38 }
 0x8ea   :  { %1910 = vmatpush.msra.mxu3 %v4173_v49 }
 0x8ec   :  { %1911 = vmatpush.msra.mxu3 %v4172_v50 }
 0x8ee   :  { %1912 = vmatpush.msra.mxu3 %v4171_v13 }
 0x8f0   :  { %1913 = vmatpush.msra.mxu3 %v4170_v2 }
 0x8f2   :  { %1914 = vmatpush.msra.mxu3 %v4169_v10 }
 0x8f4   :  { %1915 = vmatpush.msra.mxu3 %v4168_v20 }
 0x92b   :  { %v1667_v23 = vpop.f32.mrf.mxu1 }
 0x92c   :  { %v1668_v63 = vadd.f32 %v4395_v60, %v1667_v23 }
 0x92e   :  { %v5690_v32 = vmax.f32 %v1668_v63, 0.0 }
 0x930   :  { %1699 = vadd.xlane.f32.xlu2 %v5690_v32  ;;  %v1723_v58 = vmul.f32 %v5690_v32, %v5690_v32 }
 0x932   :  { %1731 = vadd.xlane.f32.xlu0 %v1723_v58 }
 0x933   :  { %v1670_v16 = vpop.f32.mrf.mxu1 }
 0x934   :  { %v1671_v43 = vadd.f32 %v4395_v60, %v1670_v16 }
 0x936   :  { %v5695_v14 = vmax.f32 %v1671_v43, 0.0 }
 0x938   :  { %1701 = vadd.xlane.f32.xlu2 %v5695_v14  ;;  %v1724_v18 = vmul.f32 %v5695_v14, %v5695_v14 }
 0x93a   :  { %1733 = vadd.xlane.f32.xlu0 %v1724_v18 }
 0x93b   :  { %v1673_v47 = vpop.f32.mrf.mxu1 }
 0x93c   :  { %v1674_v27 = vadd.f32 %v4395_v60, %v1673_v47 }
 0x93e   :  { %v5700_v34 = vmax.f32 %v1674_v27, 0.0 }
 0x940   :  { %1703 = vadd.xlane.f32.xlu2 %v5700_v34  ;;  %v1725_v35 = vmul.f32 %v5700_v34, %v5700_v34 }
 0x942   :  { %1735 = vadd.xlane.f32.xlu1 %v1725_v35 }
 0x943   :  { %v1676_v37 = vpop.f32.mrf.mxu1 }
 0x944   :  { %v1677_v24 = vadd.f32 %v4395_v60, %v1676_v37 }
 0x946   :  { %v5705_v11 = vmax.f32 %v1677_v24, 0.0 }
 0x948   :  { %1705 = vadd.xlane.f32.xlu0 %v5705_v11  ;;  %v1726_v7 = vmul.f32 %v5705_v11, %v5705_v11 }
 0x94a   :  { %1737 = vadd.xlane.f32.xlu2 %v1726_v7 }
 0x94b   :  { %v1679_v1 = vpop.f32.mrf.mxu1 }
 0x94c   :  { %v1680_v26 = vadd.f32 %v4395_v60, %v1679_v1 }
 0x94e   :  { %v5710_v40 = vmax.f32 %v1680_v26, 0.0 }
 0x950   :  { %1707 = vadd.xlane.f32.xlu0 %v5710_v40  ;;  %v1727_v6 = vmul.f32 %v5710_v40, %v5710_v40 }
 0x952   :  { %1739 = vadd.xlane.f32.xlu2 %v1727_v6 }
 0x953   :  { %v1682_v56 = vpop.f32.mrf.mxu1 }
 0x954   :  { %v1683_v28 = vadd.f32 %v4395_v60, %v1682_v56 }
 0x956   :  { %v5715_v15 = vmax.f32 %v1683_v28, 0.0 }
 0x958   :  { %1709 = vadd.xlane.f32.xlu0 %v5715_v15  ;;  %v1728_v39 = vmul.f32 %v5715_v15, %v5715_v15 }
 0x95a   :  { %1741 = vadd.xlane.f32.xlu2 %v1728_v39 }
 0x95b   :  { %v1685_v44 = vpop.f32.mrf.mxu1 }
 0x95c   :  { %v1686_v12 = vadd.f32 %v4395_v60, %v1685_v44 }
 0x95e   :  { %v5720_v46 = vmax.f32 %v1686_v12, 0.0 }
 0x960   :  { %1711 = vadd.xlane.f32.xlu0 %v5720_v46  ;;  %v1729_v4 = vmul.f32 %v5720_v46, %v5720_v46 }
 0x962   :  { %1743 = vadd.xlane.f32.xlu2 %v1729_v4 }
 0x963   :  { %v1688_v30 = vpop.f32.mrf.mxu1 }
 0x964   :  { %v1689_v51 = vadd.f32 %v4395_v60, %v1688_v30 }
 0x966   :  { %v5725_v52 = vmax.f32 %v1689_v51, 0.0  ;;  %v5785_v51 = vld [vmem:[%s7015_s14 + $0x1] ss:$0 sm:$0xff] }
 0x968   :  { %1713 = vadd.xlane.f32.xlu0 %v5725_v52  ;;  %v1730_v9 = vmul.f32 %v5725_v52, %v5725_v52 }
 0x96a   :  { %1745 = vadd.xlane.f32.xlu2 %v1730_v9 }
 0x9a3   :  { %v1700_v17 = vpop.xlane.xlu2 %1699 }
 0x9a4   :  { %v1715_v21 = vmul.f32 0.03125, %v1700_v17 }
 0x9a5   :  { %v1732_v55 = vpop.xlane.xlu0 %1731 }
 0x9a6   :  { %v1755_v53 = vmul.f32 %v1715_v21, %v1715_v21  ;;  %v1747_v5 = vmul.f32 0.03125, %v1732_v55  ;;  %v1771_v9 = vsub.f32 %v5690_v32, %v1715_v21 }
 0x9a8   :  { %v1763_v19 = vsub.f32 %v1747_v5, %v1755_v53 }
 0x9aa   :  { %v1779_v42 = vadd.f32 1e-05, %v1763_v19 }
 0x9ab   :  { %v1702_v60 = vpop.xlane.xlu2 %1701 }
 0x9ac   :  { %4514 = vrsqrt.f32 %v1779_v42  ;;  %v1716_v23 = vmul.f32 0.03125, %v1702_v60  ;;  %vm1793_vm1 = vweird.f32 %v1779_v42 }
 0x9ad   :  { %v1734_v63 = vpop.xlane.xlu0 %1733 }
 0x9ae   :  { %v1756_v58 = vmul.f32 %v1716_v23, %v1716_v23  ;;  %v1748_v16 = vmul.f32 0.03125, %v1734_v63  ;;  %v1772_v21 = vsub.f32 %v5695_v14, %v1716_v23 }
 0x9b0   :  { %v1764_v43 = vsub.f32 %v1748_v16, %v1756_v58 }
 0x9b2   :  { %v4515_v18 = vpop.eup %4514  ;;  %v1780_v47 = vadd.f32 1e-05, %v1764_v43 }
 0x9b3   :  { %v1788_v27 = vmul.f32 %v4515_v18, %v1779_v42  ;;  %v1704_v35 = vpop.xlane.xlu2 %1703  ;;  %vm1794_vm15 = vweird.f32 %v4515_v18 }
 0x9b4   :  { %4516 = vrsqrt.f32 %v1780_v47  ;;  %v5778_v37 = vmul.f32 0.03125, %v1704_v35  ;;  %vm1795_vm2 = vmor %vm1793_vm1, %vm1794_vm15  ;;  %vm1803_vm5 = vweird.f32 %v1780_v47 }
 0x9b5   :  { %v1789_v24 = vmul.f32 %v4515_v18, %v1788_v27  ;;  %v1736_v7 = vpop.xlane.xlu1 %1735 }
 0x9b6   :  { %v1757_v1 = vmul.f32 %v5778_v37, %v5778_v37  ;;  %v1749_v26 = vmul.f32 0.03125, %v1736_v7  ;;  %v1773_v7 = vsub.f32 %v5700_v34, %v5778_v37 }
 0x9b7   :  { %v1790_v6 = vmul.f32 0.5, %v1789_v24 }
 0x9b8   :  { %v1765_v56 = vsub.f32 %v1749_v26, %v1757_v1 }
 0x9b9   :  { %v1791_v28 = vsub.f32 1.5, %v1790_v6 }
 0x9ba   :  { %v4517_v39 = vpop.eup %4516  ;;  %v1781_v44 = vadd.f32 1e-05, %v1765_v56 }
 0x9bb   :  { %v1792_v12 = vmul.f32 %v4515_v18, %v1791_v28  ;;  %v1798_v4 = vmul.f32 %v4517_v39, %v1780_v47  ;;  %v1706_v30 = vpop.xlane.xlu0 %1705  ;;  %vm1804_vm3 = vweird.f32 %v4517_v39 }
 0x9bc   :  { %4518 = vrsqrt.f32 %v1781_v44  ;;  %v5788_v22 = vmul.f32 0.03125, %v1706_v30  ;;  %vm1805_vm6 = vmor %vm1803_vm5, %vm1804_vm3  ;;  %vm1813_vm8 = vweird.f32 %v1781_v44 }
 0x9bd   :  { %v1796_v62 = vsel %vm1795_vm2, %v4515_v18, %v1792_v12  ;;  %v1799_v33 = vmul.f32 %v4517_v39, %v1798_v4  ;;  %v1738_v61 = vpop.xlane.xlu2 %1737 }
 0x9be   :  { %v1758_v29 = vmul.f32 %v5788_v22, %v5788_v22  ;;  %v1750_v36 = vmul.f32 0.03125, %v1738_v61  ;;  %v1867_v3 = vmul.f32 %v1796_v62, %v1771_v9 }
 0x9bf   :  { %v1800_v45 = vmul.f32 0.5, %v1799_v33 }
 0x9c0   :  { %v1766_v38 = vsub.f32 %v1750_v36, %v1758_v29  ;;  %v1878_v32 = vmul.f32 %v5785_v51, %v1867_v3  ;;  %v1774_v36 = vsub.f32 %v5705_v11, %v5788_v22 }
 0x9c1   :  { %v1801_v49 = vsub.f32 1.5, %v1800_v45 }
 0x9c2   :  { %v4519_v50 = vpop.eup %4518  ;;  %v1782_v13 = vadd.f32 1e-05, %v1766_v38  ;;  %v1889_v2 = vadd.f32 %v5793_v25, %v1878_v32 }
 0x9c3   :  { %v1808_v10 = vmul.f32 %v4519_v50, %v1781_v44  ;;  %v1708_v17 = vpop.xlane.xlu0 %1707  ;;  %v1802_v20 = vmul.f32 %v4517_v39, %v1801_v49  ;;  %vm1814_vm7 = vweird.f32 %v4519_v50 }
 0x9c4   :  { %4520 = vrsqrt.f32 %v1782_v13  ;;  %v5800_v55 = vmul.f32 0.03125, %v1708_v17  ;;  %1916 = vmatmul.f32.vlgmr.msra.gmra.mxu3 %v1889_v2  ;;  %vm1815_vm9 = vmor %vm1813_vm8, %vm1814_vm7  ;;  %vm1823_vm11 = vweird.f32 %v1782_v13 }
 0x9c5   :  { %v1809_v53 = vmul.f32 %v4519_v50, %v1808_v10  ;;  %v1740_v5 = vpop.xlane.xlu2 %1739  ;;  %v1806_v19 = vsel %vm1805_vm6, %v4517_v39, %v1802_v20 }
 0x9c6   :  { %v1759_v42 = vmul.f32 %v5800_v55, %v5800_v55  ;;  %v1751_v60 = vmul.f32 0.03125, %v1740_v5  ;;  %v1868_v63 = vmul.f32 %v1806_v19, %v1772_v21 }
 0x9c7   :  { %v1810_v58 = vmul.f32 0.5, %v1809_v53 }
 0x9c8   :  { %v1767_v16 = vsub.f32 %v1751_v60, %v1759_v42  ;;  %v1879_v43 = vmul.f32 %v5785_v51, %v1868_v63  ;;  %v1775_v42 = vsub.f32 %v5710_v40, %v5800_v55 }
 0x9c9   :  { %v1811_v18 = vsub.f32 1.5, %v1810_v58 }
 0x9ca   :  { %v4521_v14 = vpop.eup %4520  ;;  %v1783_v23 = vadd.f32 1e-05, %v1767_v16  ;;  %v1890_v47 = vadd.f32 %v5793_v25, %v1879_v43 }
 0x9cb   :  { %v1818_v27 = vmul.f32 %v4521_v14, %v1782_v13  ;;  %v1710_v35 = vpop.xlane.xlu0 %1709  ;;  %v1812_v24 = vmul.f32 %v4519_v50, %v1811_v18  ;;  %vm1824_vm10 = vweird.f32 %v4521_v14 }
 0x9cc   :  { %4522 = vrsqrt.f32 %v1783_v23  ;;  %v5808_v1 = vmul.f32 0.03125, %v1710_v35  ;;  %1919 = vmatmul.f32.gmra.mxu3 %v1890_v47  ;;  %vm1825_vm12 = vmor %vm1823_vm11, %vm1824_vm10  ;;  %vm1833_vm14 = vweird.f32 %v1783_v23 }
 0x9cd   :  { %v1819_v26 = vmul.f32 %v4521_v14, %v1818_v27  ;;  %v1742_v6 = vpop.xlane.xlu2 %1741  ;;  %v1816_v56 = vsel %vm1815_vm9, %v4519_v50, %v1812_v24 }
 0x9ce   :  { %v1760_v28 = vmul.f32 %v5808_v1, %v5808_v1  ;;  %v1752_v39 = vmul.f32 0.03125, %v1742_v6  ;;  %v1869_v12 = vmul.f32 %v1816_v56, %v1773_v7  ;;  %v1776_v6 = vsub.f32 %v5715_v15, %v5808_v1 }
 0x9cf   :  { %v1820_v44 = vmul.f32 0.5, %v1819_v26 }
 0x9d0   :  { %v1768_v4 = vsub.f32 %v1752_v39, %v1760_v28  ;;  %v1880_v30 = vmul.f32 %v5785_v51, %v1869_v12 }
 0x9d1   :  { %v1821_v9 = vsub.f32 1.5, %v1820_v44 }
 0x9d2   :  { %v4523_v34 = vpop.eup %4522  ;;  %v1784_v37 = vadd.f32 1e-05, %v1768_v4  ;;  %v1891_v62 = vadd.f32 %v5793_v25, %v1880_v30 }
 0x9d3   :  { %v1828_v33 = vmul.f32 %v4523_v34, %v1783_v23  ;;  %v1712_v61 = vpop.xlane.xlu0 %1711  ;;  %v1822_v29 = vmul.f32 %v4521_v14, %v1821_v9  ;;  %vm1834_vm13 = vweird.f32 %v4523_v34 }
 0x9d4   :  { %4524 = vrsqrt.f32 %v1784_v37  ;;  %v5816_v3 = vmul.f32 0.03125, %v1712_v61  ;;  %1922 = vmatmul.f32.gmra.mxu3 %v1891_v62  ;;  %vm1835_vm15 = vmor %vm1833_vm14, %vm1834_vm13  ;;  %vm1843_vm2 = vweird.f32 %v1784_v37 }
 0x9d5   :  { %v1829_v45 = vmul.f32 %v4523_v34, %v1828_v33  ;;  %v1744_v38 = vpop.xlane.xlu2 %1743  ;;  %v1826_v32 = vsel %vm1825_vm12, %v4521_v14, %v1822_v29 }
 0x9d6   :  { %v1761_v49 = vmul.f32 %v5816_v3, %v5816_v3  ;;  %v1753_v50 = vmul.f32 0.03125, %v1744_v38  ;;  %v1870_v2 = vmul.f32 %v1826_v32, %v1774_v36  ;;  %v1777_v15 = vsub.f32 %v5720_v46, %v5816_v3 }
 0x9d7   :  { %v1830_v13 = vmul.f32 0.5, %v1829_v45 }
 0x9d8   :  { %v1769_v10 = vsub.f32 %v1753_v50, %v1761_v49  ;;  %v1881_v17 = vmul.f32 %v5785_v51, %v1870_v2  ;;  %v4404_v2 = vld [vmem:[%s7017_s17 + $0x1] ss:$0 sm:$0xff] }
 0x9d9   :  { %v1831_v20 = vsub.f32 1.5, %v1830_v13 }
 0x9da   :  { %v4525_v11 = vpop.eup %4524  ;;  %v1785_v22 = vadd.f32 1e-05, %v1769_v10  ;;  %v1892_v21 = vadd.f32 %v5793_v25, %v1881_v17 }
 0x9db   :  { %v1838_v53 = vmul.f32 %v4525_v11, %v1784_v37  ;;  %v1714_v5 = vpop.xlane.xlu0 %1713  ;;  %v1832_v19 = vmul.f32 %v4523_v34, %v1831_v20  ;;  %vm1844_vm1 = vweird.f32 %v4525_v11 }
 0x9dc   :  { %4526 = vrsqrt.f32 %v1785_v22  ;;  %v1722_v60 = vmul.f32 0.03125, %v1714_v5  ;;  %1925 = vmatmul.f32.gmra.mxu3 %v1892_v21  ;;  %vm1845_vm3 = vmor %vm1843_vm2, %vm1844_vm1  ;;  %vm1853_vm6 = vweird.f32 %v1785_v22 }
 0x9dd   :  { %v1839_v63 = vmul.f32 %v4525_v11, %v1838_v53  ;;  %v1746_v58 = vpop.xlane.xlu2 %1745  ;;  %v1836_v16 = vsel %vm1835_vm15, %v4523_v34, %v1832_v19 }
 0x9de   :  { %v1762_v43 = vmul.f32 %v1722_v60, %v1722_v60  ;;  %v1754_v18 = vmul.f32 0.03125, %v1746_v58  ;;  %v1871_v14 = vmul.f32 %v1836_v16, %v1775_v42  ;;  %v1778_v32 = vsub.f32 %v5725_v52, %v1722_v60 }
 0x9df   :  { %v1840_v47 = vmul.f32 0.5, %v1839_v63 }
 0x9e0   :  { %v1770_v27 = vsub.f32 %v1754_v18, %v1762_v43  ;;  %v1882_v23 = vmul.f32 %v5785_v51, %v1871_v14 }
 0x9e1   :  { %v1841_v35 = vsub.f32 1.5, %v1840_v47 }
 0x9e2   :  { %v4527_v24 = vpop.eup %4526  ;;  %v1786_v7 = vadd.f32 1e-05, %v1770_v27  ;;  %v1893_v40 = vadd.f32 %v5793_v25, %v1882_v23 }
 0x9e3   :  { %v1848_v55 = vmul.f32 %v4527_v24, %v1785_v22  ;;  %v1842_v26 = vmul.f32 %v4525_v11, %v1841_v35  ;;  %vm1854_vm5 = vweird.f32 %v4527_v24 }
 0x9e4   :  { %4528 = vrsqrt.f32 %v1786_v7  ;;  %1928 = vmatmul.f32.gmra.mxu3 %v1893_v40  ;;  %vm1855_vm7 = vmor %vm1853_vm6, %vm1854_vm5  ;;  %vm1863_vm9 = vweird.f32 %v1786_v7 }
 0x9e5   :  { %v1849_v56 = vmul.f32 %v4527_v24, %v1848_v55  ;;  %v1846_v28 = vsel %vm1845_vm3, %v4525_v11, %v1842_v26 }
 0x9e6   :  { %v1872_v39 = vmul.f32 %v1846_v28, %v1776_v6  ;;  %v4202_v28 = vld [vmem:[%s7049_s3 + $0x178] sm:$0xff] }
 0x9e7   :  { %v1850_v12 = vmul.f32 0.5, %v1849_v56  ;;  %2196 = vmatpush.msra.mxu2 %v4202_v28  ;;  %v5938_v28 = vld [vmem:[%s7050_s30 + $0x2] ss:$0 sm:$0xff] }
 0x9e8   :  { %v1883_v44 = vmul.f32 %v5785_v51, %v1872_v39  ;;  %v4201_v39 = vld [vmem:[%s7049_s3 + $0x170] sm:$0xff] }
 0x9e9   :  { %v1851_v4 = vsub.f32 1.5, %v1850_v12  ;;  %2197 = vmatpush.msra.mxu2 %v4201_v39  ;;  %v4200_v12 = vld [vmem:[%s7049_s3 + $0x168] sm:$0xff] }
 0x9ea   :  { %v4529_v30 = vpop.eup %4528  ;;  %v1894_v9 = vadd.f32 %v5793_v25, %v1883_v44  ;;  %v4199_v44 = vld [vmem:[%s7049_s3 + $0x160] sm:$0xff] }
 0x9eb   :  { %v1858_v34 = vmul.f32 %v4529_v30, %v1786_v7  ;;  %v1852_v37 = vmul.f32 %v4527_v24, %v1851_v4  ;;  %vm1864_vm8 = vweird.f32 %v4529_v30  ;;  %2198 = vmatpush.msra.mxu2 %v4200_v12  ;;  %v4198_v4 = vld [vmem:[%s7049_s3 + $0x158] sm:$0xff] }
 0x9ec   :  { %1931 = vmatmul.f32.gmra.mxu3 %v1894_v9  ;;  %vm1865_vm10 = vmor %vm1863_vm9, %vm1864_vm8  ;;  %v4196_v9 = vld [vmem:[%s7049_s3 + $0x148] sm:$0xff] }
 0x9ed   :  { %v1859_v1 = vmul.f32 %v4529_v30, %v1858_v34  ;;  %v1856_v62 = vsel %vm1855_vm7, %v4527_v24, %v1852_v37  ;;  %2199 = vmatpush.msra.mxu2 %v4199_v44  ;;  %v4195_v34 = vld [vmem:[%s7049_s3 + $0x140] sm:$0xff]  ;;  %v4194_v37 = vld [vmem:[%s7049_s3 + $0x138] sm:$0xff] }
 0x9ee   :  { %v1873_v33 = vmul.f32 %v1856_v62, %v1777_v15  ;;  %v4193_v15 = vld [vmem:[%s7049_s3 + $0x130] sm:$0xff]  ;;  %v4191_v62 = vld [vmem:[%s7049_s3 + $0x120] sm:$0xff] }
 0x9ef   :  { %v1860_v61 = vmul.f32 0.5, %v1859_v1  ;;  %2200 = vmatpush.msra.mxu2 %v4198_v4  ;;  %v4192_v1 = vld [vmem:[%s7049_s3 + $0x128] sm:$0xff] }
 0x9f0   :  { %v1884_v29 = vmul.f32 %v5785_v51, %v1873_v33  ;;  %v4190_v33 = vld [vmem:[%s7049_s3 + $0x118] sm:$0xff] }
 0x9f1   :  { %v1861_v36 = vsub.f32 1.5, %v1860_v61  ;;  %v4189_v61 = vld [vmem:[%s7049_s3 + $0x110] sm:$0xff] }
 0x9f2   :  { %v1895_v45 = vadd.f32 %v5793_v25, %v1884_v29  ;;  %v4188_v29 = vld [vmem:[%s7049_s3 + $0x108] sm:$0xff] }
 0x9f3   :  { %v1862_v38 = vmul.f32 %v4529_v30, %v1861_v36 }
 0x9f4   :  { %1934 = vmatmul.f32.gmra.mxu3 %v1895_v45  ;;  %v4187_v45 = vld [vmem:[%s7049_s3 + $0x100] sm:$0xff] }
 0x9f5   :  { %v1866_v49 = vsel %vm1865_vm10, %v4529_v30, %v1862_v38  ;;  %v4197_v30 = vld [vmem:[%s7049_s3 + $0x150] sm:$0xff] }
 0x9f6   :  { %v1874_v46 = vmul.f32 %v1866_v49, %v1778_v32  ;;  %2201 = vmatpush.msra.mxu2 %v4197_v30 }
 0x9f8   :  { %v1885_v3 = vmul.f32 %v5785_v51, %v1874_v46  ;;  %2202 = vmatpush.msra.mxu2 %v4196_v9 }
 0x9fa   :  { %v1896_v50 = vadd.f32 %v5793_v25, %v1885_v3  ;;  %2203 = vmatpush.msra.mxu2 %v4195_v34 }
 0x9fc   :  { %1937 = vmatmul.f32.gmra.mxu3 %v1896_v50  ;;  %2204 = vmatpush.msra.mxu2 %v4194_v37 }
 0x9fe   :  { %2205 = vmatpush.msra.mxu2 %v4193_v15 }
 0xa00   :  { %2206 = vmatpush.msra.mxu2 %v4192_v1 }
 0xa02   :  { %2207 = vmatpush.msra.mxu2 %v4191_v62 }
 0xa04   :  { %2208 = vmatpush.msra.mxu2 %v4190_v33 }
 0xa06   :  { %2209 = vmatpush.msra.mxu2 %v4189_v61 }
 0xa08   :  { %2210 = vmatpush.msra.mxu2 %v4188_v29 }
 0xa0a   :  { %2211 = vmatpush.msra.mxu2 %v4187_v45 }
 0xa47   :  { %v1917_v13 = vpop.f32.mrf.mxu3 }
 0xa48   :  { %v1918_v10 = vadd.f32 %v4404_v2, %v1917_v13 }
 0xa4a   :  { %v5840_v17 = vmax.f32 %v1918_v10, 0.0 }
 0xa4c   :  { %1995 = vadd.xlane.f32.xlu0 %v5840_v17  ;;  %v2019_v52 = vmul.f32 %v5840_v17, %v5840_v17 }
 0xa4e   :  { %2027 = vadd.xlane.f32.xlu2 %v2019_v52 }
 0xa4f   :  { %v1920_v20 = vpop.f32.mrf.mxu3 }
 0xa50   :  { %v1921_v11 = vadd.f32 %v4404_v2, %v1920_v20 }
 0xa52   :  { %v5845_v51 = vmax.f32 %v1921_v11, 0.0 }
 0xa54   :  { %1997 = vadd.xlane.f32.xlu0 %v5845_v51  ;;  %v2020_v25 = vmul.f32 %v5845_v51, %v5845_v51 }
 0xa56   :  { %2029 = vadd.xlane.f32.xlu2 %v2020_v25 }
 0xa57   :  { %v1923_v22 = vpop.f32.mrf.mxu3 }
 0xa58   :  { %v1924_v21 = vadd.f32 %v4404_v2, %v1923_v22 }
 0xa5a   :  { %v5850_v53 = vmax.f32 %v1924_v21, 0.0 }
 0xa5c   :  { %1999 = vadd.xlane.f32.xlu0 %v5850_v53  ;;  %v2021_v5 = vmul.f32 %v5850_v53, %v5850_v53 }
 0xa5e   :  { %2031 = vadd.xlane.f32.xlu2 %v2021_v5 }
 0xa5f   :  { %v1926_v19 = vpop.f32.mrf.mxu3 }
 0xa60   :  { %v1927_v42 = vadd.f32 %v4404_v2, %v1926_v19 }
 0xa62   :  { %v5855_v60 = vmax.f32 %v1927_v42, 0.0 }
 0xa64   :  { %2001 = vadd.xlane.f32.xlu0 %v5855_v60  ;;  %v2022_v63 = vmul.f32 %v5855_v60, %v5855_v60 }
 0xa66   :  { %2033 = vadd.xlane.f32.xlu2 %v2022_v63 }
 0xa67   :  { %v1929_v58 = vpop.f32.mrf.mxu3 }
 0xa68   :  { %v1930_v16 = vadd.f32 %v4404_v2, %v1929_v58 }
 0xa6a   :  { %v5860_v43 = vmax.f32 %v1930_v16, 0.0 }
 0xa6c   :  { %2003 = vadd.xlane.f32.xlu0 %v5860_v43  ;;  %v2023_v18 = vmul.f32 %v5860_v43, %v5860_v43 }
 0xa6e   :  { %2035 = vadd.xlane.f32.xlu2 %v2023_v18 }
 0xa6f   :  { %v1932_v14 = vpop.f32.mrf.mxu3 }
 0xa70   :  { %v1933_v47 = vadd.f32 %v4404_v2, %v1932_v14 }
 0xa72   :  { %v5865_v27 = vmax.f32 %v1933_v47, 0.0 }
 0xa74   :  { %2005 = vadd.xlane.f32.xlu0 %v5865_v27  ;;  %v2024_v23 = vmul.f32 %v5865_v27, %v5865_v27 }
 0xa76   :  { %2037 = vadd.xlane.f32.xlu2 %v2024_v23 }
 0xa77   :  { %v1935_v35 = vpop.f32.mrf.mxu3 }
 0xa78   :  { %v1936_v24 = vadd.f32 %v4404_v2, %v1935_v35 }
 0xa7a   :  { %v5870_v7 = vmax.f32 %v1936_v24, 0.0 }
 0xa7c   :  { %2007 = vadd.xlane.f32.xlu0 %v5870_v7  ;;  %v2025_v40 = vmul.f32 %v5870_v7, %v5870_v7 }
 0xa7e   :  { %2039 = vadd.xlane.f32.xlu2 %v2025_v40 }
 0xa7f   :  { %v1938_v55 = vpop.f32.mrf.mxu3 }
 0xa80   :  { %v1939_v26 = vadd.f32 %v4404_v2, %v1938_v55 }
 0xa82   :  { %v5875_v6 = vmax.f32 %v1939_v26, 0.0 }
 0xa84   :  { %2009 = vadd.xlane.f32.xlu0 %v5875_v6  ;;  %v2026_v56 = vmul.f32 %v5875_v6, %v5875_v6 }
 0xa86   :  { %2041 = vadd.xlane.f32.xlu2 %v2026_v56 }
 0xabf   :  { %v1996_v36 = vpop.xlane.xlu0 %1995 }
 0xac0   :  { %v2011_v38 = vmul.f32 0.03125, %v1996_v36 }
 0xac1   :  { %v2028_v32 = vpop.xlane.xlu2 %2027 }
 0xac2   :  { %v2051_v49 = vmul.f32 %v2011_v38, %v2011_v38  ;;  %v2043_v46 = vmul.f32 0.03125, %v2028_v32  ;;  %v2067_v26 = vsub.f32 %v5840_v17, %v2011_v38  ;;  %v5945_v17 = vld [vmem:[%s7051_s8 + $0x2] ss:$0 sm:$0xff] }
 0xac4   :  { %v2059_v3 = vsub.f32 %v2043_v46, %v2051_v49 }
 0xac6   :  { %v2075_v50 = vadd.f32 1e-05, %v2059_v3 }
 0xac7   :  { %v1998_v2 = vpop.xlane.xlu0 %1997 }
 0xac8   :  { %4530 = vrsqrt.f32 %v2075_v50  ;;  %v2012_v13 = vmul.f32 0.03125, %v1998_v2  ;;  %vm2089_vm12 = vweird.f32 %v2075_v50 }
 0xac9   :  { %v2030_v10 = vpop.xlane.xlu2 %2029 }
 0xaca   :  { %v2052_v52 = vmul.f32 %v2012_v13, %v2012_v13  ;;  %v2044_v20 = vmul.f32 0.03125, %v2030_v10  ;;  %v2068_v38 = vsub.f32 %v5845_v51, %v2012_v13 }
 0xacc   :  { %v2060_v11 = vsub.f32 %v2044_v20, %v2052_v52 }
 0xace   :  { %v4531_v25 = vpop.eup %4530  ;;  %v2076_v22 = vadd.f32 1e-05, %v2060_v11 }
 0xacf   :  { %v2084_v21 = vmul.f32 %v4531_v25, %v2075_v50  ;;  %v2000_v5 = vpop.xlane.xlu0 %1999  ;;  %vm2090_vm11 = vweird.f32 %v4531_v25 }
 0xad0   :  { %4532 = vrsqrt.f32 %v2076_v22  ;;  %v5928_v19 = vmul.f32 0.03125, %v2000_v5  ;;  %vm2091_vm13 = vmor %vm2089_vm12, %vm2090_vm11  ;;  %vm2099_vm15 = vweird.f32 %v2076_v22 }
 0xad1   :  { %v2085_v42 = vmul.f32 %v4531_v25, %v2084_v21  ;;  %v2032_v63 = vpop.xlane.xlu2 %2031 }
 0xad2   :  { %v2053_v58 = vmul.f32 %v5928_v19, %v5928_v19  ;;  %v2045_v16 = vmul.f32 0.03125, %v2032_v63  ;;  %v2069_v63 = vsub.f32 %v5850_v53, %v5928_v19 }
 0xad3   :  { %v2086_v18 = vmul.f32 0.5, %v2085_v42 }
 0xad4   :  { %v2061_v14 = vsub.f32 %v2045_v16, %v2053_v58 }
 0xad5   :  { %v2087_v47 = vsub.f32 1.5, %v2086_v18 }
 0xad6   :  { %v4533_v23 = vpop.eup %4532  ;;  %v2077_v35 = vadd.f32 1e-05, %v2061_v14 }
 0xad7   :  { %v2088_v24 = vmul.f32 %v4531_v25, %v2087_v47  ;;  %v2094_v40 = vmul.f32 %v4533_v23, %v2076_v22  ;;  %v2002_v55 = vpop.xlane.xlu0 %2001  ;;  %vm2100_vm14 = vweird.f32 %v4533_v23 }
 0xad8   :  { %4534 = vrsqrt.f32 %v2077_v35  ;;  %v5933_v56 = vmul.f32 0.03125, %v2002_v55  ;;  %vm2101_vm1 = vmor %vm2099_vm15, %vm2100_vm14  ;;  %vm2109_vm3 = vweird.f32 %v2077_v35 }
 0xad9   :  { %v2092_v39 = vsel %vm2091_vm13, %v4531_v25, %v2088_v24  ;;  %v2095_v12 = vmul.f32 %v4533_v23, %v2094_v40  ;;  %v2034_v44 = vpop.xlane.xlu2 %2033 }
 0xada   :  { %v2054_v4 = vmul.f32 %v5933_v56, %v5933_v56  ;;  %v2046_v30 = vmul.f32 0.03125, %v2034_v44  ;;  %v2163_v9 = vmul.f32 %v2092_v39, %v2067_v26 }
 0xadb   :  { %v2096_v34 = vmul.f32 0.5, %v2095_v12 }
 0xadc   :  { %v2062_v37 = vsub.f32 %v2046_v30, %v2054_v4  ;;  %v2174_v15 = vmul.f32 %v5938_v28, %v2163_v9  ;;  %v2070_v30 = vsub.f32 %v5855_v60, %v5933_v56 }
 0xadd   :  { %v2097_v1 = vsub.f32 1.5, %v2096_v34 }
 0xade   :  { %v4535_v62 = vpop.eup %4534  ;;  %v2078_v33 = vadd.f32 1e-05, %v2062_v37  ;;  %v2185_v61 = vadd.f32 %v5945_v17, %v2174_v15 }
 0xadf   :  { %v2104_v29 = vmul.f32 %v4535_v62, %v2077_v35  ;;  %v2004_v36 = vpop.xlane.xlu0 %2003  ;;  %v2098_v45 = vmul.f32 %v4533_v23, %v2097_v1  ;;  %vm2110_vm2 = vweird.f32 %v4535_v62 }
 0xae0   :  { %4536 = vrsqrt.f32 %v2078_v33  ;;  %v5950_v32 = vmul.f32 0.03125, %v2004_v36  ;;  %2212 = vmatmul.f32.vlgmr.msra.gmra.mxu2 %v2185_v61  ;;  %vm2111_vm5 = vmor %vm2109_vm3, %vm2110_vm2  ;;  %vm2119_vm7 = vweird.f32 %v2078_v33 }
 0xae1   :  { %v2105_v49 = vmul.f32 %v4535_v62, %v2104_v29  ;;  %v2036_v46 = vpop.xlane.xlu2 %2035  ;;  %v2102_v3 = vsel %vm2101_vm1, %v4533_v23, %v2098_v45 }
 0xae2   :  { %v2055_v50 = vmul.f32 %v5950_v32, %v5950_v32  ;;  %v2047_v2 = vmul.f32 0.03125, %v2036_v46  ;;  %v2164_v10 = vmul.f32 %v2102_v3, %v2068_v38 }
 0xae3   :  { %v2106_v52 = vmul.f32 0.5, %v2105_v49 }
 0xae4   :  { %v2063_v20 = vsub.f32 %v2047_v2, %v2055_v50  ;;  %v2175_v11 = vmul.f32 %v5938_v28, %v2164_v10  ;;  %v2071_v50 = vsub.f32 %v5860_v43, %v5950_v32 }
 0xae5   :  { %v2107_v25 = vsub.f32 1.5, %v2106_v52 }
 0xae6   :  { %v4537_v51 = vpop.eup %4536  ;;  %v2079_v13 = vadd.f32 1e-05, %v2063_v20  ;;  %v2186_v22 = vadd.f32 %v5945_v17, %v2175_v11 }
 0xae7   :  { %v2114_v21 = vmul.f32 %v4537_v51, %v2078_v33  ;;  %v2006_v5 = vpop.xlane.xlu0 %2005  ;;  %v2108_v42 = vmul.f32 %v4535_v62, %v2107_v25  ;;  %vm2120_vm6 = vweird.f32 %v4537_v51 }
 0xae8   :  { %4538 = vrsqrt.f32 %v2079_v13  ;;  %v5958_v58 = vmul.f32 0.03125, %v2006_v5  ;;  %2215 = vmatmul.f32.gmra.mxu2 %v2186_v22  ;;  %vm2121_vm8 = vmor %vm2119_vm7, %vm2120_vm6  ;;  %vm2129_vm10 = vweird.f32 %v2079_v13 }
 0xae9   :  { %v2115_v16 = vmul.f32 %v4537_v51, %v2114_v21  ;;  %v2038_v18 = vpop.xlane.xlu2 %2037  ;;  %v2112_v14 = vsel %vm2111_vm5, %v4535_v62, %v2108_v42 }
 0xaea   :  { %v2056_v47 = vmul.f32 %v5958_v58, %v5958_v58  ;;  %v2048_v23 = vmul.f32 0.03125, %v2038_v18  ;;  %v2165_v24 = vmul.f32 %v2112_v14, %v2069_v63  ;;  %v2072_v18 = vsub.f32 %v5865_v27, %v5958_v58 }
 0xaeb   :  { %v2116_v35 = vmul.f32 0.5, %v2115_v16 }
 0xaec   :  { %v2064_v40 = vsub.f32 %v2048_v23, %v2056_v47  ;;  %v2176_v55 = vmul.f32 %v5938_v28, %v2165_v24 }
 0xaed   :  { %v2117_v26 = vsub.f32 1.5, %v2116_v35 }
 0xaee   :  { %v4539_v53 = vpop.eup %4538  ;;  %v2080_v19 = vadd.f32 1e-05, %v2064_v40  ;;  %v2187_v39 = vadd.f32 %v5945_v17, %v2176_v55 }
 0xaef   :  { %v2124_v12 = vmul.f32 %v4539_v53, %v2079_v13  ;;  %v2008_v44 = vpop.xlane.xlu0 %2007  ;;  %v2118_v4 = vmul.f32 %v4537_v51, %v2117_v26  ;;  %vm2130_vm9 = vweird.f32 %v4539_v53 }
 0xaf0   :  { %4540 = vrsqrt.f32 %v2080_v19  ;;  %v5966_v9 = vmul.f32 0.03125, %v2008_v44  ;;  %2218 = vmatmul.f32.gmra.mxu2 %v2187_v39  ;;  %vm2131_vm11 = vmor %vm2129_vm10, %vm2130_vm9  ;;  %vm2139_vm13 = vweird.f32 %v2080_v19 }
 0xaf1   :  { %v2125_v34 = vmul.f32 %v4539_v53, %v2124_v12  ;;  %v2040_v37 = vpop.xlane.xlu2 %2039  ;;  %v2122_v15 = vsel %vm2121_vm8, %v4537_v51, %v2118_v4 }
 0xaf2   :  { %v2057_v1 = vmul.f32 %v5966_v9, %v5966_v9  ;;  %v2049_v62 = vmul.f32 0.03125, %v2040_v37  ;;  %v2166_v61 = vmul.f32 %v2122_v15, %v2070_v30  ;;  %v2073_v27 = vsub.f32 %v5870_v7, %v5966_v9 }
 0xaf3   :  { %v2126_v33 = vmul.f32 0.5, %v2125_v34 }
 0xaf4   :  { %v2065_v29 = vsub.f32 %v2049_v62, %v2057_v1  ;;  %v2177_v36 = vmul.f32 %v5938_v28, %v2166_v61  ;;  %v4414_v61 = vld [vmem:[%s7052_s6 + $0x2] ss:$0 sm:$0xff] }
 0xaf5   :  { %v2127_v45 = vsub.f32 1.5, %v2126_v33 }
 0xaf6   :  { %v4541_v60 = vpop.eup %4540  ;;  %v2081_v56 = vadd.f32 1e-05, %v2065_v29  ;;  %v2188_v38 = vadd.f32 %v5945_v17, %v2177_v36 }
 0xaf7   :  { %v2134_v49 = vmul.f32 %v4541_v60, %v2080_v19  ;;  %v2010_v46 = vpop.xlane.xlu0 %2009  ;;  %v2128_v3 = vmul.f32 %v4539_v53, %v2127_v45  ;;  %vm2140_vm12 = vweird.f32 %v4541_v60 }
 0xaf8   :  { %4542 = vrsqrt.f32 %v2081_v56  ;;  %v2018_v2 = vmul.f32 0.03125, %v2010_v46  ;;  %2221 = vmatmul.f32.gmra.mxu2 %v2188_v38  ;;  %vm2141_vm14 = vmor %vm2139_vm13, %vm2140_vm12  ;;  %vm2149_vm1 = vweird.f32 %v2081_v56 }
 0xaf9   :  { %v2135_v10 = vmul.f32 %v4541_v60, %v2134_v49  ;;  %v2042_v52 = vpop.xlane.xlu2 %2041  ;;  %v2132_v20 = vsel %vm2131_vm11, %v4539_v53, %v2128_v3 }
 0xafa   :  { %v2058_v11 = vmul.f32 %v2018_v2, %v2018_v2  ;;  %v2050_v25 = vmul.f32 0.03125, %v2042_v52  ;;  %v2167_v51 = vmul.f32 %v2132_v20, %v2071_v50  ;;  %v2074_v15 = vsub.f32 %v5875_v6, %v2018_v2 }
 0xafb   :  { %v2136_v22 = vmul.f32 0.5, %v2135_v10 }
 0xafc   :  { %v2066_v21 = vsub.f32 %v2050_v25, %v2058_v11  ;;  %v2178_v13 = vmul.f32 %v5938_v28, %v2167_v51 }
 0xafd   :  { %v2137_v5 = vsub.f32 1.5, %v2136_v22 }
 0xafe   :  { %v4543_v42 = vpop.eup %4542  ;;  %v2082_v63 = vadd.f32 1e-05, %v2066_v21  ;;  %v2189_v43 = vadd.f32 %v5945_v17, %v2178_v13 }
 0xaff   :  { %v2144_v32 = vmul.f32 %v4543_v42, %v2081_v56  ;;  %v2138_v16 = vmul.f32 %v4541_v60, %v2137_v5  ;;  %vm2150_vm15 = vweird.f32 %v4543_v42 }
 0xb00   :  { %4544 = vrsqrt.f32 %v2082_v63  ;;  %2224 = vmatmul.f32.gmra.mxu2 %v2189_v43  ;;  %vm2151_vm2 = vmor %vm2149_vm1, %vm2150_vm15  ;;  %vm2159_vm5 = vweird.f32 %v2082_v63 }
 0xb01   :  { %v2145_v14 = vmul.f32 %v4543_v42, %v2144_v32  ;;  %v2142_v47 = vsel %vm2141_vm14, %v4541_v60, %v2138_v16 }
 0xb02   :  { %v2168_v23 = vmul.f32 %v2142_v47, %v2072_v18  ;;  %v4221_v47 = vld [vmem:[%s7053_s7 + $0x178] sm:$0xff] }
 0xb03   :  { %v2146_v24 = vmul.f32 0.5, %v2145_v14  ;;  %2446 = vmatpush.msrb.mxu0 %v4221_v47  ;;  %4349 = vmatpush.msra.mxu1 %v4221_v47  ;;  %v6082_v47 = vld [vmem:[%s7054_s27 + $0x2] ss:$0 sm:$0xff] }
 0xb04   :  { %v2179_v35 = vmul.f32 %v5938_v28, %v2168_v23  ;;  %v4220_v23 = vld [vmem:[%s7053_s7 + $0x170] sm:$0xff] }
 0xb05   :  { %v2147_v40 = vsub.f32 1.5, %v2146_v24  ;;  %2447 = vmatpush.msrb.mxu0 %v4220_v23  ;;  %4350 = vmatpush.msra.mxu1 %v4220_v23  ;;  %v4219_v24 = vld [vmem:[%s7053_s7 + $0x168] sm:$0xff] }
 0xb06   :  { %v4545_v55 = vpop.eup %4544  ;;  %v2190_v26 = vadd.f32 %v5945_v17, %v2179_v35  ;;  %v4218_v35 = vld [vmem:[%s7053_s7 + $0x160] sm:$0xff] }
 0xb07   :  { %v2154_v53 = vmul.f32 %v4545_v55, %v2082_v63  ;;  %v2148_v19 = vmul.f32 %v4543_v42, %v2147_v40  ;;  %vm2160_vm3 = vweird.f32 %v4545_v55  ;;  %2448 = vmatpush.msrb.mxu0 %v4219_v24  ;;  %4351 = vmatpush.msra.mxu1 %v4219_v24  ;;  %v4217_v40 = vld [vmem:[%s7053_s7 + $0x158] sm:$0xff] }
 0xb08   :  { %2227 = vmatmul.f32.gmra.mxu2 %v2190_v26  ;;  %vm2161_vm6 = vmor %vm2159_vm5, %vm2160_vm3  ;;  %v4215_v26 = vld [vmem:[%s7053_s7 + $0x148] sm:$0xff] }
 0xb09   :  { %v2155_v58 = vmul.f32 %v4545_v55, %v2154_v53  ;;  %v2152_v39 = vsel %vm2151_vm2, %v4543_v42, %v2148_v19  ;;  %2449 = vmatpush.msrb.mxu0 %v4218_v35  ;;  %4352 = vmatpush.msra.mxu1 %v4218_v35  ;;  %v4214_v53 = vld [vmem:[%s7053_s7 + $0x140] sm:$0xff]  ;;  %v4213_v19 = vld [vmem:[%s7053_s7 + $0x138] sm:$0xff] }
 0xb0a   :  { %v2169_v12 = vmul.f32 %v2152_v39, %v2073_v27  ;;  %v4212_v27 = vld [vmem:[%s7053_s7 + $0x130] sm:$0xff]  ;;  %v4210_v39 = vld [vmem:[%s7053_s7 + $0x120] sm:$0xff] }
 0xb0b   :  { %v2156_v44 = vmul.f32 0.5, %v2155_v58  ;;  %2450 = vmatpush.msrb.mxu0 %v4217_v40  ;;  %4353 = vmatpush.msra.mxu1 %v4217_v40  ;;  %v4211_v58 = vld [vmem:[%s7053_s7 + $0x128] sm:$0xff] }
 0xb0c   :  { %v2180_v4 = vmul.f32 %v5938_v28, %v2169_v12  ;;  %v4209_v12 = vld [vmem:[%s7053_s7 + $0x118] sm:$0xff] }
 0xb0d   :  { %v2157_v30 = vsub.f32 1.5, %v2156_v44  ;;  %v4208_v44 = vld [vmem:[%s7053_s7 + $0x110] sm:$0xff] }
 0xb0e   :  { %v2191_v34 = vadd.f32 %v5945_v17, %v2180_v4  ;;  %v4207_v4 = vld [vmem:[%s7053_s7 + $0x108] sm:$0xff] }
 0xb0f   :  { %v2158_v37 = vmul.f32 %v4545_v55, %v2157_v30 }
 0xb10   :  { %2230 = vmatmul.f32.gmra.mxu2 %v2191_v34  ;;  %v4206_v34 = vld [vmem:[%s7053_s7 + $0x100] sm:$0xff] }
 0xb11   :  { %v2162_v1 = vsel %vm2161_vm6, %v4545_v55, %v2158_v37  ;;  %v4216_v55 = vld [vmem:[%s7053_s7 + $0x150] sm:$0xff] }
 0xb12   :  { %v2170_v7 = vmul.f32 %v2162_v1, %v2074_v15  ;;  %2451 = vmatpush.msrb.mxu0 %v4216_v55  ;;  %4354 = vmatpush.msra.mxu1 %v4216_v55 }
 0xb14   :  { %v2181_v9 = vmul.f32 %v5938_v28, %v2170_v7  ;;  %2452 = vmatpush.msrb.mxu0 %v4215_v26  ;;  %4355 = vmatpush.msra.mxu1 %v4215_v26 }
 0xb16   :  { %v2192_v62 = vadd.f32 %v5945_v17, %v2181_v9  ;;  %2453 = vmatpush.msrb.mxu0 %v4214_v53  ;;  %4356 = vmatpush.msra.mxu1 %v4214_v53  ;;  %v6087_v53 = vld [vmem:[%s7055_s25 + $0x2] ss:$0 sm:$0xff] }
 0xb18   :  { %2233 = vmatmul.f32.gmra.mxu2 %v2192_v62  ;;  %2454 = vmatpush.msrb.mxu0 %v4213_v19 }
 0xb19   :  { %4357 = vmatpush.msra.mxu1 %v4213_v19 }
 0xb1a   :  { %2455 = vmatpush.msrb.mxu0 %v4212_v27 }
 0xb1b   :  { %4358 = vmatpush.msra.mxu1 %v4212_v27 }
 0xb1c   :  { %2456 = vmatpush.msrb.mxu0 %v4211_v58 }
 0xb1d   :  { %4359 = vmatpush.msra.mxu1 %v4211_v58 }
 0xb1e   :  { %2457 = vmatpush.msrb.mxu0 %v4210_v39 }
 0xb1f   :  { %4360 = vmatpush.msra.mxu1 %v4210_v39 }
 0xb20   :  { %2458 = vmatpush.msrb.mxu0 %v4209_v12 }
 0xb21   :  { %4361 = vmatpush.msra.mxu1 %v4209_v12 }
 0xb22   :  { %2459 = vmatpush.msrb.mxu0 %v4208_v44 }
 0xb23   :  { %4362 = vmatpush.msra.mxu1 %v4208_v44 }
 0xb24   :  { %2460 = vmatpush.msrb.mxu0 %v4207_v4 }
 0xb25   :  { %4363 = vmatpush.msra.mxu1 %v4207_v4 }
 0xb26   :  { %2461 = vmatpush.msrb.mxu0 %v4206_v34 }
 0xb27   :  { %4364 = vmatpush.msra.mxu1 %v4206_v34 }
 0xb63   :  { %v2213_v33 = vpop.f32.mrf.mxu2 }
 0xb64   :  { %v2214_v29 = vadd.f32 %v4414_v61, %v2213_v33 }
 0xb66   :  { %v5990_v36 = vmax.f32 %v2214_v29, 0.0 }
 0xb68   :  { %2245 = vadd.xlane.f32.xlu0 %v5990_v36  ;;  %v2269_v6 = vmul.f32 %v5990_v36, %v5990_v36 }
 0xb6a   :  { %2277 = vadd.xlane.f32.xlu2 %v2269_v6 }
 0xb6b   :  { %v2216_v45 = vpop.f32.mrf.mxu2 }
 0xb6c   :  { %v2217_v60 = vadd.f32 %v4414_v61, %v2216_v45 }
 0xb6e   :  { %v5995_v28 = vmax.f32 %v2217_v60, 0.0 }
 0xb70   :  { %2247 = vadd.xlane.f32.xlu0 %v5995_v28  ;;  %v2270_v17 = vmul.f32 %v5995_v28, %v5995_v28 }
 0xb72   :  { %2279 = vadd.xlane.f32.xlu2 %v2270_v17 }
 0xb73   :  { %v2219_v56 = vpop.f32.mrf.mxu2 }
 0xb74   :  { %v2220_v38 = vadd.f32 %v4414_v61, %v2219_v56 }
 0xb76   :  { %v6000_v49 = vmax.f32 %v2220_v38, 0.0 }
 0xb78   :  { %2249 = vadd.xlane.f32.xlu0 %v6000_v49  ;;  %v2271_v46 = vmul.f32 %v6000_v49, %v6000_v49 }
 0xb7a   :  { %2281 = vadd.xlane.f32.xlu2 %v2271_v46 }
 0xb7b   :  { %v2222_v3 = vpop.f32.mrf.mxu2 }
 0xb7c   :  { %v2223_v50 = vadd.f32 %v4414_v61, %v2222_v3 }
 0xb7e   :  { %v6005_v2 = vmax.f32 %v2223_v50, 0.0 }
 0xb80   :  { %2251 = vadd.xlane.f32.xlu1 %v6005_v2  ;;  %v2272_v10 = vmul.f32 %v6005_v2, %v6005_v2 }
 0xb82   :  { %2283 = vadd.xlane.f32.xlu0 %v2272_v10 }
 0xb83   :  { %v2225_v52 = vpop.f32.mrf.mxu2 }
 0xb84   :  { %v2226_v20 = vadd.f32 %v4414_v61, %v2225_v52 }
 0xb86   :  { %v6010_v11 = vmax.f32 %v2226_v20, 0.0 }
 0xb88   :  { %v2273_v43 = vmul.f32 %v6010_v11, %v6010_v11 }
 0xb8a   :  { %2253 = vadd.xlane.f32.xlu0 %v6010_v11 }
 0xb8b   :  { %v2228_v25 = vpop.f32.mrf.mxu2 }
 0xb8c   :  { %v2229_v32 = vadd.f32 %v4414_v61, %v2228_v25 }
 0xb8e   :  { %v6025_v18 = vmax.f32 %v2229_v32, 0.0 }
 0xb90   :  { %v2274_v14 = vmul.f32 %v6025_v18, %v6025_v18 }
 0xb93   :  { %v2231_v51 = vpop.f32.mrf.mxu2 }
 0xb94   :  { %v2232_v22 = vadd.f32 %v4414_v61, %v2231_v51 }
 0xb96   :  { %v6013_v21 = vmax.f32 %v2232_v22, 0.0 }
 0xb98   :  { %2257 = vadd.xlane.f32.xlu2 %v6013_v21  ;;  %v2275_v13 = vmul.f32 %v6013_v21, %v6013_v21 }
 0xb9a   :  { %2289 = vadd.xlane.f32.xlu1 %v2275_v13 }
 0xb9b   :  { %v2234_v5 = vpop.f32.mrf.mxu2 }
 0xb9c   :  { %v2235_v42 = vadd.f32 %v4414_v61, %v2234_v5 }
 0xb9e   :  { %v6018_v63 = vmax.f32 %v2235_v42, 0.0 }
 0xba0   :  { %2285 = vadd.xlane.f32.xlu2 %v2273_v43  ;;  %v2276_v16 = vmul.f32 %v6018_v63, %v6018_v63 }
 0xba2   :  { %2259 = vadd.xlane.f32.xlu1 %v6018_v63  ;;  %2291 = vadd.xlane.f32.xlu0 %v2276_v16 }
 0xba8   :  { %2255 = vadd.xlane.f32.xlu2 %v6025_v18 }
 0xbaa   :  { %2287 = vadd.xlane.f32.xlu1 %v2274_v14 }
 0xbdb   :  { %v2246_v30 = vpop.xlane.xlu0 %2245 }
 0xbdc   :  { %v2261_v37 = vmul.f32 0.03125, %v2246_v30 }
 0xbdd   :  { %v2278_v15 = vpop.xlane.xlu2 %2277 }
 0xbde   :  { %v2301_v1 = vmul.f32 %v2261_v37, %v2261_v37  ;;  %v2293_v7 = vmul.f32 0.03125, %v2278_v15  ;;  %v2317_v16 = vsub.f32 %v5990_v36, %v2261_v37 }
 0xbe0   :  { %v2309_v9 = vsub.f32 %v2293_v7, %v2301_v1 }
 0xbe2   :  { %v2325_v62 = vadd.f32 1e-05, %v2309_v9 }
 0xbe3   :  { %v2248_v61 = vpop.xlane.xlu0 %2247 }
 0xbe4   :  { %4546 = vrsqrt.f32 %v2325_v62  ;;  %v2262_v33 = vmul.f32 0.03125, %v2248_v61  ;;  %vm2339_vm8 = vweird.f32 %v2325_v62 }
 0xbe5   :  { %v2280_v29 = vpop.xlane.xlu2 %2279 }
 0xbe6   :  { %v2302_v6 = vmul.f32 %v2262_v33, %v2262_v33  ;;  %v2294_v45 = vmul.f32 0.03125, %v2280_v29  ;;  %v2318_v34 = vsub.f32 %v5995_v28, %v2262_v33 }
 0xbe8   :  { %v2310_v60 = vsub.f32 %v2294_v45, %v2302_v6 }
 0xbea   :  { %v4547_v17 = vpop.eup %4546  ;;  %v2326_v56 = vadd.f32 1e-05, %v2310_v60 }
 0xbeb   :  { %v2334_v38 = vmul.f32 %v4547_v17, %v2325_v62  ;;  %v2250_v46 = vpop.xlane.xlu0 %2249  ;;  %vm2340_vm7 = vweird.f32 %v4547_v17 }
 0xbec   :  { %4548 = vrsqrt.f32 %v2326_v56  ;;  %v2263_v3 = vmul.f32 0.03125, %v2250_v46  ;;  %vm2341_vm9 = vmor %vm2339_vm8, %vm2340_vm7  ;;  %vm2349_vm11 = vweird.f32 %v2326_v56 }
 0xbed   :  { %v2335_v50 = vmul.f32 %v4547_v17, %v2334_v38  ;;  %v2282_v10 = vpop.xlane.xlu2 %2281 }
 0xbee   :  { %v2303_v52 = vmul.f32 %v2263_v3, %v2263_v3  ;;  %v2295_v20 = vmul.f32 0.03125, %v2282_v10  ;;  %v2319_v60 = vsub.f32 %v6000_v49, %v2263_v3 }
 0xbef   :  { %v2336_v25 = vmul.f32 0.5, %v2335_v50 }
 0xbf0   :  { %v2311_v51 = vsub.f32 %v2295_v20, %v2303_v52 }
 0xbf1   :  { %v2337_v22 = vsub.f32 1.5, %v2336_v25 }
 0xbf2   :  { %v4549_v13 = vpop.eup %4548  ;;  %v2327_v5 = vadd.f32 1e-05, %v2311_v51 }
 0xbf3   :  { %v2338_v42 = vmul.f32 %v4547_v17, %v2337_v22  ;;  %v2344_v43 = vmul.f32 %v4549_v13, %v2326_v56  ;;  %v2252_v32 = vpop.xlane.xlu1 %2251  ;;  %vm2350_vm10 = vweird.f32 %v4549_v13 }
 0xbf4   :  { %4550 = vrsqrt.f32 %v2327_v5  ;;  %v2264_v14 = vmul.f32 0.03125, %v2252_v32  ;;  %vm2351_vm12 = vmor %vm2349_vm11, %vm2350_vm10  ;;  %vm2359_vm14 = vweird.f32 %v2327_v5 }
 0xbf5   :  { %v2342_v23 = vsel %vm2341_vm9, %v4547_v17, %v2338_v42  ;;  %v2345_v24 = vmul.f32 %v4549_v13, %v2344_v43  ;;  %v2284_v35 = vpop.xlane.xlu0 %2283 }
 0xbf6   :  { %v2304_v40 = vmul.f32 %v2264_v14, %v2264_v14  ;;  %v2296_v55 = vmul.f32 0.03125, %v2284_v35  ;;  %v2413_v26 = vmul.f32 %v2342_v23, %v2317_v16  ;;  %v2320_v20 = vsub.f32 %v6005_v2, %v2264_v14 }
 0xbf7   :  { %v2346_v36 = vmul.f32 0.5, %v2345_v24 }
 0xbf8   :  { %v2312_v19 = vsub.f32 %v2296_v55, %v2304_v40  ;;  %v2424_v27 = vmul.f32 %v6082_v47, %v2413_v26 }
 0xbf9   :  { %v2347_v58 = vsub.f32 1.5, %v2346_v36 }
 0xbfa   :  { %v4551_v39 = vpop.eup %4550  ;;  %v2328_v12 = vadd.f32 1e-05, %v2312_v19  ;;  %v2435_v44 = vadd.f32 %v6087_v53, %v2424_v27 }
 0xbfb   :  { %v2354_v4 = vmul.f32 %v4551_v39, %v2327_v5  ;;  %v2348_v30 = vmul.f32 %v4549_v13, %v2347_v58  ;;  %vm2360_vm13 = vweird.f32 %v4551_v39 }
 0xbfc   :  { %4552 = vrsqrt.f32 %v2328_v12  ;;  %2462 = vmatmul.f32.vlgmr.msrb.gmra.mxu0 %v2435_v44  ;;  %vm2361_vm15 = vmor %vm2359_vm14, %vm2360_vm13  ;;  %vm2369_vm2 = vweird.f32 %v2328_v12 }
 0xbfd   :  { %v2355_v37 = vmul.f32 %v4551_v39, %v2354_v4  ;;  %v2352_v15 = vsel %vm2351_vm12, %v4549_v13, %v2348_v30  ;;  %v2254_v49 = vpop.xlane.xlu0 %2253 }
 0xbfe   :  { %v2414_v1 = vmul.f32 %v2352_v15, %v2318_v34  ;;  %v6098_v42 = vmul.f32 0.03125, %v2254_v49 }
 0xbff   :  { %v2356_v7 = vmul.f32 0.5, %v2355_v37 }
 0xc00   :  { %v2425_v9 = vmul.f32 %v6082_v47, %v2414_v1  ;;  %v2305_v2 = vmul.f32 %v6098_v42, %v6098_v42 }
 0xc01   :  { %v2357_v62 = vsub.f32 1.5, %v2356_v7 }
 0xc02   :  { %v4553_v61 = vpop.eup %4552  ;;  %v2436_v29 = vadd.f32 %v6087_v53, %v2425_v9 }
 0xc03   :  { %v2364_v6 = vmul.f32 %v4553_v61, %v2328_v12  ;;  %v2358_v45 = vmul.f32 %v4551_v39, %v2357_v62  ;;  %vm2370_vm1 = vweird.f32 %v4553_v61 }
 0xc04   :  { %2465 = vmatmul.f32.gmra.mxu0 %v2436_v29  ;;  %vm2371_vm3 = vmor %vm2369_vm2, %vm2370_vm1 }
 0xc05   :  { %v2365_v28 = vmul.f32 %v4553_v61, %v2364_v6  ;;  %v2362_v33 = vsel %vm2361_vm15, %v4551_v39, %v2358_v45 }
 0xc06   :  { %v2415_v17 = vmul.f32 %v2362_v33, %v2319_v60 }
 0xc07   :  { %v2366_v56 = vmul.f32 0.5, %v2365_v28 }
 0xc08   :  { %v2426_v38 = vmul.f32 %v6082_v47, %v2415_v17 }
 0xc09   :  { %v2367_v46 = vsub.f32 1.5, %v2366_v56 }
 0xc0a   :  { %v2437_v50 = vadd.f32 %v6087_v53, %v2426_v38 }
 0xc0b   :  { %v2258_v10 = vpop.xlane.xlu2 %2257  ;;  %v2368_v52 = vmul.f32 %v4553_v61, %v2367_v46 }
 0xc0c   :  { %v2267_v25 = vmul.f32 0.03125, %v2258_v10  ;;  %2468 = vmatmul.f32.gmra.mxu0 %v2437_v50 }
 0xc0d   :  { %v2290_v3 = vpop.xlane.xlu1 %2289  ;;  %v2372_v51 = vsel %vm2371_vm3, %v4553_v61, %v2368_v52 }
 0xc0e   :  { %v2307_v22 = vmul.f32 %v2267_v25, %v2267_v25  ;;  %v2299_v13 = vmul.f32 0.03125, %v2290_v3  ;;  %v2416_v5 = vmul.f32 %v2372_v51, %v2320_v20  ;;  %v2323_v33 = vsub.f32 %v6013_v21, %v2267_v25 }
 0xc0f   :  { %v2321_v3 = vsub.f32 %v6010_v11, %v6098_v42 }
 0xc10   :  { %v2315_v43 = vsub.f32 %v2299_v13, %v2307_v22  ;;  %v2427_v32 = vmul.f32 %v6082_v47, %v2416_v5 }
 0xc12   :  { %v2331_v16 = vadd.f32 1e-05, %v2315_v43  ;;  %v2438_v23 = vadd.f32 %v6087_v53, %v2427_v32 }
 0xc13   :  { %v2286_v24 = vpop.xlane.xlu2 %2285 }
 0xc14   :  { %4554 = vrsqrt.f32 %v2331_v16  ;;  %v2297_v14 = vmul.f32 0.03125, %v2286_v24  ;;  %2471 = vmatmul.f32.gmra.mxu0 %v2438_v23  ;;  %vm2399_vm6 = vweird.f32 %v2331_v16 }
 0xc15   :  { %v2260_v35 = vpop.xlane.xlu1 %2259  ;;  %v2292_v40 = vpop.xlane.xlu0 %2291 }
 0xc16   :  { %v2313_v55 = vsub.f32 %v2297_v14, %v2305_v2  ;;  %v2268_v26 = vmul.f32 0.03125, %v2260_v35  ;;  %v2300_v27 = vmul.f32 0.03125, %v2292_v40 }
 0xc18   :  { %v2329_v36 = vadd.f32 1e-05, %v2313_v55  ;;  %v2308_v19 = vmul.f32 %v2268_v26, %v2268_v26  ;;  %v2324_v32 = vsub.f32 %v6018_v63, %v2268_v26 }
 0xc1a   :  { %v4555_v58 = vpop.eup %4554  ;;  %4556 = vrsqrt.f32 %v2329_v36  ;;  %v2316_v39 = vsub.f32 %v2300_v27, %v2308_v19  ;;  %vm2379_vm9 = vweird.f32 %v2329_v36 }
 0xc1b   :  { %v2394_v12 = vmul.f32 %v4555_v58, %v2331_v16  ;;  %v2256_v44 = vpop.xlane.xlu2 %2255  ;;  %vm2400_vm5 = vweird.f32 %v4555_v58 }
 0xc1c   :  { %v2332_v4 = vadd.f32 1e-05, %v2316_v39  ;;  %v6104_v30 = vmul.f32 0.03125, %v2256_v44  ;;  %vm2401_vm7 = vmor %vm2399_vm6, %vm2400_vm5 }
 0xc1d   :  { %v2395_v34 = vmul.f32 %v4555_v58, %v2394_v12  ;;  %v2288_v37 = vpop.xlane.xlu1 %2287 }
 0xc1e   :  { %4558 = vrsqrt.f32 %v2332_v4  ;;  %v2306_v15 = vmul.f32 %v6104_v30, %v6104_v30  ;;  %v2298_v7 = vmul.f32 0.03125, %v2288_v37  ;;  %vm2409_vm12 = vweird.f32 %v2332_v4 }
 0xc1f   :  { %v2396_v1 = vmul.f32 0.5, %v2395_v34  ;;  %v2322_v63 = vsub.f32 %v6025_v18, %v6104_v30  ;;  %v4417_v34 = vld [vmem:[%s7056_s26 + $0x2] ss:$0 sm:$0xff] }
 0xc20   :  { %v4557_v9 = vpop.eup %4556  ;;  %v2314_v29 = vsub.f32 %v2298_v7, %v2306_v15 }
 0xc21   :  { %v2397_v62 = vsub.f32 1.5, %v2396_v1  ;;  %v2374_v61 = vmul.f32 %v4557_v9, %v2329_v36  ;;  %vm2380_vm8 = vweird.f32 %v4557_v9 }
 0xc22   :  { %v2330_v60 = vadd.f32 1e-05, %v2314_v29  ;;  %vm2381_vm10 = vmor %vm2379_vm9, %vm2380_vm8 }
 0xc23   :  { %v2398_v6 = vmul.f32 %v4555_v58, %v2397_v62  ;;  %v2375_v45 = vmul.f32 %v4557_v9, %v2374_v61 }
 0xc24   :  { %v4559_v28 = vpop.eup %4558  ;;  %4560 = vrsqrt.f32 %v2330_v60  ;;  %vm2389_vm15 = vweird.f32 %v2330_v60 }
 0xc25   :  { %v2402_v17 = vsel %vm2401_vm7, %v4555_v58, %v2398_v6  ;;  %v2376_v56 = vmul.f32 0.5, %v2375_v45  ;;  %v2404_v38 = vmul.f32 %v4559_v28, %v2332_v4  ;;  %vm2410_vm11 = vweird.f32 %v4559_v28 }
 0xc26   :  { %v2419_v46 = vmul.f32 %v2402_v17, %v2323_v33  ;;  %vm2411_vm13 = vmor %vm2409_vm12, %vm2410_vm11 }
 0xc27   :  { %v2377_v50 = vsub.f32 1.5, %v2376_v56  ;;  %v2405_v10 = vmul.f32 %v4559_v28, %v2404_v38  ;;  %v4644_v38 = vld [vmem:[%s7010_s1] sm:$0xff] }
 0xc28   :  { %v2430_v52 = vmul.f32 %v6082_v47, %v2419_v46  ;;  %v4645_v46 = vld [vmem:[%s7010_s1 + $0x8] sm:$0xff] }
 0xc29   :  { %v2378_v20 = vmul.f32 %v4557_v9, %v2377_v50  ;;  %v2406_v49 = vmul.f32 0.5, %v2405_v10  ;;  %v4646_v50 = vld [vmem:[%s7010_s1 + $0x10] sm:$0xff]  ;;  %v4647_v10 = vld [vmem:[%s7010_s1 + $0x18] sm:$0xff] }
 0xc2a   :  { %v2441_v21 = vadd.f32 %v6087_v53, %v2430_v52  ;;  %v4561_v22 = vpop.eup %4560 }
 0xc2b   :  { %v2407_v25 = vsub.f32 1.5, %v2406_v49  ;;  %v2382_v51 = vsel %vm2381_vm10, %v4557_v9, %v2378_v20  ;;  %v2384_v5 = vmul.f32 %v4561_v22, %v2330_v60  ;;  %vm2390_vm14 = vweird.f32 %v4561_v22 }
 0xc2c   :  { %2480 = vmatmul.f32.vlgmr.msra.gmra.mxu1 %v2441_v21  ;;  %v2417_v13 = vmul.f32 %v2382_v51, %v2321_v3  ;;  %vm2391_vm1 = vmor %vm2389_vm15, %vm2390_vm14 }
 0xc2d   :  { %v2408_v43 = vmul.f32 %v4559_v28, %v2407_v25  ;;  %v2385_v23 = vmul.f32 %v4561_v22, %v2384_v5  ;;  %v4243_v5 = vld [vmem:[%s7014_s12 + $0x170] sm:$0xff] }
 0xc2e   :  { %v2428_v16 = vmul.f32 %v6082_v47, %v2417_v13  ;;  %v4244_v13 = vld [vmem:[%s7014_s12 + $0x178] sm:$0xff] }
 0xc2f   :  { %v2412_v24 = vsel %vm2411_vm13, %v4559_v28, %v2408_v43  ;;  %v2386_v2 = vmul.f32 0.5, %v2385_v23  ;;  %2675 = vmatpush.msrb.mxu3 %v4244_v13  ;;  %v4242_v43 = vld [vmem:[%s7014_s12 + $0x168] sm:$0xff]  ;;  %v4239_v23 = vld [vmem:[%s7014_s12 + $0x150] sm:$0xff] }
 0xc30   :  { %v2439_v11 = vadd.f32 %v6087_v53, %v2428_v16  ;;  %v2420_v42 = vmul.f32 %v2412_v24, %v2324_v32  ;;  %v4241_v32 = vld [vmem:[%s7014_s12 + $0x160] sm:$0xff]  ;;  %v4240_v16 = vld [vmem:[%s7014_s12 + $0x158] sm:$0xff]  ;;  %v4238_v24 = vld [vmem:[%s7014_s12 + $0x148] sm:$0xff] }
 0xc31   :  { %v2387_v35 = vsub.f32 1.5, %v2386_v2  ;;  %2676 = vmatpush.msrb.mxu3 %v4243_v5  ;;  %v4235_v2 = vld [vmem:[%s7014_s12 + $0x130] sm:$0xff] }
 0xc32   :  { %2474 = vmatmul.f32.gmra.mxu0 %v2439_v11  ;;  %v2431_v14 = vmul.f32 %v6082_v47, %v2420_v42  ;;  %v4237_v11 = vld [vmem:[%s7014_s12 + $0x140] sm:$0xff]  ;;  %v4236_v42 = vld [vmem:[%s7014_s12 + $0x138] sm:$0xff] }
 0xc33   :  { %v2388_v55 = vmul.f32 %v4561_v22, %v2387_v35  ;;  %2677 = vmatpush.msrb.mxu3 %v4242_v43  ;;  %v4233_v35 = vld [vmem:[%s7014_s12 + $0x120] sm:$0xff] }
 0xc34   :  { %v2442_v40 = vadd.f32 %v6087_v53, %v2431_v14  ;;  %v4234_v14 = vld [vmem:[%s7014_s12 + $0x128] sm:$0xff] }
 0xc35   :  { %v2392_v26 = vsel %vm2391_vm1, %v4561_v22, %v2388_v55  ;;  %2678 = vmatpush.msrb.mxu3 %v4241_v32  ;;  %v4231_v55 = vld [vmem:[%s7014_s12 + $0x110] sm:$0xff]  ;;  %v4419_v32 = vld [vmem:[%s7012_s11 + $0x2] ss:$0 sm:$0xff] }
 0xc36   :  { %2483 = vmatmul.f32.gmra.mxu1 %v2442_v40  ;;  %v2418_v36 = vmul.f32 %v2392_v26, %v2322_v63  ;;  %v4232_v40 = vld [vmem:[%s7014_s12 + $0x118] sm:$0xff]  ;;  %v4230_v63 = vld [vmem:[%s7014_s12 + $0x108] sm:$0xff]  ;;  %v4229_v26 = vld [vmem:[%s7014_s12 + $0x100] sm:$0xff] }
 0xc37   :  { %2679 = vmatpush.msrb.mxu3 %v4240_v16 }
 0xc38   :  { %v2429_v19 = vmul.f32 %v6082_v47, %v2418_v36 }
 0xc39   :  { %2680 = vmatpush.msrb.mxu3 %v4239_v23 }
 0xc3a   :  { %v2440_v27 = vadd.f32 %v6087_v53, %v2429_v19 }
 0xc3b   :  { %2681 = vmatpush.msrb.mxu3 %v4238_v24 }
 0xc3c   :  { %2477 = vmatmul.f32.gmra.mxu0 %v2440_v27 }
 0xc3d   :  { %2682 = vmatpush.msrb.mxu3 %v4237_v11 }
 0xc3f   :  { %2683 = vmatpush.msrb.mxu3 %v4236_v42 }
 0xc41   :  { %2684 = vmatpush.msrb.mxu3 %v4235_v2 }
 0xc43   :  { %2685 = vmatpush.msrb.mxu3 %v4234_v14 }
 0xc45   :  { %2686 = vmatpush.msrb.mxu3 %v4233_v35 }
 0xc47   :  { %2687 = vmatpush.msrb.mxu3 %v4232_v40 }
 0xc49   :  { %2688 = vmatpush.msrb.mxu3 %v4231_v55 }
 0xc4b   :  { %2689 = vmatpush.msrb.mxu3 %v4230_v63 }
 0xc4d   :  { %2690 = vmatpush.msrb.mxu3 %v4229_v26 }
 0xc79   :  { %v2463_v58 = vpop.f32.mrf.mxu0 }
 0xc7a   :  { %v2464_v28 = vadd.f32 %v4417_v34, %v2463_v58 }
 0xc7c   :  { %v2487_v56 = vmax.f32 %v2464_v28, 0.0 }
 0xc81   :  { %v2466_v39 = vpop.f32.mrf.mxu0 }
 0xc82   :  { %v2467_v45 = vadd.f32 %v4417_v34, %v2466_v39 }
 0xc84   :  { %v2488_v17 = vmax.f32 %v2467_v45, 0.0 }
 0xc89   :  { %v2469_v12 = vpop.f32.mrf.mxu0 }
 0xc8a   :  { %v2470_v29 = vadd.f32 %v4417_v34, %v2469_v12 }
 0xc8c   :  { %v2489_v33 = vmax.f32 %v2470_v29, 0.0 }
 0xc91   :  { %v2472_v44 = vpop.f32.mrf.mxu0 }
 0xc92   :  { %v2473_v62 = vadd.f32 %v4417_v34, %v2472_v44 }
 0xc94   :  { %v2490_v60 = vmax.f32 %v2473_v62, 0.0 }
 0xca9   :  { %v2481_v4 = vpop.f32.mrf.mxu1 }
 0xcaa   :  { %v2482_v30 = vadd.f32 %v4417_v34, %v2481_v4 }
 0xcac   :  { %v2493_v7 = vmax.f32 %v2482_v30, 0.0 }
 0xcaf   :  { %v2475_v37 = vpop.f32.mrf.mxu0 }
 0xcb0   :  { %v2476_v53 = vadd.f32 %v4417_v34, %v2475_v37 }
 0xcb2   :  { %v2491_v6 = vmax.f32 %v2476_v53, 0.0 }
 0xcb3   :  { %v2484_v18 = vpop.f32.mrf.mxu1 }
 0xcb4   :  { %v2485_v15 = vadd.f32 %v4417_v34, %v2484_v18 }
 0xcb6   :  { %v2494_v1 = vmax.f32 %v2485_v15, 0.0 }
 0xcb8   :  { %2503 = vmatpush.msrb.mxu1 %v2494_v1 }
 0xcb9   :  { %v2478_v47 = vpop.f32.mrf.mxu0 }
 0xcba   :  { %2504 = vmatpush.msrb.mxu1 %v2493_v7  ;;  %v2479_v9 = vadd.f32 %v4417_v34, %v2478_v47 }
 0xcbc   :  { %v2492_v61 = vmax.f32 %v2479_v9, 0.0 }
 0xcbe   :  { %2505 = vmatpush.msrb.mxu1 %v2492_v61 }
 0xcc0   :  { %2506 = vmatpush.msrb.mxu1 %v2491_v6 }
 0xcc2   :  { %2507 = vmatpush.msrb.mxu1 %v2490_v60 }
 0xcc4   :  { %2508 = vmatpush.msrb.mxu1 %v2489_v33 }
 0xcc6   :  { %2509 = vmatpush.msrb.mxu1 %v2488_v17 }
 0xcc8   :  { %2510 = vmatpush.msrb.mxu1 %v2487_v56 }
 0xcc9   :  { %4223 = vmatmul.msk.f32.vlgmr.msrb.gmra.mxu1 %vm627_vm0, %v4644_v38 }
 0xcd1   :  { %4224 = vmatmul.msk.f32.gmra.mxu1 %vm627_vm0, %v4645_v46 }
 0xcd9   :  { %4225 = vmatmul.msk.f32.gmra.mxu1 %vm627_vm0, %v4646_v50 }
 0xce1   :  { %4226 = vmatmul.msk.f32.gmra.mxu1 %vm627_vm0, %v4647_v10 }
 0xd46   :  { %v6141_v52 = vpop.f32.mrf.mxu1 }
 0xd47   :  { %v2582_v20 = vmul.f32 %v6141_v52, %v6141_v52  ;;  %2570 = vadd.xlane.f32.xlu0 %v6141_v52 }
 0xd49   :  { %2586 = vadd.xlane.f32.xlu2 %v2582_v20  ;;  %v4418_v20 = vld [vmem:[%s7011_s10 + $0x2] ss:$0 sm:$0xff] }
 0xd4e   :  { %v6146_v49 = vpop.f32.mrf.mxu1 }
 0xd4f   :  { %v2583_v3 = vmul.f32 %v6146_v49, %v6146_v49  ;;  %2572 = vadd.xlane.f32.xlu1 %v6146_v49 }
 0xd51   :  { %2588 = vadd.xlane.f32.xlu0 %v2583_v3 }
 0xd56   :  { %v6151_v21 = vpop.f32.mrf.mxu1 }
 0xd57   :  { %2574 = vadd.xlane.f32.xlu2 %v6151_v21  ;;  %v2584_v25 = vmul.f32 %v6151_v21, %v6151_v21 }
 0xd59   :  { %2590 = vadd.xlane.f32.xlu1 %v2584_v25 }
 0xd5e   :  { %v6156_v51 = vpop.f32.mrf.mxu1 }
 0xd5f   :  { %v2585_v22 = vmul.f32 %v6156_v51, %v6156_v51  ;;  %2576 = vadd.xlane.f32.xlu0 %v6156_v51 }
 0xd61   :  { %2592 = vadd.xlane.f32.xlu2 %v2585_v22 }
 0xdba   :  { %v2571_v36 = vpop.xlane.xlu0 %2570 }
 0xdbb   :  { %v2578_v19 = vmul.f32 0.03125, %v2571_v36 }
 0xdbc   :  { %v2587_v27 = vpop.xlane.xlu2 %2586 }
 0xdbd   :  { %v2598_v58 = vmul.f32 %v2578_v19, %v2578_v19  ;;  %v2594_v39 = vmul.f32 0.03125, %v2587_v27  ;;  %v2606_v50 = vsub.f32 %v6141_v52, %v2578_v19 }
 0xdbf   :  { %v2602_v12 = vsub.f32 %v2594_v39, %v2598_v58 }
 0xdc1   :  { %v2610_v44 = vadd.f32 1e-05, %v2602_v12 }
 0xdc2   :  { %v2573_v4 = vpop.xlane.xlu1 %2572 }
 0xdc3   :  { %4562 = vrsqrt.f32 %v2610_v44  ;;  %v2579_v34 = vmul.f32 0.03125, %v2573_v4  ;;  %vm2620_vm2 = vweird.f32 %v2610_v44 }
 0xdc4   :  { %v2589_v37 = vpop.xlane.xlu0 %2588 }
 0xdc5   :  { %v2599_v18 = vmul.f32 %v2579_v34, %v2579_v34  ;;  %v2595_v30 = vmul.f32 0.03125, %v2589_v37  ;;  %v2607_v40 = vsub.f32 %v6146_v49, %v2579_v34 }
 0xdc7   :  { %v2603_v15 = vsub.f32 %v2595_v30, %v2599_v18 }
 0xdc9   :  { %v4563_v1 = vpop.eup %4562  ;;  %v2611_v7 = vadd.f32 1e-05, %v2603_v15 }
 0xdca   :  { %v2615_v47 = vmul.f32 %v4563_v1, %v2610_v44  ;;  %v2575_v53 = vpop.xlane.xlu2 %2574  ;;  %vm2621_vm0 = vweird.f32 %v4563_v1 }
 0xdcb   :  { %4564 = vrsqrt.f32 %v2611_v7  ;;  %v2580_v9 = vmul.f32 0.03125, %v2575_v53  ;;  %vm2622_vm3 = vmor %vm2620_vm2, %vm2621_vm0  ;;  %vm2630_vm6 = vweird.f32 %v2611_v7 }
 0xdcc   :  { %v2616_v62 = vmul.f32 %v4563_v1, %v2615_v47  ;;  %v2591_v61 = vpop.xlane.xlu1 %2590 }
 0xdcd   :  { %v2600_v29 = vmul.f32 %v2580_v9, %v2580_v9  ;;  %v2596_v6 = vmul.f32 0.03125, %v2591_v61  ;;  %v2608_v4 = vsub.f32 %v6151_v21, %v2580_v9  ;;  %v4420_v9 = vld [vmem:[%s7013_s13 + $0x2] ss:$0 sm:$0xff] }
 0xdce   :  { %v2617_v45 = vmul.f32 0.5, %v2616_v62 }
 0xdcf   :  { %v2604_v60 = vsub.f32 %v2596_v6, %v2600_v29 }
 0xdd0   :  { %v2618_v28 = vsub.f32 1.5, %v2617_v45 }
 0xdd1   :  { %v4565_v33 = vpop.eup %4564  ;;  %v2612_v17 = vadd.f32 1e-05, %v2604_v60 }
 0xdd2   :  { %v2619_v56 = vmul.f32 %v4563_v1, %v2618_v28  ;;  %v2625_v38 = vmul.f32 %v4565_v33, %v2611_v7  ;;  %v2577_v46 = vpop.xlane.xlu0 %2576  ;;  %vm2631_vm5 = vweird.f32 %v4565_v33 }
 0xdd3   :  { %4566 = vrsqrt.f32 %v2612_v17  ;;  %v2581_v10 = vmul.f32 0.03125, %v2577_v46  ;;  %vm2632_vm7 = vmor %vm2630_vm6, %vm2631_vm5  ;;  %vm2640_vm9 = vweird.f32 %v2612_v17 }
 0xdd4   :  { %v2623_v3 = vsel %vm2622_vm3, %v4563_v1, %v2619_v56  ;;  %v2626_v25 = vmul.f32 %v4565_v33, %v2625_v38  ;;  %v2593_v22 = vpop.xlane.xlu2 %2592 }
 0xdd5   :  { %v2601_v13 = vmul.f32 %v2581_v10, %v2581_v10  ;;  %v2597_v5 = vmul.f32 0.03125, %v2593_v22  ;;  %v2654_v43 = vmul.f32 %v2623_v3, %v2606_v50  ;;  %v2609_v47 = vsub.f32 %v6156_v51, %v2581_v10  ;;  %v4263_v22 = vld [vmem:[%s7018_s16 + $0x178] sm:$0xff] }
 0xdd6   :  { %v2627_v16 = vmul.f32 0.5, %v2626_v25  ;;  %2813 = vmatpush.msrb.mxu2 %v4263_v22 }
 0xdd7   :  { %v2605_v23 = vsub.f32 %v2597_v5, %v2601_v13  ;;  %v2661_v52 = vmul.f32 %v4418_v20, %v2654_v43  ;;  %v4262_v13 = vld [vmem:[%s7018_s16 + $0x170] sm:$0xff]  ;;  %v4261_v5 = vld [vmem:[%s7018_s16 + $0x168] sm:$0xff]  ;;  %v4260_v43 = vld [vmem:[%s7018_s16 + $0x160] sm:$0xff] }
 0xdd8   :  { %v2628_v24 = vsub.f32 1.5, %v2627_v16  ;;  %2814 = vmatpush.msrb.mxu2 %v4262_v13  ;;  %v4258_v16 = vld [vmem:[%s7018_s16 + $0x150] sm:$0xff] }
 0xdd9   :  { %v4567_v11 = vpop.eup %4566  ;;  %v2613_v42 = vadd.f32 1e-05, %v2605_v23  ;;  %v2668_v2 = vadd.f32 %v4419_v32, %v2661_v52  ;;  %v4257_v23 = vld [vmem:[%s7018_s16 + $0x148] sm:$0xff]  ;;  %v4256_v52 = vld [vmem:[%s7018_s16 + $0x140] sm:$0xff] }
 0xdda   :  { %v2635_v14 = vmul.f32 %v4567_v11, %v2612_v17  ;;  %v2629_v35 = vmul.f32 %v4565_v33, %v2628_v24  ;;  %vm2641_vm8 = vweird.f32 %v4567_v11  ;;  %2815 = vmatpush.msrb.mxu2 %v4261_v5  ;;  %v4255_v24 = vld [vmem:[%s7018_s16 + $0x138] sm:$0xff] }
 0xddb   :  { %4568 = vrsqrt.f32 %v2613_v42  ;;  %2691 = vmatmul.f32.vlgmr.msrb.gmra.mxu3 %v2668_v2  ;;  %vm2642_vm10 = vmor %vm2640_vm9, %vm2641_vm8  ;;  %vm2650_vm12 = vweird.f32 %v2613_v42  ;;  %v4252_v2 = vld [vmem:[%s7018_s16 + $0x120] sm:$0xff] }
 0xddc   :  { %v2636_v55 = vmul.f32 %v4567_v11, %v2635_v14  ;;  %v2633_v63 = vsel %vm2632_vm7, %v4565_v33, %v2629_v35  ;;  %2816 = vmatpush.msrb.mxu2 %v4260_v43  ;;  %v4251_v14 = vld [vmem:[%s7018_s16 + $0x118] sm:$0xff]  ;;  %v4250_v35 = vld [vmem:[%s7018_s16 + $0x110] sm:$0xff]  ;;  %v4422_v43 = vld [vmem:[%s7016_s15 + $0x2] ss:$0 sm:$0xff] }
 0xddd   :  { %v2655_v26 = vmul.f32 %v2633_v63, %v2607_v40  ;;  %v4249_v40 = vld [vmem:[%s7018_s16 + $0x108] sm:$0xff] }
 0xdde   :  { %v2637_v36 = vmul.f32 0.5, %v2636_v55  ;;  %v4248_v55 = vld [vmem:[%s7018_s16 + $0x100] sm:$0xff] }
 0xddf   :  { %v2662_v19 = vmul.f32 %v4418_v20, %v2655_v26 }
 0xde0   :  { %v2638_v27 = vsub.f32 1.5, %v2637_v36 }
 0xde1   :  { %v4569_v58 = vpop.eup %4568  ;;  %v2669_v39 = vadd.f32 %v4419_v32, %v2662_v19 }
 0xde2   :  { %v2645_v12 = vmul.f32 %v4569_v58, %v2613_v42  ;;  %v2639_v44 = vmul.f32 %v4567_v11, %v2638_v27  ;;  %vm2651_vm11 = vweird.f32 %v4569_v58  ;;  %v4253_v42 = vld [vmem:[%s7018_s16 + $0x128] sm:$0xff] }
 0xde3   :  { %2694 = vmatmul.f32.gmra.mxu3 %v2669_v39  ;;  %vm2652_vm13 = vmor %vm2650_vm12, %vm2651_vm11 }
 0xde4   :  { %v2646_v49 = vmul.f32 %v4569_v58, %v2645_v12  ;;  %v2643_v34 = vsel %vm2642_vm10, %v4567_v11, %v2639_v44  ;;  %v4254_v11 = vld [vmem:[%s7018_s16 + $0x130] sm:$0xff] }
 0xde5   :  { %v2656_v37 = vmul.f32 %v2643_v34, %v2608_v4 }
 0xde6   :  { %v2647_v18 = vmul.f32 0.5, %v2646_v49 }
 0xde7   :  { %v2663_v30 = vmul.f32 %v4418_v20, %v2656_v37 }
 0xde8   :  { %v2648_v15 = vsub.f32 1.5, %v2647_v18 }
 0xde9   :  { %v2670_v1 = vadd.f32 %v4419_v32, %v2663_v30 }
 0xdea   :  { %v2649_v7 = vmul.f32 %v4569_v58, %v2648_v15 }
 0xdeb   :  { %2697 = vmatmul.f32.gmra.mxu3 %v2670_v1 }
 0xdec   :  { %v2653_v53 = vsel %vm2652_vm13, %v4569_v58, %v2649_v7 }
 0xded   :  { %v2657_v62 = vmul.f32 %v2653_v53, %v2609_v47 }
 0xdef   :  { %v2664_v61 = vmul.f32 %v4418_v20, %v2657_v62 }
 0xdf1   :  { %v2671_v21 = vadd.f32 %v4419_v32, %v2664_v61  ;;  %v4259_v32 = vld [vmem:[%s7018_s16 + $0x158] sm:$0xff] }
 0xdf2   :  { %2817 = vmatpush.msrb.mxu2 %v4259_v32 }
 0xdf3   :  { %2700 = vmatmul.f32.gmra.mxu3 %v2671_v21 }
 0xdf4   :  { %2818 = vmatpush.msrb.mxu2 %v4258_v16 }
 0xdf6   :  { %2819 = vmatpush.msrb.mxu2 %v4257_v23 }
 0xdf8   :  { %2820 = vmatpush.msrb.mxu2 %v4256_v52 }
 0xdfa   :  { %2821 = vmatpush.msrb.mxu2 %v4255_v24 }
 0xdfc   :  { %2822 = vmatpush.msrb.mxu2 %v4254_v11 }
 0xdfe   :  { %2823 = vmatpush.msrb.mxu2 %v4253_v42 }
 0xe00   :  { %2824 = vmatpush.msrb.mxu2 %v4252_v2 }
 0xe02   :  { %2825 = vmatpush.msrb.mxu2 %v4251_v14 }
 0xe04   :  { %2826 = vmatpush.msrb.mxu2 %v4250_v35 }
 0xe06   :  { %2827 = vmatpush.msrb.mxu2 %v4249_v40 }
 0xe08   :  { %2828 = vmatpush.msrb.mxu2 %v4248_v55 }
 0xe5e   :  { %v2692_v29 = vpop.f32.mrf.mxu3 }
 0xe5f   :  { %v2693_v6 = vadd.f32 %v4420_v9, %v2692_v29 }
 0xe61   :  { %v6222_v45 = vmax.f32 %v2693_v6, 0.0 }
 0xe63   :  { %2708 = vadd.xlane.f32.xlu1 %v6222_v45  ;;  %v2720_v51 = vmul.f32 %v6222_v45, %v6222_v45 }
 0xe65   :  { %2724 = vadd.xlane.f32.xlu0 %v2720_v51 }
 0xe66   :  { %v2695_v60 = vpop.f32.mrf.mxu3 }
 0xe67   :  { %v2696_v28 = vadd.f32 %v4420_v9, %v2695_v60 }
 0xe69   :  { %v6227_v33 = vmax.f32 %v2696_v28, 0.0 }
 0xe6b   :  { %2710 = vadd.xlane.f32.xlu2 %v6227_v33  ;;  %v2721_v17 = vmul.f32 %v6227_v33, %v6227_v33 }
 0xe6d   :  { %2726 = vadd.xlane.f32.xlu1 %v2721_v17 }
 0xe6e   :  { %v2698_v56 = vpop.f32.mrf.mxu3 }
 0xe6f   :  { %v2699_v38 = vadd.f32 %v4420_v9, %v2698_v56 }
 0xe71   :  { %v6232_v46 = vmax.f32 %v2699_v38, 0.0 }
 0xe73   :  { %2712 = vadd.xlane.f32.xlu0 %v6232_v46  ;;  %v2722_v50 = vmul.f32 %v6232_v46, %v6232_v46 }
 0xe75   :  { %2728 = vadd.xlane.f32.xlu2 %v2722_v50  ;;  %v4421_v50 = vld [vmem:[%s7015_s14 + $0x2] ss:$0 sm:$0xff] }
 0xe76   :  { %v2701_v10 = vpop.f32.mrf.mxu3 }
 0xe77   :  { %v2702_v20 = vadd.f32 %v4420_v9, %v2701_v10 }
 0xe79   :  { %v6237_v3 = vmax.f32 %v2702_v20, 0.0 }
 0xe7b   :  { %2714 = vadd.xlane.f32.xlu1 %v6237_v3  ;;  %v2723_v25 = vmul.f32 %v6237_v3, %v6237_v3 }
 0xe7d   :  { %2730 = vadd.xlane.f32.xlu0 %v2723_v25 }
 0xed6   :  { %v2709_v63 = vpop.xlane.xlu1 %2708 }
 0xed7   :  { %v2716_v26 = vmul.f32 0.03125, %v2709_v63 }
 0xed8   :  { %v2725_v36 = vpop.xlane.xlu0 %2724 }
 0xed9   :  { %v2736_v19 = vmul.f32 %v2716_v26, %v2716_v26  ;;  %v2732_v27 = vmul.f32 0.03125, %v2725_v36  ;;  %v2744_v56 = vsub.f32 %v6222_v45, %v2716_v26 }
 0xedb   :  { %v2740_v58 = vsub.f32 %v2732_v27, %v2736_v19 }
 0xedd   :  { %v2748_v39 = vadd.f32 1e-05, %v2740_v58 }
 0xede   :  { %v2711_v12 = vpop.xlane.xlu2 %2710 }
 0xedf   :  { %4570 = vrsqrt.f32 %v2748_v39  ;;  %v2717_v44 = vmul.f32 0.03125, %v2711_v12  ;;  %vm2758_vm15 = vweird.f32 %v2748_v39 }
 0xee0   :  { %v2727_v4 = vpop.xlane.xlu1 %2726 }
 0xee1   :  { %v2737_v49 = vmul.f32 %v2717_v44, %v2717_v44  ;;  %v2733_v34 = vmul.f32 0.03125, %v2727_v4  ;;  %v2745_v14 = vsub.f32 %v6227_v33, %v2717_v44 }
 0xee3   :  { %v2741_v37 = vsub.f32 %v2733_v34, %v2737_v49 }
 0xee5   :  { %v4571_v18 = vpop.eup %4570  ;;  %v2749_v30 = vadd.f32 1e-05, %v2741_v37 }
 0xee6   :  { %v2753_v15 = vmul.f32 %v4571_v18, %v2748_v39  ;;  %v2713_v1 = vpop.xlane.xlu0 %2712  ;;  %vm2759_vm14 = vweird.f32 %v4571_v18 }
 0xee7   :  { %4572 = vrsqrt.f32 %v2749_v30  ;;  %v2718_v7 = vmul.f32 0.03125, %v2713_v1  ;;  %vm2760_vm1 = vmor %vm2758_vm15, %vm2759_vm14  ;;  %vm2768_vm2 = vweird.f32 %v2749_v30 }
 0xee8   :  { %v2754_v47 = vmul.f32 %v4571_v18, %v2753_v15  ;;  %v2729_v53 = vpop.xlane.xlu2 %2728 }
 0xee9   :  { %v2738_v62 = vmul.f32 %v2718_v7, %v2718_v7  ;;  %v2734_v61 = vmul.f32 0.03125, %v2729_v53  ;;  %v2746_v12 = vsub.f32 %v6232_v46, %v2718_v7  ;;  %v4423_v7 = vld [vmem:[%s7017_s17 + $0x2] ss:$0 sm:$0xff] }
 0xeea   :  { %v2755_v21 = vmul.f32 0.5, %v2754_v47 }
 0xeeb   :  { %v2742_v9 = vsub.f32 %v2734_v61, %v2738_v62 }
 0xeec   :  { %v2756_v29 = vsub.f32 1.5, %v2755_v21 }
 0xeed   :  { %v4573_v6 = vpop.eup %4572  ;;  %v2750_v51 = vadd.f32 1e-05, %v2742_v9 }
 0xeee   :  { %v2757_v60 = vmul.f32 %v4571_v18, %v2756_v29  ;;  %v2763_v28 = vmul.f32 %v4573_v6, %v2749_v30  ;;  %v2715_v17 = vpop.xlane.xlu1 %2714  ;;  %vm2769_vm0 = vweird.f32 %v4573_v6 }
 0xeef   :  { %4574 = vrsqrt.f32 %v2750_v51  ;;  %v2719_v38 = vmul.f32 0.03125, %v2715_v17  ;;  %vm2770_vm3 = vmor %vm2768_vm2, %vm2769_vm0  ;;  %vm2778_vm6 = vweird.f32 %v2750_v51 }
 0xef0   :  { %v2761_v10 = vsel %vm2760_vm1, %v4571_v18, %v2757_v60  ;;  %v2764_v20 = vmul.f32 %v4573_v6, %v2763_v28  ;;  %v2731_v25 = vpop.xlane.xlu0 %2730 }
 0xef1   :  { %v2739_v22 = vmul.f32 %v2719_v38, %v2719_v38  ;;  %v2735_v13 = vmul.f32 0.03125, %v2731_v25  ;;  %v2792_v5 = vmul.f32 %v2761_v10, %v2744_v56  ;;  %v2747_v15 = vsub.f32 %v6237_v3, %v2719_v38  ;;  %v4282_v25 = vld [vmem:[%s7049_s3 + $0x1f8] sm:$0xff] }
 0xef2   :  { %v2765_v32 = vmul.f32 0.5, %v2764_v20  ;;  %2997 = vmatpush.msra.mxu1 %v4282_v25 }
 0xef3   :  { %v2743_v16 = vsub.f32 %v2735_v13, %v2739_v22  ;;  %v2799_v45 = vmul.f32 %v4421_v50, %v2792_v5  ;;  %v4281_v22 = vld [vmem:[%s7049_s3 + $0x1f0] sm:$0xff]  ;;  %v4280_v13 = vld [vmem:[%s7049_s3 + $0x1e8] sm:$0xff]  ;;  %v4279_v5 = vld [vmem:[%s7049_s3 + $0x1e0] sm:$0xff] }
 0xef4   :  { %v2766_v23 = vsub.f32 1.5, %v2765_v32  ;;  %2998 = vmatpush.msra.mxu1 %v4281_v22  ;;  %v4277_v32 = vld [vmem:[%s7049_s3 + $0x1d0] sm:$0xff] }
 0xef5   :  { %v4575_v52 = vpop.eup %4574  ;;  %v2751_v24 = vadd.f32 1e-05, %v2743_v16  ;;  %v2806_v11 = vadd.f32 %v4422_v43, %v2799_v45  ;;  %v4276_v16 = vld [vmem:[%s7049_s3 + $0x1c8] sm:$0xff]  ;;  %v4275_v45 = vld [vmem:[%s7049_s3 + $0x1c0] sm:$0xff] }
 0xef6   :  { %v2773_v42 = vmul.f32 %v4575_v52, %v2750_v51  ;;  %v2767_v2 = vmul.f32 %v4573_v6, %v2766_v23  ;;  %vm2779_vm5 = vweird.f32 %v4575_v52  ;;  %2999 = vmatpush.msra.mxu1 %v4280_v13  ;;  %v4274_v23 = vld [vmem:[%s7049_s3 + $0x1b8] sm:$0xff] }
 0xef7   :  { %4576 = vrsqrt.f32 %v2751_v24  ;;  %2829 = vmatmul.f32.vlgmr.msrb.gmra.mxu2 %v2806_v11  ;;  %vm2780_vm7 = vmor %vm2778_vm6, %vm2779_vm5  ;;  %vm2788_vm9 = vweird.f32 %v2751_v24  ;;  %v4271_v11 = vld [vmem:[%s7049_s3 + $0x1a0] sm:$0xff] }
 0xef8   :  { %v2774_v35 = vmul.f32 %v4575_v52, %v2773_v42  ;;  %v2771_v40 = vsel %vm2770_vm3, %v4573_v6, %v2767_v2  ;;  %3000 = vmatpush.msra.mxu1 %v4279_v5  ;;  %v4270_v42 = vld [vmem:[%s7049_s3 + $0x198] sm:$0xff]  ;;  %v4269_v2 = vld [vmem:[%s7049_s3 + $0x190] sm:$0xff]  ;;  %v4425_v5 = vld [vmem:[%s7051_s8 + $0x3] ss:$0 sm:$0xff] }
 0xef9   :  { %v2793_v55 = vmul.f32 %v2771_v40, %v2745_v14  ;;  %v4268_v14 = vld [vmem:[%s7049_s3 + $0x188] sm:$0xff] }
 0xefa   :  { %v2775_v63 = vmul.f32 0.5, %v2774_v35  ;;  %v4267_v35 = vld [vmem:[%s7049_s3 + $0x180] sm:$0xff] }
 0xefb   :  { %v2800_v26 = vmul.f32 %v4421_v50, %v2793_v55 }
 0xefc   :  { %v2776_v36 = vsub.f32 1.5, %v2775_v63 }
 0xefd   :  { %v4577_v19 = vpop.eup %4576  ;;  %v2807_v27 = vadd.f32 %v4422_v43, %v2800_v26 }
 0xefe   :  { %v2783_v58 = vmul.f32 %v4577_v19, %v2751_v24  ;;  %v2777_v39 = vmul.f32 %v4575_v52, %v2776_v36  ;;  %vm2789_vm8 = vweird.f32 %v4577_v19  ;;  %v4272_v24 = vld [vmem:[%s7049_s3 + $0x1a8] sm:$0xff] }
 0xeff   :  { %2832 = vmatmul.f32.gmra.mxu2 %v2807_v27  ;;  %vm2790_vm10 = vmor %vm2788_vm9, %vm2789_vm8 }
 0xf00   :  { %v2784_v33 = vmul.f32 %v4577_v19, %v2783_v58  ;;  %v2781_v44 = vsel %vm2780_vm7, %v4575_v52, %v2777_v39  ;;  %v4273_v52 = vld [vmem:[%s7049_s3 + $0x1b0] sm:$0xff] }
 0xf01   :  { %v2794_v4 = vmul.f32 %v2781_v44, %v2746_v12 }
 0xf02   :  { %v2785_v49 = vmul.f32 0.5, %v2784_v33 }
 0xf03   :  { %v2801_v34 = vmul.f32 %v4421_v50, %v2794_v4 }
 0xf04   :  { %v2786_v37 = vsub.f32 1.5, %v2785_v49 }
 0xf05   :  { %v2808_v18 = vadd.f32 %v4422_v43, %v2801_v34 }
 0xf06   :  { %v2787_v30 = vmul.f32 %v4577_v19, %v2786_v37 }
 0xf07   :  { %2835 = vmatmul.f32.gmra.mxu2 %v2808_v18 }
 0xf08   :  { %v2791_v1 = vsel %vm2790_vm10, %v4577_v19, %v2787_v30 }
 0xf09   :  { %v2795_v47 = vmul.f32 %v2791_v1, %v2747_v15 }
 0xf0b   :  { %v2802_v53 = vmul.f32 %v4421_v50, %v2795_v47 }
 0xf0d   :  { %v2809_v46 = vadd.f32 %v4422_v43, %v2802_v53  ;;  %v4278_v43 = vld [vmem:[%s7049_s3 + $0x1d8] sm:$0xff] }
 0xf0e   :  { %3001 = vmatpush.msra.mxu1 %v4278_v43 }
 0xf0f   :  { %2838 = vmatmul.f32.gmra.mxu2 %v2809_v46 }
 0xf10   :  { %3002 = vmatpush.msra.mxu1 %v4277_v32 }
 0xf12   :  { %3003 = vmatpush.msra.mxu1 %v4276_v16 }
 0xf14   :  { %3004 = vmatpush.msra.mxu1 %v4275_v45 }
 0xf16   :  { %3005 = vmatpush.msra.mxu1 %v4274_v23 }
 0xf18   :  { %3006 = vmatpush.msra.mxu1 %v4273_v52 }
 0xf1a   :  { %3007 = vmatpush.msra.mxu1 %v4272_v24 }
 0xf1c   :  { %3008 = vmatpush.msra.mxu1 %v4271_v11 }
 0xf1e   :  { %3009 = vmatpush.msra.mxu1 %v4270_v42 }
 0xf20   :  { %3010 = vmatpush.msra.mxu1 %v4269_v2 }
 0xf22   :  { %3011 = vmatpush.msra.mxu1 %v4268_v14 }
 0xf24   :  { %3012 = vmatpush.msra.mxu1 %v4267_v35 }
 0xf7a   :  { %v2830_v62 = vpop.f32.mrf.mxu2 }
 0xf7b   :  { %v2831_v61 = vadd.f32 %v4423_v7, %v2830_v62 }
 0xf7d   :  { %v6303_v21 = vmax.f32 %v2831_v61, 0.0 }
 0xf7f   :  { %2892 = vadd.xlane.f32.xlu2 %v6303_v21  ;;  %v2904_v3 = vmul.f32 %v6303_v21, %v6303_v21 }
 0xf81   :  { %2908 = vadd.xlane.f32.xlu1 %v2904_v3 }
 0xf82   :  { %v2833_v9 = vpop.f32.mrf.mxu2 }
 0xf83   :  { %v2834_v29 = vadd.f32 %v4423_v7, %v2833_v9 }
 0xf85   :  { %v6308_v6 = vmax.f32 %v2834_v29, 0.0 }
 0xf87   :  { %2894 = vadd.xlane.f32.xlu0 %v6308_v6  ;;  %v2905_v51 = vmul.f32 %v6308_v6, %v6308_v6 }
 0xf89   :  { %2910 = vadd.xlane.f32.xlu2 %v2905_v51 }
 0xf8a   :  { %v2836_v60 = vpop.f32.mrf.mxu2 }
 0xf8b   :  { %v2837_v28 = vadd.f32 %v4423_v7, %v2836_v60 }
 0xf8d   :  { %v6313_v17 = vmax.f32 %v2837_v28, 0.0 }
 0xf8f   :  { %2896 = vadd.xlane.f32.xlu1 %v6313_v17  ;;  %v2906_v56 = vmul.f32 %v6313_v17, %v6313_v17 }
 0xf91   :  { %2912 = vadd.xlane.f32.xlu0 %v2906_v56  ;;  %v4424_v56 = vld [vmem:[%s7050_s30 + $0x3] ss:$0 sm:$0xff] }
 0xf92   :  { %v2839_v38 = vpop.f32.mrf.mxu2 }
 0xf93   :  { %v2840_v50 = vadd.f32 %v4423_v7, %v2839_v38 }
 0xf95   :  { %v6318_v10 = vmax.f32 %v2840_v50, 0.0 }
 0xf97   :  { %2898 = vadd.xlane.f32.xlu2 %v6318_v10  ;;  %v2907_v20 = vmul.f32 %v6318_v10, %v6318_v10 }
 0xf99   :  { %2914 = vadd.xlane.f32.xlu1 %v2907_v20 }
 0xff2   :  { %v2893_v40 = vpop.xlane.xlu2 %2892 }
 0xff3   :  { %v2900_v55 = vmul.f32 0.03125, %v2893_v40 }
 0xff4   :  { %v2909_v63 = vpop.xlane.xlu1 %2908 }
 0xff5   :  { %v2920_v26 = vmul.f32 %v2900_v55, %v2900_v55  ;;  %v2916_v36 = vmul.f32 0.03125, %v2909_v63  ;;  %v2928_v60 = vsub.f32 %v6303_v21, %v2900_v55 }
 0xff7   :  { %v2924_v19 = vsub.f32 %v2916_v36, %v2920_v26 }
 0xff9   :  { %v2932_v27 = vadd.f32 1e-05, %v2924_v19 }
 0xffa   :  { %v2895_v58 = vpop.xlane.xlu0 %2894 }
 0xffb   :  { %4578 = vrsqrt.f32 %v2932_v27  ;;  %v2901_v39 = vmul.f32 0.03125, %v2895_v58  ;;  %vm2942_vm12 = vweird.f32 %v2932_v27 }
 0xffc   :  { %v2911_v12 = vpop.xlane.xlu2 %2910 }
 0xffd   :  { %v2921_v33 = vmul.f32 %v2901_v39, %v2901_v39  ;;  %v2917_v44 = vmul.f32 0.03125, %v2911_v12  ;;  %v2929_v42 = vsub.f32 %v6308_v6, %v2901_v39 }
 0xfff   :  { %v2925_v4 = vsub.f32 %v2917_v44, %v2921_v33 }
0x1001   :  { %v4579_v49 = vpop.eup %4578  ;;  %v2933_v34 = vadd.f32 1e-05, %v2925_v4 }
0x1002   :  { %v2937_v37 = vmul.f32 %v4579_v49, %v2932_v27  ;;  %v2897_v18 = vpop.xlane.xlu1 %2896  ;;  %vm2943_vm11 = vweird.f32 %v4579_v49 }
0x1003   :  { %4580 = vrsqrt.f32 %v2933_v34  ;;  %v2902_v30 = vmul.f32 0.03125, %v2897_v18  ;;  %vm2944_vm13 = vmor %vm2942_vm12, %vm2943_vm11  ;;  %vm2952_vm15 = vweird.f32 %v2933_v34 }
0x1004   :  { %v2938_v15 = vmul.f32 %v4579_v49, %v2937_v37  ;;  %v2913_v1 = vpop.xlane.xlu0 %2912 }
0x1005   :  { %v2922_v47 = vmul.f32 %v2902_v30, %v2902_v30  ;;  %v2918_v53 = vmul.f32 0.03125, %v2913_v1  ;;  %v2930_v58 = vsub.f32 %v6313_v17, %v2902_v30  ;;  %v4426_v30 = vld [vmem:[%s7052_s6 + $0x3] ss:$0 sm:$0xff] }
0x1006   :  { %v2939_v46 = vmul.f32 0.5, %v2938_v15 }
0x1007   :  { %v2926_v7 = vsub.f32 %v2918_v53, %v2922_v47 }
0x1008   :  { %v2940_v62 = vsub.f32 1.5, %v2939_v46 }
0x1009   :  { %v4581_v61 = vpop.eup %4580  ;;  %v2934_v3 = vadd.f32 1e-05, %v2926_v7 }
0x100a   :  { %v2941_v9 = vmul.f32 %v4579_v49, %v2940_v62  ;;  %v2947_v29 = vmul.f32 %v4581_v61, %v2933_v34  ;;  %v2899_v51 = vpop.xlane.xlu2 %2898  ;;  %vm2953_vm14 = vweird.f32 %v4581_v61 }
0x100b   :  { %4582 = vrsqrt.f32 %v2934_v3  ;;  %v2903_v28 = vmul.f32 0.03125, %v2899_v51  ;;  %vm2954_vm1 = vmor %vm2952_vm15, %vm2953_vm14  ;;  %vm2962_vm2 = vweird.f32 %v2934_v3 }
0x100c   :  { %v2945_v38 = vsel %vm2944_vm13, %v4579_v49, %v2941_v9  ;;  %v2948_v50 = vmul.f32 %v4581_v61, %v2947_v29  ;;  %v2915_v20 = vpop.xlane.xlu1 %2914 }
0x100d   :  { %v2923_v25 = vmul.f32 %v2903_v28, %v2903_v28  ;;  %v2919_v22 = vmul.f32 0.03125, %v2915_v20  ;;  %v2976_v13 = vmul.f32 %v2945_v38, %v2928_v60  ;;  %v2931_v37 = vsub.f32 %v6318_v10, %v2903_v28  ;;  %v4301_v20 = vld [vmem:[%s7053_s7 + $0x1f8] sm:$0xff] }
0x100e   :  { %v2949_v43 = vmul.f32 0.5, %v2948_v50  ;;  %3135 = vmatpush.msra.mxu3 %v4301_v20 }
0x100f   :  { %v2927_v32 = vsub.f32 %v2919_v22, %v2923_v25  ;;  %v2983_v21 = vmul.f32 %v4424_v56, %v2976_v13  ;;  %v4300_v25 = vld [vmem:[%s7053_s7 + $0x1f0] sm:$0xff]  ;;  %v4299_v22 = vld [vmem:[%s7053_s7 + $0x1e8] sm:$0xff]  ;;  %v4298_v13 = vld [vmem:[%s7053_s7 + $0x1e0] sm:$0xff] }
0x1010   :  { %v2950_v16 = vsub.f32 1.5, %v2949_v43  ;;  %3136 = vmatpush.msra.mxu3 %v4300_v25  ;;  %v4296_v43 = vld [vmem:[%s7053_s7 + $0x1d0] sm:$0xff] }
0x1011   :  { %v4583_v45 = vpop.eup %4582  ;;  %v2935_v23 = vadd.f32 1e-05, %v2927_v32  ;;  %v2990_v52 = vadd.f32 %v4425_v5, %v2983_v21  ;;  %v4295_v32 = vld [vmem:[%s7053_s7 + $0x1c8] sm:$0xff]  ;;  %v4294_v21 = vld [vmem:[%s7053_s7 + $0x1c0] sm:$0xff] }
0x1012   :  { %v2957_v24 = vmul.f32 %v4583_v45, %v2934_v3  ;;  %v2951_v11 = vmul.f32 %v4581_v61, %v2950_v16  ;;  %vm2963_vm0 = vweird.f32 %v4583_v45  ;;  %3137 = vmatpush.msra.mxu3 %v4299_v22  ;;  %v4293_v16 = vld [vmem:[%s7053_s7 + $0x1b8] sm:$0xff] }
0x1013   :  { %4584 = vrsqrt.f32 %v2935_v23  ;;  %3013 = vmatmul.f32.vlgmr.msra.gmra.mxu1 %v2990_v52  ;;  %vm2964_vm3 = vmor %vm2962_vm2, %vm2963_vm0  ;;  %vm2972_vm6 = vweird.f32 %v2935_v23  ;;  %v4290_v52 = vld [vmem:[%s7053_s7 + $0x1a0] sm:$0xff] }
0x1014   :  { %v2958_v2 = vmul.f32 %v4583_v45, %v2957_v24  ;;  %v2955_v14 = vsel %vm2954_vm1, %v4581_v61, %v2951_v11  ;;  %3138 = vmatpush.msra.mxu3 %v4298_v13  ;;  %v4289_v24 = vld [vmem:[%s7053_s7 + $0x198] sm:$0xff]  ;;  %v4288_v11 = vld [vmem:[%s7053_s7 + $0x190] sm:$0xff]  ;;  %v4428_v13 = vld [vmem:[%s7055_s25 + $0x3] ss:$0 sm:$0xff] }
0x1015   :  { %v2977_v35 = vmul.f32 %v2955_v14, %v2929_v42  ;;  %v4287_v42 = vld [vmem:[%s7053_s7 + $0x188] sm:$0xff] }
0x1016   :  { %v2959_v40 = vmul.f32 0.5, %v2958_v2  ;;  %v4286_v2 = vld [vmem:[%s7053_s7 + $0x180] sm:$0xff] }
0x1017   :  { %v2984_v55 = vmul.f32 %v4424_v56, %v2977_v35 }
0x1018   :  { %v2960_v63 = vsub.f32 1.5, %v2959_v40 }
0x1019   :  { %v4585_v26 = vpop.eup %4584  ;;  %v2991_v36 = vadd.f32 %v4425_v5, %v2984_v55 }
0x101a   :  { %v2961_v19 = vmul.f32 %v4583_v45, %v2960_v63  ;;  %v2967_v27 = vmul.f32 %v4585_v26, %v2935_v23  ;;  %vm2973_vm5 = vweird.f32 %v4585_v26  ;;  %v4291_v23 = vld [vmem:[%s7053_s7 + $0x1a8] sm:$0xff] }
0x101b   :  { %3016 = vmatmul.f32.gmra.mxu1 %v2991_v36  ;;  %vm2974_vm7 = vmor %vm2972_vm6, %vm2973_vm5 }
0x101c   :  { %v2968_v6 = vmul.f32 %v4585_v26, %v2967_v27  ;;  %v2965_v39 = vsel %vm2964_vm3, %v4583_v45, %v2961_v19  ;;  %v4292_v45 = vld [vmem:[%s7053_s7 + $0x1b0] sm:$0xff] }
0x101d   :  { %v2978_v12 = vmul.f32 %v2965_v39, %v2930_v58 }
0x101e   :  { %v2969_v33 = vmul.f32 0.5, %v2968_v6 }
0x101f   :  { %v2985_v44 = vmul.f32 %v4424_v56, %v2978_v12 }
0x1020   :  { %v2970_v4 = vsub.f32 1.5, %v2969_v33 }
0x1021   :  { %v2992_v49 = vadd.f32 %v4425_v5, %v2985_v44 }
0x1022   :  { %v2971_v34 = vmul.f32 %v4585_v26, %v2970_v4 }
0x1023   :  { %3019 = vmatmul.f32.gmra.mxu1 %v2992_v49 }
0x1024   :  { %v2975_v18 = vsel %vm2974_vm7, %v4585_v26, %v2971_v34 }
0x1025   :  { %v2979_v15 = vmul.f32 %v2975_v18, %v2931_v37 }
0x1027   :  { %v2986_v1 = vmul.f32 %v4424_v56, %v2979_v15 }
0x1029   :  { %v2993_v17 = vadd.f32 %v4425_v5, %v2986_v1  ;;  %v4297_v5 = vld [vmem:[%s7053_s7 + $0x1d8] sm:$0xff] }
0x102a   :  { %3139 = vmatpush.msra.mxu3 %v4297_v5 }
0x102b   :  { %3022 = vmatmul.f32.gmra.mxu1 %v2993_v17 }
0x102c   :  { %3140 = vmatpush.msra.mxu3 %v4296_v43 }
0x102e   :  { %3141 = vmatpush.msra.mxu3 %v4295_v32 }
0x1030   :  { %3142 = vmatpush.msra.mxu3 %v4294_v21 }
0x1032   :  { %3143 = vmatpush.msra.mxu3 %v4293_v16 }
0x1034   :  { %3144 = vmatpush.msra.mxu3 %v4292_v45 }
0x1036   :  { %3145 = vmatpush.msra.mxu3 %v4291_v23 }
0x1038   :  { %3146 = vmatpush.msra.mxu3 %v4290_v52 }
0x103a   :  { %3147 = vmatpush.msra.mxu3 %v4289_v24 }
0x103c   :  { %3148 = vmatpush.msra.mxu3 %v4288_v11 }
0x103e   :  { %3149 = vmatpush.msra.mxu3 %v4287_v42 }
0x1040   :  { %3150 = vmatpush.msra.mxu3 %v4286_v2 }
0x1090   :  { %v3014_v47 = vpop.f32.mrf.mxu1 }
0x1091   :  { %v3015_v53 = vadd.f32 %v4426_v30, %v3014_v47 }
0x1093   :  { %v6384_v46 = vmax.f32 %v3015_v53, 0.0 }
0x1095   :  { %3030 = vadd.xlane.f32.xlu0 %v6384_v46  ;;  %v3042_v10 = vmul.f32 %v6384_v46, %v6384_v46 }
0x1097   :  { %3046 = vadd.xlane.f32.xlu2 %v3042_v10 }
0x1098   :  { %v3017_v7 = vpop.f32.mrf.mxu1 }
0x1099   :  { %v3018_v62 = vadd.f32 %v4426_v30, %v3017_v7 }
0x109b   :  { %v6389_v61 = vmax.f32 %v3018_v62, 0.0 }
0x109d   :  { %3032 = vadd.xlane.f32.xlu1 %v6389_v61  ;;  %v3043_v3 = vmul.f32 %v6389_v61, %v6389_v61 }
0x109f   :  { %3048 = vadd.xlane.f32.xlu0 %v3043_v3 }
0x10a0   :  { %v3020_v9 = vpop.f32.mrf.mxu1 }
0x10a1   :  { %v3021_v29 = vadd.f32 %v4426_v30, %v3020_v9 }
0x10a3   :  { %v6394_v51 = vmax.f32 %v3021_v29, 0.0 }
0x10a5   :  { %3034 = vadd.xlane.f32.xlu2 %v6394_v51  ;;  %v3044_v60 = vmul.f32 %v6394_v51, %v6394_v51 }
0x10a7   :  { %3050 = vadd.xlane.f32.xlu1 %v3044_v60  ;;  %v4427_v60 = vld [vmem:[%s7054_s27 + $0x3] ss:$0 sm:$0xff]  ;;  %s7058_s27 = sld [smem:[#allocation12_spill]] }
0x10a8   :  { %v3023_v28 = vpop.f32.mrf.mxu1 }
0x10a9   :  { %v3024_v56 = vadd.f32 %v4426_v30, %v3023_v28 }
0x10ab   :  { %v6399_v38 = vmax.f32 %v3024_v56, 0.0 }
0x10ad   :  { %3036 = vadd.xlane.f32.xlu0 %v6399_v38  ;;  %v3045_v50 = vmul.f32 %v6399_v38, %v6399_v38 }
0x10af   :  { %3052 = vadd.xlane.f32.xlu2 %v3045_v50 }
0x1108   :  { %v3031_v14 = vpop.xlane.xlu0 %3030 }
0x1109   :  { %v3038_v35 = vmul.f32 0.03125, %v3031_v14 }
0x110a   :  { %v3047_v40 = vpop.xlane.xlu2 %3046 }
0x110b   :  { %v3058_v55 = vmul.f32 %v3038_v35, %v3038_v35  ;;  %v3054_v63 = vmul.f32 0.03125, %v3047_v40  ;;  %v3066_v9 = vsub.f32 %v6384_v46, %v3038_v35 }
0x110d   :  { %v3062_v26 = vsub.f32 %v3054_v63, %v3058_v55 }
0x110f   :  { %v3070_v36 = vadd.f32 1e-05, %v3062_v26 }
0x1110   :  { %v3033_v19 = vpop.xlane.xlu1 %3032 }
0x1111   :  { %4586 = vrsqrt.f32 %v3070_v36  ;;  %v3039_v27 = vmul.f32 0.03125, %v3033_v19  ;;  %vm3080_vm9 = vweird.f32 %v3070_v36 }
0x1112   :  { %v3049_v58 = vpop.xlane.xlu0 %3048 }
0x1113   :  { %v3059_v6 = vmul.f32 %v3039_v27, %v3039_v27  ;;  %v3055_v39 = vmul.f32 0.03125, %v3049_v58  ;;  %v3067_v24 = vsub.f32 %v6389_v61, %v3039_v27 }
0x1115   :  { %v3063_v12 = vsub.f32 %v3055_v39, %v3059_v6 }
0x1117   :  { %v4587_v33 = vpop.eup %4586  ;;  %v3071_v44 = vadd.f32 1e-05, %v3063_v12 }
0x1118   :  { %v3075_v4 = vmul.f32 %v4587_v33, %v3070_v36  ;;  %v3035_v49 = vpop.xlane.xlu2 %3034  ;;  %vm3081_vm8 = vweird.f32 %v4587_v33 }
0x1119   :  { %4588 = vrsqrt.f32 %v3071_v44  ;;  %v3040_v34 = vmul.f32 0.03125, %v3035_v49  ;;  %vm3082_vm10 = vmor %vm3080_vm9, %vm3081_vm8  ;;  %vm3090_vm12 = vweird.f32 %v3071_v44 }
0x111a   :  { %v3076_v37 = vmul.f32 %v4587_v33, %v3075_v4  ;;  %v3051_v18 = vpop.xlane.xlu1 %3050 }
0x111b   :  { %v3060_v15 = vmul.f32 %v3040_v34, %v3040_v34  ;;  %v3056_v1 = vmul.f32 0.03125, %v3051_v18  ;;  %v3068_v19 = vsub.f32 %v6394_v51, %v3040_v34 }
0x111c   :  { %v3077_v17 = vmul.f32 0.5, %v3076_v37 }
0x111d   :  { %v3064_v30 = vsub.f32 %v3056_v1, %v3060_v15 }
0x111e   :  { %v3078_v47 = vsub.f32 1.5, %v3077_v17  ;;  %v4429_v17 = vld [vmem:[%s7056_s26 + $0x3] ss:$0 sm:$0xff] }
0x111f   :  { %v4589_v53 = vpop.eup %4588  ;;  %v3072_v10 = vadd.f32 1e-05, %v3064_v30 }
0x1120   :  { %v3079_v7 = vmul.f32 %v4587_v33, %v3078_v47  ;;  %v3085_v62 = vmul.f32 %v4589_v53, %v3071_v44  ;;  %v3037_v3 = vpop.xlane.xlu0 %3036  ;;  %vm3091_vm11 = vweird.f32 %v4589_v53 }
0x1121   :  { %4590 = vrsqrt.f32 %v3072_v10  ;;  %v3041_v29 = vmul.f32 0.03125, %v3037_v3  ;;  %vm3092_vm13 = vmor %vm3090_vm12, %vm3091_vm11  ;;  %vm3100_vm15 = vweird.f32 %v3072_v10 }
0x1122   :  { %v3083_v28 = vsel %vm3082_vm10, %v4587_v33, %v3079_v7  ;;  %v3086_v56 = vmul.f32 %v4589_v53, %v3085_v62  ;;  %v3053_v50 = vpop.xlane.xlu2 %3052 }
0x1123   :  { %v3061_v20 = vmul.f32 %v3041_v29, %v3041_v29  ;;  %v3057_v25 = vmul.f32 0.03125, %v3053_v50  ;;  %v3114_v22 = vmul.f32 %v3083_v28, %v3066_v9  ;;  %v3069_v4 = vsub.f32 %v6399_v38, %v3041_v29 }
0x1124   :  { %v3087_v5 = vmul.f32 0.5, %v3086_v56 }
0x1125   :  { %v3065_v43 = vsub.f32 %v3057_v25, %v3061_v20  ;;  %v3121_v46 = vmul.f32 %v4427_v60, %v3114_v22 }
0x1126   :  { %v3088_v32 = vsub.f32 1.5, %v3087_v5  ;;  %v4327_v5 = vld [vmem:[%s7014_s12 + $0x1f0] sm:$0xff] }
0x1127   :  { %v4591_v21 = vpop.eup %4590  ;;  %v3073_v16 = vadd.f32 1e-05, %v3065_v43  ;;  %v3128_v45 = vadd.f32 %v4428_v13, %v3121_v46  ;;  %v4326_v43 = vld [vmem:[%s7014_s12 + $0x1e8] sm:$0xff]  ;;  %v4325_v46 = vld [vmem:[%s7014_s12 + $0x1e0] sm:$0xff] }
0x1128   :  { %v3095_v23 = vmul.f32 %v4591_v21, %v3072_v10  ;;  %v3089_v52 = vmul.f32 %v4589_v53, %v3088_v32  ;;  %vm3101_vm14 = vweird.f32 %v4591_v21  ;;  %v4324_v32 = vld [vmem:[%s7014_s12 + $0x1d8] sm:$0xff] }
0x1129   :  { %4592 = vrsqrt.f32 %v3073_v16  ;;  %3151 = vmatmul.f32.vlgmr.msra.gmra.mxu3 %v3128_v45  ;;  %vm3102_vm1 = vmor %vm3100_vm15, %vm3101_vm14  ;;  %vm3110_vm2 = vweird.f32 %v3073_v16  ;;  %v4321_v45 = vld [vmem:[%s7014_s12 + $0x1c0] sm:$0xff] }
0x112a   :  { %v3096_v11 = vmul.f32 %v4591_v21, %v3095_v23  ;;  %v3093_v42 = vsel %vm3092_vm13, %v4589_v53, %v3089_v52  ;;  %v4320_v23 = vld [vmem:[%s7014_s12 + $0x1b8] sm:$0xff]  ;;  %v4319_v52 = vld [vmem:[%s7014_s12 + $0x1b0] sm:$0xff] }
0x112b   :  { %v3115_v2 = vmul.f32 %v3093_v42, %v3067_v24  ;;  %v4318_v24 = vld [vmem:[%s7014_s12 + $0x1a8] sm:$0xff]  ;;  %v4316_v42 = vld [vmem:[%s7014_s12 + $0x198] sm:$0xff] }
0x112c   :  { %v3097_v14 = vmul.f32 0.5, %v3096_v11  ;;  %v4317_v11 = vld [vmem:[%s7014_s12 + $0x1a0] sm:$0xff] }
0x112d   :  { %v3122_v35 = vmul.f32 %v4427_v60, %v3115_v2  ;;  %v4315_v2 = vld [vmem:[%s7014_s12 + $0x190] sm:$0xff] }
0x112e   :  { %v3098_v40 = vsub.f32 1.5, %v3097_v14  ;;  %v4314_v14 = vld [vmem:[%s7014_s12 + $0x188] sm:$0xff] }
0x112f   :  { %v4593_v55 = vpop.eup %4592  ;;  %v3129_v63 = vadd.f32 %v4428_v13, %v3122_v35  ;;  %v4313_v35 = vld [vmem:[%s7014_s12 + $0x180] sm:$0xff] }
0x1130   :  { %v3105_v26 = vmul.f32 %v4593_v55, %v3073_v16  ;;  %v3099_v36 = vmul.f32 %v4591_v21, %v3098_v40  ;;  %vm3111_vm0 = vweird.f32 %v4593_v55  ;;  %v4322_v16 = vld [vmem:[%s7014_s12 + $0x1c8] sm:$0xff] }
0x1131   :  { %3154 = vmatmul.f32.gmra.mxu3 %v3129_v63  ;;  %vm3112_vm3 = vmor %vm3110_vm2, %vm3111_vm0 }
0x1132   :  { %v3106_v61 = vmul.f32 %v4593_v55, %v3105_v26  ;;  %v3103_v27 = vsel %vm3102_vm1, %v4591_v21, %v3099_v36  ;;  %v4323_v21 = vld [vmem:[%s7014_s12 + $0x1d0] sm:$0xff] }
0x1133   :  { %v3116_v58 = vmul.f32 %v3103_v27, %v3068_v19 }
0x1134   :  { %v3107_v6 = vmul.f32 0.5, %v3106_v61 }
0x1135   :  { %v3123_v39 = vmul.f32 %v4427_v60, %v3116_v58 }
0x1136   :  { %v3108_v12 = vsub.f32 1.5, %v3107_v6 }
0x1137   :  { %v3130_v33 = vadd.f32 %v4428_v13, %v3123_v39 }
0x1138   :  { %v3109_v44 = vmul.f32 %v4593_v55, %v3108_v12 }
0x1139   :  { %3157 = vmatmul.f32.gmra.mxu3 %v3130_v33 }
0x113a   :  { %v3113_v49 = vsel %vm3112_vm3, %v4593_v55, %v3109_v44 }
0x113b   :  { %v3117_v37 = vmul.f32 %v3113_v49, %v3069_v4 }
0x113d   :  { %v3124_v18 = vmul.f32 %v4427_v60, %v3117_v37 }
0x113f   :  { %v3131_v51 = vadd.f32 %v4428_v13, %v3124_v18  ;;  %v4328_v13 = vld [vmem:[%s7014_s12 + $0x1f8] sm:$0xff] }
0x1140   :  { %3456 = vmatpush.msra.mxu0 %v4328_v13 }
0x1141   :  { %3160 = vmatmul.f32.gmra.mxu3 %v3131_v51 }
0x1142   :  { %3457 = vmatpush.msra.mxu0 %v4327_v5 }
0x1144   :  { %3458 = vmatpush.msra.mxu0 %v4326_v43 }
0x1146   :  { %3459 = vmatpush.msra.mxu0 %v4325_v46 }
0x1148   :  { %3460 = vmatpush.msra.mxu0 %v4324_v32 }
0x114a   :  { %3461 = vmatpush.msra.mxu0 %v4323_v21 }
0x114c   :  { %3462 = vmatpush.msra.mxu0 %v4322_v16 }
0x114e   :  { %3463 = vmatpush.msra.mxu0 %v4321_v45 }
0x1150   :  { %3464 = vmatpush.msra.mxu0 %v4320_v23 }
0x1152   :  { %3465 = vmatpush.msra.mxu0 %v4319_v52 }
0x1154   :  { %3466 = vmatpush.msra.mxu0 %v4318_v24 }
0x1156   :  { %3467 = vmatpush.msra.mxu0 %v4317_v11 }
0x1158   :  { %3468 = vmatpush.msra.mxu0 %v4316_v42 }
0x115a   :  { %3469 = vmatpush.msra.mxu0 %v4315_v2 }
0x115c   :  { %3470 = vmatpush.msra.mxu0 %v4314_v14 }
0x115e   :  { %3471 = vmatpush.msra.mxu0 %v4313_v35 }
0x11ac   :  { %v3152_v34 = vpop.f32.mrf.mxu3 }
0x11ad   :  { %v3153_v38 = vadd.f32 %v4429_v17, %v3152_v34 }
0x11af   :  { %v3164_v9 = vmax.f32 %v3153_v38, 0.0 }
0x11b4   :  { %v3155_v15 = vpop.f32.mrf.mxu3 }
0x11b5   :  { %v3156_v10 = vadd.f32 %v4429_v17, %v3155_v15 }
0x11b7   :  { %v3165_v3 = vmax.f32 %v3156_v10, 0.0 }
0x11bc   :  { %v3158_v1 = vpop.f32.mrf.mxu3 }
0x11bd   :  { %v3159_v47 = vadd.f32 %v4429_v17, %v3158_v1 }
0x11bf   :  { %v3166_v62 = vmax.f32 %v3159_v47, 0.0 }
0x11c4   :  { %v3161_v30 = vpop.f32.mrf.mxu3 }
0x11c5   :  { %v3162_v53 = vadd.f32 %v4429_v17, %v3161_v30 }
0x11c7   :  { %v3167_v7 = vmax.f32 %v3162_v53, 0.0 }
0x11c9   :  { %3180 = vmatpush.msra.mxu2 %v3167_v7 }
0x11cb   :  { %3181 = vmatpush.msra.mxu2 %v3166_v62 }
0x11cd   :  { %3182 = vmatpush.msra.mxu2 %v3165_v3  ;;  %v6576_v3 = vld [vmem:[%s7011_s10 + $0x3] ss:$0 sm:$0xff] }
0x11cf   :  { %3183 = vmatpush.msra.mxu2 %v3164_v9 }
0x11d0   :  { %4303 = vmatmul.msk.f32.vlgmr.msra.gmra.mxu2 %vm1337_vm4, %v5505_v57 }
0x11d8   :  { %4304 = vmatmul.msk.f32.gmra.mxu2 %vm1337_vm4, %v5510_v59 }
0x11e0   :  { %4305 = vmatmul.msk.f32.gmra.mxu2 %vm1337_vm4, %v5514_v0 }
0x11e8   :  { %4306 = vmatmul.msk.f32.gmra.mxu2 %vm1337_vm4, %v5518_v8 }
0x11f0   :  { %4307 = vmatmul.msk.f32.gmra.mxu2 %vm1337_vm4, %v5522_v48 }
0x11f8   :  { %4308 = vmatmul.msk.f32.gmra.mxu2 %vm1337_vm4, %v5528_v31 }
0x1200   :  { %4309 = vmatmul.msk.f32.gmra.mxu2 %vm1337_vm4, %v5532_v54 }
0x1208   :  { %4310 = vmatmul.msk.f32.gmra.mxu2 %vm1337_vm4, %v5536_v41 }
0x1253   :  { %v6481_v57 = vpop.f32.mrf.mxu2 }
0x1254   :  { %v3279_v59 = vmul.f32 %v6481_v57, %v6481_v57  ;;  %3255 = vadd.xlane.f32.xlu1 %v6481_v57 }
0x1256   :  { %3287 = vadd.xlane.f32.xlu0 %v3279_v59 }
0x125b   :  { %v6486_v0 = vpop.f32.mrf.mxu2 }
0x125c   :  { %3257 = vadd.xlane.f32.xlu2 %v6486_v0  ;;  %v3280_v8 = vmul.f32 %v6486_v0, %v6486_v0 }
0x125e   :  { %3289 = vadd.xlane.f32.xlu1 %v3280_v8 }
0x1263   :  { %v6491_v48 = vpop.f32.mrf.mxu2 }
0x1264   :  { %v3281_v31 = vmul.f32 %v6491_v48, %v6491_v48  ;;  %3259 = vadd.xlane.f32.xlu0 %v6491_v48 }
0x1266   :  { %3291 = vadd.xlane.f32.xlu2 %v3281_v31 }
0x126b   :  { %v6496_v54 = vpop.f32.mrf.mxu2 }
0x126c   :  { %v3282_v41 = vmul.f32 %v6496_v54, %v6496_v54  ;;  %3261 = vadd.xlane.f32.xlu1 %v6496_v54 }
0x126e   :  { %3293 = vadd.xlane.f32.xlu0 %v3282_v41 }
0x1273   :  { %v6501_v29 = vpop.f32.mrf.mxu2 }
0x1274   :  { %3263 = vadd.xlane.f32.xlu2 %v6501_v29  ;;  %v3283_v60 = vmul.f32 %v6501_v29, %v6501_v29 }
0x1276   :  { %3295 = vadd.xlane.f32.xlu1 %v3283_v60  ;;  %v6584_v60 = vld [vmem:[%s7012_s11 + $0x3] ss:$0 sm:$0xff] }
0x127b   :  { %v6506_v28 = vpop.f32.mrf.mxu2 }
0x127c   :  { %v3284_v56 = vmul.f32 %v6506_v28, %v6506_v28  ;;  %3265 = vadd.xlane.f32.xlu0 %v6506_v28 }
0x127e   :  { %3297 = vadd.xlane.f32.xlu2 %v3284_v56 }
0x1283   :  { %v6511_v50 = vpop.f32.mrf.mxu2 }
0x1284   :  { %v3285_v20 = vmul.f32 %v6511_v50, %v6511_v50  ;;  %3267 = vadd.xlane.f32.xlu1 %v6511_v50 }
0x1286   :  { %3299 = vadd.xlane.f32.xlu0 %v3285_v20 }
0x128b   :  { %v6516_v25 = vpop.f32.mrf.mxu2 }
0x128c   :  { %v3286_v22 = vmul.f32 %v6516_v25, %v6516_v25  ;;  %3269 = vadd.xlane.f32.xlu2 %v6516_v25 }
0x128e   :  { %3301 = vadd.xlane.f32.xlu1 %v3286_v22 }
0x12c7   :  { %v3256_v40 = vpop.xlane.xlu1 %3255 }
0x12c8   :  { %v3271_v55 = vmul.f32 0.03125, %v3256_v40 }
0x12c9   :  { %v3288_v63 = vpop.xlane.xlu0 %3287 }
0x12ca   :  { %v3311_v26 = vmul.f32 %v3271_v55, %v3271_v55  ;;  %v3303_v36 = vmul.f32 0.03125, %v3288_v63  ;;  %v3327_v9 = vsub.f32 %v6481_v57, %v3271_v55 }
0x12cc   :  { %v3319_v19 = vsub.f32 %v3303_v36, %v3311_v26 }
0x12ce   :  { %v3335_v61 = vadd.f32 1e-05, %v3319_v19 }
0x12cf   :  { %v3258_v27 = vpop.xlane.xlu2 %3257 }
0x12d0   :  { %4594 = vrsqrt.f32 %v3335_v61  ;;  %v3272_v58 = vmul.f32 0.03125, %v3258_v27  ;;  %vm3349_vm5 = vweird.f32 %v3335_v61 }
0x12d1   :  { %v3290_v6 = vpop.xlane.xlu1 %3289 }
0x12d2   :  { %v3312_v39 = vmul.f32 %v3272_v58, %v3272_v58  ;;  %v3304_v12 = vmul.f32 0.03125, %v3290_v6  ;;  %v3328_v52 = vsub.f32 %v6486_v0, %v3272_v58 }
0x12d4   :  { %v3320_v33 = vsub.f32 %v3304_v12, %v3312_v39 }
0x12d6   :  { %v4595_v44 = vpop.eup %4594  ;;  %v3336_v4 = vadd.f32 1e-05, %v3320_v33 }
0x12d7   :  { %v3344_v49 = vmul.f32 %v4595_v44, %v3335_v61  ;;  %v3260_v37 = vpop.xlane.xlu0 %3259  ;;  %vm3350_vm4 = vweird.f32 %v4595_v44 }
0x12d8   :  { %4596 = vrsqrt.f32 %v3336_v4  ;;  %v6569_v18 = vmul.f32 0.03125, %v3260_v37  ;;  %vm3351_vm6 = vmor %vm3349_vm5, %vm3350_vm4  ;;  %vm3359_vm8 = vweird.f32 %v3336_v4 }
0x12d9   :  { %v3345_v51 = vmul.f32 %v4595_v44, %v3344_v49  ;;  %v3292_v34 = vpop.xlane.xlu2 %3291 }
0x12da   :  { %v3313_v15 = vmul.f32 %v6569_v18, %v6569_v18  ;;  %v3305_v1 = vmul.f32 0.03125, %v3292_v34  ;;  %v3329_v39 = vsub.f32 %v6491_v48, %v6569_v18 }
0x12db   :  { %v3346_v17 = vmul.f32 0.5, %v3345_v51 }
0x12dc   :  { %v3321_v30 = vsub.f32 %v3305_v1, %v3313_v15 }
0x12dd   :  { %v3347_v47 = vsub.f32 1.5, %v3346_v17 }
0x12de   :  { %v4597_v53 = vpop.eup %4596  ;;  %v3337_v10 = vadd.f32 1e-05, %v3321_v30 }
0x12df   :  { %v3348_v7 = vmul.f32 %v4595_v44, %v3347_v47  ;;  %v3354_v38 = vmul.f32 %v4597_v53, %v3336_v4  ;;  %v3262_v62 = vpop.xlane.xlu1 %3261  ;;  %vm3360_vm7 = vweird.f32 %v4597_v53 }
0x12e0   :  { %4598 = vrsqrt.f32 %v3337_v10  ;;  %v6579_v59 = vmul.f32 0.03125, %v3262_v62  ;;  %vm3361_vm9 = vmor %vm3359_vm8, %vm3360_vm7  ;;  %vm3369_vm11 = vweird.f32 %v3337_v10 }
0x12e1   :  { %v3352_v8 = vsel %vm3351_vm6, %v4595_v44, %v3348_v7  ;;  %v3355_v31 = vmul.f32 %v4597_v53, %v3354_v38  ;;  %v3294_v41 = vpop.xlane.xlu0 %3293 }
0x12e2   :  { %v3423_v56 = vmul.f32 %v3352_v8, %v3327_v9  ;;  %v3314_v20 = vmul.f32 %v6579_v59, %v6579_v59  ;;  %v3306_v22 = vmul.f32 0.03125, %v3294_v41  ;;  %v3330_v7 = vsub.f32 %v6496_v54, %v6579_v59 }
0x12e3   :  { %v3356_v13 = vmul.f32 0.5, %v3355_v31 }
0x12e4   :  { %v3434_v57 = vmul.f32 %v6576_v3, %v3423_v56  ;;  %v3322_v5 = vsub.f32 %v3306_v22, %v3314_v20 }
0x12e5   :  { %v3357_v43 = vsub.f32 1.5, %v3356_v13 }
0x12e6   :  { %v4599_v46 = vpop.eup %4598  ;;  %v3338_v32 = vadd.f32 1e-05, %v3322_v5  ;;  %v3445_v21 = vadd.f32 %v6584_v60, %v3434_v57 }
0x12e7   :  { %v3358_v16 = vmul.f32 %v4597_v53, %v3357_v43  ;;  %v3364_v45 = vmul.f32 %v4599_v46, %v3337_v10  ;;  %v3264_v23 = vpop.xlane.xlu2 %3263  ;;  %vm3370_vm10 = vweird.f32 %v4599_v46 }
0x12e8   :  { %4600 = vrsqrt.f32 %v3338_v32  ;;  %v6591_v24 = vmul.f32 0.03125, %v3264_v23  ;;  %3472 = vmatmul.f32.vlgmr.msra.gmra.mxu0 %v3445_v21  ;;  %vm3371_vm12 = vmor %vm3369_vm11, %vm3370_vm10  ;;  %vm3379_vm14 = vweird.f32 %v3338_v32 }
0x12e9   :  { %v3365_v11 = vmul.f32 %v4599_v46, %v3364_v45  ;;  %v3296_v42 = vpop.xlane.xlu1 %3295  ;;  %v3362_v2 = vsel %vm3361_vm9, %v4597_v53, %v3358_v16 }
0x12ea   :  { %v3315_v14 = vmul.f32 %v6591_v24, %v6591_v24  ;;  %v3307_v35 = vmul.f32 0.03125, %v3296_v42  ;;  %v3424_v40 = vmul.f32 %v3362_v2, %v3328_v52  ;;  %v3331_v21 = vsub.f32 %v6501_v29, %v6591_v24 }
0x12eb   :  { %v3366_v55 = vmul.f32 0.5, %v3365_v11 }
0x12ec   :  { %v3323_v63 = vsub.f32 %v3307_v35, %v3315_v14  ;;  %v3435_v26 = vmul.f32 %v6576_v3, %v3424_v40 }
0x12ed   :  { %v3367_v36 = vsub.f32 1.5, %v3366_v55 }
0x12ee   :  { %v4601_v0 = vpop.eup %4600  ;;  %v3339_v19 = vadd.f32 1e-05, %v3323_v63  ;;  %v3446_v61 = vadd.f32 %v6584_v60, %v3435_v26 }
0x12ef   :  { %v3368_v27 = vmul.f32 %v4599_v46, %v3367_v36  ;;  %v3374_v58 = vmul.f32 %v4601_v0, %v3338_v32  ;;  %v3266_v6 = vpop.xlane.xlu0 %3265  ;;  %vm3380_vm13 = vweird.f32 %v4601_v0 }
0x12f0   :  { %4602 = vrsqrt.f32 %v3339_v19  ;;  %v6599_v12 = vmul.f32 0.03125, %v3266_v6  ;;  %3475 = vmatmul.f32.gmra.mxu0 %v3446_v61  ;;  %vm3381_vm15 = vmor %vm3379_vm14, %vm3380_vm13  ;;  %vm3389_vm0 = vweird.f32 %v3339_v19 }
0x12f1   :  { %v3375_v33 = vmul.f32 %v4601_v0, %v3374_v58  ;;  %v3298_v44 = vpop.xlane.xlu2 %3297  ;;  %v3372_v4 = vsel %vm3371_vm12, %v4599_v46, %v3368_v27 }
0x12f2   :  { %v3316_v49 = vmul.f32 %v6599_v12, %v6599_v12  ;;  %v3308_v37 = vmul.f32 0.03125, %v3298_v44  ;;  %v3425_v51 = vmul.f32 %v3372_v4, %v3329_v39 }
0x12f3   :  { %v3376_v34 = vmul.f32 0.5, %v3375_v33 }
0x12f4   :  { %v3324_v15 = vsub.f32 %v3308_v37, %v3316_v49  ;;  %v3436_v1 = vmul.f32 %v6576_v3, %v3425_v51 }
0x12f5   :  { %v3377_v17 = vsub.f32 1.5, %v3376_v34 }
0x12f6   :  { %v4603_v48 = vpop.eup %4602  ;;  %v3340_v18 = vadd.f32 1e-05, %v3324_v15  ;;  %v3447_v30 = vadd.f32 %v6584_v60, %v3436_v1 }
0x12f7   :  { %v3378_v47 = vmul.f32 %v4601_v0, %v3377_v17  ;;  %v3384_v53 = vmul.f32 %v4603_v48, %v3339_v19  ;;  %v3268_v10 = vpop.xlane.xlu1 %3267  ;;  %vm3390_vm1 = vweird.f32 %v4603_v48 }
0x12f8   :  { %4604 = vrsqrt.f32 %v3340_v18  ;;  %v6607_v38 = vmul.f32 0.03125, %v3268_v10  ;;  %3478 = vmatmul.f32.gmra.mxu0 %v3447_v30  ;;  %vm3391_vm2 = vmor %vm3389_vm0, %vm3390_vm1  ;;  %vm3399_vm4 = vweird.f32 %v3340_v18  ;;  %v4396_v10 = vld [vmem:[%s7013_s13 + $0x3] ss:$0 sm:$0xff]  ;;  %s7057_s13 = sld [smem:[#allocation11_spill]] }
0x12f9   :  { %v3385_v62 = vmul.f32 %v4603_v48, %v3384_v53  ;;  %v3300_v9 = vpop.xlane.xlu0 %3299  ;;  %v3382_v8 = vsel %vm3381_vm15, %v4601_v0, %v3378_v47  ;;  %v3332_v0 = vsub.f32 %v6506_v28, %v6599_v12 }
0x12fa   :  { %v3317_v31 = vmul.f32 %v6607_v38, %v6607_v38  ;;  %v3309_v41 = vmul.f32 0.03125, %v3300_v9  ;;  %v3426_v56 = vmul.f32 %v3382_v8, %v3330_v7  ;;  %v3333_v28 = vsub.f32 %v6511_v50, %v6607_v38 }
0x12fb   :  { %v3386_v20 = vmul.f32 0.5, %v3385_v62 }
0x12fc   :  { %v3325_v22 = vsub.f32 %v3309_v41, %v3317_v31  ;;  %v3437_v13 = vmul.f32 %v6576_v3, %v3426_v56 }
0x12fd   :  { %v3387_v57 = vsub.f32 1.5, %v3386_v20 }
0x12fe   :  { %v4605_v54 = vpop.eup %4604  ;;  %v3341_v59 = vadd.f32 1e-05, %v3325_v22  ;;  %v3448_v5 = vadd.f32 %v6584_v60, %v3437_v13 }
0x12ff   :  { %v3388_v43 = vmul.f32 %v4603_v48, %v3387_v57  ;;  %v3394_v46 = vmul.f32 %v4605_v54, %v3340_v18  ;;  %v3270_v32 = vpop.xlane.xlu2 %3269  ;;  %vm3400_vm3 = vweird.f32 %v4605_v54 }
0x1300   :  { %4606 = vrsqrt.f32 %v3341_v59  ;;  %v3278_v16 = vmul.f32 0.03125, %v3270_v32  ;;  %3481 = vmatmul.f32.gmra.mxu0 %v3448_v5  ;;  %vm3401_vm5 = vmor %vm3399_vm4, %vm3400_vm3  ;;  %vm3409_vm7 = vweird.f32 %v3341_v59 }
0x1301   :  { %v3395_v45 = vmul.f32 %v4605_v54, %v3394_v46  ;;  %v3302_v23 = vpop.xlane.xlu1 %3301  ;;  %v3392_v52 = vsel %vm3391_vm2, %v4603_v48, %v3388_v43 }
0x1302   :  { %v3318_v11 = vmul.f32 %v3278_v16, %v3278_v16  ;;  %v3310_v42 = vmul.f32 0.03125, %v3302_v23  ;;  %v3427_v2 = vmul.f32 %v3392_v52, %v3331_v21  ;;  %v3334_v18 = vsub.f32 %v6516_v25, %v3278_v16 }
0x1303   :  { %v3396_v14 = vmul.f32 0.5, %v3395_v45 }
0x1304   :  { %v3326_v35 = vsub.f32 %v3310_v42, %v3318_v11  ;;  %v3438_v40 = vmul.f32 %v6576_v3, %v3427_v2 }
0x1305   :  { %v3397_v55 = vsub.f32 1.5, %v3396_v14 }
0x1306   :  { %v4607_v63 = vpop.eup %4606  ;;  %v3342_v26 = vadd.f32 1e-05, %v3326_v35  ;;  %v3449_v29 = vadd.f32 %v6584_v60, %v3438_v40 }
0x1307   :  { %v3398_v24 = vmul.f32 %v4605_v54, %v3397_v55  ;;  %v3404_v36 = vmul.f32 %v4607_v63, %v3341_v59  ;;  %vm3410_vm6 = vweird.f32 %v4607_v63  ;;  %v4347_v55 = vld [vmem:[%s7018_s16 + $0x1f8] sm:$0xff] }
0x1308   :  { %4608 = vrsqrt.f32 %v3342_v26  ;;  %3484 = vmatmul.f32.gmra.mxu0 %v3449_v29  ;;  %vm3411_vm8 = vmor %vm3409_vm7, %vm3410_vm6  ;;  %vm3419_vm10 = vweird.f32 %v3342_v26  ;;  %3706 = vmatpush.msrb.mxu1 %v4347_v55  ;;  %v4344_v29 = vld [vmem:[%s7018_s16 + $0x1e0] sm:$0xff] }
0x1309   :  { %v3405_v19 = vmul.f32 %v4607_v63, %v3404_v36  ;;  %v3402_v61 = vsel %vm3401_vm5, %v4605_v54, %v3398_v24  ;;  %v4343_v24 = vld [vmem:[%s7018_s16 + $0x1d8] sm:$0xff]  ;;  %v4342_v36 = vld [vmem:[%s7018_s16 + $0x1d0] sm:$0xff] }
0x130a   :  { %v3428_v27 = vmul.f32 %v3402_v61, %v3332_v0  ;;  %v4341_v0 = vld [vmem:[%s7018_s16 + $0x1c8] sm:$0xff]  ;;  %v4339_v61 = vld [vmem:[%s7018_s16 + $0x1b8] sm:$0xff] }
0x130b   :  { %v3406_v58 = vmul.f32 0.5, %v3405_v19  ;;  %v4340_v19 = vld [vmem:[%s7018_s16 + $0x1c0] sm:$0xff] }
0x130c   :  { %v3439_v6 = vmul.f32 %v6576_v3, %v3428_v27  ;;  %v4338_v27 = vld [vmem:[%s7018_s16 + $0x1b0] sm:$0xff] }
0x130d   :  { %v3407_v39 = vsub.f32 1.5, %v3406_v58  ;;  %v4337_v58 = vld [vmem:[%s7018_s16 + $0x1a8] sm:$0xff] }
0x130e   :  { %v4609_v33 = vpop.eup %4608  ;;  %v3450_v44 = vadd.f32 %v6584_v60, %v3439_v6  ;;  %v4336_v6 = vld [vmem:[%s7018_s16 + $0x1a0] sm:$0xff] }
0x130f   :  { %v3408_v4 = vmul.f32 %v4607_v63, %v3407_v39  ;;  %v3414_v49 = vmul.f32 %v4609_v33, %v3342_v26  ;;  %vm3420_vm9 = vweird.f32 %v4609_v33  ;;  %v4345_v26 = vld [vmem:[%s7018_s16 + $0x1e8] sm:$0xff]  ;;  %v4335_v39 = vld [vmem:[%s7018_s16 + $0x198] sm:$0xff] }
0x1310   :  { %3487 = vmatmul.f32.gmra.mxu0 %v3450_v44  ;;  %vm3421_vm11 = vmor %vm3419_vm10, %vm3420_vm9  ;;  %v4333_v44 = vld [vmem:[%s7018_s16 + $0x188] sm:$0xff] }
0x1311   :  { %v3415_v12 = vmul.f32 %v4609_v33, %v3414_v49  ;;  %v3412_v37 = vsel %vm3411_vm8, %v4607_v63, %v3408_v4  ;;  %v4346_v63 = vld [vmem:[%s7018_s16 + $0x1f0] sm:$0xff]  ;;  %v4332_v4 = vld [vmem:[%s7018_s16 + $0x180] sm:$0xff] }
0x1312   :  { %v3429_v51 = vmul.f32 %v3412_v37, %v3333_v28  ;;  %3707 = vmatpush.msrb.mxu1 %v4346_v63 }
0x1313   :  { %v3416_v34 = vmul.f32 0.5, %v3415_v12 }
0x1314   :  { %v3440_v15 = vmul.f32 %v6576_v3, %v3429_v51  ;;  %3708 = vmatpush.msrb.mxu1 %v4345_v26 }
0x1315   :  { %v3417_v1 = vsub.f32 1.5, %v3416_v34 }
0x1316   :  { %v3451_v17 = vadd.f32 %v6584_v60, %v3440_v15  ;;  %3709 = vmatpush.msrb.mxu1 %v4344_v29 }
0x1317   :  { %v3418_v48 = vmul.f32 %v4609_v33, %v3417_v1 }
0x1318   :  { %3490 = vmatmul.f32.gmra.mxu0 %v3451_v17  ;;  %3710 = vmatpush.msrb.mxu1 %v4343_v24 }
0x1319   :  { %v3422_v30 = vsel %vm3421_vm11, %v4609_v33, %v3418_v48  ;;  %v4334_v33 = vld [vmem:[%s7018_s16 + $0x190] sm:$0xff] }
0x131a   :  { %v3430_v50 = vmul.f32 %v3422_v30, %v3334_v18  ;;  %3711 = vmatpush.msrb.mxu1 %v4342_v36 }
0x131c   :  { %v3441_v47 = vmul.f32 %v6576_v3, %v3430_v50  ;;  %3712 = vmatpush.msrb.mxu1 %v4341_v0 }
0x131e   :  { %v3452_v53 = vadd.f32 %v6584_v60, %v3441_v47  ;;  %3713 = vmatpush.msrb.mxu1 %v4340_v19 }
0x1320   :  { %3493 = vmatmul.f32.gmra.mxu0 %v3452_v53  ;;  %3714 = vmatpush.msrb.mxu1 %v4339_v61 }
0x1322   :  { %3715 = vmatpush.msrb.mxu1 %v4338_v27 }
0x1324   :  { %3716 = vmatpush.msrb.mxu1 %v4337_v58 }
0x1326   :  { %3717 = vmatpush.msrb.mxu1 %v4336_v6 }
0x1328   :  { %3718 = vmatpush.msrb.mxu1 %v4335_v39 }
0x132a   :  { %3719 = vmatpush.msrb.mxu1 %v4334_v33 }
0x132c   :  { %3720 = vmatpush.msrb.mxu1 %v4333_v44 }
0x132e   :  { %3721 = vmatpush.msrb.mxu1 %v4332_v4 }
0x1365   :  { %v3473_v7 = vpop.f32.mrf.mxu0 }
0x1366   :  { %v3474_v38 = vadd.f32 %v4396_v10, %v3473_v7 }
0x1368   :  { %v6631_v62 = vmax.f32 %v3474_v38, 0.0 }
0x136a   :  { %3505 = vadd.xlane.f32.xlu0 %v6631_v62  ;;  %v3529_v25 = vmul.f32 %v6631_v62, %v6631_v62 }
0x136c   :  { %3537 = vadd.xlane.f32.xlu2 %v3529_v25 }
0x136d   :  { %v3476_v9 = vpop.f32.mrf.mxu0 }
0x136e   :  { %v3477_v8 = vadd.f32 %v4396_v10, %v3476_v9 }
0x1370   :  { %v6636_v3 = vmax.f32 %v3477_v8, 0.0 }
0x1372   :  { %3507 = vadd.xlane.f32.xlu1 %v6636_v3  ;;  %v3530_v60 = vmul.f32 %v6636_v3, %v6636_v3 }
0x1374   :  { %3539 = vadd.xlane.f32.xlu0 %v3530_v60 }
0x1375   :  { %v3479_v31 = vpop.f32.mrf.mxu0 }
0x1376   :  { %v3480_v41 = vadd.f32 %v4396_v10, %v3479_v31 }
0x1378   :  { %v6641_v56 = vmax.f32 %v3480_v41, 0.0 }
0x137a   :  { %3509 = vadd.xlane.f32.xlu2 %v6641_v56  ;;  %v3531_v20 = vmul.f32 %v6641_v56, %v6641_v56 }
0x137c   :  { %3541 = vadd.xlane.f32.xlu1 %v3531_v20 }
0x137d   :  { %v3482_v22 = vpop.f32.mrf.mxu0 }
0x137e   :  { %v3483_v13 = vadd.f32 %v4396_v10, %v3482_v22 }
0x1380   :  { %v6646_v57 = vmax.f32 %v3483_v13, 0.0 }
0x1382   :  { %3511 = vadd.xlane.f32.xlu0 %v6646_v57  ;;  %v3532_v54 = vmul.f32 %v6646_v57, %v6646_v57 }
0x1384   :  { %3543 = vadd.xlane.f32.xlu2 %v3532_v54 }
0x1385   :  { %v3485_v59 = vpop.f32.mrf.mxu0 }
0x1386   :  { %v3486_v5 = vadd.f32 %v4396_v10, %v3485_v59 }
0x1388   :  { %v6651_v43 = vmax.f32 %v3486_v5, 0.0 }
0x138a   :  { %3513 = vadd.xlane.f32.xlu1 %v6651_v43  ;;  %v3533_v46 = vmul.f32 %v6651_v43, %v6651_v43 }
0x138c   :  { %3545 = vadd.xlane.f32.xlu0 %v3533_v46  ;;  %v6726_v46 = vld [vmem:[%s7015_s14 + $0x3] ss:$0 sm:$0xff] }
0x138d   :  { %v3488_v32 = vpop.f32.mrf.mxu0 }
0x138e   :  { %v3489_v21 = vadd.f32 %v4396_v10, %v3488_v32 }
0x1390   :  { %v6656_v16 = vmax.f32 %v3489_v21, 0.0 }
0x1392   :  { %3515 = vadd.xlane.f32.xlu2 %v6656_v16  ;;  %v3534_v45 = vmul.f32 %v6656_v16, %v6656_v16 }
0x1394   :  { %3547 = vadd.xlane.f32.xlu1 %v3534_v45 }
0x1395   :  { %v3491_v23 = vpop.f32.mrf.mxu0 }
0x1396   :  { %v3492_v52 = vadd.f32 %v4396_v10, %v3491_v23 }
0x1398   :  { %v6661_v11 = vmax.f32 %v3492_v52, 0.0 }
0x139a   :  { %3517 = vadd.xlane.f32.xlu0 %v6661_v11  ;;  %v3535_v42 = vmul.f32 %v6661_v11, %v6661_v11 }
0x139c   :  { %3549 = vadd.xlane.f32.xlu2 %v3535_v42  ;;  %v6734_v42 = vld [vmem:[%s7016_s15 + $0x3] ss:$0 sm:$0xff] }
0x139d   :  { %v3494_v2 = vpop.f32.mrf.mxu0 }
0x139e   :  { %v3495_v14 = vadd.f32 %v4396_v10, %v3494_v2 }
0x13a0   :  { %v6666_v35 = vmax.f32 %v3495_v14, 0.0 }
0x13a2   :  { %3519 = vadd.xlane.f32.xlu1 %v6666_v35  ;;  %v3536_v40 = vmul.f32 %v6666_v35, %v6666_v35 }
0x13a4   :  { %3551 = vadd.xlane.f32.xlu0 %v3536_v40 }
0x13dd   :  { %v3506_v49 = vpop.xlane.xlu0 %3505 }
0x13de   :  { %v3521_v28 = vmul.f32 0.03125, %v3506_v49 }
0x13df   :  { %v3538_v12 = vpop.xlane.xlu2 %3537 }
0x13e0   :  { %v3561_v37 = vmul.f32 %v3521_v28, %v3521_v28  ;;  %v3553_v51 = vmul.f32 0.03125, %v3538_v12  ;;  %v3577_v32 = vsub.f32 %v6631_v62, %v3521_v28 }
0x13e2   :  { %v3569_v34 = vsub.f32 %v3553_v51, %v3561_v37 }
0x13e4   :  { %v3585_v15 = vadd.f32 1e-05, %v3569_v34 }
0x13e5   :  { %v3508_v1 = vpop.xlane.xlu1 %3507 }
0x13e6   :  { %4610 = vrsqrt.f32 %v3585_v15  ;;  %v3522_v17 = vmul.f32 0.03125, %v3508_v1  ;;  %vm3599_vm13 = vweird.f32 %v3585_v15 }
0x13e7   :  { %v3540_v48 = vpop.xlane.xlu0 %3539 }
0x13e8   :  { %v3562_v18 = vmul.f32 %v3522_v17, %v3522_v17  ;;  %v3554_v30 = vmul.f32 0.03125, %v3540_v48  ;;  %v3578_v27 = vsub.f32 %v6636_v3, %v3522_v17 }
0x13ea   :  { %v3570_v50 = vsub.f32 %v3554_v30, %v3562_v18 }
0x13ec   :  { %v4611_v47 = vpop.eup %4610  ;;  %v3586_v53 = vadd.f32 1e-05, %v3570_v50 }
0x13ed   :  { %v3594_v10 = vmul.f32 %v4611_v47, %v3585_v15  ;;  %v3510_v7 = vpop.xlane.xlu2 %3509  ;;  %vm3600_vm12 = vweird.f32 %v4611_v47 }
0x13ee   :  { %4612 = vrsqrt.f32 %v3586_v53  ;;  %v6719_v38 = vmul.f32 0.03125, %v3510_v7  ;;  %vm3601_vm14 = vmor %vm3599_vm13, %vm3600_vm12  ;;  %vm3609_vm1 = vweird.f32 %v3586_v53 }
0x13ef   :  { %v3595_v25 = vmul.f32 %v4611_v47, %v3594_v10  ;;  %v3542_v9 = vpop.xlane.xlu1 %3541 }
0x13f0   :  { %v3563_v8 = vmul.f32 %v6719_v38, %v6719_v38  ;;  %v3555_v60 = vmul.f32 0.03125, %v3542_v9  ;;  %v3579_v18 = vsub.f32 %v6641_v56, %v6719_v38 }
0x13f1   :  { %v3596_v31 = vmul.f32 0.5, %v3595_v25 }
0x13f2   :  { %v3571_v41 = vsub.f32 %v3555_v60, %v3563_v8 }
0x13f3   :  { %v3597_v20 = vsub.f32 1.5, %v3596_v31 }
0x13f4   :  { %v4613_v22 = vpop.eup %4612  ;;  %v3587_v13 = vadd.f32 1e-05, %v3571_v41 }
0x13f5   :  { %v3598_v54 = vmul.f32 %v4611_v47, %v3597_v20  ;;  %v3604_v59 = vmul.f32 %v4613_v22, %v3586_v53  ;;  %v3512_v5 = vpop.xlane.xlu0 %3511  ;;  %vm3610_vm15 = vweird.f32 %v4613_v22 }
0x13f6   :  { %4614 = vrsqrt.f32 %v3587_v13  ;;  %v6729_v21 = vmul.f32 0.03125, %v3512_v5  ;;  %vm3611_vm0 = vmor %vm3609_vm1, %vm3610_vm15  ;;  %vm3619_vm3 = vweird.f32 %v3587_v13 }
0x13f7   :  { %v3602_v45 = vsel %vm3601_vm14, %v4611_v47, %v3598_v54  ;;  %v3605_v23 = vmul.f32 %v4613_v22, %v3604_v59  ;;  %v3544_v52 = vpop.xlane.xlu2 %3543 }
0x13f8   :  { %v3673_v2 = vmul.f32 %v3602_v45, %v3577_v32  ;;  %v3564_v14 = vmul.f32 %v6729_v21, %v6729_v21  ;;  %v3556_v40 = vmul.f32 0.03125, %v3544_v52  ;;  %v3580_v54 = vsub.f32 %v6646_v57, %v6729_v21 }
0x13f9   :  { %v3606_v55 = vmul.f32 0.5, %v3605_v23 }
0x13fa   :  { %v3684_v62 = vmul.f32 %v6726_v46, %v3673_v2  ;;  %v3572_v63 = vsub.f32 %v3556_v40, %v3564_v14 }
0x13fb   :  { %v3607_v26 = vsub.f32 1.5, %v3606_v55 }
0x13fc   :  { %v4615_v29 = vpop.eup %4614  ;;  %v3588_v24 = vadd.f32 1e-05, %v3572_v63  ;;  %v3695_v36 = vadd.f32 %v6734_v42, %v3684_v62 }
0x13fd   :  { %v3608_v0 = vmul.f32 %v4613_v22, %v3607_v26  ;;  %v3614_v19 = vmul.f32 %v4615_v29, %v3587_v13  ;;  %v3514_v61 = vpop.xlane.xlu1 %3513  ;;  %vm3620_vm2 = vweird.f32 %v4615_v29 }
0x13fe   :  { %4616 = vrsqrt.f32 %v3588_v24  ;;  %v6741_v58 = vmul.f32 0.03125, %v3514_v61  ;;  %3722 = vmatmul.f32.vlgmr.msrb.gmra.mxu1 %v3695_v36  ;;  %vm3621_vm4 = vmor %vm3619_vm3, %vm3620_vm2  ;;  %vm3629_vm6 = vweird.f32 %v3588_v24  ;;  %v3769_v61 = vld [vmem:[%s7019_s18 + $0x70] sm:$0xff] }
0x13ff   :  { %v3615_v6 = vmul.f32 %v4615_v29, %v3614_v19  ;;  %v3546_v39 = vpop.xlane.xlu0 %3545  ;;  %v3612_v33 = vsel %vm3611_vm0, %v4613_v22, %v3608_v0  ;;  %v3770_v19 = vld [vmem:[%s7019_s18 + $0x78] sm:$0xff] }
0x1400   :  { %v3565_v44 = vmul.f32 %v6741_v58, %v6741_v58  ;;  %v3557_v4 = vmul.f32 0.03125, %v3546_v39  ;;  %v3674_v49 = vmul.f32 %v3612_v33, %v3578_v27  ;;  %v3581_v36 = vsub.f32 %v6651_v43, %v6741_v58  ;;  %3775 = vmatpush.msrb.mxu3 %v3770_v19 }
0x1401   :  { %v3616_v28 = vmul.f32 0.5, %v3615_v6 }
0x1402   :  { %v3573_v12 = vsub.f32 %v3557_v4, %v3565_v44  ;;  %v3685_v37 = vmul.f32 %v6726_v46, %v3674_v49  ;;  %v3768_v44 = vld [vmem:[%s7019_s18 + $0x68] sm:$0xff]  ;;  %3776 = vmatpush.msrb.mxu3 %v3769_v61 }
0x1403   :  { %v3617_v51 = vsub.f32 1.5, %v3616_v28 }
0x1404   :  { %v4617_v3 = vpop.eup %4616  ;;  %v3589_v34 = vadd.f32 1e-05, %v3573_v12  ;;  %v3696_v15 = vadd.f32 %v6734_v42, %v3685_v37  ;;  %v3767_v12 = vld [vmem:[%s7019_s18 + $0x60] sm:$0xff]  ;;  %3777 = vmatpush.msrb.mxu3 %v3768_v44 }
0x1405   :  { %v3618_v1 = vmul.f32 %v4615_v29, %v3617_v51  ;;  %v3624_v17 = vmul.f32 %v4617_v3, %v3588_v24  ;;  %v3516_v48 = vpop.xlane.xlu2 %3515  ;;  %vm3630_vm5 = vweird.f32 %v4617_v3 }
0x1406   :  { %4618 = vrsqrt.f32 %v3589_v34  ;;  %v6749_v30 = vmul.f32 0.03125, %v3516_v48  ;;  %3725 = vmatmul.f32.gmra.mxu1 %v3696_v15  ;;  %vm3631_vm7 = vmor %vm3629_vm6, %vm3630_vm5  ;;  %vm3639_vm9 = vweird.f32 %v3589_v34  ;;  %v3766_v15 = vld [vmem:[%s7019_s18 + $0x58] sm:$0xff]  ;;  %3778 = vmatpush.msrb.mxu3 %v3767_v12 }
0x1407   :  { %v3625_v50 = vmul.f32 %v4617_v3, %v3624_v17  ;;  %v3548_v47 = vpop.xlane.xlu1 %3547  ;;  %v3622_v53 = vsel %vm3621_vm4, %v4615_v29, %v3618_v1 }
0x1408   :  { %v3566_v10 = vmul.f32 %v6749_v30, %v6749_v30  ;;  %v3558_v7 = vmul.f32 0.03125, %v3548_v47  ;;  %v3675_v25 = vmul.f32 %v3622_v53, %v3579_v18  ;;  %v3582_v48 = vsub.f32 %v6656_v16, %v6749_v30  ;;  %v3765_v18 = vld [vmem:[%s7019_s18 + $0x50] sm:$0xff]  ;;  %3779 = vmatpush.msrb.mxu3 %v3766_v15  ;;  %v3763_v16 = vld [vmem:[%s7019_s18 + $0x40] sm:$0xff] }
0x1409   :  { %v3626_v9 = vmul.f32 0.5, %v3625_v50  ;;  %v4430_v15 = vld [vmem:[%s7020_s19] ss:$0 sm:$0xff] }
0x140a   :  { %v3574_v8 = vsub.f32 %v3558_v7, %v3566_v10  ;;  %v3686_v60 = vmul.f32 %v6726_v46, %v3675_v25  ;;  %v3764_v10 = vld [vmem:[%s7019_s18 + $0x48] sm:$0xff]  ;;  %3780 = vmatpush.msrb.mxu3 %v3765_v18 }
0x140b   :  { %v3627_v31 = vsub.f32 1.5, %v3626_v9 }
0x140c   :  { %v4619_v56 = vpop.eup %4618  ;;  %v3590_v38 = vadd.f32 1e-05, %v3574_v8  ;;  %v3697_v41 = vadd.f32 %v6734_v42, %v3686_v60  ;;  %3781 = vmatpush.msrb.mxu3 %v3764_v10  ;;  %v3762_v60 = vld [vmem:[%s7019_s18 + $0x38] sm:$0xff] }
0x140d   :  { %v3628_v20 = vmul.f32 %v4617_v3, %v3627_v31  ;;  %v3634_v22 = vmul.f32 %v4619_v56, %v3589_v34  ;;  %v3518_v13 = vpop.xlane.xlu0 %3517  ;;  %vm3640_vm8 = vweird.f32 %v4619_v56 }
0x140e   :  { %4620 = vrsqrt.f32 %v3590_v38  ;;  %v6757_v59 = vmul.f32 0.03125, %v3518_v13  ;;  %3728 = vmatmul.f32.gmra.mxu1 %v3697_v41  ;;  %vm3641_vm10 = vmor %vm3639_vm9, %vm3640_vm8  ;;  %vm3649_vm12 = vweird.f32 %v3590_v38  ;;  %3782 = vmatpush.msrb.mxu3 %v3763_v16  ;;  %v3761_v41 = vld [vmem:[%s7019_s18 + $0x30] sm:$0xff] }
0x140f   :  { %v3635_v5 = vmul.f32 %v4619_v56, %v3634_v22  ;;  %v3550_v32 = vpop.xlane.xlu2 %3549  ;;  %v3632_v45 = vsel %vm3631_vm7, %v4617_v3, %v3628_v20 }
0x1410   :  { %v3567_v23 = vmul.f32 %v6757_v59, %v6757_v59  ;;  %v3559_v52 = vmul.f32 0.03125, %v3550_v32  ;;  %v3676_v2 = vmul.f32 %v3632_v45, %v3580_v54  ;;  %3783 = vmatpush.msrb.mxu3 %v3762_v60  ;;  %v3760_v54 = vld [vmem:[%s7019_s18 + $0x28] sm:$0xff] }
0x1411   :  { %v3636_v14 = vmul.f32 0.5, %v3635_v5 }
0x1412   :  { %v3575_v40 = vsub.f32 %v3559_v52, %v3567_v23  ;;  %v3687_v55 = vmul.f32 %v6726_v46, %v3676_v2  ;;  %3784 = vmatpush.msrb.mxu3 %v3761_v41  ;;  %v3758_v23 = vld [vmem:[%s7019_s18 + $0x18] sm:$0xff] }
0x1413   :  { %v3637_v62 = vsub.f32 1.5, %v3636_v14 }
0x1414   :  { %v4621_v57 = vpop.eup %4620  ;;  %v3591_v21 = vadd.f32 1e-05, %v3575_v40  ;;  %v3698_v63 = vadd.f32 %v6734_v42, %v3687_v55  ;;  %3785 = vmatpush.msrb.mxu3 %v3760_v54 }
0x1415   :  { %v3638_v26 = vmul.f32 %v4619_v56, %v3637_v62  ;;  %v3644_v29 = vmul.f32 %v4621_v57, %v3590_v38  ;;  %v3520_v24 = vpop.xlane.xlu1 %3519  ;;  %vm3650_vm11 = vweird.f32 %v4621_v57  ;;  %v3583_v38 = vsub.f32 %v6661_v11, %v6757_v59  ;;  %v3759_v11 = vld [vmem:[%s7019_s18 + $0x20] sm:$0xff] }
0x1416   :  { %4622 = vrsqrt.f32 %v3591_v21  ;;  %v6765_v0 = vmul.f32 0.03125, %v3520_v24  ;;  %3731 = vmatmul.f32.gmra.mxu1 %v3698_v63  ;;  %vm3651_vm13 = vmor %vm3649_vm12, %vm3650_vm11  ;;  %vm3659_vm15 = vweird.f32 %v3591_v21  ;;  %3786 = vmatpush.msrb.mxu3 %v3759_v11 }
0x1417   :  { %v3645_v27 = vmul.f32 %v4621_v57, %v3644_v29  ;;  %v3552_v6 = vpop.xlane.xlu0 %3551  ;;  %v3642_v39 = vsel %vm3641_vm10, %v4619_v56, %v3638_v26 }
0x1418   :  { %v3568_v43 = vmul.f32 %v6765_v0, %v6765_v0  ;;  %v3560_v58 = vmul.f32 0.03125, %v3552_v6  ;;  %v3677_v33 = vmul.f32 %v3642_v39, %v3581_v36  ;;  %v3584_v2 = vsub.f32 %v6666_v35, %v6765_v0  ;;  %3787 = vmatpush.msrb.mxu3 %v3758_v23  ;;  %v3755_v35 = vld [vmem:[%s7019_s18] sm:$0xff] }
0x1419   :  { %v3646_v4 = vmul.f32 0.5, %v3645_v27 }
0x141a   :  { %v3576_v49 = vsub.f32 %v3560_v58, %v3568_v43  ;;  %v3688_v28 = vmul.f32 %v6726_v46, %v3677_v33 }
0x141b   :  { %v3647_v37 = vsub.f32 1.5, %v3646_v4 }
0x141c   :  { %v4623_v51 = vpop.eup %4622  ;;  %v3592_v3 = vadd.f32 1e-05, %v3576_v49  ;;  %v3699_v34 = vadd.f32 %v6734_v42, %v3688_v28 }
0x141d   :  { %v3648_v1 = vmul.f32 %v4621_v57, %v3647_v37  ;;  %v3654_v17 = vmul.f32 %v4623_v51, %v3591_v21  ;;  %vm3660_vm14 = vweird.f32 %v4623_v51  ;;  %v3756_v21 = vld [vmem:[%s7019_s18 + $0x8] sm:$0xff] }
0x141e   :  { %4624 = vrsqrt.f32 %v3592_v3  ;;  %3734 = vmatmul.f32.gmra.mxu1 %v3699_v34  ;;  %vm3661_vm1 = vmor %vm3659_vm15, %vm3660_vm14  ;;  %vm3669_vm2 = vweird.f32 %v3592_v3 }
0x141f   :  { %v3655_v50 = vmul.f32 %v4623_v51, %v3654_v17  ;;  %v3652_v47 = vsel %vm3651_vm13, %v4621_v57, %v3648_v1  ;;  %v3757_v57 = vld [vmem:[%s7019_s18 + $0x10] sm:$0xff] }
0x1420   :  { %v3678_v53 = vmul.f32 %v3652_v47, %v3582_v48  ;;  %3788 = vmatpush.msrb.mxu3 %v3757_v57  ;;  %v4036_v57 = vld [vmem:[%s7023_s22 + $0x60] sm:$0xff] }
0x1421   :  { %v3656_v7 = vmul.f32 0.5, %v3655_v50 }
0x1422   :  { %v3689_v25 = vmul.f32 %v6726_v46, %v3678_v53  ;;  %3789 = vmatpush.msrb.mxu3 %v3756_v21  ;;  %v4035_v21 = vld [vmem:[%s7023_s22 + $0x58] sm:$0xff] }
0x1423   :  { %v3657_v30 = vsub.f32 1.5, %v3656_v7 }
0x1424   :  { %v4625_v9 = vpop.eup %4624  ;;  %v3700_v8 = vadd.f32 %v6734_v42, %v3689_v25  ;;  %3790 = vmatpush.msrb.mxu3 %v3755_v35  ;;  %v4034_v35 = vld [vmem:[%s7023_s22 + $0x50] sm:$0xff] }
0x1425   :  { %v3658_v31 = vmul.f32 %v4623_v51, %v3657_v30  ;;  %v3664_v56 = vmul.f32 %v4625_v9, %v3592_v3  ;;  %vm3670_vm0 = vweird.f32 %v4625_v9 }
0x1426   :  { %3737 = vmatmul.f32.gmra.mxu1 %v3700_v8  ;;  %vm3671_vm3 = vmor %vm3669_vm2, %vm3670_vm0 }
0x1427   :  { %v3665_v20 = vmul.f32 %v4625_v9, %v3664_v56  ;;  %v3662_v22 = vsel %vm3661_vm1, %v4623_v51, %v3658_v31 }
0x1428   :  { %v3679_v13 = vmul.f32 %v3662_v22, %v3583_v38 }
0x1429   :  { %v3666_v5 = vmul.f32 0.5, %v3665_v20 }
0x142a   :  { %v3690_v32 = vmul.f32 %v6726_v46, %v3679_v13 }
0x142b   :  { %v3667_v59 = vsub.f32 1.5, %v3666_v5 }
0x142c   :  { %v3701_v45 = vadd.f32 %v6734_v42, %v3690_v32 }
0x142d   :  { %v3668_v52 = vmul.f32 %v4625_v9, %v3667_v59 }
0x142e   :  { %3740 = vmatmul.f32.gmra.mxu1 %v3701_v45 }
0x142f   :  { %v3672_v14 = vsel %vm3671_vm3, %v4625_v9, %v3668_v52 }
0x1430   :  { %v3680_v40 = vmul.f32 %v3672_v14, %v3584_v2 }
0x1432   :  { %v3691_v55 = vmul.f32 %v6726_v46, %v3680_v40  ;;  %v4405_v46 = vld [vmem:[%s7017_s17 + $0x3] ss:$0 sm:$0xff]  ;;  %v4039_v40 = vld [vmem:[%s7023_s22 + $0x78] sm:$0xff] }
0x1433   :  { %4044 = vmatpush.msrb.mxu2 %v4039_v40  ;;  %4365 = vmatpush.msra.mxu3 %v4039_v40 }
0x1434   :  { %v3702_v62 = vadd.f32 %v6734_v42, %v3691_v55  ;;  %v4038_v55 = vld [vmem:[%s7023_s22 + $0x70] sm:$0xff] }
0x1435   :  { %4045 = vmatpush.msrb.mxu2 %v4038_v55  ;;  %4366 = vmatpush.msra.mxu3 %v4038_v55 }
0x1436   :  { %3743 = vmatmul.f32.gmra.mxu1 %v3702_v62  ;;  %v4037_v62 = vld [vmem:[%s7023_s22 + $0x68] sm:$0xff] }
0x1437   :  { %4046 = vmatpush.msrb.mxu2 %v4037_v62  ;;  %4367 = vmatpush.msra.mxu3 %v4037_v62 }
0x1439   :  { %4047 = vmatpush.msrb.mxu2 %v4036_v57  ;;  %4368 = vmatpush.msra.mxu3 %v4036_v57 }
0x143b   :  { %4048 = vmatpush.msrb.mxu2 %v4035_v21  ;;  %4369 = vmatpush.msra.mxu3 %v4035_v21 }
0x143d   :  { %4049 = vmatpush.msrb.mxu2 %v4034_v35  ;;  %4370 = vmatpush.msra.mxu3 %v4034_v35 }
0x147b   :  { %v3723_v42 = vpop.f32.mrf.mxu1 }
0x147c   :  { %v3724_v63 = vadd.f32 %v4405_v46, %v3723_v42  ;;  %v4032_v42 = vld [vmem:[%s7023_s22 + $0x40] sm:$0xff] }
0x147e   :  { %v3747_v26 = vmax.f32 %v3724_v63, 0.0  ;;  %v4031_v63 = vld [vmem:[%s7023_s22 + $0x38] sm:$0xff] }
0x1480   :  { %3791 = vmatmul.f32.vlgmr.msrb.gmra.mxu3 %v3747_v26  ;;  %v4030_v26 = vld [vmem:[%s7023_s22 + $0x30] sm:$0xff] }
0x1483   :  { %v3726_v29 = vpop.f32.mrf.mxu1 }
0x1484   :  { %v3727_v24 = vadd.f32 %v4405_v46, %v3726_v29  ;;  %v4029_v29 = vld [vmem:[%s7023_s22 + $0x28] sm:$0xff] }
0x1486   :  { %v3748_v36 = vmax.f32 %v3727_v24, 0.0  ;;  %v4028_v24 = vld [vmem:[%s7023_s22 + $0x20] sm:$0xff] }
0x1488   :  { %3794 = vmatmul.f32.gmra.mxu3 %v3748_v36  ;;  %v4027_v36 = vld [vmem:[%s7023_s22 + $0x18] sm:$0xff] }
0x148b   :  { %v3729_v0 = vpop.f32.mrf.mxu1 }
0x148c   :  { %v3730_v19 = vadd.f32 %v4405_v46, %v3729_v0  ;;  %v4026_v0 = vld [vmem:[%s7023_s22 + $0x10] sm:$0xff] }
0x148e   :  { %v3749_v61 = vmax.f32 %v3730_v19, 0.0  ;;  %v4025_v19 = vld [vmem:[%s7023_s22 + $0x8] sm:$0xff] }
0x1490   :  { %3797 = vmatmul.f32.gmra.mxu3 %v3749_v61  ;;  %v4024_v61 = vld [vmem:[%s7023_s22] sm:$0xff] }
0x1493   :  { %v3732_v27 = vpop.f32.mrf.mxu1 }
0x1494   :  { %v3733_v6 = vadd.f32 %v4405_v46, %v3732_v27 }
0x1496   :  { %v3750_v39 = vmax.f32 %v3733_v6, 0.0 }
0x1498   :  { %3800 = vmatmul.f32.gmra.mxu3 %v3750_v39 }
0x149b   :  { %v3735_v43 = vpop.f32.mrf.mxu1 }
0x149c   :  { %v3736_v58 = vadd.f32 %v4405_v46, %v3735_v43 }
0x149e   :  { %v3751_v33 = vmax.f32 %v3736_v58, 0.0 }
0x14a0   :  { %3803 = vmatmul.f32.gmra.mxu3 %v3751_v33 }
0x14a3   :  { %v3738_v44 = vpop.f32.mrf.mxu1 }
0x14a4   :  { %v3739_v4 = vadd.f32 %v4405_v46, %v3738_v44 }
0x14a6   :  { %v3752_v49 = vmax.f32 %v3739_v4, 0.0 }
0x14a8   :  { %3806 = vmatmul.f32.gmra.mxu3 %v3752_v49 }
0x14ab   :  { %v3741_v28 = vpop.f32.mrf.mxu1 }
0x14ac   :  { %v3742_v12 = vadd.f32 %v4405_v46, %v3741_v28 }
0x14ae   :  { %v3753_v37 = vmax.f32 %v3742_v12, 0.0 }
0x14b0   :  { %3809 = vmatmul.f32.gmra.mxu3 %v3753_v37 }
0x14b3   :  { %v3744_v51 = vpop.f32.mrf.mxu1 }
0x14b4   :  { %v3745_v3 = vadd.f32 %v4405_v46, %v3744_v51  ;;  %v4033_v46 = vld [vmem:[%s7023_s22 + $0x48] sm:$0xff] }
0x14b5   :  { %4050 = vmatpush.msrb.mxu2 %v4033_v46  ;;  %4371 = vmatpush.msra.mxu3 %v4033_v46 }
0x14b6   :  { %v3754_v34 = vmax.f32 %v3745_v3, 0.0 }
0x14b7   :  { %4051 = vmatpush.msrb.mxu2 %v4032_v42  ;;  %4372 = vmatpush.msra.mxu3 %v4032_v42 }
0x14b8   :  { %3812 = vmatmul.f32.gmra.mxu3 %v3754_v34 }
0x14b9   :  { %4052 = vmatpush.msrb.mxu2 %v4031_v63  ;;  %4373 = vmatpush.msra.mxu3 %v4031_v63 }
0x14bb   :  { %4053 = vmatpush.msrb.mxu2 %v4030_v26  ;;  %4374 = vmatpush.msra.mxu3 %v4030_v26 }
0x14bd   :  { %4054 = vmatpush.msrb.mxu2 %v4029_v29  ;;  %4375 = vmatpush.msra.mxu3 %v4029_v29 }
0x14bf   :  { %4055 = vmatpush.msrb.mxu2 %v4028_v24  ;;  %4376 = vmatpush.msra.mxu3 %v4028_v24 }
0x14c1   :  { %4056 = vmatpush.msrb.mxu2 %v4027_v36  ;;  %4377 = vmatpush.msra.mxu3 %v4027_v36 }
0x14c3   :  { %4057 = vmatpush.msrb.mxu2 %v4026_v0  ;;  %4378 = vmatpush.msra.mxu3 %v4026_v0 }
0x14c5   :  { %4058 = vmatpush.msrb.mxu2 %v4025_v19  ;;  %4379 = vmatpush.msra.mxu3 %v4025_v19 }
0x14c7   :  { %4059 = vmatpush.msrb.mxu2 %v4024_v61  ;;  %4380 = vmatpush.msra.mxu3 %v4024_v61 }
0x1503   :  { %v3792_v1 = vpop.f32.mrf.mxu3 }
0x1504   :  { %v3793_v17 = vadd.f32 %v4430_v15, %v3792_v1 }
0x1506   :  { %v6837_v48 = vmax.f32 %v3793_v17, 0.0 }
0x1508   :  { %3826 = vadd.xlane.f32.xlu2 %v6837_v48  ;;  %v3850_v18 = vmul.f32 %v6837_v48, %v6837_v48 }
0x150a   :  { %3858 = vadd.xlane.f32.xlu1 %v3850_v18 }
0x150b   :  { %v3795_v50 = vpop.f32.mrf.mxu3 }
0x150c   :  { %v3796_v47 = vadd.f32 %v4430_v15, %v3795_v50 }
0x150e   :  { %v6842_v53 = vmax.f32 %v3796_v47, 0.0 }
0x1510   :  { %3828 = vadd.xlane.f32.xlu0 %v6842_v53  ;;  %v3851_v10 = vmul.f32 %v6842_v53, %v6842_v53 }
0x1512   :  { %3860 = vadd.xlane.f32.xlu2 %v3851_v10 }
0x1513   :  { %v3798_v7 = vpop.f32.mrf.mxu3 }
0x1514   :  { %v3799_v25 = vadd.f32 %v4430_v15, %v3798_v7 }
0x1516   :  { %v6847_v16 = vmax.f32 %v3799_v25, 0.0 }
0x1518   :  { %3830 = vadd.xlane.f32.xlu1 %v6847_v16  ;;  %v3852_v30 = vmul.f32 %v6847_v16, %v6847_v16 }
0x151a   :  { %3862 = vadd.xlane.f32.xlu0 %v3852_v30 }
0x151b   :  { %v3801_v9 = vpop.f32.mrf.mxu3 }
0x151c   :  { %v3802_v8 = vadd.f32 %v4430_v15, %v3801_v9 }
0x151e   :  { %v6852_v60 = vmax.f32 %v3802_v8, 0.0 }
0x1520   :  { %3832 = vadd.xlane.f32.xlu2 %v6852_v60  ;;  %v3853_v31 = vmul.f32 %v6852_v60, %v6852_v60 }
0x1522   :  { %3864 = vadd.xlane.f32.xlu1 %v3853_v31 }
0x1523   :  { %v3804_v56 = vpop.f32.mrf.mxu3 }
0x1524   :  { %v3805_v38 = vadd.f32 %v4430_v15, %v3804_v56 }
0x1526   :  { %v6857_v41 = vmax.f32 %v3805_v38, 0.0 }
0x1528   :  { %3834 = vadd.xlane.f32.xlu0 %v6857_v41  ;;  %v3854_v20 = vmul.f32 %v6857_v41, %v6857_v41 }
0x152a   :  { %3866 = vadd.xlane.f32.xlu1 %v3854_v20 }
0x152b   :  { %v3807_v22 = vpop.f32.mrf.mxu3 }
0x152c   :  { %v3808_v32 = vadd.f32 %v4430_v15, %v3807_v22  ;;  %v6933_v22 = vld [vmem:[%s7021_s20] ss:$0 sm:$0xff] }
0x152e   :  { %v6867_v45 = vmax.f32 %v3808_v32, 0.0 }
0x1530   :  { %v3855_v2 = vmul.f32 %v6867_v45, %v6867_v45 }
0x1533   :  { %v3810_v13 = vpop.f32.mrf.mxu3 }
0x1534   :  { %v3811_v54 = vadd.f32 %v4430_v15, %v3810_v13 }
0x1536   :  { %v6862_v5 = vmax.f32 %v3811_v54, 0.0 }
0x1538   :  { %3838 = vadd.xlane.f32.xlu2 %v6862_v5  ;;  %v3856_v11 = vmul.f32 %v6862_v5, %v6862_v5 }
0x153a   :  { %3870 = vadd.xlane.f32.xlu0 %v3856_v11 }
0x153b   :  { %v3813_v59 = vpop.f32.mrf.mxu3 }
0x153c   :  { %v3814_v23 = vadd.f32 %v4430_v15, %v3813_v59 }
0x153e   :  { %v6869_v52 = vmax.f32 %v3814_v23, 0.0 }
0x1540   :  { %3836 = vadd.xlane.f32.xlu2 %v6867_v45  ;;  %3840 = vadd.xlane.f32.xlu1 %v6869_v52  ;;  %v3857_v14 = vmul.f32 %v6869_v52, %v6869_v52 }
0x1542   :  { %3868 = vadd.xlane.f32.xlu0 %v3855_v2 }
0x1548   :  { %3872 = vadd.xlane.f32.xlu2 %v3857_v14 }
0x157b   :  { %v3827_v27 = vpop.xlane.xlu2 %3826 }
0x157c   :  { %v3842_v6 = vmul.f32 0.03125, %v3827_v27 }
0x157d   :  { %v3859_v39 = vpop.xlane.xlu1 %3858 }
0x157e   :  { %v3882_v43 = vmul.f32 %v3842_v6, %v3842_v6  ;;  %v3874_v58 = vmul.f32 0.03125, %v3859_v39  ;;  %v3898_v20 = vsub.f32 %v6837_v48, %v3842_v6  ;;  %v6942_v48 = vld [vmem:[%s7057_s13] ss:$0 sm:$0xff] }
0x1580   :  { %v3890_v33 = vsub.f32 %v3874_v58, %v3882_v43 }
0x1582   :  { %v3906_v44 = vadd.f32 1e-05, %v3890_v33 }
0x1583   :  { %v3829_v4 = vpop.xlane.xlu0 %3828 }
0x1584   :  { %4626 = vrsqrt.f32 %v3906_v44  ;;  %v3843_v49 = vmul.f32 0.03125, %v3829_v4  ;;  %vm3920_vm5 = vweird.f32 %v3906_v44 }
0x1585   :  { %v3861_v28 = vpop.xlane.xlu2 %3860 }
0x1586   :  { %v3883_v12 = vmul.f32 %v3843_v49, %v3843_v49  ;;  %v3875_v37 = vmul.f32 0.03125, %v3861_v28  ;;  %v3899_v26 = vsub.f32 %v6842_v53, %v3843_v49 }
0x1588   :  { %v3891_v51 = vsub.f32 %v3875_v37, %v3883_v12 }
0x158a   :  { %v4627_v3 = vpop.eup %4626  ;;  %v3907_v34 = vadd.f32 1e-05, %v3891_v51 }
0x158b   :  { %v3915_v15 = vmul.f32 %v4627_v3, %v3906_v44  ;;  %v3831_v1 = vpop.xlane.xlu1 %3830  ;;  %vm3921_vm4 = vweird.f32 %v4627_v3 }
0x158c   :  { %4628 = vrsqrt.f32 %v3907_v34  ;;  %v6925_v17 = vmul.f32 0.03125, %v3831_v1  ;;  %vm3922_vm6 = vmor %vm3920_vm5, %vm3921_vm4  ;;  %vm3930_vm8 = vweird.f32 %v3907_v34 }
0x158d   :  { %v3916_v18 = vmul.f32 %v4627_v3, %v3915_v15  ;;  %v3863_v50 = vpop.xlane.xlu0 %3862 }
0x158e   :  { %v3884_v47 = vmul.f32 %v6925_v17, %v6925_v17  ;;  %v3876_v10 = vmul.f32 0.03125, %v3863_v50  ;;  %v3900_v28 = vsub.f32 %v6847_v16, %v6925_v17 }
0x158f   :  { %v3917_v7 = vmul.f32 0.5, %v3916_v18 }
0x1590   :  { %v3892_v25 = vsub.f32 %v3876_v10, %v3884_v47 }
0x1591   :  { %v3918_v30 = vsub.f32 1.5, %v3917_v7 }
0x1592   :  { %v4629_v9 = vpop.eup %4628  ;;  %v3908_v8 = vadd.f32 1e-05, %v3892_v25 }
0x1593   :  { %v3919_v31 = vmul.f32 %v4627_v3, %v3918_v30  ;;  %v3925_v56 = vmul.f32 %v4629_v9, %v3907_v34  ;;  %v3833_v38 = vpop.xlane.xlu2 %3832  ;;  %vm3931_vm7 = vweird.f32 %v4629_v9 }
0x1594   :  { %4630 = vrsqrt.f32 %v3908_v8  ;;  %v6935_v13 = vmul.f32 0.03125, %v3833_v38  ;;  %vm3932_vm9 = vmor %vm3930_vm8, %vm3931_vm7  ;;  %vm3940_vm11 = vweird.f32 %v3908_v8 }
0x1595   :  { %v3923_v54 = vsel %vm3922_vm6, %v4627_v3, %v3919_v31  ;;  %v3926_v32 = vmul.f32 %v4629_v9, %v3925_v56  ;;  %v3865_v11 = vpop.xlane.xlu1 %3864 }
0x1596   :  { %v3994_v59 = vmul.f32 %v3923_v54, %v3898_v20  ;;  %v3885_v23 = vmul.f32 %v6935_v13, %v6935_v13  ;;  %v3877_v2 = vmul.f32 0.03125, %v3865_v11  ;;  %v3901_v16 = vsub.f32 %v6852_v60, %v6935_v13 }
0x1597   :  { %v3927_v14 = vmul.f32 0.5, %v3926_v32 }
0x1598   :  { %v4005_v40 = vmul.f32 %v6933_v22, %v3994_v59  ;;  %v3893_v55 = vsub.f32 %v3877_v2, %v3885_v23 }
0x1599   :  { %v3928_v62 = vsub.f32 1.5, %v3927_v14 }
0x159a   :  { %v4631_v57 = vpop.eup %4630  ;;  %v3909_v21 = vadd.f32 1e-05, %v3893_v55  ;;  %v4016_v35 = vadd.f32 %v6942_v48, %v4005_v40 }
0x159b   :  { %v3929_v46 = vmul.f32 %v4629_v9, %v3928_v62  ;;  %v3935_v42 = vmul.f32 %v4631_v57, %v3908_v8  ;;  %v3835_v63 = vpop.xlane.xlu0 %3834  ;;  %vm3941_vm10 = vweird.f32 %v4631_v57 }
0x159c   :  { %4632 = vrsqrt.f32 %v3909_v21  ;;  %v6947_v29 = vmul.f32 0.03125, %v3835_v63  ;;  %4060 = vmatmul.f32.vlgmr.msrb.gmra.mxu2 %v4016_v35  ;;  %vm3942_vm12 = vmor %vm3940_vm11, %vm3941_vm10  ;;  %vm3950_vm14 = vweird.f32 %v3909_v21 }
0x159d   :  { %v3936_v24 = vmul.f32 %v4631_v57, %v3935_v42  ;;  %v3867_v36 = vpop.xlane.xlu1 %3866  ;;  %v3933_v0 = vsel %vm3932_vm9, %v4629_v9, %v3929_v46 }
0x159e   :  { %v3886_v19 = vmul.f32 %v6947_v29, %v6947_v29  ;;  %v3878_v61 = vmul.f32 0.03125, %v3867_v36  ;;  %v3995_v27 = vmul.f32 %v3933_v0, %v3899_v26  ;;  %v3902_v23 = vsub.f32 %v6857_v41, %v6947_v29 }
0x159f   :  { %v3937_v6 = vmul.f32 0.5, %v3936_v24 }
0x15a0   :  { %v3894_v39 = vsub.f32 %v3878_v61, %v3886_v19  ;;  %v4006_v43 = vmul.f32 %v6933_v22, %v3995_v27 }
0x15a1   :  { %v3938_v58 = vsub.f32 1.5, %v3937_v6 }
0x15a2   :  { %v4633_v53 = vpop.eup %4632  ;;  %v3910_v33 = vadd.f32 1e-05, %v3894_v39  ;;  %v4017_v44 = vadd.f32 %v6942_v48, %v4006_v43 }
0x15a3   :  { %v3939_v4 = vmul.f32 %v4631_v57, %v3938_v58  ;;  %v3945_v49 = vmul.f32 %v4633_v53, %v3909_v21  ;;  %vm3951_vm13 = vweird.f32 %v4633_v53 }
0x15a4   :  { %4634 = vrsqrt.f32 %v3910_v33  ;;  %4063 = vmatmul.f32.gmra.mxu2 %v4017_v44  ;;  %vm3952_vm15 = vmor %vm3950_vm14, %vm3951_vm13  ;;  %vm3960_vm0 = vweird.f32 %v3910_v33 }
0x15a5   :  { %v3946_v12 = vmul.f32 %v4633_v53, %v3945_v49  ;;  %v3943_v37 = vsel %vm3942_vm12, %v4631_v57, %v3939_v4 }
0x15a6   :  { %v3996_v51 = vmul.f32 %v3943_v37, %v3900_v28 }
0x15a7   :  { %v3947_v3 = vmul.f32 0.5, %v3946_v12 }
0x15a8   :  { %v4007_v34 = vmul.f32 %v6933_v22, %v3996_v51 }
0x15a9   :  { %v3948_v15 = vsub.f32 1.5, %v3947_v3 }
0x15aa   :  { %v4635_v1 = vpop.eup %4634  ;;  %v4018_v18 = vadd.f32 %v6942_v48, %v4007_v34 }
0x15ab   :  { %v3949_v50 = vmul.f32 %v4633_v53, %v3948_v15  ;;  %v3955_v47 = vmul.f32 %v4635_v1, %v3910_v33  ;;  %v3839_v10 = vpop.xlane.xlu2 %3838  ;;  %vm3961_vm1 = vweird.f32 %v4635_v1 }
0x15ac   :  { %v3848_v17 = vmul.f32 0.03125, %v3839_v10  ;;  %4066 = vmatmul.f32.gmra.mxu2 %v4018_v18  ;;  %vm3962_vm2 = vmor %vm3960_vm0, %vm3961_vm1 }
0x15ad   :  { %v3956_v7 = vmul.f32 %v4635_v1, %v3955_v47  ;;  %v3871_v25 = vpop.xlane.xlu0 %3870  ;;  %v3953_v30 = vsel %vm3952_vm15, %v4633_v53, %v3949_v50 }
0x15ae   :  { %v3888_v9 = vmul.f32 %v3848_v17, %v3848_v17  ;;  %v3880_v8 = vmul.f32 0.03125, %v3871_v25  ;;  %v3997_v31 = vmul.f32 %v3953_v30, %v3901_v16  ;;  %v3904_v58 = vsub.f32 %v6862_v5, %v3848_v17 }
0x15af   :  { %v3957_v56 = vmul.f32 0.5, %v3956_v7 }
0x15b0   :  { %v3896_v38 = vsub.f32 %v3880_v8, %v3888_v9  ;;  %v4008_v20 = vmul.f32 %v6933_v22, %v3997_v31  ;;  %v4433_v8 = vld [vmem:[%s7058_s27] ss:$0 sm:$0xff] }
0x15b1   :  { %v3958_v54 = vsub.f32 1.5, %v3957_v56 }
0x15b2   :  { %v3912_v32 = vadd.f32 1e-05, %v3896_v38  ;;  %v4019_v11 = vadd.f32 %v6942_v48, %v4008_v20 }
0x15b3   :  { %v3959_v59 = vmul.f32 %v4635_v1, %v3958_v54  ;;  %v3837_v60 = vpop.xlane.xlu2 %3836  ;;  %v3841_v2 = vpop.xlane.xlu1 %3840 }
0x15b4   :  { %4636 = vrsqrt.f32 %v3912_v32  ;;  %v3847_v13 = vmul.f32 0.03125, %v3837_v60  ;;  %4069 = vmatmul.f32.gmra.mxu2 %v4019_v11  ;;  %v3849_v21 = vmul.f32 0.03125, %v3841_v2  ;;  %vm3980_vm4 = vweird.f32 %v3912_v32 }
0x15b5   :  { %v3869_v14 = vpop.xlane.xlu0 %3868  ;;  %v3963_v40 = vsel %vm3962_vm2, %v4635_v1, %v3959_v59 }
0x15b6   :  { %v3887_v55 = vmul.f32 %v3847_v13, %v3847_v13  ;;  %v3879_v62 = vmul.f32 0.03125, %v3869_v14  ;;  %v3998_v57 = vmul.f32 %v3963_v40, %v3902_v23  ;;  %v3889_v0 = vmul.f32 %v3849_v21, %v3849_v21 }
0x15b7   :  { %v3903_v5 = vsub.f32 %v6867_v45, %v3847_v13  ;;  %v3905_v17 = vsub.f32 %v6869_v52, %v3849_v21 }
0x15b8   :  { %v3895_v35 = vsub.f32 %v3879_v62, %v3887_v55  ;;  %v4009_v46 = vmul.f32 %v6933_v22, %v3998_v57 }
0x15ba   :  { %v4637_v42 = vpop.eup %4636  ;;  %v3911_v26 = vadd.f32 1e-05, %v3895_v35  ;;  %v4020_v36 = vadd.f32 %v6942_v48, %v4009_v46 }
0x15bb   :  { %v3975_v63 = vmul.f32 %v4637_v42, %v3912_v32  ;;  %v3873_v24 = vpop.xlane.xlu2 %3872  ;;  %vm3981_vm3 = vweird.f32 %v4637_v42 }
0x15bc   :  { %v3881_v19 = vmul.f32 0.03125, %v3873_v24  ;;  %4638 = vrsqrt.f32 %v3911_v26  ;;  %4072 = vmatmul.f32.gmra.mxu2 %v4020_v36  ;;  %vm3982_vm5 = vmor %vm3980_vm4, %vm3981_vm3  ;;  %vm3970_vm7 = vweird.f32 %v3911_v26 }
0x15bd   :  { %v3976_v61 = vmul.f32 %v4637_v42, %v3975_v63 }
0x15be   :  { %v3897_v41 = vsub.f32 %v3881_v19, %v3889_v0 }
0x15bf   :  { %v3977_v29 = vmul.f32 0.5, %v3976_v61 }
0x15c0   :  { %v3913_v27 = vadd.f32 1e-05, %v3897_v41 }
0x15c1   :  { %v3978_v6 = vsub.f32 1.5, %v3977_v29 }
0x15c2   :  { %4640 = vrsqrt.f32 %v3913_v27  ;;  %v4639_v39 = vpop.eup %4638  ;;  %vm3990_vm10 = vweird.f32 %v3913_v27 }
0x15c3   :  { %v3979_v43 = vmul.f32 %v4637_v42, %v3978_v6  ;;  %v3965_v53 = vmul.f32 %v4639_v39, %v3911_v26  ;;  %vm3971_vm6 = vweird.f32 %v4639_v39 }
0x15c4   :  { %vm3972_vm8 = vmor %vm3970_vm7, %vm3971_vm6 }
0x15c5   :  { %v3983_v33 = vsel %vm3982_vm5, %v4637_v42, %v3979_v43  ;;  %v3966_v4 = vmul.f32 %v4639_v39, %v3965_v53 }
0x15c6   :  { %v4000_v44 = vmul.f32 %v3983_v33, %v3904_v58 }
0x15c7   :  { %v3967_v12 = vmul.f32 0.5, %v3966_v4 }
0x15c8   :  { %v4641_v49 = vpop.eup %4640  ;;  %v4011_v28 = vmul.f32 %v6933_v22, %v4000_v44 }
0x15c9   :  { %v3985_v37 = vmul.f32 %v4641_v49, %v3913_v27  ;;  %v3968_v51 = vsub.f32 1.5, %v3967_v12  ;;  %vm3991_vm9 = vweird.f32 %v4641_v49 }
0x15ca   :  { %v4022_v3 = vadd.f32 %v6942_v48, %v4011_v28  ;;  %vm3992_vm11 = vmor %vm3990_vm10, %vm3991_vm9 }
0x15cb   :  { %v3986_v34 = vmul.f32 %v4641_v49, %v3985_v37  ;;  %v3969_v15 = vmul.f32 %v4639_v39, %v3968_v51 }
0x15cc   :  { %4078 = vmatmul.f32.vlgmr.msra.gmra.mxu3 %v4022_v3 }
0x15cd   :  { %v3987_v1 = vmul.f32 0.5, %v3986_v34  ;;  %v3973_v18 = vsel %vm3972_vm8, %v4639_v39, %v3969_v15 }
0x15ce   :  { %v3999_v47 = vmul.f32 %v3973_v18, %v3903_v5 }
0x15cf   :  { %v3988_v50 = vsub.f32 1.5, %v3987_v1 }
0x15d0   :  { %v4010_v16 = vmul.f32 %v6933_v22, %v3999_v47 }
0x15d1   :  { %v3989_v10 = vmul.f32 %v4641_v49, %v3988_v50 }
0x15d2   :  { %v4021_v7 = vadd.f32 %v6942_v48, %v4010_v16 }
0x15d3   :  { %v3993_v25 = vsel %vm3992_vm11, %v4641_v49, %v3989_v10 }
0x15d4   :  { %v4001_v30 = vmul.f32 %v3993_v25, %v3905_v17  ;;  %4075 = vmatmul.f32.gmra.mxu2 %v4021_v7 }
0x15d6   :  { %v4012_v45 = vmul.f32 %v6933_v22, %v4001_v30 }
0x15d8   :  { %v4023_v9 = vadd.f32 %v6942_v48, %v4012_v45 }
0x15da   :  { %4081 = vmatmul.f32.gmra.mxu3 %v4023_v9 }
0x161f   :  { %v4061_v31 = vpop.f32.mrf.mxu2 }
0x1620   :  { %v4062_v56 = vadd.f32 %v4433_v8, %v4061_v31 }
0x1622   :  { %4085 = vst [vmem:[%s7059_s29] sm:$0xff] %v4062_v56 }
0x1627   :  { %v4064_v52 = vpop.f32.mrf.mxu2 }
0x1628   :  { %v4065_v38 = vadd.f32 %v4433_v8, %v4064_v52 }
0x162a   :  { %4086 = vst [vmem:[%s7059_s29 + $0x8] sm:$0xff] %v4065_v38 }
0x162f   :  { %v4067_v22 = vpop.f32.mrf.mxu2 }
0x1630   :  { %v4068_v20 = vadd.f32 %v4433_v8, %v4067_v22 }
0x1632   :  { %4087 = vst [vmem:[%s7059_s29 + $0x10] sm:$0xff] %v4068_v20 }
0x1637   :  { %v4070_v48 = vpop.f32.mrf.mxu2 }
0x1638   :  { %v4071_v54 = vadd.f32 %v4433_v8, %v4070_v48 }
0x163a   :  { %4088 = vst [vmem:[%s7059_s29 + $0x18] sm:$0xff] %v4071_v54 }
0x163f   :  { %v4073_v32 = vpop.f32.mrf.mxu2 }
0x1640   :  { %v4074_v11 = vadd.f32 %v4433_v8, %v4073_v32 }
0x1642   :  { %4089 = vst [vmem:[%s7059_s29 + $0x20] sm:$0xff] %v4074_v11 }
0x164f   :  { %v4079_v59 = vpop.f32.mrf.mxu3 }
0x1650   :  { %v4080_v60 = vadd.f32 %v4433_v8, %v4079_v59 }
0x1652   :  { %4091 = vst [vmem:[%s7059_s29 + $0x30] sm:$0xff] %v4080_v60 }
0x1657   :  { %v4076_v13 = vpop.f32.mrf.mxu2 }
0x1658   :  { %v4077_v23 = vadd.f32 %v4433_v8, %v4076_v13 }
0x165a   :  { %4090 = vst [vmem:[%s7059_s29 + $0x28] sm:$0xff] %v4077_v23 }
0x165d   :  { %v4082_v2 = vpop.f32.mrf.mxu3 }
0x165e   :  { %v4083_v14 = vadd.f32 %v4433_v8, %v4082_v2 }
0x1660   :  { %4092 = vst [vmem:[%s7059_s29 + $0x38] sm:$0xff] %v4083_v14 }

</bundles_post_ra>
